<compile_context>
chip_gen: v6e
topology: v6e:2x2x1
jax: 0.10.0
libtpu: 0.0.40
codegen_flags: <defaults>
</compile_context>

<pallas_src>
import functools

import jax
import jax.numpy as jnp
from jax.experimental import pallas as pl
from jax.experimental.pallas import tpu as pltpu


# ---------------------------------------------------------------------------
# Fused kernel: per-head qkv projection + attention + accumulated output projection
# ---------------------------------------------------------------------------

def fused_attention_kernel(x_ref, wq_ref, wk_ref, wv_ref, wp_ref, bp_ref, o_ref, *,
                           num_heads, batch, seq, scale):
    # x_ref : (B*N, C)          stacked batch, f32
    # wq_ref/wk_ref/wv_ref : (H, C, d)   head-indexed projection weights
    # wp_ref: (H, d, C)          head-indexed output-projection weights
    # bp_ref: (1, C)             output-projection bias
    # o_ref : (B*N, C)
    x = x_ref[...]                                   # (BN, C)
    BN, C = x.shape
    d = C // num_heads

    # Output accumulator starts at the projection bias (f32).
    y = jnp.broadcast_to(bp_ref[...], (BN, C)).astype(jnp.float32)

    for h in range(num_heads):
        # Head-indexed projections; leading-dim index on the weight refs is free.
        # Scale folded into q (BN*d elements instead of the (N, N) scores).
        q_h = jnp.dot(x, wq_ref[h], preferred_element_type=jnp.float32) * scale  # (BN, d)
        k_h = jnp.dot(x, wk_ref[h], preferred_element_type=jnp.float32)          # (BN, d)
        v_h = jnp.dot(x, wv_ref[h], preferred_element_type=jnp.float32)          # (BN, d)

        ctx_parts = []
        for b in range(batch):
            lo = b * seq                              # sublane offset (multiple of 8)
            qb = q_h[lo:lo + seq]                     # (N, d)
            kb = k_h[lo:lo + seq]
            vb = v_h[lo:lo + seq]
            # scores (already scaled via q) -> softmax (f32) -> weighted sum of v
            s = jax.lax.dot_general(
                qb, kb,
                dimension_numbers=(((1,), (1,)), ((), ())),
                preferred_element_type=jnp.float32,
            )                                                         # (N, N)
            m = jnp.max(s, axis=-1, keepdims=True)
            p = jnp.exp(s - m)
            denom = jnp.sum(p, axis=-1, keepdims=True)
            ctx_b = jnp.dot(p, vb, preferred_element_type=jnp.float32)
            # approx=False keeps the 1e-5 comparison against the f32 reference intact.
            ctx_b = ctx_b * pl.reciprocal(denom, approx=False)        # (N, d)
            ctx_parts.append(ctx_b)

        # Stack batches back along sublanes (offsets are multiples of 8 -> cheap).
        ctx_h = jnp.concatenate(ctx_parts, axis=0) if batch > 1 else ctx_parts[0]  # (BN, d)

        # Head merge fused into the output projection: MXU accumulation, no lane concat.
        y = y + jnp.dot(ctx_h, wp_ref[h], preferred_element_type=jnp.float32)       # (BN, C)

    o_ref[...] = y.astype(o_ref.dtype)


# ---------------------------------------------------------------------------
# Wrapper
# ---------------------------------------------------------------------------

def attention_forward(x, H, W, params, *, num_heads, sr_ratio=1):
    """Pallas version of Attention.forward(x, H, W) with sr_ratio=1."""
    assert sr_ratio == 1, "sr_ratio > 1 (strided Conv2d + LayerNorm) is not implemented"
    del H, W  # only needed for the sr_ratio > 1 branch
    B, N, C = x.shape
    assert C % num_heads == 0, f"dim {C} must be divisible by num_heads {num_heads}"
    d = C // num_heads
    scale = d ** (-0.5)

    wq = params["wq"]       # (C, C)    torch Linear layout: (out, in)
    wkv = params["wkv"]     # (2C, C)
    wp = params["wp"]       # (C, C)
    bp = params["bp"]       # (C,)

    # Host-side head-indexed layouts (tiny arrays; pure layout plumbing).
    #   x @ wq_h[h] == (x @ wq.T)[:, h*d:(h+1)*d]
    wq_h = wq.reshape(num_heads, d, C).transpose(0, 2, 1)        # (H, C, d)
    wk_h = wkv[:C].reshape(num_heads, d, C).transpose(0, 2, 1)   # (H, C, d)
    wv_h = wkv[C:].reshape(num_heads, d, C).transpose(0, 2, 1)   # (H, C, d)
    #   sum_h ctx_h @ wp_h[h] == concat_h(ctx_h) @ wp.T
    wp_h = wp.reshape(C, num_heads, d).transpose(1, 2, 0)        # (H, d, C)

    x2 = x.reshape(B * N, C)

    kernel = functools.partial(fused_attention_kernel, num_heads=num_heads,
                               batch=B, seq=N, scale=scale)

    flops = 8 * B * N * C * C + 4 * B * N * N * C
    transcendentals = B * num_heads * N * N
    bytes_accessed = 4 * (2 * B * N * C + 4 * C * C + C)

    out2 = pl.pallas_call(
        kernel,
        out_shape=jax.ShapeDtypeStruct((B * N, C), x.dtype),
        grid=(1,),
        in_specs=[
            pl.BlockSpec((B * N, C), lambda i: (0, 0)),             # x (stacked batch)
            pl.BlockSpec((num_heads, C, d), lambda i: (0, 0, 0)),   # wq (head-indexed)
            pl.BlockSpec((num_heads, C, d), lambda i: (0, 0, 0)),   # wk
            pl.BlockSpec((num_heads, C, d), lambda i: (0, 0, 0)),   # wv
            pl.BlockSpec((num_heads, d, C), lambda i: (0, 0, 0)),   # wp (head-indexed)
            pl.BlockSpec((1, C), lambda i: (0, 0)),                 # bp
        ],
        out_specs=pl.BlockSpec((B * N, C), lambda i: (0, 0)),
        compiler_params=pltpu.CompilerParams(
            dimension_semantics=("arbitrary",)),
        cost_estimate=pl.CostEstimate(flops=flops,
                                      transcendentals=transcendentals,
                                      bytes_accessed=bytes_accessed),
    )(x2, wq_h, wk_h, wv_h, wp_h, bp.reshape(1, C))

    return out2.reshape(B, N, C)


# ---------------------------------------------------------------------------
# Pure-JAX reference (mirrors the PyTorch forward) for a correctness check
# ---------------------------------------------------------------------------

def attention_reference(x, params, *, num_heads):
    B, N, C = x.shape
    d = C // num_heads
    scale = d ** (-0.5)
    q = x @ params["wq"].T
    kv = x @ params["wkv"].T
    k, v = kv[:, :, :C], kv[:, :, C:]
    q = q.reshape(B, N, num_heads, d).transpose(0, 2, 1, 3)
    k = k.reshape(B, N, num_heads, d).transpose(0, 2, 1, 3)
    v = v.reshape(B, N, num_heads, d).transpose(0, 2, 1, 3)
    attn = jnp.einsum("bhnd,bhmd->bhnm", q, k) * scale
    attn = jax.nn.softmax(attn, axis=-1)
    ctx = jnp.einsum("bhnm,bhmd->bhnd", attn, v)
    ctx = ctx.transpose(0, 2, 1, 3).reshape(B, N, C)
    return ctx @ params["wp"].T + params["bp"]


# ---------------------------------------------------------------------------
# Main
# ---------------------------------------------------------------------------

if __name__ == "__main__":
    # Small shapes consistent with the module: dim=32, num_heads=8, H=W=8 -> N=64.
    B, Hsp, Wsp, C = 2, 8, 8, 32
    num_heads = 8
    N = Hsp * Wsp

    key = jax.random.PRNGKey(0)
    kx, kq, kkv, kp = jax.random.split(key, 4)

    # Deterministic synthetic parameters (torch Linear layout: (out_features, in_features)).
    # trunc_normal(std=0.02) approximated by a plain normal * 0.02; proj bias is zeros.
    params = {
        "wq":  0.02 * jax.random.normal(kq,  (C, C), dtype=jnp.float32),
        "wkv": 0.02 * jax.random.normal(kkv, (2 * C, C), dtype=jnp.float32),
        "wp":  0.02 * jax.random.normal(kp,  (C, C), dtype=jnp.float32),
        "bp":  jnp.zeros((C,), dtype=jnp.float32),
    }

    x = jax.random.normal(kx, (B, N, C), dtype=jnp.float32)

    out = attention_forward(x, Hsp, Wsp, params, num_heads=num_heads)
    out = jax.block_until_ready(out)

    ref = attention_reference(x, params, num_heads=num_heads)
    assert out.shape == (B, N, C)
    assert jnp.allclose(out, ref, atol=1e-5, rtol=1e-5), "mismatch vs JAX reference"

    print("KERNEL_OK")
</pallas_src>

<mosaic_0001>
module attributes {stable_mosaic.version = 11 : i64} {
  func.func @fused_attention_kernel(%arg0: i32, %arg1: memref<128x32xf32, #tpu.memory_space<vmem>>, %arg2: memref<8x32x4xf32, #tpu.memory_space<vmem>>, %arg3: memref<8x32x4xf32, #tpu.memory_space<vmem>>, %arg4: memref<8x32x4xf32, #tpu.memory_space<vmem>>, %arg5: memref<8x4x32xf32, #tpu.memory_space<vmem>>, %arg6: memref<1x32xf32, #tpu.memory_space<vmem>>, %arg7: memref<128x32xf32, #tpu.memory_space<vmem>>) attributes {dimension_semantics = [#tpu.dimension_semantics<arbitrary>], iteration_bounds = array<i64: 1>, scalar_prefetch = 0 : i64, scratch_operands = 0 : i64, tpu.core_type = #tpu.core_type<tc>, window_params = [{pipeline_mode = #tpu.pipeline_mode<synchronous>, transform_indices = @transform_0, window_bounds = array<i64: 128, 32>}, {pipeline_mode = #tpu.pipeline_mode<synchronous>, transform_indices = @transform_1, window_bounds = array<i64: 8, 32, 4>}, {pipeline_mode = #tpu.pipeline_mode<synchronous>, transform_indices = @transform_2, window_bounds = array<i64: 8, 32, 4>}, {pipeline_mode = #tpu.pipeline_mode<synchronous>, transform_indices = @transform_3, window_bounds = array<i64: 8, 32, 4>}, {pipeline_mode = #tpu.pipeline_mode<synchronous>, transform_indices = @transform_4, window_bounds = array<i64: 8, 4, 32>}, {pipeline_mode = #tpu.pipeline_mode<synchronous>, transform_indices = @transform_5, window_bounds = array<i64: 1, 32>}, {pipeline_mode = #tpu.pipeline_mode<synchronous>, transform_indices = @transform_6, window_bounds = array<i64: 128, 32>}]} {
    %c0 = arith.constant 0 : index
    %c0_0 = arith.constant 0 : index
    %0 = vector.load %arg1[%c0, %c0_0] : memref<128x32xf32, #tpu.memory_space<vmem>>, vector<128x32xf32>
    %c0_1 = arith.constant 0 : index
    %c0_2 = arith.constant 0 : index
    %1 = vector.load %arg6[%c0_1, %c0_2] : memref<1x32xf32, #tpu.memory_space<vmem>>, vector<1x32xf32>
    %2 = vector.shape_cast %1 : vector<1x32xf32> to vector<1x32xf32>
    %3 = vector.broadcast %2 : vector<1x32xf32> to vector<128x32xf32>
    %c0_3 = arith.constant 0 : index
    %c0_4 = arith.constant 0 : index
    %c0_5 = arith.constant 0 : index
    %4 = vector.load %arg2[%c0_3, %c0_4, %c0_5] : memref<8x32x4xf32, #tpu.memory_space<vmem>>, vector<1x32x4xf32>
    %5 = vector.shape_cast %4 : vector<1x32x4xf32> to vector<32x4xf32>
    %cst = arith.constant dense<0.000000e+00> : vector<128x4xf32>
    %6 = tpu.matmul %0, %5, %cst {dimension_numbers = #tpu.dot_dimension_numbers<[1], [0], [0], [1], [0, 0, 1, 1], [], []>} : vector<128x32xf32>, vector<32x4xf32>, vector<128x4xf32> -> vector<128x4xf32>
    %cst_6 = arith.constant 5.000000e-01 : f32
    %7 = vector.broadcast %cst_6 : f32 to vector<128x4xf32>
    %8 = arith.mulf %6, %7 : vector<128x4xf32>
    %c0_7 = arith.constant 0 : index
    %c0_8 = arith.constant 0 : index
    %c0_9 = arith.constant 0 : index
    %9 = vector.load %arg3[%c0_7, %c0_8, %c0_9] : memref<8x32x4xf32, #tpu.memory_space<vmem>>, vector<1x32x4xf32>
    %10 = vector.shape_cast %9 : vector<1x32x4xf32> to vector<32x4xf32>
    %cst_10 = arith.constant dense<0.000000e+00> : vector<128x4xf32>
    %11 = tpu.matmul %0, %10, %cst_10 {dimension_numbers = #tpu.dot_dimension_numbers<[1], [0], [0], [1], [0, 0, 1, 1], [], []>} : vector<128x32xf32>, vector<32x4xf32>, vector<128x4xf32> -> vector<128x4xf32>
    %c0_11 = arith.constant 0 : index
    %c0_12 = arith.constant 0 : index
    %c0_13 = arith.constant 0 : index
    %12 = vector.load %arg4[%c0_11, %c0_12, %c0_13] : memref<8x32x4xf32, #tpu.memory_space<vmem>>, vector<1x32x4xf32>
    %13 = vector.shape_cast %12 : vector<1x32x4xf32> to vector<32x4xf32>
    %cst_14 = arith.constant dense<0.000000e+00> : vector<128x4xf32>
    %14 = tpu.matmul %0, %13, %cst_14 {dimension_numbers = #tpu.dot_dimension_numbers<[1], [0], [0], [1], [0, 0, 1, 1], [], []>} : vector<128x32xf32>, vector<32x4xf32>, vector<128x4xf32> -> vector<128x4xf32>
    %15 = vector.extract_strided_slice %8 {offsets = [0, 0], sizes = [64, 4], strides = [1, 1]} : vector<128x4xf32> to vector<64x4xf32>
    %16 = vector.extract_strided_slice %11 {offsets = [0, 0], sizes = [64, 4], strides = [1, 1]} : vector<128x4xf32> to vector<64x4xf32>
    %17 = vector.extract_strided_slice %14 {offsets = [0, 0], sizes = [64, 4], strides = [1, 1]} : vector<128x4xf32> to vector<64x4xf32>
    %cst_15 = arith.constant dense<0.000000e+00> : vector<64x64xf32>
    %18 = tpu.matmul %15, %16, %cst_15 {dimension_numbers = #tpu.dot_dimension_numbers<[1], [1], [0], [0], [0, 0, 1, 0], [], []>} : vector<64x4xf32>, vector<64x4xf32>, vector<64x64xf32> -> vector<64x64xf32>
    %cst_16 = arith.constant dense<0xFF800000> : vector<64xf32>
    %19 = vector.multi_reduction <maximumf>, %18, %cst_16 [1] : vector<64x64xf32> to vector<64xf32>
    %20 = vector.shape_cast %19 : vector<64xf32> to vector<64x1xf32>
    %21 = vector.broadcast %20 : vector<64x1xf32> to vector<64x64xf32>
    %22 = arith.subf %18, %21 : vector<64x64xf32>
    %23 = math.exp %22 : vector<64x64xf32>
    %cst_17 = arith.constant dense<0.000000e+00> : vector<64xf32>
    %24 = vector.multi_reduction <add>, %23, %cst_17 [1] : vector<64x64xf32> to vector<64xf32>
    %25 = vector.shape_cast %24 : vector<64xf32> to vector<64x1xf32>
    %cst_18 = arith.constant dense<0.000000e+00> : vector<64x4xf32>
    %26 = tpu.matmul %23, %17, %cst_18 {dimension_numbers = #tpu.dot_dimension_numbers<[1], [0], [0], [1], [0, 0, 1, 1], [], []>} : vector<64x64xf32>, vector<64x4xf32>, vector<64x4xf32> -> vector<64x4xf32>
    %27 = tpu.reciprocal %25 : vector<64x1xf32> -> vector<64x1xf32>
    %28 = vector.broadcast %27 : vector<64x1xf32> to vector<64x4xf32>
    %29 = arith.mulf %26, %28 : vector<64x4xf32>
    %30 = vector.extract_strided_slice %8 {offsets = [64, 0], sizes = [64, 4], strides = [1, 1]} : vector<128x4xf32> to vector<64x4xf32>
    %31 = vector.extract_strided_slice %11 {offsets = [64, 0], sizes = [64, 4], strides = [1, 1]} : vector<128x4xf32> to vector<64x4xf32>
    %32 = vector.extract_strided_slice %14 {offsets = [64, 0], sizes = [64, 4], strides = [1, 1]} : vector<128x4xf32> to vector<64x4xf32>
    %cst_19 = arith.constant dense<0.000000e+00> : vector<64x64xf32>
    %33 = tpu.matmul %30, %31, %cst_19 {dimension_numbers = #tpu.dot_dimension_numbers<[1], [1], [0], [0], [0, 0, 1, 0], [], []>} : vector<64x4xf32>, vector<64x4xf32>, vector<64x64xf32> -> vector<64x64xf32>
    %cst_20 = arith.constant dense<0xFF800000> : vector<64xf32>
    %34 = vector.multi_reduction <maximumf>, %33, %cst_20 [1] : vector<64x64xf32> to vector<64xf32>
    %35 = vector.shape_cast %34 : vector<64xf32> to vector<64x1xf32>
    %36 = vector.broadcast %35 : vector<64x1xf32> to vector<64x64xf32>
    %37 = arith.subf %33, %36 : vector<64x64xf32>
    %38 = math.exp %37 : vector<64x64xf32>
    %cst_21 = arith.constant dense<0.000000e+00> : vector<64xf32>
    %39 = vector.multi_reduction <add>, %38, %cst_21 [1] : vector<64x64xf32> to vector<64xf32>
    %40 = vector.shape_cast %39 : vector<64xf32> to vector<64x1xf32>
    %cst_22 = arith.constant dense<0.000000e+00> : vector<64x4xf32>
    %41 = tpu.matmul %38, %32, %cst_22 {dimension_numbers = #tpu.dot_dimension_numbers<[1], [0], [0], [1], [0, 0, 1, 1], [], []>} : vector<64x64xf32>, vector<64x4xf32>, vector<64x4xf32> -> vector<64x4xf32>
    %42 = tpu.reciprocal %40 : vector<64x1xf32> -> vector<64x1xf32>
    %43 = vector.broadcast %42 : vector<64x1xf32> to vector<64x4xf32>
    %44 = arith.mulf %41, %43 : vector<64x4xf32>
    %45 = tpu.concatenate %29, %44 in 0 : vector<64x4xf32>, vector<64x4xf32> -> vector<128x4xf32>
    %c0_23 = arith.constant 0 : index
    %c0_24 = arith.constant 0 : index
    %c0_25 = arith.constant 0 : index
    %46 = vector.load %arg5[%c0_23, %c0_24, %c0_25] : memref<8x4x32xf32, #tpu.memory_space<vmem>>, vector<1x4x32xf32>
    %47 = vector.shape_cast %46 : vector<1x4x32xf32> to vector<4x32xf32>
    %cst_26 = arith.constant dense<0.000000e+00> : vector<128x32xf32>
    %48 = tpu.matmul %45, %47, %cst_26 {dimension_numbers = #tpu.dot_dimension_numbers<[1], [0], [0], [1], [0, 0, 1, 1], [], []>} : vector<128x4xf32>, vector<4x32xf32>, vector<128x32xf32> -> vector<128x32xf32>
    %49 = arith.addf %3, %48 : vector<128x32xf32>
    %c1 = arith.constant 1 : index
    %c0_27 = arith.constant 0 : index
    %c0_28 = arith.constant 0 : index
    %50 = vector.load %arg2[%c1, %c0_27, %c0_28] : memref<8x32x4xf32, #tpu.memory_space<vmem>>, vector<1x32x4xf32>
    %51 = vector.shape_cast %50 : vector<1x32x4xf32> to vector<32x4xf32>
    %cst_29 = arith.constant dense<0.000000e+00> : vector<128x4xf32>
    %52 = tpu.matmul %0, %51, %cst_29 {dimension_numbers = #tpu.dot_dimension_numbers<[1], [0], [0], [1], [0, 0, 1, 1], [], []>} : vector<128x32xf32>, vector<32x4xf32>, vector<128x4xf32> -> vector<128x4xf32>
    %cst_30 = arith.constant 5.000000e-01 : f32
    %53 = vector.broadcast %cst_30 : f32 to vector<128x4xf32>
    %54 = arith.mulf %52, %53 : vector<128x4xf32>
    %c1_31 = arith.constant 1 : index
    %c0_32 = arith.constant 0 : index
    %c0_33 = arith.constant 0 : index
    %55 = vector.load %arg3[%c1_31, %c0_32, %c0_33] : memref<8x32x4xf32, #tpu.memory_space<vmem>>, vector<1x32x4xf32>
    %56 = vector.shape_cast %55 : vector<1x32x4xf32> to vector<32x4xf32>
    %cst_34 = arith.constant dense<0.000000e+00> : vector<128x4xf32>
    %57 = tpu.matmul %0, %56, %cst_34 {dimension_numbers = #tpu.dot_dimension_numbers<[1], [0], [0], [1], [0, 0, 1, 1], [], []>} : vector<128x32xf32>, vector<32x4xf32>, vector<128x4xf32> -> vector<128x4xf32>
    %c1_35 = arith.constant 1 : index
    %c0_36 = arith.constant 0 : index
    %c0_37 = arith.constant 0 : index
    %58 = vector.load %arg4[%c1_35, %c0_36, %c0_37] : memref<8x32x4xf32, #tpu.memory_space<vmem>>, vector<1x32x4xf32>
    %59 = vector.shape_cast %58 : vector<1x32x4xf32> to vector<32x4xf32>
    %cst_38 = arith.constant dense<0.000000e+00> : vector<128x4xf32>
    %60 = tpu.matmul %0, %59, %cst_38 {dimension_numbers = #tpu.dot_dimension_numbers<[1], [0], [0], [1], [0, 0, 1, 1], [], []>} : vector<128x32xf32>, vector<32x4xf32>, vector<128x4xf32> -> vector<128x4xf32>
    %61 = vector.extract_strided_slice %54 {offsets = [0, 0], sizes = [64, 4], strides = [1, 1]} : vector<128x4xf32> to vector<64x4xf32>
    %62 = vector.extract_strided_slice %57 {offsets = [0, 0], sizes = [64, 4], strides = [1, 1]} : vector<128x4xf32> to vector<64x4xf32>
    %63 = vector.extract_strided_slice %60 {offsets = [0, 0], sizes = [64, 4], strides = [1, 1]} : vector<128x4xf32> to vector<64x4xf32>
    %cst_39 = arith.constant dense<0.000000e+00> : vector<64x64xf32>
    %64 = tpu.matmul %61, %62, %cst_39 {dimension_numbers = #tpu.dot_dimension_numbers<[1], [1], [0], [0], [0, 0, 1, 0], [], []>} : vector<64x4xf32>, vector<64x4xf32>, vector<64x64xf32> -> vector<64x64xf32>
    %cst_40 = arith.constant dense<0xFF800000> : vector<64xf32>
    %65 = vector.multi_reduction <maximumf>, %64, %cst_40 [1] : vector<64x64xf32> to vector<64xf32>
    %66 = vector.shape_cast %65 : vector<64xf32> to vector<64x1xf32>
    %67 = vector.broadcast %66 : vector<64x1xf32> to vector<64x64xf32>
    %68 = arith.subf %64, %67 : vector<64x64xf32>
    %69 = math.exp %68 : vector<64x64xf32>
    %cst_41 = arith.constant dense<0.000000e+00> : vector<64xf32>
    %70 = vector.multi_reduction <add>, %69, %cst_41 [1] : vector<64x64xf32> to vector<64xf32>
    %71 = vector.shape_cast %70 : vector<64xf32> to vector<64x1xf32>
    %cst_42 = arith.constant dense<0.000000e+00> : vector<64x4xf32>
    %72 = tpu.matmul %69, %63, %cst_42 {dimension_numbers = #tpu.dot_dimension_numbers<[1], [0], [0], [1], [0, 0, 1, 1], [], []>} : vector<64x64xf32>, vector<64x4xf32>, vector<64x4xf32> -> vector<64x4xf32>
    %73 = tpu.reciprocal %71 : vector<64x1xf32> -> vector<64x1xf32>
    %74 = vector.broadcast %73 : vector<64x1xf32> to vector<64x4xf32>
    %75 = arith.mulf %72, %74 : vector<64x4xf32>
    %76 = vector.extract_strided_slice %54 {offsets = [64, 0], sizes = [64, 4], strides = [1, 1]} : vector<128x4xf32> to vector<64x4xf32>
    %77 = vector.extract_strided_slice %57 {offsets = [64, 0], sizes = [64, 4], strides = [1, 1]} : vector<128x4xf32> to vector<64x4xf32>
    %78 = vector.extract_strided_slice %60 {offsets = [64, 0], sizes = [64, 4], strides = [1, 1]} : vector<128x4xf32> to vector<64x4xf32>
    %cst_43 = arith.constant dense<0.000000e+00> : vector<64x64xf32>
    %79 = tpu.matmul %76, %77, %cst_43 {dimension_numbers = #tpu.dot_dimension_numbers<[1], [1], [0], [0], [0, 0, 1, 0], [], []>} : vector<64x4xf32>, vector<64x4xf32>, vector<64x64xf32> -> vector<64x64xf32>
    %cst_44 = arith.constant dense<0xFF800000> : vector<64xf32>
    %80 = vector.multi_reduction <maximumf>, %79, %cst_44 [1] : vector<64x64xf32> to vector<64xf32>
    %81 = vector.shape_cast %80 : vector<64xf32> to vector<64x1xf32>
    %82 = vector.broadcast %81 : vector<64x1xf32> to vector<64x64xf32>
    %83 = arith.subf %79, %82 : vector<64x64xf32>
    %84 = math.exp %83 : vector<64x64xf32>
    %cst_45 = arith.constant dense<0.000000e+00> : vector<64xf32>
    %85 = vector.multi_reduction <add>, %84, %cst_45 [1] : vector<64x64xf32> to vector<64xf32>
    %86 = vector.shape_cast %85 : vector<64xf32> to vector<64x1xf32>
    %cst_46 = arith.constant dense<0.000000e+00> : vector<64x4xf32>
    %87 = tpu.matmul %84, %78, %cst_46 {dimension_numbers = #tpu.dot_dimension_numbers<[1], [0], [0], [1], [0, 0, 1, 1], [], []>} : vector<64x64xf32>, vector<64x4xf32>, vector<64x4xf32> -> vector<64x4xf32>
    %88 = tpu.reciprocal %86 : vector<64x1xf32> -> vector<64x1xf32>
    %89 = vector.broadcast %88 : vector<64x1xf32> to vector<64x4xf32>
    %90 = arith.mulf %87, %89 : vector<64x4xf32>
    %91 = tpu.concatenate %75, %90 in 0 : vector<64x4xf32>, vector<64x4xf32> -> vector<128x4xf32>
    %c1_47 = arith.constant 1 : index
    %c0_48 = arith.constant 0 : index
    %c0_49 = arith.constant 0 : index
    %92 = vector.load %arg5[%c1_47, %c0_48, %c0_49] : memref<8x4x32xf32, #tpu.memory_space<vmem>>, vector<1x4x32xf32>
    %93 = vector.shape_cast %92 : vector<1x4x32xf32> to vector<4x32xf32>
    %cst_50 = arith.constant dense<0.000000e+00> : vector<128x32xf32>
    %94 = tpu.matmul %91, %93, %cst_50 {dimension_numbers = #tpu.dot_dimension_numbers<[1], [0], [0], [1], [0, 0, 1, 1], [], []>} : vector<128x4xf32>, vector<4x32xf32>, vector<128x32xf32> -> vector<128x32xf32>
    %95 = arith.addf %49, %94 : vector<128x32xf32>
    %c2 = arith.constant 2 : index
    %c0_51 = arith.constant 0 : index
    %c0_52 = arith.constant 0 : index
    %96 = vector.load %arg2[%c2, %c0_51, %c0_52] : memref<8x32x4xf32, #tpu.memory_space<vmem>>, vector<1x32x4xf32>
    %97 = vector.shape_cast %96 : vector<1x32x4xf32> to vector<32x4xf32>
    %cst_53 = arith.constant dense<0.000000e+00> : vector<128x4xf32>
    %98 = tpu.matmul %0, %97, %cst_53 {dimension_numbers = #tpu.dot_dimension_numbers<[1], [0], [0], [1], [0, 0, 1, 1], [], []>} : vector<128x32xf32>, vector<32x4xf32>, vector<128x4xf32> -> vector<128x4xf32>
    %cst_54 = arith.constant 5.000000e-01 : f32
    %99 = vector.broadcast %cst_54 : f32 to vector<128x4xf32>
    %100 = arith.mulf %98, %99 : vector<128x4xf32>
    %c2_55 = arith.constant 2 : index
    %c0_56 = arith.constant 0 : index
    %c0_57 = arith.constant 0 : index
    %101 = vector.load %arg3[%c2_55, %c0_56, %c0_57] : memref<8x32x4xf32, #tpu.memory_space<vmem>>, vector<1x32x4xf32>
    %102 = vector.shape_cast %101 : vector<1x32x4xf32> to vector<32x4xf32>
    %cst_58 = arith.constant dense<0.000000e+00> : vector<128x4xf32>
    %103 = tpu.matmul %0, %102, %cst_58 {dimension_numbers = #tpu.dot_dimension_numbers<[1], [0], [0], [1], [0, 0, 1, 1], [], []>} : vector<128x32xf32>, vector<32x4xf32>, vector<128x4xf32> -> vector<128x4xf32>
    %c2_59 = arith.constant 2 : index
    %c0_60 = arith.constant 0 : index
    %c0_61 = arith.constant 0 : index
    %104 = vector.load %arg4[%c2_59, %c0_60, %c0_61] : memref<8x32x4xf32, #tpu.memory_space<vmem>>, vector<1x32x4xf32>
    %105 = vector.shape_cast %104 : vector<1x32x4xf32> to vector<32x4xf32>
    %cst_62 = arith.constant dense<0.000000e+00> : vector<128x4xf32>
    %106 = tpu.matmul %0, %105, %cst_62 {dimension_numbers = #tpu.dot_dimension_numbers<[1], [0], [0], [1], [0, 0, 1, 1], [], []>} : vector<128x32xf32>, vector<32x4xf32>, vector<128x4xf32> -> vector<128x4xf32>
    %107 = vector.extract_strided_slice %100 {offsets = [0, 0], sizes = [64, 4], strides = [1, 1]} : vector<128x4xf32> to vector<64x4xf32>
    %108 = vector.extract_strided_slice %103 {offsets = [0, 0], sizes = [64, 4], strides = [1, 1]} : vector<128x4xf32> to vector<64x4xf32>
    %109 = vector.extract_strided_slice %106 {offsets = [0, 0], sizes = [64, 4], strides = [1, 1]} : vector<128x4xf32> to vector<64x4xf32>
    %cst_63 = arith.constant dense<0.000000e+00> : vector<64x64xf32>
    %110 = tpu.matmul %107, %108, %cst_63 {dimension_numbers = #tpu.dot_dimension_numbers<[1], [1], [0], [0], [0, 0, 1, 0], [], []>} : vector<64x4xf32>, vector<64x4xf32>, vector<64x64xf32> -> vector<64x64xf32>
    %cst_64 = arith.constant dense<0xFF800000> : vector<64xf32>
    %111 = vector.multi_reduction <maximumf>, %110, %cst_64 [1] : vector<64x64xf32> to vector<64xf32>
    %112 = vector.shape_cast %111 : vector<64xf32> to vector<64x1xf32>
    %113 = vector.broadcast %112 : vector<64x1xf32> to vector<64x64xf32>
    %114 = arith.subf %110, %113 : vector<64x64xf32>
    %115 = math.exp %114 : vector<64x64xf32>
    %cst_65 = arith.constant dense<0.000000e+00> : vector<64xf32>
    %116 = vector.multi_reduction <add>, %115, %cst_65 [1] : vector<64x64xf32> to vector<64xf32>
    %117 = vector.shape_cast %116 : vector<64xf32> to vector<64x1xf32>
    %cst_66 = arith.constant dense<0.000000e+00> : vector<64x4xf32>
    %118 = tpu.matmul %115, %109, %cst_66 {dimension_numbers = #tpu.dot_dimension_numbers<[1], [0], [0], [1], [0, 0, 1, 1], [], []>} : vector<64x64xf32>, vector<64x4xf32>, vector<64x4xf32> -> vector<64x4xf32>
    %119 = tpu.reciprocal %117 : vector<64x1xf32> -> vector<64x1xf32>
    %120 = vector.broadcast %119 : vector<64x1xf32> to vector<64x4xf32>
    %121 = arith.mulf %118, %120 : vector<64x4xf32>
    %122 = vector.extract_strided_slice %100 {offsets = [64, 0], sizes = [64, 4], strides = [1, 1]} : vector<128x4xf32> to vector<64x4xf32>
    %123 = vector.extract_strided_slice %103 {offsets = [64, 0], sizes = [64, 4], strides = [1, 1]} : vector<128x4xf32> to vector<64x4xf32>
    %124 = vector.extract_strided_slice %106 {offsets = [64, 0], sizes = [64, 4], strides = [1, 1]} : vector<128x4xf32> to vector<64x4xf32>
    %cst_67 = arith.constant dense<0.000000e+00> : vector<64x64xf32>
    %125 = tpu.matmul %122, %123, %cst_67 {dimension_numbers = #tpu.dot_dimension_numbers<[1], [1], [0], [0], [0, 0, 1, 0], [], []>} : vector<64x4xf32>, vector<64x4xf32>, vector<64x64xf32> -> vector<64x64xf32>
    %cst_68 = arith.constant dense<0xFF800000> : vector<64xf32>
    %126 = vector.multi_reduction <maximumf>, %125, %cst_68 [1] : vector<64x64xf32> to vector<64xf32>
    %127 = vector.shape_cast %126 : vector<64xf32> to vector<64x1xf32>
    %128 = vector.broadcast %127 : vector<64x1xf32> to vector<64x64xf32>
    %129 = arith.subf %125, %128 : vector<64x64xf32>
    %130 = math.exp %129 : vector<64x64xf32>
    %cst_69 = arith.constant dense<0.000000e+00> : vector<64xf32>
    %131 = vector.multi_reduction <add>, %130, %cst_69 [1] : vector<64x64xf32> to vector<64xf32>
    %132 = vector.shape_cast %131 : vector<64xf32> to vector<64x1xf32>
    %cst_70 = arith.constant dense<0.000000e+00> : vector<64x4xf32>
    %133 = tpu.matmul %130, %124, %cst_70 {dimension_numbers = #tpu.dot_dimension_numbers<[1], [0], [0], [1], [0, 0, 1, 1], [], []>} : vector<64x64xf32>, vector<64x4xf32>, vector<64x4xf32> -> vector<64x4xf32>
    %134 = tpu.reciprocal %132 : vector<64x1xf32> -> vector<64x1xf32>
    %135 = vector.broadcast %134 : vector<64x1xf32> to vector<64x4xf32>
    %136 = arith.mulf %133, %135 : vector<64x4xf32>
    %137 = tpu.concatenate %121, %136 in 0 : vector<64x4xf32>, vector<64x4xf32> -> vector<128x4xf32>
    %c2_71 = arith.constant 2 : index
    %c0_72 = arith.constant 0 : index
    %c0_73 = arith.constant 0 : index
    %138 = vector.load %arg5[%c2_71, %c0_72, %c0_73] : memref<8x4x32xf32, #tpu.memory_space<vmem>>, vector<1x4x32xf32>
    %139 = vector.shape_cast %138 : vector<1x4x32xf32> to vector<4x32xf32>
    %cst_74 = arith.constant dense<0.000000e+00> : vector<128x32xf32>
    %140 = tpu.matmul %137, %139, %cst_74 {dimension_numbers = #tpu.dot_dimension_numbers<[1], [0], [0], [1], [0, 0, 1, 1], [], []>} : vector<128x4xf32>, vector<4x32xf32>, vector<128x32xf32> -> vector<128x32xf32>
    %141 = arith.addf %95, %140 : vector<128x32xf32>
    %c3 = arith.constant 3 : index
    %c0_75 = arith.constant 0 : index
    %c0_76 = arith.constant 0 : index
    %142 = vector.load %arg2[%c3, %c0_75, %c0_76] : memref<8x32x4xf32, #tpu.memory_space<vmem>>, vector<1x32x4xf32>
    %143 = vector.shape_cast %142 : vector<1x32x4xf32> to vector<32x4xf32>
    %cst_77 = arith.constant dense<0.000000e+00> : vector<128x4xf32>
    %144 = tpu.matmul %0, %143, %cst_77 {dimension_numbers = #tpu.dot_dimension_numbers<[1], [0], [0], [1], [0, 0, 1, 1], [], []>} : vector<128x32xf32>, vector<32x4xf32>, vector<128x4xf32> -> vector<128x4xf32>
    %cst_78 = arith.constant 5.000000e-01 : f32
    %145 = vector.broadcast %cst_78 : f32 to vector<128x4xf32>
    %146 = arith.mulf %144, %145 : vector<128x4xf32>
    %c3_79 = arith.constant 3 : index
    %c0_80 = arith.constant 0 : index
    %c0_81 = arith.constant 0 : index
    %147 = vector.load %arg3[%c3_79, %c0_80, %c0_81] : memref<8x32x4xf32, #tpu.memory_space<vmem>>, vector<1x32x4xf32>
    %148 = vector.shape_cast %147 : vector<1x32x4xf32> to vector<32x4xf32>
    %cst_82 = arith.constant dense<0.000000e+00> : vector<128x4xf32>
    %149 = tpu.matmul %0, %148, %cst_82 {dimension_numbers = #tpu.dot_dimension_numbers<[1], [0], [0], [1], [0, 0, 1, 1], [], []>} : vector<128x32xf32>, vector<32x4xf32>, vector<128x4xf32> -> vector<128x4xf32>
    %c3_83 = arith.constant 3 : index
    %c0_84 = arith.constant 0 : index
    %c0_85 = arith.constant 0 : index
    %150 = vector.load %arg4[%c3_83, %c0_84, %c0_85] : memref<8x32x4xf32, #tpu.memory_space<vmem>>, vector<1x32x4xf32>
    %151 = vector.shape_cast %150 : vector<1x32x4xf32> to vector<32x4xf32>
    %cst_86 = arith.constant dense<0.000000e+00> : vector<128x4xf32>
    %152 = tpu.matmul %0, %151, %cst_86 {dimension_numbers = #tpu.dot_dimension_numbers<[1], [0], [0], [1], [0, 0, 1, 1], [], []>} : vector<128x32xf32>, vector<32x4xf32>, vector<128x4xf32> -> vector<128x4xf32>
    %153 = vector.extract_strided_slice %146 {offsets = [0, 0], sizes = [64, 4], strides = [1, 1]} : vector<128x4xf32> to vector<64x4xf32>
    %154 = vector.extract_strided_slice %149 {offsets = [0, 0], sizes = [64, 4], strides = [1, 1]} : vector<128x4xf32> to vector<64x4xf32>
    %155 = vector.extract_strided_slice %152 {offsets = [0, 0], sizes = [64, 4], strides = [1, 1]} : vector<128x4xf32> to vector<64x4xf32>
    %cst_87 = arith.constant dense<0.000000e+00> : vector<64x64xf32>
    %156 = tpu.matmul %153, %154, %cst_87 {dimension_numbers = #tpu.dot_dimension_numbers<[1], [1], [0], [0], [0, 0, 1, 0], [], []>} : vector<64x4xf32>, vector<64x4xf32>, vector<64x64xf32> -> vector<64x64xf32>
    %cst_88 = arith.constant dense<0xFF800000> : vector<64xf32>
    %157 = vector.multi_reduction <maximumf>, %156, %cst_88 [1] : vector<64x64xf32> to vector<64xf32>
    %158 = vector.shape_cast %157 : vector<64xf32> to vector<64x1xf32>
    %159 = vector.broadcast %158 : vector<64x1xf32> to vector<64x64xf32>
    %160 = arith.subf %156, %159 : vector<64x64xf32>
    %161 = math.exp %160 : vector<64x64xf32>
    %cst_89 = arith.constant dense<0.000000e+00> : vector<64xf32>
    %162 = vector.multi_reduction <add>, %161, %cst_89 [1] : vector<64x64xf32> to vector<64xf32>
    %163 = vector.shape_cast %162 : vector<64xf32> to vector<64x1xf32>
    %cst_90 = arith.constant dense<0.000000e+00> : vector<64x4xf32>
    %164 = tpu.matmul %161, %155, %cst_90 {dimension_numbers = #tpu.dot_dimension_numbers<[1], [0], [0], [1], [0, 0, 1, 1], [], []>} : vector<64x64xf32>, vector<64x4xf32>, vector<64x4xf32> -> vector<64x4xf32>
    %165 = tpu.reciprocal %163 : vector<64x1xf32> -> vector<64x1xf32>
    %166 = vector.broadcast %165 : vector<64x1xf32> to vector<64x4xf32>
    %167 = arith.mulf %164, %166 : vector<64x4xf32>
    %168 = vector.extract_strided_slice %146 {offsets = [64, 0], sizes = [64, 4], strides = [1, 1]} : vector<128x4xf32> to vector<64x4xf32>
    %169 = vector.extract_strided_slice %149 {offsets = [64, 0], sizes = [64, 4], strides = [1, 1]} : vector<128x4xf32> to vector<64x4xf32>
    %170 = vector.extract_strided_slice %152 {offsets = [64, 0], sizes = [64, 4], strides = [1, 1]} : vector<128x4xf32> to vector<64x4xf32>
    %cst_91 = arith.constant dense<0.000000e+00> : vector<64x64xf32>
    %171 = tpu.matmul %168, %169, %cst_91 {dimension_numbers = #tpu.dot_dimension_numbers<[1], [1], [0], [0], [0, 0, 1, 0], [], []>} : vector<64x4xf32>, vector<64x4xf32>, vector<64x64xf32> -> vector<64x64xf32>
    %cst_92 = arith.constant dense<0xFF800000> : vector<64xf32>
    %172 = vector.multi_reduction <maximumf>, %171, %cst_92 [1] : vector<64x64xf32> to vector<64xf32>
    %173 = vector.shape_cast %172 : vector<64xf32> to vector<64x1xf32>
    %174 = vector.broadcast %173 : vector<64x1xf32> to vector<64x64xf32>
    %175 = arith.subf %171, %174 : vector<64x64xf32>
    %176 = math.exp %175 : vector<64x64xf32>
    %cst_93 = arith.constant dense<0.000000e+00> : vector<64xf32>
    %177 = vector.multi_reduction <add>, %176, %cst_93 [1] : vector<64x64xf32> to vector<64xf32>
    %178 = vector.shape_cast %177 : vector<64xf32> to vector<64x1xf32>
    %cst_94 = arith.constant dense<0.000000e+00> : vector<64x4xf32>
    %179 = tpu.matmul %176, %170, %cst_94 {dimension_numbers = #tpu.dot_dimension_numbers<[1], [0], [0], [1], [0, 0, 1, 1], [], []>} : vector<64x64xf32>, vector<64x4xf32>, vector<64x4xf32> -> vector<64x4xf32>
    %180 = tpu.reciprocal %178 : vector<64x1xf32> -> vector<64x1xf32>
    %181 = vector.broadcast %180 : vector<64x1xf32> to vector<64x4xf32>
    %182 = arith.mulf %179, %181 : vector<64x4xf32>
    %183 = tpu.concatenate %167, %182 in 0 : vector<64x4xf32>, vector<64x4xf32> -> vector<128x4xf32>
    %c3_95 = arith.constant 3 : index
    %c0_96 = arith.constant 0 : index
    %c0_97 = arith.constant 0 : index
    %184 = vector.load %arg5[%c3_95, %c0_96, %c0_97] : memref<8x4x32xf32, #tpu.memory_space<vmem>>, vector<1x4x32xf32>
    %185 = vector.shape_cast %184 : vector<1x4x32xf32> to vector<4x32xf32>
    %cst_98 = arith.constant dense<0.000000e+00> : vector<128x32xf32>
    %186 = tpu.matmul %183, %185, %cst_98 {dimension_numbers = #tpu.dot_dimension_numbers<[1], [0], [0], [1], [0, 0, 1, 1], [], []>} : vector<128x4xf32>, vector<4x32xf32>, vector<128x32xf32> -> vector<128x32xf32>
    %187 = arith.addf %141, %186 : vector<128x32xf32>
    %c4 = arith.constant 4 : index
    %c0_99 = arith.constant 0 : index
    %c0_100 = arith.constant 0 : index
    %188 = vector.load %arg2[%c4, %c0_99, %c0_100] : memref<8x32x4xf32, #tpu.memory_space<vmem>>, vector<1x32x4xf32>
    %189 = vector.shape_cast %188 : vector<1x32x4xf32> to vector<32x4xf32>
    %cst_101 = arith.constant dense<0.000000e+00> : vector<128x4xf32>
    %190 = tpu.matmul %0, %189, %cst_101 {dimension_numbers = #tpu.dot_dimension_numbers<[1], [0], [0], [1], [0, 0, 1, 1], [], []>} : vector<128x32xf32>, vector<32x4xf32>, vector<128x4xf32> -> vector<128x4xf32>
    %cst_102 = arith.constant 5.000000e-01 : f32
    %191 = vector.broadcast %cst_102 : f32 to vector<128x4xf32>
    %192 = arith.mulf %190, %191 : vector<128x4xf32>
    %c4_103 = arith.constant 4 : index
    %c0_104 = arith.constant 0 : index
    %c0_105 = arith.constant 0 : index
    %193 = vector.load %arg3[%c4_103, %c0_104, %c0_105] : memref<8x32x4xf32, #tpu.memory_space<vmem>>, vector<1x32x4xf32>
    %194 = vector.shape_cast %193 : vector<1x32x4xf32> to vector<32x4xf32>
    %cst_106 = arith.constant dense<0.000000e+00> : vector<128x4xf32>
    %195 = tpu.matmul %0, %194, %cst_106 {dimension_numbers = #tpu.dot_dimension_numbers<[1], [0], [0], [1], [0, 0, 1, 1], [], []>} : vector<128x32xf32>, vector<32x4xf32>, vector<128x4xf32> -> vector<128x4xf32>
    %c4_107 = arith.constant 4 : index
    %c0_108 = arith.constant 0 : index
    %c0_109 = arith.constant 0 : index
    %196 = vector.load %arg4[%c4_107, %c0_108, %c0_109] : memref<8x32x4xf32, #tpu.memory_space<vmem>>, vector<1x32x4xf32>
    %197 = vector.shape_cast %196 : vector<1x32x4xf32> to vector<32x4xf32>
    %cst_110 = arith.constant dense<0.000000e+00> : vector<128x4xf32>
    %198 = tpu.matmul %0, %197, %cst_110 {dimension_numbers = #tpu.dot_dimension_numbers<[1], [0], [0], [1], [0, 0, 1, 1], [], []>} : vector<128x32xf32>, vector<32x4xf32>, vector<128x4xf32> -> vector<128x4xf32>
    %199 = vector.extract_strided_slice %192 {offsets = [0, 0], sizes = [64, 4], strides = [1, 1]} : vector<128x4xf32> to vector<64x4xf32>
    %200 = vector.extract_strided_slice %195 {offsets = [0, 0], sizes = [64, 4], strides = [1, 1]} : vector<128x4xf32> to vector<64x4xf32>
    %201 = vector.extract_strided_slice %198 {offsets = [0, 0], sizes = [64, 4], strides = [1, 1]} : vector<128x4xf32> to vector<64x4xf32>
    %cst_111 = arith.constant dense<0.000000e+00> : vector<64x64xf32>
    %202 = tpu.matmul %199, %200, %cst_111 {dimension_numbers = #tpu.dot_dimension_numbers<[1], [1], [0], [0], [0, 0, 1, 0], [], []>} : vector<64x4xf32>, vector<64x4xf32>, vector<64x64xf32> -> vector<64x64xf32>
    %cst_112 = arith.constant dense<0xFF800000> : vector<64xf32>
    %203 = vector.multi_reduction <maximumf>, %202, %cst_112 [1] : vector<64x64xf32> to vector<64xf32>
    %204 = vector.shape_cast %203 : vector<64xf32> to vector<64x1xf32>
    %205 = vector.broadcast %204 : vector<64x1xf32> to vector<64x64xf32>
    %206 = arith.subf %202, %205 : vector<64x64xf32>
    %207 = math.exp %206 : vector<64x64xf32>
    %cst_113 = arith.constant dense<0.000000e+00> : vector<64xf32>
    %208 = vector.multi_reduction <add>, %207, %cst_113 [1] : vector<64x64xf32> to vector<64xf32>
    %209 = vector.shape_cast %208 : vector<64xf32> to vector<64x1xf32>
    %cst_114 = arith.constant dense<0.000000e+00> : vector<64x4xf32>
    %210 = tpu.matmul %207, %201, %cst_114 {dimension_numbers = #tpu.dot_dimension_numbers<[1], [0], [0], [1], [0, 0, 1, 1], [], []>} : vector<64x64xf32>, vector<64x4xf32>, vector<64x4xf32> -> vector<64x4xf32>
    %211 = tpu.reciprocal %209 : vector<64x1xf32> -> vector<64x1xf32>
    %212 = vector.broadcast %211 : vector<64x1xf32> to vector<64x4xf32>
    %213 = arith.mulf %210, %212 : vector<64x4xf32>
    %214 = vector.extract_strided_slice %192 {offsets = [64, 0], sizes = [64, 4], strides = [1, 1]} : vector<128x4xf32> to vector<64x4xf32>
    %215 = vector.extract_strided_slice %195 {offsets = [64, 0], sizes = [64, 4], strides = [1, 1]} : vector<128x4xf32> to vector<64x4xf32>
    %216 = vector.extract_strided_slice %198 {offsets = [64, 0], sizes = [64, 4], strides = [1, 1]} : vector<128x4xf32> to vector<64x4xf32>
    %cst_115 = arith.constant dense<0.000000e+00> : vector<64x64xf32>
    %217 = tpu.matmul %214, %215, %cst_115 {dimension_numbers = #tpu.dot_dimension_numbers<[1], [1], [0], [0], [0, 0, 1, 0], [], []>} : vector<64x4xf32>, vector<64x4xf32>, vector<64x64xf32> -> vector<64x64xf32>
    %cst_116 = arith.constant dense<0xFF800000> : vector<64xf32>
    %218 = vector.multi_reduction <maximumf>, %217, %cst_116 [1] : vector<64x64xf32> to vector<64xf32>
    %219 = vector.shape_cast %218 : vector<64xf32> to vector<64x1xf32>
    %220 = vector.broadcast %219 : vector<64x1xf32> to vector<64x64xf32>
    %221 = arith.subf %217, %220 : vector<64x64xf32>
    %222 = math.exp %221 : vector<64x64xf32>
    %cst_117 = arith.constant dense<0.000000e+00> : vector<64xf32>
    %223 = vector.multi_reduction <add>, %222, %cst_117 [1] : vector<64x64xf32> to vector<64xf32>
    %224 = vector.shape_cast %223 : vector<64xf32> to vector<64x1xf32>
    %cst_118 = arith.constant dense<0.000000e+00> : vector<64x4xf32>
    %225 = tpu.matmul %222, %216, %cst_118 {dimension_numbers = #tpu.dot_dimension_numbers<[1], [0], [0], [1], [0, 0, 1, 1], [], []>} : vector<64x64xf32>, vector<64x4xf32>, vector<64x4xf32> -> vector<64x4xf32>
    %226 = tpu.reciprocal %224 : vector<64x1xf32> -> vector<64x1xf32>
    %227 = vector.broadcast %226 : vector<64x1xf32> to vector<64x4xf32>
    %228 = arith.mulf %225, %227 : vector<64x4xf32>
    %229 = tpu.concatenate %213, %228 in 0 : vector<64x4xf32>, vector<64x4xf32> -> vector<128x4xf32>
    %c4_119 = arith.constant 4 : index
    %c0_120 = arith.constant 0 : index
    %c0_121 = arith.constant 0 : index
    %230 = vector.load %arg5[%c4_119, %c0_120, %c0_121] : memref<8x4x32xf32, #tpu.memory_space<vmem>>, vector<1x4x32xf32>
    %231 = vector.shape_cast %230 : vector<1x4x32xf32> to vector<4x32xf32>
    %cst_122 = arith.constant dense<0.000000e+00> : vector<128x32xf32>
    %232 = tpu.matmul %229, %231, %cst_122 {dimension_numbers = #tpu.dot_dimension_numbers<[1], [0], [0], [1], [0, 0, 1, 1], [], []>} : vector<128x4xf32>, vector<4x32xf32>, vector<128x32xf32> -> vector<128x32xf32>
    %233 = arith.addf %187, %232 : vector<128x32xf32>
    %c5 = arith.constant 5 : index
    %c0_123 = arith.constant 0 : index
    %c0_124 = arith.constant 0 : index
    %234 = vector.load %arg2[%c5, %c0_123, %c0_124] : memref<8x32x4xf32, #tpu.memory_space<vmem>>, vector<1x32x4xf32>
    %235 = vector.shape_cast %234 : vector<1x32x4xf32> to vector<32x4xf32>
    %cst_125 = arith.constant dense<0.000000e+00> : vector<128x4xf32>
    %236 = tpu.matmul %0, %235, %cst_125 {dimension_numbers = #tpu.dot_dimension_numbers<[1], [0], [0], [1], [0, 0, 1, 1], [], []>} : vector<128x32xf32>, vector<32x4xf32>, vector<128x4xf32> -> vector<128x4xf32>
    %cst_126 = arith.constant 5.000000e-01 : f32
    %237 = vector.broadcast %cst_126 : f32 to vector<128x4xf32>
    %238 = arith.mulf %236, %237 : vector<128x4xf32>
    %c5_127 = arith.constant 5 : index
    %c0_128 = arith.constant 0 : index
    %c0_129 = arith.constant 0 : index
    %239 = vector.load %arg3[%c5_127, %c0_128, %c0_129] : memref<8x32x4xf32, #tpu.memory_space<vmem>>, vector<1x32x4xf32>
    %240 = vector.shape_cast %239 : vector<1x32x4xf32> to vector<32x4xf32>
    %cst_130 = arith.constant dense<0.000000e+00> : vector<128x4xf32>
    %241 = tpu.matmul %0, %240, %cst_130 {dimension_numbers = #tpu.dot_dimension_numbers<[1], [0], [0], [1], [0, 0, 1, 1], [], []>} : vector<128x32xf32>, vector<32x4xf32>, vector<128x4xf32> -> vector<128x4xf32>
    %c5_131 = arith.constant 5 : index
    %c0_132 = arith.constant 0 : index
    %c0_133 = arith.constant 0 : index
    %242 = vector.load %arg4[%c5_131, %c0_132, %c0_133] : memref<8x32x4xf32, #tpu.memory_space<vmem>>, vector<1x32x4xf32>
    %243 = vector.shape_cast %242 : vector<1x32x4xf32> to vector<32x4xf32>
    %cst_134 = arith.constant dense<0.000000e+00> : vector<128x4xf32>
    %244 = tpu.matmul %0, %243, %cst_134 {dimension_numbers = #tpu.dot_dimension_numbers<[1], [0], [0], [1], [0, 0, 1, 1], [], []>} : vector<128x32xf32>, vector<32x4xf32>, vector<128x4xf32> -> vector<128x4xf32>
    %245 = vector.extract_strided_slice %238 {offsets = [0, 0], sizes = [64, 4], strides = [1, 1]} : vector<128x4xf32> to vector<64x4xf32>
    %246 = vector.extract_strided_slice %241 {offsets = [0, 0], sizes = [64, 4], strides = [1, 1]} : vector<128x4xf32> to vector<64x4xf32>
    %247 = vector.extract_strided_slice %244 {offsets = [0, 0], sizes = [64, 4], strides = [1, 1]} : vector<128x4xf32> to vector<64x4xf32>
    %cst_135 = arith.constant dense<0.000000e+00> : vector<64x64xf32>
    %248 = tpu.matmul %245, %246, %cst_135 {dimension_numbers = #tpu.dot_dimension_numbers<[1], [1], [0], [0], [0, 0, 1, 0], [], []>} : vector<64x4xf32>, vector<64x4xf32>, vector<64x64xf32> -> vector<64x64xf32>
    %cst_136 = arith.constant dense<0xFF800000> : vector<64xf32>
    %249 = vector.multi_reduction <maximumf>, %248, %cst_136 [1] : vector<64x64xf32> to vector<64xf32>
    %250 = vector.shape_cast %249 : vector<64xf32> to vector<64x1xf32>
    %251 = vector.broadcast %250 : vector<64x1xf32> to vector<64x64xf32>
    %252 = arith.subf %248, %251 : vector<64x64xf32>
    %253 = math.exp %252 : vector<64x64xf32>
    %cst_137 = arith.constant dense<0.000000e+00> : vector<64xf32>
    %254 = vector.multi_reduction <add>, %253, %cst_137 [1] : vector<64x64xf32> to vector<64xf32>
    %255 = vector.shape_cast %254 : vector<64xf32> to vector<64x1xf32>
    %cst_138 = arith.constant dense<0.000000e+00> : vector<64x4xf32>
    %256 = tpu.matmul %253, %247, %cst_138 {dimension_numbers = #tpu.dot_dimension_numbers<[1], [0], [0], [1], [0, 0, 1, 1], [], []>} : vector<64x64xf32>, vector<64x4xf32>, vector<64x4xf32> -> vector<64x4xf32>
    %257 = tpu.reciprocal %255 : vector<64x1xf32> -> vector<64x1xf32>
    %258 = vector.broadcast %257 : vector<64x1xf32> to vector<64x4xf32>
    %259 = arith.mulf %256, %258 : vector<64x4xf32>
    %260 = vector.extract_strided_slice %238 {offsets = [64, 0], sizes = [64, 4], strides = [1, 1]} : vector<128x4xf32> to vector<64x4xf32>
    %261 = vector.extract_strided_slice %241 {offsets = [64, 0], sizes = [64, 4], strides = [1, 1]} : vector<128x4xf32> to vector<64x4xf32>
    %262 = vector.extract_strided_slice %244 {offsets = [64, 0], sizes = [64, 4], strides = [1, 1]} : vector<128x4xf32> to vector<64x4xf32>
    %cst_139 = arith.constant dense<0.000000e+00> : vector<64x64xf32>
    %263 = tpu.matmul %260, %261, %cst_139 {dimension_numbers = #tpu.dot_dimension_numbers<[1], [1], [0], [0], [0, 0, 1, 0], [], []>} : vector<64x4xf32>, vector<64x4xf32>, vector<64x64xf32> -> vector<64x64xf32>
    %cst_140 = arith.constant dense<0xFF800000> : vector<64xf32>
    %264 = vector.multi_reduction <maximumf>, %263, %cst_140 [1] : vector<64x64xf32> to vector<64xf32>
    %265 = vector.shape_cast %264 : vector<64xf32> to vector<64x1xf32>
    %266 = vector.broadcast %265 : vector<64x1xf32> to vector<64x64xf32>
    %267 = arith.subf %263, %266 : vector<64x64xf32>
    %268 = math.exp %267 : vector<64x64xf32>
    %cst_141 = arith.constant dense<0.000000e+00> : vector<64xf32>
    %269 = vector.multi_reduction <add>, %268, %cst_141 [1] : vector<64x64xf32> to vector<64xf32>
    %270 = vector.shape_cast %269 : vector<64xf32> to vector<64x1xf32>
    %cst_142 = arith.constant dense<0.000000e+00> : vector<64x4xf32>
    %271 = tpu.matmul %268, %262, %cst_142 {dimension_numbers = #tpu.dot_dimension_numbers<[1], [0], [0], [1], [0, 0, 1, 1], [], []>} : vector<64x64xf32>, vector<64x4xf32>, vector<64x4xf32> -> vector<64x4xf32>
    %272 = tpu.reciprocal %270 : vector<64x1xf32> -> vector<64x1xf32>
    %273 = vector.broadcast %272 : vector<64x1xf32> to vector<64x4xf32>
    %274 = arith.mulf %271, %273 : vector<64x4xf32>
    %275 = tpu.concatenate %259, %274 in 0 : vector<64x4xf32>, vector<64x4xf32> -> vector<128x4xf32>
    %c5_143 = arith.constant 5 : index
    %c0_144 = arith.constant 0 : index
    %c0_145 = arith.constant 0 : index
    %276 = vector.load %arg5[%c5_143, %c0_144, %c0_145] : memref<8x4x32xf32, #tpu.memory_space<vmem>>, vector<1x4x32xf32>
    %277 = vector.shape_cast %276 : vector<1x4x32xf32> to vector<4x32xf32>
    %cst_146 = arith.constant dense<0.000000e+00> : vector<128x32xf32>
    %278 = tpu.matmul %275, %277, %cst_146 {dimension_numbers = #tpu.dot_dimension_numbers<[1], [0], [0], [1], [0, 0, 1, 1], [], []>} : vector<128x4xf32>, vector<4x32xf32>, vector<128x32xf32> -> vector<128x32xf32>
    %279 = arith.addf %233, %278 : vector<128x32xf32>
    %c6 = arith.constant 6 : index
    %c0_147 = arith.constant 0 : index
    %c0_148 = arith.constant 0 : index
    %280 = vector.load %arg2[%c6, %c0_147, %c0_148] : memref<8x32x4xf32, #tpu.memory_space<vmem>>, vector<1x32x4xf32>
    %281 = vector.shape_cast %280 : vector<1x32x4xf32> to vector<32x4xf32>
    %cst_149 = arith.constant dense<0.000000e+00> : vector<128x4xf32>
    %282 = tpu.matmul %0, %281, %cst_149 {dimension_numbers = #tpu.dot_dimension_numbers<[1], [0], [0], [1], [0, 0, 1, 1], [], []>} : vector<128x32xf32>, vector<32x4xf32>, vector<128x4xf32> -> vector<128x4xf32>
    %cst_150 = arith.constant 5.000000e-01 : f32
    %283 = vector.broadcast %cst_150 : f32 to vector<128x4xf32>
    %284 = arith.mulf %282, %283 : vector<128x4xf32>
    %c6_151 = arith.constant 6 : index
    %c0_152 = arith.constant 0 : index
    %c0_153 = arith.constant 0 : index
    %285 = vector.load %arg3[%c6_151, %c0_152, %c0_153] : memref<8x32x4xf32, #tpu.memory_space<vmem>>, vector<1x32x4xf32>
    %286 = vector.shape_cast %285 : vector<1x32x4xf32> to vector<32x4xf32>
    %cst_154 = arith.constant dense<0.000000e+00> : vector<128x4xf32>
    %287 = tpu.matmul %0, %286, %cst_154 {dimension_numbers = #tpu.dot_dimension_numbers<[1], [0], [0], [1], [0, 0, 1, 1], [], []>} : vector<128x32xf32>, vector<32x4xf32>, vector<128x4xf32> -> vector<128x4xf32>
    %c6_155 = arith.constant 6 : index
    %c0_156 = arith.constant 0 : index
    %c0_157 = arith.constant 0 : index
    %288 = vector.load %arg4[%c6_155, %c0_156, %c0_157] : memref<8x32x4xf32, #tpu.memory_space<vmem>>, vector<1x32x4xf32>
    %289 = vector.shape_cast %288 : vector<1x32x4xf32> to vector<32x4xf32>
    %cst_158 = arith.constant dense<0.000000e+00> : vector<128x4xf32>
    %290 = tpu.matmul %0, %289, %cst_158 {dimension_numbers = #tpu.dot_dimension_numbers<[1], [0], [0], [1], [0, 0, 1, 1], [], []>} : vector<128x32xf32>, vector<32x4xf32>, vector<128x4xf32> -> vector<128x4xf32>
    %291 = vector.extract_strided_slice %284 {offsets = [0, 0], sizes = [64, 4], strides = [1, 1]} : vector<128x4xf32> to vector<64x4xf32>
    %292 = vector.extract_strided_slice %287 {offsets = [0, 0], sizes = [64, 4], strides = [1, 1]} : vector<128x4xf32> to vector<64x4xf32>
    %293 = vector.extract_strided_slice %290 {offsets = [0, 0], sizes = [64, 4], strides = [1, 1]} : vector<128x4xf32> to vector<64x4xf32>
    %cst_159 = arith.constant dense<0.000000e+00> : vector<64x64xf32>
    %294 = tpu.matmul %291, %292, %cst_159 {dimension_numbers = #tpu.dot_dimension_numbers<[1], [1], [0], [0], [0, 0, 1, 0], [], []>} : vector<64x4xf32>, vector<64x4xf32>, vector<64x64xf32> -> vector<64x64xf32>
    %cst_160 = arith.constant dense<0xFF800000> : vector<64xf32>
    %295 = vector.multi_reduction <maximumf>, %294, %cst_160 [1] : vector<64x64xf32> to vector<64xf32>
    %296 = vector.shape_cast %295 : vector<64xf32> to vector<64x1xf32>
    %297 = vector.broadcast %296 : vector<64x1xf32> to vector<64x64xf32>
    %298 = arith.subf %294, %297 : vector<64x64xf32>
    %299 = math.exp %298 : vector<64x64xf32>
    %cst_161 = arith.constant dense<0.000000e+00> : vector<64xf32>
    %300 = vector.multi_reduction <add>, %299, %cst_161 [1] : vector<64x64xf32> to vector<64xf32>
    %301 = vector.shape_cast %300 : vector<64xf32> to vector<64x1xf32>
    %cst_162 = arith.constant dense<0.000000e+00> : vector<64x4xf32>
    %302 = tpu.matmul %299, %293, %cst_162 {dimension_numbers = #tpu.dot_dimension_numbers<[1], [0], [0], [1], [0, 0, 1, 1], [], []>} : vector<64x64xf32>, vector<64x4xf32>, vector<64x4xf32> -> vector<64x4xf32>
    %303 = tpu.reciprocal %301 : vector<64x1xf32> -> vector<64x1xf32>
    %304 = vector.broadcast %303 : vector<64x1xf32> to vector<64x4xf32>
    %305 = arith.mulf %302, %304 : vector<64x4xf32>
    %306 = vector.extract_strided_slice %284 {offsets = [64, 0], sizes = [64, 4], strides = [1, 1]} : vector<128x4xf32> to vector<64x4xf32>
    %307 = vector.extract_strided_slice %287 {offsets = [64, 0], sizes = [64, 4], strides = [1, 1]} : vector<128x4xf32> to vector<64x4xf32>
    %308 = vector.extract_strided_slice %290 {offsets = [64, 0], sizes = [64, 4], strides = [1, 1]} : vector<128x4xf32> to vector<64x4xf32>
    %cst_163 = arith.constant dense<0.000000e+00> : vector<64x64xf32>
    %309 = tpu.matmul %306, %307, %cst_163 {dimension_numbers = #tpu.dot_dimension_numbers<[1], [1], [0], [0], [0, 0, 1, 0], [], []>} : vector<64x4xf32>, vector<64x4xf32>, vector<64x64xf32> -> vector<64x64xf32>
    %cst_164 = arith.constant dense<0xFF800000> : vector<64xf32>
    %310 = vector.multi_reduction <maximumf>, %309, %cst_164 [1] : vector<64x64xf32> to vector<64xf32>
    %311 = vector.shape_cast %310 : vector<64xf32> to vector<64x1xf32>
    %312 = vector.broadcast %311 : vector<64x1xf32> to vector<64x64xf32>
    %313 = arith.subf %309, %312 : vector<64x64xf32>
    %314 = math.exp %313 : vector<64x64xf32>
    %cst_165 = arith.constant dense<0.000000e+00> : vector<64xf32>
    %315 = vector.multi_reduction <add>, %314, %cst_165 [1] : vector<64x64xf32> to vector<64xf32>
    %316 = vector.shape_cast %315 : vector<64xf32> to vector<64x1xf32>
    %cst_166 = arith.constant dense<0.000000e+00> : vector<64x4xf32>
    %317 = tpu.matmul %314, %308, %cst_166 {dimension_numbers = #tpu.dot_dimension_numbers<[1], [0], [0], [1], [0, 0, 1, 1], [], []>} : vector<64x64xf32>, vector<64x4xf32>, vector<64x4xf32> -> vector<64x4xf32>
    %318 = tpu.reciprocal %316 : vector<64x1xf32> -> vector<64x1xf32>
    %319 = vector.broadcast %318 : vector<64x1xf32> to vector<64x4xf32>
    %320 = arith.mulf %317, %319 : vector<64x4xf32>
    %321 = tpu.concatenate %305, %320 in 0 : vector<64x4xf32>, vector<64x4xf32> -> vector<128x4xf32>
    %c6_167 = arith.constant 6 : index
    %c0_168 = arith.constant 0 : index
    %c0_169 = arith.constant 0 : index
    %322 = vector.load %arg5[%c6_167, %c0_168, %c0_169] : memref<8x4x32xf32, #tpu.memory_space<vmem>>, vector<1x4x32xf32>
    %323 = vector.shape_cast %322 : vector<1x4x32xf32> to vector<4x32xf32>
    %cst_170 = arith.constant dense<0.000000e+00> : vector<128x32xf32>
    %324 = tpu.matmul %321, %323, %cst_170 {dimension_numbers = #tpu.dot_dimension_numbers<[1], [0], [0], [1], [0, 0, 1, 1], [], []>} : vector<128x4xf32>, vector<4x32xf32>, vector<128x32xf32> -> vector<128x32xf32>
    %325 = arith.addf %279, %324 : vector<128x32xf32>
    %c7 = arith.constant 7 : index
    %c0_171 = arith.constant 0 : index
    %c0_172 = arith.constant 0 : index
    %326 = vector.load %arg2[%c7, %c0_171, %c0_172] : memref<8x32x4xf32, #tpu.memory_space<vmem>>, vector<1x32x4xf32>
    %327 = vector.shape_cast %326 : vector<1x32x4xf32> to vector<32x4xf32>
    %cst_173 = arith.constant dense<0.000000e+00> : vector<128x4xf32>
    %328 = tpu.matmul %0, %327, %cst_173 {dimension_numbers = #tpu.dot_dimension_numbers<[1], [0], [0], [1], [0, 0, 1, 1], [], []>} : vector<128x32xf32>, vector<32x4xf32>, vector<128x4xf32> -> vector<128x4xf32>
    %cst_174 = arith.constant 5.000000e-01 : f32
    %329 = vector.broadcast %cst_174 : f32 to vector<128x4xf32>
    %330 = arith.mulf %328, %329 : vector<128x4xf32>
    %c7_175 = arith.constant 7 : index
    %c0_176 = arith.constant 0 : index
    %c0_177 = arith.constant 0 : index
    %331 = vector.load %arg3[%c7_175, %c0_176, %c0_177] : memref<8x32x4xf32, #tpu.memory_space<vmem>>, vector<1x32x4xf32>
    %332 = vector.shape_cast %331 : vector<1x32x4xf32> to vector<32x4xf32>
    %cst_178 = arith.constant dense<0.000000e+00> : vector<128x4xf32>
    %333 = tpu.matmul %0, %332, %cst_178 {dimension_numbers = #tpu.dot_dimension_numbers<[1], [0], [0], [1], [0, 0, 1, 1], [], []>} : vector<128x32xf32>, vector<32x4xf32>, vector<128x4xf32> -> vector<128x4xf32>
    %c7_179 = arith.constant 7 : index
    %c0_180 = arith.constant 0 : index
    %c0_181 = arith.constant 0 : index
    %334 = vector.load %arg4[%c7_179, %c0_180, %c0_181] : memref<8x32x4xf32, #tpu.memory_space<vmem>>, vector<1x32x4xf32>
    %335 = vector.shape_cast %334 : vector<1x32x4xf32> to vector<32x4xf32>
    %cst_182 = arith.constant dense<0.000000e+00> : vector<128x4xf32>
    %336 = tpu.matmul %0, %335, %cst_182 {dimension_numbers = #tpu.dot_dimension_numbers<[1], [0], [0], [1], [0, 0, 1, 1], [], []>} : vector<128x32xf32>, vector<32x4xf32>, vector<128x4xf32> -> vector<128x4xf32>
    %337 = vector.extract_strided_slice %330 {offsets = [0, 0], sizes = [64, 4], strides = [1, 1]} : vector<128x4xf32> to vector<64x4xf32>
    %338 = vector.extract_strided_slice %333 {offsets = [0, 0], sizes = [64, 4], strides = [1, 1]} : vector<128x4xf32> to vector<64x4xf32>
    %339 = vector.extract_strided_slice %336 {offsets = [0, 0], sizes = [64, 4], strides = [1, 1]} : vector<128x4xf32> to vector<64x4xf32>
    %cst_183 = arith.constant dense<0.000000e+00> : vector<64x64xf32>
    %340 = tpu.matmul %337, %338, %cst_183 {dimension_numbers = #tpu.dot_dimension_numbers<[1], [1], [0], [0], [0, 0, 1, 0], [], []>} : vector<64x4xf32>, vector<64x4xf32>, vector<64x64xf32> -> vector<64x64xf32>
    %cst_184 = arith.constant dense<0xFF800000> : vector<64xf32>
    %341 = vector.multi_reduction <maximumf>, %340, %cst_184 [1] : vector<64x64xf32> to vector<64xf32>
    %342 = vector.shape_cast %341 : vector<64xf32> to vector<64x1xf32>
    %343 = vector.broadcast %342 : vector<64x1xf32> to vector<64x64xf32>
    %344 = arith.subf %340, %343 : vector<64x64xf32>
    %345 = math.exp %344 : vector<64x64xf32>
    %cst_185 = arith.constant dense<0.000000e+00> : vector<64xf32>
    %346 = vector.multi_reduction <add>, %345, %cst_185 [1] : vector<64x64xf32> to vector<64xf32>
    %347 = vector.shape_cast %346 : vector<64xf32> to vector<64x1xf32>
    %cst_186 = arith.constant dense<0.000000e+00> : vector<64x4xf32>
    %348 = tpu.matmul %345, %339, %cst_186 {dimension_numbers = #tpu.dot_dimension_numbers<[1], [0], [0], [1], [0, 0, 1, 1], [], []>} : vector<64x64xf32>, vector<64x4xf32>, vector<64x4xf32> -> vector<64x4xf32>
    %349 = tpu.reciprocal %347 : vector<64x1xf32> -> vector<64x1xf32>
    %350 = vector.broadcast %349 : vector<64x1xf32> to vector<64x4xf32>
    %351 = arith.mulf %348, %350 : vector<64x4xf32>
    %352 = vector.extract_strided_slice %330 {offsets = [64, 0], sizes = [64, 4], strides = [1, 1]} : vector<128x4xf32> to vector<64x4xf32>
    %353 = vector.extract_strided_slice %333 {offsets = [64, 0], sizes = [64, 4], strides = [1, 1]} : vector<128x4xf32> to vector<64x4xf32>
    %354 = vector.extract_strided_slice %336 {offsets = [64, 0], sizes = [64, 4], strides = [1, 1]} : vector<128x4xf32> to vector<64x4xf32>
    %cst_187 = arith.constant dense<0.000000e+00> : vector<64x64xf32>
    %355 = tpu.matmul %352, %353, %cst_187 {dimension_numbers = #tpu.dot_dimension_numbers<[1], [1], [0], [0], [0, 0, 1, 0], [], []>} : vector<64x4xf32>, vector<64x4xf32>, vector<64x64xf32> -> vector<64x64xf32>
    %cst_188 = arith.constant dense<0xFF800000> : vector<64xf32>
    %356 = vector.multi_reduction <maximumf>, %355, %cst_188 [1] : vector<64x64xf32> to vector<64xf32>
    %357 = vector.shape_cast %356 : vector<64xf32> to vector<64x1xf32>
    %358 = vector.broadcast %357 : vector<64x1xf32> to vector<64x64xf32>
    %359 = arith.subf %355, %358 : vector<64x64xf32>
    %360 = math.exp %359 : vector<64x64xf32>
    %cst_189 = arith.constant dense<0.000000e+00> : vector<64xf32>
    %361 = vector.multi_reduction <add>, %360, %cst_189 [1] : vector<64x64xf32> to vector<64xf32>
    %362 = vector.shape_cast %361 : vector<64xf32> to vector<64x1xf32>
    %cst_190 = arith.constant dense<0.000000e+00> : vector<64x4xf32>
    %363 = tpu.matmul %360, %354, %cst_190 {dimension_numbers = #tpu.dot_dimension_numbers<[1], [0], [0], [1], [0, 0, 1, 1], [], []>} : vector<64x64xf32>, vector<64x4xf32>, vector<64x4xf32> -> vector<64x4xf32>
    %364 = tpu.reciprocal %362 : vector<64x1xf32> -> vector<64x1xf32>
    %365 = vector.broadcast %364 : vector<64x1xf32> to vector<64x4xf32>
    %366 = arith.mulf %363, %365 : vector<64x4xf32>
    %367 = tpu.concatenate %351, %366 in 0 : vector<64x4xf32>, vector<64x4xf32> -> vector<128x4xf32>
    %c7_191 = arith.constant 7 : index
    %c0_192 = arith.constant 0 : index
    %c0_193 = arith.constant 0 : index
    %368 = vector.load %arg5[%c7_191, %c0_192, %c0_193] : memref<8x4x32xf32, #tpu.memory_space<vmem>>, vector<1x4x32xf32>
    %369 = vector.shape_cast %368 : vector<1x4x32xf32> to vector<4x32xf32>
    %cst_194 = arith.constant dense<0.000000e+00> : vector<128x32xf32>
    %370 = tpu.matmul %367, %369, %cst_194 {dimension_numbers = #tpu.dot_dimension_numbers<[1], [0], [0], [1], [0, 0, 1, 1], [], []>} : vector<128x4xf32>, vector<4x32xf32>, vector<128x32xf32> -> vector<128x32xf32>
    %371 = arith.addf %325, %370 : vector<128x32xf32>
    %c0_195 = arith.constant 0 : index
    %c0_196 = arith.constant 0 : index
    %372 = vector.load %arg7[%c0_195, %c0_196] : memref<128x32xf32, #tpu.memory_space<vmem>>, vector<128x32xf32>
    tpu.vector_store %arg7[%c0_195, %c0_196], %371 {strides = array<i32>} : memref<128x32xf32, #tpu.memory_space<vmem>>, vector<128x32xf32>,
    return
  }
  func.func @transform_0(%arg0: i32) -> (i32, i32) {
    %c0_i32 = arith.constant 0 : i32
    %c0_i32_0 = arith.constant 0 : i32
    %c0_i32_1 = arith.constant 0 : i32
    return %c0_i32, %c0_i32_0 : i32, i32
  }
  func.func @transform_1(%arg0: i32) -> (i32, i32, i32) {
    %c0_i32 = arith.constant 0 : i32
    %c0_i32_0 = arith.constant 0 : i32
    %c0_i32_1 = arith.constant 0 : i32
    %c0_i32_2 = arith.constant 0 : i32
    return %c0_i32, %c0_i32_0, %c0_i32_1 : i32, i32, i32
  }
  func.func @transform_2(%arg0: i32) -> (i32, i32, i32) {
    %c0_i32 = arith.constant 0 : i32
    %c0_i32_0 = arith.constant 0 : i32
    %c0_i32_1 = arith.constant 0 : i32
    %c0_i32_2 = arith.constant 0 : i32
    return %c0_i32, %c0_i32_0, %c0_i32_1 : i32, i32, i32
  }
  func.func @transform_3(%arg0: i32) -> (i32, i32, i32) {
    %c0_i32 = arith.constant 0 : i32
    %c0_i32_0 = arith.constant 0 : i32
    %c0_i32_1 = arith.constant 0 : i32
    %c0_i32_2 = arith.constant 0 : i32
    return %c0_i32, %c0_i32_0, %c0_i32_1 : i32, i32, i32
  }
  func.func @transform_4(%arg0: i32) -> (i32, i32, i32) {
    %c0_i32 = arith.constant 0 : i32
    %c0_i32_0 = arith.constant 0 : i32
    %c0_i32_1 = arith.constant 0 : i32
    %c0_i32_2 = arith.constant 0 : i32
    return %c0_i32, %c0_i32_0, %c0_i32_1 : i32, i32, i32
  }
  func.func @transform_5(%arg0: i32) -> (i32, i32) {
    %c0_i32 = arith.constant 0 : i32
    %c0_i32_0 = arith.constant 0 : i32
    %c0_i32_1 = arith.constant 0 : i32
    return %c0_i32, %c0_i32_0 : i32, i32
  }
  func.func @transform_6(%arg0: i32) -> (i32, i32) {
    %c0_i32 = arith.constant 0 : i32
    %c0_i32_0 = arith.constant 0 : i32
    %c0_i32_1 = arith.constant 0 : i32
    return %c0_i32, %c0_i32_0 : i32, i32
  }
}

</mosaic_0001>

<bundles_post_ra>
// kernel: tpu_custom_call.1
= control target key start
LH: loop header
LB: loop body
LE: loop exit
PB: predicated region body
PF: predicated region fallthrough
CT: control target
= control target key end

     0   :  { %vm50_vm0 = vcmask 261120   ;;  %vm558_vm1 = vcmask 31744   ;;  %vm712_vm2 = vcmask 523264   ;;  %vm1349_vm3 = vcmask 1043456   ;;  %s19828_s2 = inlined_call_operand.vmem [shape: f32[8,32,4], index: 2, kind: input, shape index: {}]   ;;  %s19829_s0 = inlined_call_operand.vmem [shape: f32[128,32], index: 0, kind: input, shape index: {}]   ;;  %s19830_s1 = inlined_call_operand.vmem [shape: f32[8,32,4], index: 1, kind: input, shape index: {}]   ;;  %s19831_s3 = inlined_call_operand.vmem [shape: f32[8,32,4], index: 3, kind: input, shape index: {}]   ;;  %s19832_s4 = inlined_call_operand.vmem [shape: f32[8,4,32], index: 4, kind: input, shape index: {}]   ;;  %s19833_s5 = inlined_call_operand.vmem [shape: f32[1,32], index: 5, kind: input, shape index: {}]   ;;  %s19834_s6 = inlined_call_operand.vmem [shape: f32[128,32], index: 6, kind: output, shape index: {}]  }
   0x1   :  { %v263_v0 = vld [vmem:[%s19828_s2 + $0x18] sm:$0xff]  ;;  %v262_v1 = vld [vmem:[%s19828_s2 + $0x10] sm:$0xff]  ;;  %v16155_v2 = vld [vmem:[%s19829_s0] sm:$0xff] }
   0x2   :  { %13630 = vmatprep.subr.mxu1 %v263_v0  ;;  %v261_v3 = vld [vmem:[%s19828_s2 + $0x8] sm:$0xff]  ;;  %13638 = vmatprep.mubr.msk.f32.mxu1 %vm50_vm0, %v16155_v2  ;;  %v260_v4 = vld [vmem:[%s19828_s2] sm:$0xff]  ;;  %v49_v6 = vld [vmem:[%s19830_s1 + $0x18] sm:$0xff] }
   0x3   :  { %13631 = vmatpush3.msra.mxu1 %v263_v0  ;;  %13606 = vmatprep.mubr.msk.f32.mxu0 %vm50_vm0, %v16155_v2  ;;  %v16170_v5 = vld [vmem:[%s19829_s0 + $0x8] sm:$0xff]  ;;  %v16178_v7 = vld [vmem:[%s19829_s0 + $0x10] sm:$0xff]  ;;  %v16193_v10 = vld [vmem:[%s19829_s0 + $0x18] sm:$0xff] }
   0x4   :  { %13632 = vmatprep.subr.mxu1 %v262_v1  ;;  %13598 = vmatprep.subr.mxu0 %v49_v6  ;;  %v48_v8 = vld [vmem:[%s19830_s1 + $0x10] sm:$0xff]  ;;  %v47_v9 = vld [vmem:[%s19830_s1 + $0x8] sm:$0xff]  ;;  %v46_v11 = vld [vmem:[%s19830_s1] sm:$0xff] }
   0x5   :  { %13633 = vmatpush3.msra.mxu1 %v262_v1  ;;  %13599 = vmatpush3.msra.mxu0 %v49_v6  ;;  %v16201_v12 = vld [vmem:[%s19829_s0 + $0x20] sm:$0xff]  ;;  %v412_v13 = vld [vmem:[%s19831_s3 + $0x18] sm:$0xff]  ;;  %v16213_v14 = vld [vmem:[%s19829_s0 + $0x28] sm:$0xff] }
   0x6   :  { %13634 = vmatprep.subr.mxu1 %v261_v3  ;;  %13600 = vmatprep.subr.mxu0 %v48_v8  ;;  %v16218_v15 = vld [vmem:[%s19829_s0 + $0x30] sm:$0xff]  ;;  %v16231_v16 = vld [vmem:[%s19829_s0 + $0x38] sm:$0xff]  ;;  %v16236_v17 = vld [vmem:[%s19829_s0 + $0x40] sm:$0xff] }
   0x7   :  { %13635 = vmatpush3.msra.mxu1 %v261_v3  ;;  %13601 = vmatpush3.msra.mxu0 %v48_v8  ;;  %v16249_v18 = vld [vmem:[%s19829_s0 + $0x48] sm:$0xff]  ;;  %v16254_v19 = vld [vmem:[%s19829_s0 + $0x50] sm:$0xff]  ;;  %v16267_v20 = vld [vmem:[%s19829_s0 + $0x58] sm:$0xff] }
   0x8   :  { %13636 = vmatprep.subr.mxu1 %v260_v4  ;;  %13602 = vmatprep.subr.mxu0 %v47_v9  ;;  %v16272_v21 = vld [vmem:[%s19829_s0 + $0x60] sm:$0xff]  ;;  %v16285_v22 = vld [vmem:[%s19829_s0 + $0x68] sm:$0xff]  ;;  %v16290_v23 = vld [vmem:[%s19829_s0 + $0x70] sm:$0xff] }
   0x9   :  { %13637 = vmatpush3.msra.mxu1 %v260_v4  ;;  %13603 = vmatpush3.msra.mxu0 %v47_v9  ;;  %v16303_v24 = vld [vmem:[%s19829_s0 + $0x78] sm:$0xff]  ;;  %v411_v25 = vld [vmem:[%s19831_s3 + $0x10] sm:$0xff]  ;;  %v410_v26 = vld [vmem:[%s19831_s3 + $0x8] sm:$0xff] }
   0xa   :  { %13639 = vmatmul.mubr.msk.f32.vlgmr.msra.gmra.mxu1 %vm50_vm0, %v16170_v5  ;;  %13604 = vmatprep.subr.mxu0 %v46_v11  ;;  %v409_v27 = vld [vmem:[%s19831_s3] sm:$0xff] }
   0xb   :  { %13641 = vmatprep.mubr.msk.f32.mxu1 %vm50_vm0, %v16178_v7  ;;  %13605 = vmatpush3.msra.mxu0 %v46_v11 }
   0xc   :  { %13607 = vmatmul.mubr.msk.f32.vlgmr.msra.gmra.mxu0 %vm50_vm0, %v16170_v5  ;;  %13662 = vmatprep.subr.mxu0 %v412_v13 }
   0xd   :  { %13609 = vmatprep.mubr.msk.f32.mxu0 %vm50_vm0, %v16178_v7  ;;  %13663 = vmatpush3.msra.mxu0 %v412_v13 }
   0xe   :  { %13642 = vmatmul.mubr.msk.f32.gmra.mxu1 %vm50_vm0, %v16193_v10  ;;  %13664 = vmatprep.subr.mxu0 %v411_v25 }
   0xf   :  { %13644 = vmatprep.mubr.msk.f32.mxu1 %vm50_vm0, %v16201_v12  ;;  %13665 = vmatpush3.msra.mxu0 %v411_v25 }
  0x10   :  { %13610 = vmatmul.mubr.msk.f32.gmra.mxu0 %vm50_vm0, %v16193_v10  ;;  %13666 = vmatprep.subr.mxu0 %v410_v26 }
  0x11   :  { %13612 = vmatprep.mubr.msk.f32.mxu0 %vm50_vm0, %v16201_v12  ;;  %13667 = vmatpush3.msra.mxu0 %v410_v26 }
  0x12   :  { %13645 = vmatmul.mubr.msk.f32.gmra.mxu1 %vm50_vm0, %v16213_v14  ;;  %13668 = vmatprep.subr.mxu0 %v409_v27 }
  0x13   :  { %13647 = vmatprep.mubr.msk.f32.mxu1 %vm50_vm0, %v16218_v15  ;;  %13669 = vmatpush3.msra.mxu0 %v409_v27 }
  0x14   :  { %13613 = vmatmul.mubr.msk.f32.gmra.mxu0 %vm50_vm0, %v16213_v14 }
  0x15   :  { %13615 = vmatprep.mubr.msk.f32.mxu0 %vm50_vm0, %v16218_v15 }
  0x16   :  { %13648 = vmatmul.mubr.msk.f32.gmra.mxu1 %vm50_vm0, %v16231_v16 }
  0x17   :  { %13650 = vmatprep.mubr.msk.f32.mxu1 %vm50_vm0, %v16236_v17 }
  0x18   :  { %13616 = vmatmul.mubr.msk.f32.gmra.mxu0 %vm50_vm0, %v16231_v16 }
  0x19   :  { %13618 = vmatprep.mubr.msk.f32.mxu0 %vm50_vm0, %v16236_v17 }
  0x1a   :  { %13651 = vmatmul.mubr.msk.f32.gmra.mxu1 %vm50_vm0, %v16249_v18 }
  0x1b   :  { %13653 = vmatprep.mubr.msk.f32.mxu1 %vm50_vm0, %v16254_v19 }
  0x1c   :  { %13619 = vmatmul.mubr.msk.f32.gmra.mxu0 %vm50_vm0, %v16249_v18 }
  0x1d   :  { %13621 = vmatprep.mubr.msk.f32.mxu0 %vm50_vm0, %v16254_v19 }
  0x1e   :  { %13654 = vmatmul.mubr.msk.f32.gmra.mxu1 %vm50_vm0, %v16267_v20 }
  0x1f   :  { %13656 = vmatprep.mubr.msk.f32.mxu1 %vm50_vm0, %v16272_v21 }
  0x20   :  { %13622 = vmatmul.mubr.msk.f32.gmra.mxu0 %vm50_vm0, %v16267_v20 }
  0x21   :  { %13624 = vmatprep.mubr.msk.f32.mxu0 %vm50_vm0, %v16272_v21 }
  0x22   :  { %13657 = vmatmul.mubr.msk.f32.gmra.mxu1 %vm50_vm0, %v16285_v22 }
  0x23   :  { %13659 = vmatprep.mubr.msk.f32.mxu1 %vm50_vm0, %v16290_v23 }
  0x24   :  { %13625 = vmatmul.mubr.msk.f32.gmra.mxu0 %vm50_vm0, %v16285_v22 }
  0x25   :  { %13627 = vmatprep.mubr.msk.f32.mxu0 %vm50_vm0, %v16290_v23 }
  0x26   :  { %13660 = vmatmul.mubr.msk.f32.gmra.mxu1 %vm50_vm0, %v16303_v24 }
  0x28   :  { %13628 = vmatmul.mubr.msk.f32.gmra.mxu0 %vm50_vm0, %v16303_v24 }
  0x29   :  { %13670 = vmatprep.mubr.msk.f32.mxu0 %vm50_vm0, %v16155_v2 }
  0x2c   :  { %13671 = vmatmul.mubr.msk.f32.vlgmr.msra.gmra.mxu0 %vm50_vm0, %v16170_v5 }
  0x2d   :  { %13673 = vmatprep.mubr.msk.f32.mxu0 %vm50_vm0, %v16178_v7 }
  0x30   :  { %13674 = vmatmul.mubr.msk.f32.gmra.mxu0 %vm50_vm0, %v16193_v10 }
  0x31   :  { %13676 = vmatprep.mubr.msk.f32.mxu0 %vm50_vm0, %v16201_v12 }
  0x34   :  { %13677 = vmatmul.mubr.msk.f32.gmra.mxu0 %vm50_vm0, %v16213_v14 }
  0x35   :  { %13679 = vmatprep.mubr.msk.f32.mxu0 %vm50_vm0, %v16218_v15 }
  0x38   :  { %13680 = vmatmul.mubr.msk.f32.gmra.mxu0 %vm50_vm0, %v16231_v16 }
  0x39   :  { %13682 = vmatprep.mubr.msk.f32.mxu0 %vm50_vm0, %v16236_v17 }
  0x3c   :  { %13683 = vmatmul.mubr.msk.f32.gmra.mxu0 %vm50_vm0, %v16249_v18 }
  0x3d   :  { %13685 = vmatprep.mubr.msk.f32.mxu0 %vm50_vm0, %v16254_v19 }
  0x40   :  { %13686 = vmatmul.mubr.msk.f32.gmra.mxu0 %vm50_vm0, %v16267_v20 }
  0x41   :  { %13688 = vmatprep.mubr.msk.f32.mxu0 %vm50_vm0, %v16272_v21 }
  0x44   :  { %13689 = vmatmul.mubr.msk.f32.gmra.mxu0 %vm50_vm0, %v16285_v22 }
  0x45   :  { %13691 = vmatprep.mubr.msk.f32.mxu0 %vm50_vm0, %v16290_v23 }
  0x48   :  { %13692 = vmatmul.mubr.msk.f32.gmra.mxu0 %vm50_vm0, %v16303_v24 }
  0xca   :  { %v13640_v28 = vpop.f32.mrf.mxu1 }
  0xcc   :  { %v330_v29 = vpop.f32.mrf.mxu1  ;;  %v13608_v32 = vpop.f32.mrf.mxu0 }
  0xcd   :  { %v245_v57 = vmul.f32 0.5, %v13608_v32 }
  0xce   :  { %v13643_v30 = vpop.f32.mrf.mxu1  ;;  %v165_v34 = vpop.f32.mrf.mxu0 }
  0xcf   :  { %v244_v35 = vmul.f32 0.5, %v165_v34 }
  0xd0   :  { %v340_v31 = vpop.f32.mrf.mxu1  ;;  %v13611_v37 = vpop.f32.mrf.mxu0 }
  0xd1   :  { %13710 = vmatprep.mubr.msk.f32.mxu1 %vm558_vm1, %v244_v35  ;;  %v247_v60 = vmul.f32 0.5, %v13611_v37 }
  0xd2   :  { %v13646_v33 = vpop.f32.mrf.mxu1  ;;  %v175_v39 = vpop.f32.mrf.mxu0 }
  0xd3   :  { %v246_v56 = vmul.f32 0.5, %v175_v39 }
  0xd4   :  { %v350_v36 = vpop.f32.mrf.mxu1  ;;  %v13614_v41 = vpop.f32.mrf.mxu0 }
  0xd5   :  { %v249_v62 = vmul.f32 0.5, %v13614_v41 }
  0xd6   :  { %v13649_v38 = vpop.f32.mrf.mxu1  ;;  %v185_v43 = vpop.f32.mrf.mxu0 }
  0xd7   :  { %13694 = vmatprep.subr.msk.mxu1 %vm558_vm1, %v13649_v38  ;;  %v248_v59 = vmul.f32 0.5, %v185_v43 }
  0xd8   :  { %v360_v40 = vpop.f32.mrf.mxu1  ;;  %13695 = vmatpush3.xpose.msk.msra.mxu1 %vm558_vm1, %v13649_v38  ;;  %v13617_v45 = vpop.f32.mrf.mxu0 }
  0xd9   :  { %13696 = vmatprep.subr.msk.mxu1 %vm558_vm1, %v360_v40  ;;  %v251_v1 = vmul.f32 0.5, %v13617_v45 }
  0xda   :  { %v13652_v42 = vpop.f32.mrf.mxu1  ;;  %v195_v47 = vpop.f32.mrf.mxu0 }
  0xdb   :  { %v250_v63 = vmul.f32 0.5, %v195_v47 }
  0xdc   :  { %v370_v44 = vpop.f32.mrf.mxu1  ;;  %13697 = vmatpush3.xpose.msk.msra.mxu1 %vm558_vm1, %v360_v40  ;;  %v13620_v49 = vpop.f32.mrf.mxu0 }
  0xdd   :  { %13698 = vmatprep.subr.msk.mxu1 %vm558_vm1, %v13646_v33  ;;  %v253_v4 = vmul.f32 0.5, %v13620_v49 }
  0xde   :  { %v13655_v46 = vpop.f32.mrf.mxu1  ;;  %v205_v51 = vpop.f32.mrf.mxu0 }
  0xdf   :  { %v252_v52 = vmul.f32 0.5, %v205_v51 }
  0xe0   :  { %v380_v48 = vpop.f32.mrf.mxu1  ;;  %13699 = vmatpush3.xpose.msk.msra.mxu1 %vm558_vm1, %v13646_v33  ;;  %v13623_v58 = vpop.f32.mrf.mxu0 }
  0xe1   :  { %13700 = vmatprep.subr.msk.mxu1 %vm558_vm1, %v350_v36  ;;  %13766 = vmatprep.mubr.msk.f32.mxu0 %vm558_vm1, %v252_v52  ;;  %v255_v9 = vmul.f32 0.5, %v13623_v58 }
  0xe2   :  { %v13658_v50 = vpop.f32.mrf.mxu1  ;;  %v215_v61 = vpop.f32.mrf.mxu0 }
  0xe3   :  { %v254_v6 = vmul.f32 0.5, %v215_v61 }
  0xe4   :  { %v390_v53 = vpop.f32.mrf.mxu1  ;;  %13701 = vmatpush3.xpose.msk.msra.mxu1 %vm558_vm1, %v350_v36  ;;  %v13626_v0 = vpop.f32.mrf.mxu0 }
  0xe5   :  { %13702 = vmatprep.subr.msk.mxu1 %vm558_vm1, %v13643_v30  ;;  %v257_v25 = vmul.f32 0.5, %v13626_v0 }
  0xe6   :  { %v13661_v54 = vpop.f32.mrf.mxu1  ;;  %v225_v3 = vpop.f32.mrf.mxu0 }
  0xe7   :  { %13750 = vmatprep.subr.msk.mxu0 %vm558_vm1, %v13661_v54  ;;  %v256_v11 = vmul.f32 0.5, %v225_v3 }
  0xe8   :  { %13703 = vmatpush3.xpose.msk.msra.mxu1 %vm558_vm1, %v13643_v30  ;;  %13751 = vmatpush3.xpose.msk.msra.mxu0 %vm558_vm1, %v13661_v54  ;;  %v400_v55 = vpop.f32.mrf.mxu1  ;;  %v13629_v8 = vpop.f32.mrf.mxu0 }
  0xe9   :  { %13704 = vmatprep.subr.msk.mxu1 %vm558_vm1, %v340_v31  ;;  %13752 = vmatprep.subr.msk.mxu0 %vm558_vm1, %v400_v55  ;;  %v259_v27 = vmul.f32 0.5, %v13629_v8 }
  0xea   :  { %v235_v13 = vpop.f32.mrf.mxu0 }
  0xeb   :  { %v258_v26 = vmul.f32 0.5, %v235_v13 }
  0xec   :  { %13705 = vmatpush3.xpose.msk.msra.mxu1 %vm558_vm1, %v340_v31  ;;  %13753 = vmatpush3.xpose.msk.msra.mxu0 %vm558_vm1, %v400_v55 }
  0xed   :  { %13706 = vmatprep.subr.msk.mxu1 %vm558_vm1, %v13640_v28  ;;  %13754 = vmatprep.subr.msk.mxu0 %vm558_vm1, %v13658_v50 }
  0xf0   :  { %13707 = vmatpush3.xpose.msk.msra.mxu1 %vm558_vm1, %v13640_v28  ;;  %13755 = vmatpush3.xpose.msk.msra.mxu0 %vm558_vm1, %v13658_v50  ;;  %v13672_v28 = vpop.f32.mrf.mxu0 }
  0xf1   :  { %13708 = vmatprep.subr.msk.mxu1 %vm558_vm1, %v330_v29  ;;  %13756 = vmatprep.subr.msk.mxu0 %vm558_vm1, %v390_v53 }
  0xf4   :  { %13709 = vmatpush3.xpose.msk.msra.mxu1 %vm558_vm1, %v330_v29  ;;  %13757 = vmatpush3.xpose.msk.msra.mxu0 %vm558_vm1, %v390_v53  ;;  %v479_v29 = vpop.f32.mrf.mxu0 }
  0xf5   :  { %13758 = vmatprep.subr.msk.mxu0 %vm558_vm1, %v13655_v46 }
  0xf6   :  { %v13675_v30 = vpop.f32.mrf.mxu0 }
  0xf7   :  { %13711 = vmatmul.mubr.msk.f32.vlgmr.msra.gmra.mxu1 %vm558_vm1, %v245_v57 }
  0xf8   :  { %13759 = vmatpush3.xpose.msk.msra.mxu0 %vm558_vm1, %v13655_v46  ;;  %13713 = vmatprep.mubr.msk.f32.mxu1 %vm558_vm1, %v246_v56  ;;  %v489_v31 = vpop.f32.mrf.mxu0 }
  0xf9   :  { %13760 = vmatprep.subr.msk.mxu0 %vm558_vm1, %v380_v48 }
  0xfa   :  { %v13678_v32 = vpop.f32.mrf.mxu0 }
  0xfb   :  { %13714 = vmatmul.mubr.msk.f32.gmra.mxu1 %vm558_vm1, %v247_v60 }
  0xfc   :  { %13761 = vmatpush3.xpose.msk.msra.mxu0 %vm558_vm1, %v380_v48  ;;  %13716 = vmatprep.mubr.msk.f32.mxu1 %vm558_vm1, %v248_v59  ;;  %v499_v33 = vpop.f32.mrf.mxu0 }
  0xfd   :  { %13762 = vmatprep.subr.msk.mxu0 %vm558_vm1, %v13652_v42 }
  0xfe   :  { %v13681_v34 = vpop.f32.mrf.mxu0 }
  0xff   :  { %13717 = vmatmul.mubr.msk.f32.gmra.mxu1 %vm558_vm1, %v249_v62  ;;  %13722 = vmatprep.subr.mxu1 %v13681_v34 }
 0x100   :  { %13763 = vmatpush3.xpose.msk.msra.mxu0 %vm558_vm1, %v13652_v42  ;;  %13719 = vmatprep.mubr.msk.f32.mxu1 %vm558_vm1, %v250_v63  ;;  %v509_v35 = vpop.f32.mrf.mxu0 }
 0x101   :  { %13764 = vmatprep.subr.msk.mxu0 %vm558_vm1, %v370_v44  ;;  %13723 = vmatpush3.msra.mxu1 %v13681_v34 }
 0x102   :  { %13724 = vmatprep.subr.mxu1 %v509_v35  ;;  %v16406_v36 = vpop.f32.mrf.mxu0 }
 0x103   :  { %13720 = vmatmul.mubr.msk.f32.gmra.mxu1 %vm558_vm1, %v251_v1 }
 0x104   :  { %13765 = vmatpush3.xpose.msk.msra.mxu0 %vm558_vm1, %v370_v44  ;;  %13725 = vmatpush3.msra.mxu1 %v509_v35  ;;  %v16408_v37 = vpop.f32.mrf.mxu0 }
 0x105   :  { %13726 = vmatprep.subr.mxu1 %v13678_v32 }
 0x106   :  { %13727 = vmatpush3.msra.mxu1 %v13678_v32  ;;  %v16410_v38 = vpop.f32.mrf.mxu0 }
 0x107   :  { %13767 = vmatmul.mubr.msk.f32.vlgmr.msra.gmra.mxu0 %vm558_vm1, %v253_v4  ;;  %13728 = vmatprep.subr.mxu1 %v499_v33 }
 0x108   :  { %13769 = vmatprep.mubr.msk.f32.mxu0 %vm558_vm1, %v254_v6  ;;  %13729 = vmatpush3.msra.mxu1 %v499_v33  ;;  %v16412_v39 = vpop.f32.mrf.mxu0 }
 0x109   :  { %13730 = vmatprep.subr.mxu1 %v13675_v30 }
 0x10a   :  { %13731 = vmatpush3.msra.mxu1 %v13675_v30  ;;  %v16414_v40 = vpop.f32.mrf.mxu0 }
 0x10b   :  { %13770 = vmatmul.mubr.msk.f32.gmra.mxu0 %vm558_vm1, %v255_v9  ;;  %13732 = vmatprep.subr.mxu1 %v489_v31 }
 0x10c   :  { %13772 = vmatprep.mubr.msk.f32.mxu0 %vm558_vm1, %v256_v11  ;;  %13733 = vmatpush3.msra.mxu1 %v489_v31  ;;  %v16416_v41 = vpop.f32.mrf.mxu0 }
 0x10d   :  { %13734 = vmatprep.subr.mxu1 %v13672_v28 }
 0x10e   :  { %13735 = vmatpush3.msra.mxu1 %v13672_v28  ;;  %v16418_v42 = vpop.f32.mrf.mxu0 }
 0x10f   :  { %13773 = vmatmul.mubr.msk.f32.gmra.mxu0 %vm558_vm1, %v257_v25  ;;  %13736 = vmatprep.subr.mxu1 %v479_v29 }
 0x110   :  { %13775 = vmatprep.mubr.msk.f32.mxu0 %vm558_vm1, %v258_v26  ;;  %13737 = vmatpush3.msra.mxu1 %v479_v29  ;;  %v16422_v43 = vpop.f32.mrf.mxu0 }
 0x111   :  { %13778 = vmatprep.subr.mxu0 %v16418_v42  ;;  %15470 = vmatprep.subr.mxu1 %v16418_v42 }
 0x112   :  { %13779 = vmatpush3.msra.mxu0 %v16418_v42 }
 0x113   :  { %13776 = vmatmul.mubr.msk.f32.gmra.mxu0 %vm558_vm1, %v259_v27  ;;  %13780 = vmatprep.subr.mxu0 %v16422_v43 }
 0x114   :  { %13781 = vmatpush3.msra.mxu0 %v16422_v43 }
 0x115   :  { %13782 = vmatprep.subr.mxu0 %v16414_v40 }
 0x116   :  { %13783 = vmatpush3.msra.mxu0 %v16414_v40 }
 0x117   :  { %13784 = vmatprep.subr.mxu0 %v16416_v41 }
 0x118   :  { %13785 = vmatpush3.msra.mxu0 %v16416_v41 }
 0x119   :  { %13786 = vmatprep.subr.mxu0 %v16410_v38 }
 0x11a   :  { %13787 = vmatpush3.msra.mxu0 %v16410_v38 }
 0x11b   :  { %13788 = vmatprep.subr.mxu0 %v16412_v39 }
 0x11c   :  { %13789 = vmatpush3.msra.mxu0 %v16412_v39 }
 0x11d   :  { %13790 = vmatprep.subr.mxu0 %v16406_v36 }
 0x11e   :  { %13791 = vmatpush3.msra.mxu0 %v16406_v36 }
 0x11f   :  { %13792 = vmatprep.subr.mxu0 %v16408_v37 }
 0x120   :  { %13793 = vmatpush3.msra.mxu0 %v16408_v37 }
 0x1b7   :  { %v13712_v44 = vpop.f32.mrf.mxu1 }
 0x1b8   :  { %v716_v49 = vsel %vm712_vm2, %v13712_v44, -inf }
 0x1b9   :  { %v673_v45 = vpop.f32.mrf.mxu1 }
 0x1ba   :  { %v713_v46 = vsel %vm712_vm2, %v673_v45, -inf }
 0x1bb   :  { %714 = vmax.xlane.f32.xlu0 %v713_v46  ;;  %v13715_v47 = vpop.f32.mrf.mxu1 }
 0x1bc   :  { %v722_v53 = vsel %vm712_vm2, %v13715_v47, -inf }
 0x1bd   :  { %v683_v48 = vpop.f32.mrf.mxu1 }
 0x1be   :  { %v719_v50 = vsel %vm712_vm2, %v683_v48, -inf }
 0x1bf   :  { %717 = vmax.xlane.f32.xlu0 %v716_v49  ;;  %720 = vmax.xlane.f32.xlu1 %v719_v50  ;;  %v13718_v51 = vpop.f32.mrf.mxu1 }
 0x1c0   :  { %v728_v57 = vsel %vm712_vm2, %v13718_v51, -inf }
 0x1c1   :  { %v693_v52 = vpop.f32.mrf.mxu1 }
 0x1c2   :  { %v725_v54 = vsel %vm712_vm2, %v693_v52, -inf }
 0x1c3   :  { %723 = vmax.xlane.f32.xlu1 %v722_v53  ;;  %726 = vmax.xlane.f32.xlu0 %v725_v54  ;;  %v16444_v55 = vpop.f32.mrf.mxu1 }
 0x1c4   :  { %v734_v61 = vsel %vm712_vm2, %v16444_v55, -inf }
 0x1c5   :  { %v703_v56 = vpop.f32.mrf.mxu1 }
 0x1c6   :  { %v731_v58 = vsel %vm712_vm2, %v703_v56, -inf }
 0x1c7   :  { %729 = vmax.xlane.f32.xlu1 %v728_v57  ;;  %732 = vmax.xlane.f32.xlu0 %v731_v58  ;;  %v16448_v59 = vpop.f32.mrf.mxu0 }
 0x1c8   :  { %v1086_v1 = vsel %vm712_vm2, %v16448_v59, -inf }
 0x1c9   :  { %v1044_v60 = vpop.f32.mrf.mxu0 }
 0x1ca   :  { %v1083_v62 = vsel %vm712_vm2, %v1044_v60, -inf }
 0x1cb   :  { %735 = vmax.xlane.f32.xlu1 %v734_v61  ;;  %1084 = vmax.xlane.f32.xlu0 %v1083_v62  ;;  %v16453_v63 = vpop.f32.mrf.mxu0 }
 0x1cc   :  { %v1092_v8 = vsel %vm712_vm2, %v16453_v63, -inf }
 0x1cd   :  { %v16455_v0 = vpop.f32.mrf.mxu0 }
 0x1ce   :  { %v1089_v3 = vsel %vm712_vm2, %v16455_v0, -inf }
 0x1cf   :  { %1087 = vmax.xlane.f32.xlu1 %v1086_v1  ;;  %1090 = vmax.xlane.f32.xlu0 %v1089_v3  ;;  %v16461_v4 = vpop.f32.mrf.mxu0 }
 0x1d0   :  { %v1098_v25 = vsel %vm712_vm2, %v16461_v4, -inf }
 0x1d1   :  { %v16463_v6 = vpop.f32.mrf.mxu0 }
 0x1d2   :  { %v1095_v9 = vsel %vm712_vm2, %v16463_v6, -inf }
 0x1d3   :  { %1093 = vmax.xlane.f32.xlu1 %v1092_v8  ;;  %1096 = vmax.xlane.f32.xlu0 %v1095_v9  ;;  %v16469_v11 = vpop.f32.mrf.mxu0 }
 0x1d4   :  { %v1104_v27 = vsel %vm712_vm2, %v16469_v11, -inf }
 0x1d5   :  { %v16471_v13 = vpop.f32.mrf.mxu0 }
 0x1d6   :  { %v1101_v26 = vsel %vm712_vm2, %v16471_v13, -inf }
 0x1d7   :  { %1099 = vmax.xlane.f32.xlu1 %v1098_v25  ;;  %1102 = vmax.xlane.f32.xlu0 %v1101_v26 }
 0x1db   :  { %1105 = vmax.xlane.f32.xlu1 %v1104_v27 }
 0x244   :  { %v715_v28 = vpop.xlane.xlu0 %714 }
 0x245   :  { %v737_v29 = vsub.f32 %v673_v45, %v715_v28 }
 0x247   :  { %v745_v30 = vmul.f32 1.442695, %v737_v29 }
 0x248   :  { %v718_v31 = vpop.xlane.xlu0 %717  ;;  %v721_v32 = vpop.xlane.xlu1 %720 }
 0x249   :  { %15486 = vpow2.f32 %v745_v30  ;;  %v738_v33 = vsub.f32 %v13712_v44, %v718_v31  ;;  %v739_v34 = vsub.f32 %v683_v48, %v721_v32 }
 0x24b   :  { %v747_v35 = vmul.f32 1.442695, %v738_v33  ;;  %v749_v46 = vmul.f32 1.442695, %v739_v34 }
 0x24c   :  { %v724_v49 = vpop.xlane.xlu1 %723  ;;  %v727_v50 = vpop.xlane.xlu0 %726 }
 0x24d   :  { %15488 = vpow2.f32 %v747_v35  ;;  %v740_v53 = vsub.f32 %v13715_v47, %v724_v49  ;;  %v741_v54 = vsub.f32 %v693_v52, %v727_v50 }
 0x24e   :  { %15490 = vpow2.f32 %v749_v46 }
 0x24f   :  { %v751_v57 = vmul.f32 1.442695, %v740_v53  ;;  %v753_v58 = vmul.f32 1.442695, %v741_v54 }
 0x250   :  { %v730_v61 = vpop.xlane.xlu1 %729  ;;  %v733_v62 = vpop.xlane.xlu0 %732 }
 0x251   :  { %15492 = vpow2.f32 %v751_v57  ;;  %v742_v45 = vsub.f32 %v13718_v51, %v730_v61  ;;  %v743_v1 = vsub.f32 %v703_v56, %v733_v62 }
 0x252   :  { %15494 = vpow2.f32 %v753_v58 }
 0x253   :  { %v755_v3 = vmul.f32 1.442695, %v742_v45  ;;  %v757_v8 = vmul.f32 1.442695, %v743_v1 }
 0x254   :  { %v736_v44 = vpop.xlane.xlu1 %735  ;;  %v1085_v48 = vpop.xlane.xlu0 %1084 }
 0x255   :  { %15496 = vpow2.f32 %v755_v3  ;;  %v744_v9 = vsub.f32 %v16444_v55, %v736_v44  ;;  %v1107_v25 = vsub.f32 %v1044_v60, %v1085_v48 }
 0x256   :  { %v15487_v26 = vpop.eup %15486  ;;  %15498 = vpow2.f32 %v757_v8 }
 0x257   :  { %v759_v47 = vmul.f32 1.442695, %v744_v9  ;;  %v1115_v52 = vmul.f32 1.442695, %v1107_v25  ;;  %13738 = vmatprep.mubr.msk.f32.mxu1 %vm712_vm2, %v15487_v26  ;;  %v761_v27 = vsel %vm712_vm2, %v15487_v26, 0.0 }
 0x258   :  { %v1088_v28 = vpop.xlane.xlu1 %1087  ;;  %v1091_v51 = vpop.xlane.xlu0 %1090  ;;  %762 = vadd.xlane.f32.xlu0 %v761_v27 }
 0x259   :  { %15500 = vpow2.f32 %v759_v47  ;;  %v1108_v56 = vsub.f32 %v16448_v59, %v1088_v28  ;;  %v1109_v29 = vsub.f32 %v16455_v0, %v1091_v51 }
 0x25a   :  { %v15489_v30 = vpop.eup %15488  ;;  %15502 = vpow2.f32 %v1115_v52 }
 0x25b   :  { %v15491_v55 = vpop.eup %15490  ;;  %v1117_v60 = vmul.f32 1.442695, %v1108_v56  ;;  %v1119_v31 = vmul.f32 1.442695, %v1109_v29  ;;  %13739 = vmatmul.mubr.msk.f32.vlgmr.msra.gmra.mxu1 %vm712_vm2, %v15489_v30  ;;  %v764_v32 = vsel %vm712_vm2, %v15489_v30, 0.0  ;;  %v16544_v30 = vld [vmem:[%s19828_s2 + $0x38] sm:$0xff] }
 0x25c   :  { %15478 = vmatpush3.msra.mxu1 %v16418_v42  ;;  %13741 = vmatprep.mubr.msk.f32.mxu1 %vm712_vm2, %v15491_v55  ;;  %v1094_v33 = vpop.xlane.xlu1 %1093  ;;  %v1097_v34 = vpop.xlane.xlu0 %1096  ;;  %v767_v35 = vsel %vm712_vm2, %v15491_v55, 0.0  ;;  %v1300_v29 = vld [vmem:[%s19832_s4] sm:$0xf]  ;;  %v11591_v55 = vld [vmem:[%s19830_s1 + $0x38] sm:$0xff] }
 0x25d   :  { %15504 = vpow2.f32 %v1117_v60  ;;  %15471 = vmatprep.subr.mxu1 %v16422_v43  ;;  %v1110_v59 = vsub.f32 %v16453_v63, %v1094_v33  ;;  %v1111_v0 = vsub.f32 %v16463_v6, %v1097_v34  ;;  %765 = vadd.xlane.f32.xlu1 %v764_v32  ;;  %v11590_v60 = vld [vmem:[%s19830_s1 + $0x30] sm:$0xff]  ;;  %v11588_v32 = vld [vmem:[%s19830_s1 + $0x20] sm:$0xff] }
 0x25e   :  { %v15493_v46 = vpop.eup %15492  ;;  %15506 = vpow2.f32 %v1119_v31  ;;  %768 = vadd.xlane.f32.xlu0 %v767_v35  ;;  %15479 = vmatpush3.msra.mxu1 %v16422_v43  ;;  %v11589_v31 = vld [vmem:[%s19830_s1 + $0x28] sm:$0xff] }
 0x25f   :  { %v15495_v42 = vpop.eup %15494  ;;  %v1121_v49 = vmul.f32 1.442695, %v1110_v59  ;;  %v1123_v50 = vmul.f32 1.442695, %v1111_v0  ;;  %15472 = vmatprep.subr.mxu1 %v16414_v40  ;;  %13742 = vmatmul.mubr.msk.f32.gmra.mxu1 %vm712_vm2, %v15493_v46  ;;  %v770_v53 = vsel %vm712_vm2, %v15493_v46, 0.0  ;;  %v11610_v59 = vld [vmem:[%s19828_s2 + $0x30] sm:$0xff] }
 0x260   :  { %15480 = vmatpush3.msra.mxu1 %v16414_v40  ;;  %13744 = vmatprep.mubr.msk.f32.mxu1 %vm712_vm2, %v15495_v42  ;;  %v1100_v63 = vpop.xlane.xlu1 %1099  ;;  %v773_v6 = vsel %vm712_vm2, %v15495_v42, 0.0  ;;  %v1103_v54 = vpop.xlane.xlu0 %1102 }
 0x261   :  { %15508 = vpow2.f32 %v1121_v49  ;;  %15473 = vmatprep.subr.mxu1 %v16416_v41  ;;  %v1112_v43 = vsub.f32 %v16461_v4, %v1100_v63  ;;  %771 = vadd.xlane.f32.xlu1 %v770_v53  ;;  %v1113_v57 = vsub.f32 %v16471_v13, %v1103_v54 }
 0x262   :  { %v15497_v58 = vpop.eup %15496  ;;  %15510 = vpow2.f32 %v1123_v50  ;;  %774 = vadd.xlane.f32.xlu0 %v773_v6  ;;  %15481 = vmatpush3.msra.mxu1 %v16416_v41  ;;  %v11609_v50 = vld [vmem:[%s19828_s2 + $0x28] sm:$0xff] }
 0x263   :  { %v15499_v40 = vpop.eup %15498  ;;  %v1125_v61 = vmul.f32 1.442695, %v1112_v43  ;;  %v1127_v62 = vmul.f32 1.442695, %v1113_v57  ;;  %15474 = vmatprep.subr.mxu1 %v16410_v38  ;;  %13745 = vmatmul.mubr.msk.f32.gmra.mxu1 %vm712_vm2, %v15497_v58  ;;  %v776_v45 = vsel %vm712_vm2, %v15497_v58, 0.0  ;;  %v11608_v43 = vld [vmem:[%s19828_s2 + $0x20] sm:$0xff] }
 0x264   :  { %15482 = vmatpush3.msra.mxu1 %v16410_v38  ;;  %13747 = vmatprep.mubr.msk.f32.mxu1 %vm712_vm2, %v15499_v40  ;;  %v1106_v4 = vpop.xlane.xlu1 %1105  ;;  %v779_v13 = vsel %vm712_vm2, %v15499_v40, 0.0 }
 0x265   :  { %15512 = vpow2.f32 %v1125_v61  ;;  %15475 = vmatprep.subr.mxu1 %v16412_v39  ;;  %777 = vadd.xlane.f32.xlu1 %v776_v45  ;;  %v1114_v41 = vsub.f32 %v16469_v11, %v1106_v4 }
 0x266   :  { %v15501_v1 = vpop.eup %15500  ;;  %15514 = vpow2.f32 %v1127_v62  ;;  %780 = vadd.xlane.f32.xlu0 %v779_v13  ;;  %15483 = vmatpush3.msra.mxu1 %v16412_v39 }
 0x267   :  { %v15503_v3 = vpop.eup %15502  ;;  %v1129_v8 = vmul.f32 1.442695, %v1114_v41  ;;  %15476 = vmatprep.subr.mxu1 %v16406_v36  ;;  %13748 = vmatmul.mubr.msk.f32.gmra.mxu1 %vm712_vm2, %v15501_v1  ;;  %v782_v38 = vsel %vm712_vm2, %v15501_v1, 0.0 }
 0x268   :  { %15484 = vmatpush3.msra.mxu1 %v16406_v36  ;;  %13794 = vmatprep.mubr.msk.f32.mxu0 %vm712_vm2, %v15503_v3  ;;  %v1131_v44 = vsel %vm712_vm2, %v15503_v3, 0.0 }
 0x269   :  { %15516 = vpow2.f32 %v1129_v8  ;;  %15477 = vmatprep.subr.mxu1 %v16408_v37  ;;  %783 = vadd.xlane.f32.xlu1 %v782_v38 }
 0x26a   :  { %v15505_v11 = vpop.eup %15504  ;;  %1132 = vadd.xlane.f32.xlu0 %v1131_v44  ;;  %15485 = vmatpush3.msra.mxu1 %v16408_v37 }
 0x26b   :  { %v15507_v39 = vpop.eup %15506  ;;  %13795 = vmatmul.mubr.msk.f32.vlgmr.msra.gmra.mxu0 %vm712_vm2, %v15505_v11  ;;  %v1134_v48 = vsel %vm712_vm2, %v15505_v11, 0.0  ;;  %13806 = vmatprep.subr.msk.mxu0 %vm1349_vm3, %v1300_v29 }
 0x26c   :  { %13797 = vmatprep.mubr.msk.f32.mxu0 %vm712_vm2, %v15507_v39  ;;  %v1137_v36 = vsel %vm712_vm2, %v15507_v39, 0.0  ;;  %13807 = vmatpush3.msk.msra.mxu0 %vm1349_vm3, %v1300_v29 }
 0x26d   :  { %1135 = vadd.xlane.f32.xlu1 %v1134_v48  ;;  %13864 = vmatprep.subr.mxu0 %v16544_v30 }
 0x26e   :  { %v15509_v9 = vpop.eup %15508  ;;  %1138 = vadd.xlane.f32.xlu0 %v1137_v36  ;;  %13832 = vmatprep.subr.mxu1 %v11591_v55 }
 0x26f   :  { %v15511_v25 = vpop.eup %15510  ;;  %13798 = vmatmul.mubr.msk.f32.gmra.mxu0 %vm712_vm2, %v15509_v9  ;;  %v1140_v26 = vsel %vm712_vm2, %v15509_v9, 0.0 }
 0x270   :  { %13800 = vmatprep.mubr.msk.f32.mxu1 %vm712_vm2, %v15511_v25  ;;  %v1143_v37 = vsel %vm712_vm2, %v15511_v25, 0.0 }
 0x271   :  { %1141 = vadd.xlane.f32.xlu1 %v1140_v26 }
 0x272   :  { %v15513_v47 = vpop.eup %15512  ;;  %1144 = vadd.xlane.f32.xlu0 %v1143_v37 }
 0x273   :  { %v15515_v52 = vpop.eup %15514  ;;  %13801 = vmatmul.mubr.msk.f32.vlgmr.msra.gmra.mxu1 %vm712_vm2, %v15513_v47  ;;  %v1146_v27 = vsel %vm712_vm2, %v15513_v47, 0.0 }
 0x274   :  { %13803 = vmatprep.mubr.msk.f32.mxu1 %vm712_vm2, %v15515_v52  ;;  %v1149_v28 = vsel %vm712_vm2, %v15515_v52, 0.0  ;;  %13833 = vmatpush3.msra.mxu1 %v11591_v55 }
 0x275   :  { %1147 = vadd.xlane.f32.xlu1 %v1146_v27  ;;  %13834 = vmatprep.subr.mxu1 %v11590_v60 }
 0x276   :  { %v15517_v51 = vpop.eup %15516  ;;  %1150 = vadd.xlane.f32.xlu0 %v1149_v28  ;;  %13835 = vmatpush3.msra.mxu1 %v11590_v60 }
 0x277   :  { %13804 = vmatmul.mubr.msk.f32.gmra.mxu1 %vm712_vm2, %v15517_v51  ;;  %v1152_v56 = vsel %vm712_vm2, %v15517_v51, 0.0  ;;  %13836 = vmatprep.subr.mxu1 %v11589_v31 }
 0x278   :  { %13840 = vmatprep.mubr.msk.f32.mxu1 %vm50_vm0, %v16155_v2  ;;  %13837 = vmatpush3.msra.mxu1 %v11589_v31 }
 0x279   :  { %1153 = vadd.xlane.f32.xlu1 %v1152_v56  ;;  %13838 = vmatprep.subr.mxu1 %v11588_v32 }
 0x27a   :  { %13839 = vmatpush3.msra.mxu1 %v11588_v32 }
 0x27b   :  { %13841 = vmatmul.mubr.msk.f32.vlgmr.msra.gmra.mxu1 %vm50_vm0, %v16170_v5 }
 0x27c   :  { %13843 = vmatprep.mubr.msk.f32.mxu1 %vm50_vm0, %v16178_v7 }
 0x27f   :  { %13844 = vmatmul.mubr.msk.f32.gmra.mxu1 %vm50_vm0, %v16193_v10 }
 0x280   :  { %13846 = vmatprep.mubr.msk.f32.mxu1 %vm50_vm0, %v16201_v12 }
 0x283   :  { %13847 = vmatmul.mubr.msk.f32.gmra.mxu1 %vm50_vm0, %v16213_v14 }
 0x284   :  { %13849 = vmatprep.mubr.msk.f32.mxu1 %vm50_vm0, %v16218_v15 }
 0x287   :  { %13850 = vmatmul.mubr.msk.f32.gmra.mxu1 %vm50_vm0, %v16231_v16 }
 0x288   :  { %13852 = vmatprep.mubr.msk.f32.mxu1 %vm50_vm0, %v16236_v17 }
 0x28b   :  { %13853 = vmatmul.mubr.msk.f32.gmra.mxu1 %vm50_vm0, %v16249_v18 }
 0x28c   :  { %13855 = vmatprep.mubr.msk.f32.mxu1 %vm50_vm0, %v16254_v19 }
 0x28f   :  { %13856 = vmatmul.mubr.msk.f32.gmra.mxu1 %vm50_vm0, %v16267_v20 }
 0x290   :  { %13858 = vmatprep.mubr.msk.f32.mxu1 %vm50_vm0, %v16272_v21 }
 0x293   :  { %13859 = vmatmul.mubr.msk.f32.gmra.mxu1 %vm50_vm0, %v16285_v22 }
 0x294   :  { %13861 = vmatprep.mubr.msk.f32.mxu1 %vm50_vm0, %v16290_v23 }
 0x297   :  { %13862 = vmatmul.mubr.msk.f32.gmra.mxu1 %vm50_vm0, %v16303_v24 }
 0x298   :  { %13904 = vmatprep.mubr.msk.f32.mxu1 %vm50_vm0, %v16155_v2 }
 0x2e1   :  { %v763_v5 = vpop.xlane.xlu0 %762 }
 0x2e2   :  { %15518 = vrcp.f32 %v763_v5 }
 0x2e6   :  { %v766_v7 = vpop.xlane.xlu1 %765 }
 0x2e7   :  { %v769_v10 = vpop.xlane.xlu0 %768  ;;  %15520 = vrcp.f32 %v766_v7 }
 0x2e8   :  { %15522 = vrcp.f32 %v769_v10 }
 0x2ea   :  { %v772_v12 = vpop.xlane.xlu1 %771 }
 0x2eb   :  { %v775_v14 = vpop.xlane.xlu0 %774  ;;  %15524 = vrcp.f32 %v772_v12  ;;  %v16620_v12 = vld [vmem:[%s19829_s0] sm:$0xff] }
 0x2ec   :  { %15526 = vrcp.f32 %v775_v14  ;;  %v16627_v14 = vld [vmem:[%s19829_s0 + $0x8] sm:$0xff] }
 0x2ee   :  { %v778_v15 = vpop.xlane.xlu1 %777 }
 0x2ef   :  { %v781_v16 = vpop.xlane.xlu0 %780  ;;  %15528 = vrcp.f32 %v778_v15  ;;  %v15519_v21 = vpop.eup %15518  ;;  %v16634_v15 = vld [vmem:[%s19829_s0 + $0x10] sm:$0xff] }
 0x2f0   :  { %15530 = vrcp.f32 %v781_v16  ;;  %v16641_v16 = vld [vmem:[%s19829_s0 + $0x18] sm:$0xff] }
 0x2f2   :  { %v784_v17 = vpop.xlane.xlu1 %783 }
 0x2f3   :  { %v1133_v18 = vpop.xlane.xlu0 %1132  ;;  %15532 = vrcp.f32 %v784_v17  ;;  %v16648_v17 = vld [vmem:[%s19829_s0 + $0x20] sm:$0xff] }
 0x2f4   :  { %v15521_v23 = vpop.eup %15520  ;;  %15534 = vrcp.f32 %v1133_v18  ;;  %v16655_v18 = vld [vmem:[%s19829_s0 + $0x28] sm:$0xff] }
 0x2f5   :  { %v15523_v0 = vpop.eup %15522 }
 0x2f6   :  { %v1136_v19 = vpop.xlane.xlu1 %1135 }
 0x2f7   :  { %v1139_v2 = vpop.xlane.xlu0 %1138  ;;  %15536 = vrcp.f32 %v1136_v19  ;;  %v16662_v19 = vld [vmem:[%s19829_s0 + $0x30] sm:$0xff] }
 0x2f8   :  { %v15525_v42 = vpop.eup %15524  ;;  %15538 = vrcp.f32 %v1139_v2  ;;  %v16683_v2 = vld [vmem:[%s19829_s0 + $0x48] sm:$0xff] }
 0x2f9   :  { %v15527_v57 = vpop.eup %15526 }
 0x2fa   :  { %v1142_v24 = vpop.xlane.xlu1 %1141 }
 0x2fb   :  { %v1145_v53 = vpop.xlane.xlu0 %1144  ;;  %15540 = vrcp.f32 %v1142_v24  ;;  %v16704_v24 = vld [vmem:[%s19829_s0 + $0x60] sm:$0xff] }
 0x2fc   :  { %v15529_v40 = vpop.eup %15528  ;;  %15542 = vrcp.f32 %v1145_v53  ;;  %v11628_v53 = vld [vmem:[%s19831_s3 + $0x20] sm:$0xff] }
 0x2fd   :  { %v15531_v4 = vpop.eup %15530 }
 0x2fe   :  { %v1148_v54 = vpop.xlane.xlu1 %1147 }
 0x2ff   :  { %15544 = vrcp.f32 %v1148_v54  ;;  %v1151_v13 = vpop.xlane.xlu0 %1150 }
 0x300   :  { %v15533_v1 = vpop.eup %15532  ;;  %15546 = vrcp.f32 %v1151_v13 }
 0x301   :  { %v15535_v11 = vpop.eup %15534 }
 0x302   :  { %v1154_v3 = vpop.xlane.xlu1 %1153 }
 0x303   :  { %15548 = vrcp.f32 %v1154_v3 }
 0x304   :  { %v15537_v48 = vpop.eup %15536 }
 0x305   :  { %v15539_v26 = vpop.eup %15538 }
 0x308   :  { %v15541_v47 = vpop.eup %15540 }
 0x309   :  { %v15543_v51 = vpop.eup %15542 }
 0x30c   :  { %v15545_v29 = vpop.eup %15544 }
 0x30d   :  { %v15547_v31 = vpop.eup %15546 }
 0x310   :  { %v15549_v5 = vpop.eup %15548 }
 0x31b   :  { %v13740_v20 = vpop.f32.mrf.mxu1 }
 0x31c   :  { %v923_v34 = vmul.f32 %v15521_v23, %v13740_v20  ;;  %v16669_v20 = vld [vmem:[%s19829_s0 + $0x38] sm:$0xff] }
 0x31d   :  { %v875_v22 = vpop.f32.mrf.mxu1  ;;  %v16697_v23 = vld [vmem:[%s19829_s0 + $0x58] sm:$0xff] }
 0x31e   :  { %v922_v33 = vmul.f32 %v15519_v21, %v875_v22  ;;  %v16676_v21 = vld [vmem:[%s19829_s0 + $0x40] sm:$0xff]  ;;  %v16690_v22 = vld [vmem:[%s19829_s0 + $0x50] sm:$0xff] }
 0x31f   :  { %v13743_v35 = vpop.f32.mrf.mxu1 }
 0x320   :  { %13808 = vmatprep.mubr.msk.f32.mxu0 %vm558_vm1, %v922_v33  ;;  %v925_v63 = vmul.f32 %v15525_v42, %v13743_v35  ;;  %v16711_v33 = vld [vmem:[%s19829_s0 + $0x68] sm:$0xff]  ;;  %v16725_v35 = vld [vmem:[%s19829_s0 + $0x78] sm:$0xff] }
 0x321   :  { %v885_v46 = vpop.f32.mrf.mxu1  ;;  %13809 = vmatmul.mubr.msk.f32.vlgmr.msra.gmra.mxu0 %vm558_vm1, %v923_v34  ;;  %v16718_v34 = vld [vmem:[%s19829_s0 + $0x70] sm:$0xff]  ;;  %v11631_v42 = vld [vmem:[%s19831_s3 + $0x38] sm:$0xff] }
 0x322   :  { %v924_v49 = vmul.f32 %v15523_v0, %v885_v46  ;;  %13865 = vmatpush3.msra.mxu0 %v16544_v30  ;;  %13896 = vmatprep.subr.mxu1 %v11631_v42 }
 0x323   :  { %v13746_v6 = vpop.f32.mrf.mxu1  ;;  %13866 = vmatprep.subr.mxu0 %v11610_v59  ;;  %13897 = vmatpush3.msra.mxu1 %v11631_v42 }
 0x324   :  { %13811 = vmatprep.mubr.msk.f32.mxu0 %vm558_vm1, %v924_v49  ;;  %13867 = vmatpush3.msra.mxu0 %v11610_v59  ;;  %v927_v62 = vmul.f32 %v15529_v40, %v13746_v6  ;;  %v11630_v49 = vld [vmem:[%s19831_s3 + $0x30] sm:$0xff] }
 0x325   :  { %v895_v58 = vpop.f32.mrf.mxu1  ;;  %13812 = vmatmul.mubr.msk.f32.gmra.mxu0 %vm558_vm1, %v925_v63  ;;  %13868 = vmatprep.subr.mxu0 %v11609_v50 }
 0x326   :  { %v926_v61 = vmul.f32 %v15527_v57, %v895_v58  ;;  %13869 = vmatpush3.msra.mxu0 %v11609_v50  ;;  %v11629_v50 = vld [vmem:[%s19831_s3 + $0x28] sm:$0xff]  ;;  %13898 = vmatprep.subr.mxu1 %v11630_v49 }
 0x327   :  { %v13749_v45 = vpop.f32.mrf.mxu1  ;;  %13870 = vmatprep.subr.mxu0 %v11608_v43  ;;  %13899 = vmatpush3.msra.mxu1 %v11630_v49 }
 0x328   :  { %13814 = vmatprep.mubr.msk.f32.mxu0 %vm558_vm1, %v926_v61  ;;  %13871 = vmatpush3.msra.mxu0 %v11608_v43  ;;  %v929_v38 = vmul.f32 %v15533_v1, %v13749_v45 }
 0x329   :  { %v905_v41 = vpop.f32.mrf.mxu1  ;;  %13815 = vmatmul.mubr.msk.f32.gmra.mxu0 %vm558_vm1, %v927_v62  ;;  %13900 = vmatprep.subr.mxu1 %v11629_v50 }
 0x32a   :  { %v928_v8 = vmul.f32 %v15531_v4, %v905_v41  ;;  %13901 = vmatpush3.msra.mxu1 %v11629_v50 }
 0x32b   :  { %v13796_v44 = vpop.f32.mrf.mxu0  ;;  %13902 = vmatprep.subr.mxu1 %v11628_v53 }
 0x32c   :  { %13817 = vmatprep.mubr.msk.f32.mxu0 %vm558_vm1, %v928_v8  ;;  %v1293_v9 = vmul.f32 %v15537_v48, %v13796_v44  ;;  %13903 = vmatpush3.msra.mxu1 %v11628_v53 }
 0x32d   :  { %v1245_v39 = vpop.f32.mrf.mxu0  ;;  %13818 = vmatmul.mubr.msk.f32.gmra.mxu0 %vm558_vm1, %v929_v38  ;;  %13905 = vmatmul.mubr.msk.f32.vlgmr.msra.gmra.mxu1 %vm50_vm0, %v16627_v14 }
 0x32e   :  { %v1292_v36 = vmul.f32 %v15535_v11, %v1245_v39  ;;  %13907 = vmatprep.mubr.msk.f32.mxu1 %vm50_vm0, %v16634_v15 }
 0x32f   :  { %v13799_v25 = vpop.f32.mrf.mxu0 }
 0x330   :  { %13820 = vmatprep.mubr.msk.f32.mxu0 %vm558_vm1, %v1292_v36  ;;  %v1295_v27 = vmul.f32 %v15541_v47, %v13799_v25 }
 0x331   :  { %v1255_v37 = vpop.f32.mrf.mxu0  ;;  %13821 = vmatmul.mubr.msk.f32.gmra.mxu0 %vm558_vm1, %v1293_v9  ;;  %13908 = vmatmul.mubr.msk.f32.gmra.mxu1 %vm50_vm0, %v16641_v16 }
 0x332   :  { %v1294_v52 = vmul.f32 %v15539_v26, %v1255_v37  ;;  %13910 = vmatprep.mubr.msk.f32.mxu1 %vm50_vm0, %v16648_v17 }
 0x333   :  { %v13802_v28 = vpop.f32.mrf.mxu1 }
 0x334   :  { %13823 = vmatprep.mubr.msk.f32.mxu0 %vm558_vm1, %v1294_v52  ;;  %v1297_v55 = vmul.f32 %v15545_v29, %v13802_v28 }
 0x335   :  { %v1265_v56 = vpop.f32.mrf.mxu1  ;;  %13824 = vmatmul.mubr.msk.f32.gmra.mxu0 %vm558_vm1, %v1295_v27  ;;  %13911 = vmatmul.mubr.msk.f32.gmra.mxu1 %vm50_vm0, %v16655_v18 }
 0x336   :  { %v1296_v30 = vmul.f32 %v15543_v51, %v1265_v56  ;;  %13913 = vmatprep.mubr.msk.f32.mxu1 %vm50_vm0, %v16662_v19 }
 0x337   :  { %v13805_v60 = vpop.f32.mrf.mxu1 }
 0x338   :  { %13826 = vmatprep.mubr.msk.f32.mxu0 %vm558_vm1, %v1296_v30  ;;  %v1299_v10 = vmul.f32 %v15549_v5, %v13805_v60 }
 0x339   :  { %v1275_v32 = vpop.f32.mrf.mxu1  ;;  %13827 = vmatmul.mubr.msk.f32.gmra.mxu0 %vm558_vm1, %v1297_v55  ;;  %13914 = vmatmul.mubr.msk.f32.gmra.mxu1 %vm50_vm0, %v16669_v20 }
 0x33a   :  { %v1298_v7 = vmul.f32 %v15547_v31, %v1275_v32  ;;  %13916 = vmatprep.mubr.msk.f32.mxu1 %vm50_vm0, %v16676_v21 }
 0x33b   :  { %v16729_v59 = vpop.f32.mrf.mxu1 }
 0x33c   :  { %13829 = vmatprep.mubr.msk.f32.mxu0 %vm558_vm1, %v1298_v7  ;;  %v1665_v32 = vmul.f32 0.5, %v16729_v59 }
 0x33d   :  { %13830 = vmatmul.mubr.msk.f32.gmra.mxu0 %vm558_vm1, %v1299_v10  ;;  %v1585_v0 = vpop.f32.mrf.mxu1  ;;  %13917 = vmatmul.mubr.msk.f32.gmra.mxu1 %vm50_vm0, %v16683_v2 }
 0x33e   :  { %13872 = vmatprep.mubr.msk.f32.mxu0 %vm50_vm0, %v16620_v12  ;;  %v1664_v46 = vmul.f32 0.5, %v1585_v0  ;;  %13919 = vmatprep.mubr.msk.f32.mxu1 %vm50_vm0, %v16690_v22 }
 0x33f   :  { %v13845_v47 = vpop.f32.mrf.mxu1 }
 0x340   :  { %v1667_v5 = vmul.f32 0.5, %v13845_v47 }
 0x341   :  { %13873 = vmatmul.mubr.msk.f32.vlgmr.msra.gmra.mxu0 %vm50_vm0, %v16627_v14  ;;  %13920 = vmatmul.mubr.msk.f32.gmra.mxu1 %vm50_vm0, %v16697_v23  ;;  %v1595_v27 = vpop.f32.mrf.mxu1 }
 0x342   :  { %13875 = vmatprep.mubr.msk.f32.mxu0 %vm50_vm0, %v16634_v15  ;;  %13922 = vmatprep.mubr.msk.f32.mxu1 %vm50_vm0, %v16704_v24  ;;  %v1666_v31 = vmul.f32 0.5, %v1595_v27 }
 0x343   :  { %v13848_v51 = vpop.f32.mrf.mxu1 }
 0x344   :  { %v1669_v42 = vmul.f32 0.5, %v13848_v51 }
 0x345   :  { %13876 = vmatmul.mubr.msk.f32.gmra.mxu0 %vm50_vm0, %v16641_v16  ;;  %13923 = vmatmul.mubr.msk.f32.gmra.mxu1 %vm50_vm0, %v16711_v33  ;;  %v1605_v29 = vpop.f32.mrf.mxu1 }
 0x346   :  { %13878 = vmatprep.mubr.msk.f32.mxu0 %vm50_vm0, %v16648_v17  ;;  %13925 = vmatprep.mubr.msk.f32.mxu1 %vm50_vm0, %v16718_v34  ;;  %v1668_v0 = vmul.f32 0.5, %v1605_v29 }
 0x347   :  { %v13851_v55 = vpop.f32.mrf.mxu1 }
 0x348   :  { %v1671_v50 = vmul.f32 0.5, %v13851_v55 }
 0x349   :  { %13879 = vmatmul.mubr.msk.f32.gmra.mxu0 %vm50_vm0, %v16655_v18  ;;  %13926 = vmatmul.mubr.msk.f32.gmra.mxu1 %vm50_vm0, %v16725_v35  ;;  %v1615_v7 = vpop.f32.mrf.mxu1 }
 0x34a   :  { %13881 = vmatprep.mubr.msk.f32.mxu0 %vm50_vm0, %v16662_v19  ;;  %v1670_v59 = vmul.f32 0.5, %v1615_v7 }
 0x34d   :  { %13882 = vmatmul.mubr.msk.f32.gmra.mxu0 %vm50_vm0, %v16669_v20 }
 0x34e   :  { %13884 = vmatprep.mubr.msk.f32.mxu0 %vm50_vm0, %v16676_v21 }
 0x351   :  { %13885 = vmatmul.mubr.msk.f32.gmra.mxu0 %vm50_vm0, %v16683_v2 }
 0x352   :  { %13887 = vmatprep.mubr.msk.f32.mxu0 %vm50_vm0, %v16690_v22 }
 0x355   :  { %13888 = vmatmul.mubr.msk.f32.gmra.mxu0 %vm50_vm0, %v16697_v23 }
 0x356   :  { %13890 = vmatprep.mubr.msk.f32.mxu0 %vm50_vm0, %v16704_v24 }
 0x359   :  { %13891 = vmatmul.mubr.msk.f32.gmra.mxu0 %vm50_vm0, %v16711_v33 }
 0x35a   :  { %13893 = vmatprep.mubr.msk.f32.mxu0 %vm50_vm0, %v16718_v34 }
 0x35d   :  { %13894 = vmatmul.mubr.msk.f32.gmra.mxu0 %vm50_vm0, %v16725_v35 }
 0x35e   :  { %13944 = vmatprep.mubr.msk.f32.mxu0 %vm558_vm1, %v1664_v46  ;;  %v13854_v46 = vpop.f32.mrf.mxu1 }
 0x360   :  { %v1625_v49 = vpop.f32.mrf.mxu1 }
 0x361   :  { %v1672_v53 = vmul.f32 0.5, %v1625_v49 }
 0x3e1   :  { %v16744_v63 = vpop.f32.mrf.mxu0 }
 0x3e3   :  { %v16746_v6 = vpop.f32.mrf.mxu0 }
 0x3e5   :  { %v16752_v54 = vpop.f32.mrf.mxu0 }
 0x3e7   :  { %v16754_v43 = vpop.f32.mrf.mxu0 }
 0x3e8   :  { %19835 = vst [vmem:[#allocation2_spill] sm:$0xff] %v16754_v43 }
 0x3e9   :  { %v16760_v57 = vpop.f32.mrf.mxu0 }
 0x3eb   :  { %v16762_v58 = vpop.f32.mrf.mxu0 }
 0x3ec   :  { %19836 = vst [vmem:[#allocation3_spill] sm:$0xff] %v16762_v58 }
 0x3ed   :  { %v16768_v40 = vpop.f32.mrf.mxu0 }
 0x3ef   :  { %v16770_v61 = vpop.f32.mrf.mxu0 }
 0x3f0   :  { %19837 = vst [vmem:[#allocation4_spill] sm:$0xff] %v16770_v61 }
 0x3f1   :  { %v16776_v62 = vpop.f32.mrf.mxu0 }
 0x3f3   :  { %v16778_v45 = vpop.f32.mrf.mxu0 }
 0x3f4   :  { %19838 = vst [vmem:[#allocation5_spill] sm:$0xff] %v16778_v45 }
 0x3f5   :  { %v16784_v4 = vpop.f32.mrf.mxu0 }
 0x3f7   :  { %v16786_v13 = vpop.f32.mrf.mxu0 }
 0x3f8   :  { %19839 = vst [vmem:[#allocation6_spill] sm:$0xff] %v16786_v13 }
 0x3f9   :  { %v16792_v41 = vpop.f32.mrf.mxu0 }
 0x3fb   :  { %v16794_v1 = vpop.f32.mrf.mxu0 }
 0x3fc   :  { %19840 = vst [vmem:[#allocation7_spill] sm:$0xff] %v16794_v1 }
 0x3fd   :  { %v16800_v3 = vpop.f32.mrf.mxu0 }
 0x3ff   :  { %v16802_v8 = vpop.f32.mrf.mxu0 }
 0x400   :  { %19841 = vst [vmem:[#allocation8_spill] sm:$0xff] %v16802_v8 }
 0x401   :  { %v13874_v38 = vpop.f32.mrf.mxu0 }
 0x403   :  { %v1751_v44 = vpop.f32.mrf.mxu0 }
 0x405   :  { %v13877_v11 = vpop.f32.mrf.mxu0 }
 0x407   :  { %v1761_v39 = vpop.f32.mrf.mxu0 }
 0x409   :  { %v13880_v48 = vpop.f32.mrf.mxu0 }
 0x40b   :  { %v1771_v36 = vpop.f32.mrf.mxu0 }
 0x40d   :  { %v13883_v9 = vpop.f32.mrf.mxu0 }
 0x40e   :  { %13928 = vmatprep.subr.msk.mxu0 %vm558_vm1, %v13883_v9 }
 0x40f   :  { %v1781_v25 = vpop.f32.mrf.mxu0  ;;  %13929 = vmatpush3.xpose.msk.msra.mxu0 %vm558_vm1, %v13883_v9 }
 0x410   :  { %13930 = vmatprep.subr.msk.mxu0 %vm558_vm1, %v1781_v25 }
 0x411   :  { %v13886_v26 = vpop.f32.mrf.mxu0 }
 0x413   :  { %13931 = vmatpush3.xpose.msk.msra.mxu0 %vm558_vm1, %v1781_v25  ;;  %v1791_v37 = vpop.f32.mrf.mxu0 }
 0x414   :  { %13932 = vmatprep.subr.msk.mxu0 %vm558_vm1, %v13880_v48 }
 0x415   :  { %v13889_v52 = vpop.f32.mrf.mxu0 }
 0x417   :  { %13933 = vmatpush3.xpose.msk.msra.mxu0 %vm558_vm1, %v13880_v48  ;;  %v1801_v28 = vpop.f32.mrf.mxu0 }
 0x418   :  { %13934 = vmatprep.subr.msk.mxu0 %vm558_vm1, %v1771_v36 }
 0x419   :  { %v13892_v56 = vpop.f32.mrf.mxu0 }
 0x41b   :  { %13935 = vmatpush3.xpose.msk.msra.mxu0 %vm558_vm1, %v1771_v36  ;;  %v1811_v30 = vpop.f32.mrf.mxu0  ;;  %v1673_v36 = vmul.f32 0.5, %v13854_v46 }
 0x41c   :  { %13936 = vmatprep.subr.msk.mxu0 %vm558_vm1, %v13877_v11 }
 0x41d   :  { %v13895_v60 = vpop.f32.mrf.mxu0 }
 0x41f   :  { %13937 = vmatpush3.xpose.msk.msra.mxu0 %vm558_vm1, %v13877_v11  ;;  %v1821_v10 = vpop.f32.mrf.mxu0 }
 0x420   :  { %13938 = vmatprep.subr.msk.mxu0 %vm558_vm1, %v1761_v39 }
 0x423   :  { %13939 = vmatpush3.xpose.msk.msra.mxu0 %vm558_vm1, %v1761_v39 }
 0x424   :  { %13940 = vmatprep.subr.msk.mxu0 %vm558_vm1, %v13874_v38 }
 0x427   :  { %13941 = vmatpush3.xpose.msk.msra.mxu0 %vm558_vm1, %v13874_v38  ;;  %v13857_v38 = vpop.f32.mrf.mxu1 }
 0x428   :  { %13942 = vmatprep.subr.msk.mxu0 %vm558_vm1, %v1751_v44  ;;  %v1675_v47 = vmul.f32 0.5, %v13857_v38 }
 0x42b   :  { %13943 = vmatpush3.xpose.msk.msra.mxu0 %vm558_vm1, %v1751_v44  ;;  %v1635_v44 = vpop.f32.mrf.mxu1 }
 0x42c   :  { %13984 = vmatprep.subr.msk.mxu0 %vm558_vm1, %v13895_v60  ;;  %v1674_v48 = vmul.f32 0.5, %v1635_v44 }
 0x42d   :  { %v13860_v11 = vpop.f32.mrf.mxu1 }
 0x42e   :  { %13945 = vmatmul.mubr.msk.f32.vlgmr.msra.gmra.mxu0 %vm558_vm1, %v1665_v32  ;;  %v1677_v27 = vmul.f32 0.5, %v13860_v11 }
 0x42f   :  { %13985 = vmatpush3.xpose.msk.msra.mxu0 %vm558_vm1, %v13895_v60  ;;  %13947 = vmatprep.mubr.msk.f32.mxu0 %vm558_vm1, %v1666_v31  ;;  %v1645_v39 = vpop.f32.mrf.mxu1 }
 0x430   :  { %13986 = vmatprep.subr.msk.mxu0 %vm558_vm1, %v1821_v10  ;;  %v1676_v25 = vmul.f32 0.5, %v1645_v39 }
 0x431   :  { %v13863_v9 = vpop.f32.mrf.mxu1 }
 0x432   :  { %13948 = vmatmul.mubr.msk.f32.gmra.mxu0 %vm558_vm1, %v1667_v5 }
 0x433   :  { %13987 = vmatpush3.xpose.msk.msra.mxu0 %vm558_vm1, %v1821_v10  ;;  %13950 = vmatprep.mubr.msk.f32.mxu0 %vm558_vm1, %v1668_v0 }
 0x434   :  { %13988 = vmatprep.subr.msk.mxu0 %vm558_vm1, %v13892_v56 }
 0x436   :  { %13951 = vmatmul.mubr.msk.f32.gmra.mxu0 %vm558_vm1, %v1669_v42 }
 0x437   :  { %13989 = vmatpush3.xpose.msk.msra.mxu0 %vm558_vm1, %v13892_v56  ;;  %13953 = vmatprep.mubr.msk.f32.mxu0 %vm558_vm1, %v1670_v59 }
 0x438   :  { %13990 = vmatprep.subr.msk.mxu0 %vm558_vm1, %v1811_v30 }
 0x43a   :  { %13954 = vmatmul.mubr.msk.f32.gmra.mxu0 %vm558_vm1, %v1671_v50 }
 0x43b   :  { %13991 = vmatpush3.xpose.msk.msra.mxu0 %vm558_vm1, %v1811_v30  ;;  %14000 = vmatprep.mubr.msk.f32.mxu0 %vm558_vm1, %v1672_v53 }
 0x43c   :  { %13992 = vmatprep.subr.msk.mxu0 %vm558_vm1, %v13889_v52 }
 0x43f   :  { %13993 = vmatpush3.xpose.msk.msra.mxu0 %vm558_vm1, %v13889_v52  ;;  %v1655_v52 = vpop.f32.mrf.mxu1 }
 0x440   :  { %13994 = vmatprep.subr.msk.mxu0 %vm558_vm1, %v1801_v28 }
 0x443   :  { %13995 = vmatpush3.xpose.msk.msra.mxu0 %vm558_vm1, %v1801_v28  ;;  %v13906_v28 = vpop.f32.mrf.mxu1 }
 0x444   :  { %13996 = vmatprep.subr.msk.mxu0 %vm558_vm1, %v13886_v26 }
 0x445   :  { %v1901_v51 = vpop.f32.mrf.mxu1 }
 0x447   :  { %13997 = vmatpush3.xpose.msk.msra.mxu0 %vm558_vm1, %v13886_v26  ;;  %v1678_v26 = vmul.f32 0.5, %v1655_v52  ;;  %v13909_v56 = vpop.f32.mrf.mxu1 }
 0x448   :  { %13998 = vmatprep.subr.msk.mxu0 %vm558_vm1, %v1791_v37 }
 0x449   :  { %v1911_v29 = vpop.f32.mrf.mxu1 }
 0x44b   :  { %13999 = vmatpush3.xpose.msk.msra.mxu0 %vm558_vm1, %v1791_v37  ;;  %v1679_v37 = vmul.f32 0.5, %v13863_v9  ;;  %v13912_v30 = vpop.f32.mrf.mxu1 }
 0x44d   :  { %v1921_v55 = vpop.f32.mrf.mxu1 }
 0x44e   :  { %14001 = vmatmul.mubr.msk.f32.vlgmr.msra.gmra.mxu0 %vm558_vm1, %v1673_v36 }
 0x44f   :  { %14003 = vmatprep.mubr.msk.f32.mxu0 %vm558_vm1, %v1674_v48  ;;  %v13915_v60 = vpop.f32.mrf.mxu1 }
 0x450   :  { %13956 = vmatprep.subr.mxu1 %v13915_v60 }
 0x451   :  { %v1931_v31 = vpop.f32.mrf.mxu1  ;;  %13957 = vmatpush3.msra.mxu1 %v13915_v60 }
 0x452   :  { %14004 = vmatmul.mubr.msk.f32.gmra.mxu0 %vm558_vm1, %v1675_v47  ;;  %13958 = vmatprep.subr.mxu1 %v1931_v31 }
 0x453   :  { %14006 = vmatprep.mubr.msk.f32.mxu0 %vm558_vm1, %v1676_v25  ;;  %13959 = vmatpush3.msra.mxu1 %v1931_v31  ;;  %v16876_v36 = vpop.f32.mrf.mxu1 }
 0x454   :  { %13960 = vmatprep.subr.mxu1 %v13912_v30 }
 0x455   :  { %13961 = vmatpush3.msra.mxu1 %v13912_v30  ;;  %v16878_v9 = vpop.f32.mrf.mxu1 }
 0x456   :  { %14007 = vmatmul.mubr.msk.f32.gmra.mxu0 %vm558_vm1, %v1677_v27  ;;  %13962 = vmatprep.subr.mxu1 %v1921_v55 }
 0x457   :  { %14009 = vmatprep.mubr.msk.f32.mxu0 %vm558_vm1, %v1678_v26  ;;  %13963 = vmatpush3.msra.mxu1 %v1921_v55  ;;  %v16880_v25 = vpop.f32.mrf.mxu1 }
 0x458   :  { %13964 = vmatprep.subr.mxu1 %v13909_v56 }
 0x459   :  { %13965 = vmatpush3.msra.mxu1 %v13909_v56  ;;  %v16882_v47 = vpop.f32.mrf.mxu1 }
 0x45a   :  { %14010 = vmatmul.mubr.msk.f32.gmra.mxu0 %vm558_vm1, %v1679_v37  ;;  %13966 = vmatprep.subr.mxu1 %v1911_v29 }
 0x45b   :  { %14074 = vmatprep.mubr.msk.f32.mxu0 %vm50_vm0, %v16620_v12  ;;  %13967 = vmatpush3.msra.mxu1 %v1911_v29  ;;  %v16884_v52 = vpop.f32.mrf.mxu1 }
 0x45c   :  { %13968 = vmatprep.subr.mxu1 %v13906_v28 }
 0x45d   :  { %13969 = vmatpush3.msra.mxu1 %v13906_v28  ;;  %v16886_v26 = vpop.f32.mrf.mxu1 }
 0x45e   :  { %13970 = vmatprep.subr.mxu1 %v1901_v51 }
 0x45f   :  { %13971 = vmatpush3.msra.mxu1 %v1901_v51  ;;  %v16892_v28 = vpop.f32.mrf.mxu1 }
 0x460   :  { %14012 = vmatprep.subr.mxu1 %v16892_v28 }
 0x4ee   :  { %v13946_v32 = vpop.f32.mrf.mxu0 }
 0x4ef   :  { %v2136_v5 = vsel %vm712_vm2, %v13946_v32, -inf }
 0x4f0   :  { %2137 = vmax.xlane.f32.xlu1 %v2136_v5  ;;  %v2094_v7 = vpop.f32.mrf.mxu0 }
 0x4f1   :  { %v2133_v10 = vsel %vm712_vm2, %v2094_v7, -inf }
 0x4f2   :  { %2134 = vmax.xlane.f32.xlu0 %v2133_v10  ;;  %v13949_v0 = vpop.f32.mrf.mxu0 }
 0x4f3   :  { %v2142_v46 = vsel %vm712_vm2, %v13949_v0, -inf }
 0x4f4   :  { %2143 = vmax.xlane.f32.xlu1 %v2142_v46  ;;  %v2104_v42 = vpop.f32.mrf.mxu0 }
 0x4f5   :  { %v2139_v59 = vsel %vm712_vm2, %v2104_v42, -inf }
 0x4f6   :  { %2140 = vmax.xlane.f32.xlu0 %v2139_v59  ;;  %v16860_v49 = vpop.f32.mrf.mxu0 }
 0x4f7   :  { %v2148_v50 = vsel %vm712_vm2, %v16860_v49, -inf }
 0x4f8   :  { %2149 = vmax.xlane.f32.xlu1 %v2148_v50  ;;  %v16864_v53 = vpop.f32.mrf.mxu0 }
 0x4f9   :  { %v2145_v38 = vsel %vm712_vm2, %v16864_v53, -inf }
 0x4fa   :  { %2146 = vmax.xlane.f32.xlu0 %v2145_v38  ;;  %v16868_v44 = vpop.f32.mrf.mxu0 }
 0x4fb   :  { %v2154_v11 = vsel %vm712_vm2, %v16868_v44, -inf }
 0x4fc   :  { %2155 = vmax.xlane.f32.xlu1 %v2154_v11  ;;  %v16872_v39 = vpop.f32.mrf.mxu0 }
 0x4fd   :  { %v2151_v48 = vsel %vm712_vm2, %v16872_v39, -inf }
 0x4fe   :  { %2152 = vmax.xlane.f32.xlu0 %v2151_v48 }
 0x50e   :  { %v16888_v27 = vpop.f32.mrf.mxu0 }
 0x50f   :  { %v2506_v37 = vsel %vm712_vm2, %v16888_v27, -inf }
 0x510   :  { %2507 = vmax.xlane.f32.xlu1 %v2506_v37  ;;  %v16894_v51 = vpop.f32.mrf.mxu0 }
 0x511   :  { %v2503_v56 = vsel %vm712_vm2, %v16894_v51, -inf }
 0x512   :  { %v16899_v29 = vpop.f32.mrf.mxu0  ;;  %2504 = vmax.xlane.f32.xlu0 %v2503_v56 }
 0x513   :  { %v2512_v30 = vsel %vm712_vm2, %v16899_v29, -inf }
 0x514   :  { %2513 = vmax.xlane.f32.xlu1 %v2512_v30  ;;  %v16903_v55 = vpop.f32.mrf.mxu0 }
 0x515   :  { %v2509_v60 = vsel %vm712_vm2, %v16903_v55, -inf }
 0x516   :  { %v16907_v31 = vpop.f32.mrf.mxu0  ;;  %2510 = vmax.xlane.f32.xlu0 %v2509_v60 }
 0x517   :  { %v2518_v5 = vsel %vm712_vm2, %v16907_v31, -inf }
 0x518   :  { %2519 = vmax.xlane.f32.xlu1 %v2518_v5  ;;  %v16911_v10 = vpop.f32.mrf.mxu0 }
 0x519   :  { %v2515_v46 = vsel %vm712_vm2, %v16911_v10, -inf }
 0x51a   :  { %v16915_v59 = vpop.f32.mrf.mxu0  ;;  %2516 = vmax.xlane.f32.xlu0 %v2515_v46 }
 0x51b   :  { %v2524_v50 = vsel %vm712_vm2, %v16915_v59, -inf }
 0x51c   :  { %2525 = vmax.xlane.f32.xlu1 %v2524_v50  ;;  %v16919_v38 = vpop.f32.mrf.mxu0 }
 0x51d   :  { %v2521_v11 = vsel %vm712_vm2, %v16919_v38, -inf }
 0x51e   :  { %2522 = vmax.xlane.f32.xlu0 %v2521_v11 }
 0x579   :  { %v2138_v48 = vpop.xlane.xlu1 %2137 }
 0x57a   :  { %v2158_v37 = vsub.f32 %v13946_v32, %v2138_v48 }
 0x57b   :  { %v2135_v56 = vpop.xlane.xlu0 %2134 }
 0x57c   :  { %v2167_v30 = vmul.f32 1.442695, %v2158_v37  ;;  %v2157_v60 = vsub.f32 %v2094_v7, %v2135_v56 }
 0x57d   :  { %v2144_v5 = vpop.xlane.xlu1 %2143 }
 0x57e   :  { %15550 = vpow2.f32 %v2167_v30  ;;  %v2165_v8 = vmul.f32 1.442695, %v2157_v60  ;;  %v2160_v1 = vsub.f32 %v13949_v0, %v2144_v5 }
 0x57f   :  { %v2141_v46 = vpop.xlane.xlu0 %2140 }
 0x580   :  { %15552 = vpow2.f32 %v2165_v8  ;;  %v2171_v13 = vmul.f32 1.442695, %v2160_v1  ;;  %v2159_v45 = vsub.f32 %v2104_v42, %v2141_v46 }
 0x581   :  { %v2150_v50 = vpop.xlane.xlu1 %2149 }
 0x582   :  { %15554 = vpow2.f32 %v2171_v13  ;;  %v2169_v61 = vmul.f32 1.442695, %v2159_v45  ;;  %v2162_v58 = vsub.f32 %v16860_v49, %v2150_v50 }
 0x583   :  { %v2147_v43 = vpop.xlane.xlu0 %2146 }
 0x584   :  { %15556 = vpow2.f32 %v2169_v61  ;;  %v2175_v11 = vmul.f32 1.442695, %v2162_v58  ;;  %v2161_v32 = vsub.f32 %v16864_v53, %v2147_v43  ;;  %v1971_v43 = vpop.f32.mrf.mxu1 }
 0x585   :  { %v2156_v48 = vpop.xlane.xlu1 %2155 }
 0x586   :  { %15558 = vpow2.f32 %v2175_v11  ;;  %v2173_v7 = vmul.f32 1.442695, %v2161_v32  ;;  %v2164_v37 = vsub.f32 %v16868_v44, %v2156_v48 }
 0x587   :  { %v2153_v0 = vpop.xlane.xlu0 %2152 }
 0x588   :  { %15560 = vpow2.f32 %v2173_v7  ;;  %v2179_v8 = vmul.f32 1.442695, %v2164_v37  ;;  %v2163_v1 = vsub.f32 %v16872_v39, %v2153_v0 }
 0x58a   :  { %15562 = vpow2.f32 %v2179_v8  ;;  %v2177_v13 = vmul.f32 1.442695, %v2163_v1 }
 0x58b   :  { %v15551_v45 = vpop.eup %15550 }
 0x58c   :  { %15564 = vpow2.f32 %v2177_v13  ;;  %v2184_v42 = vsel %vm712_vm2, %v15551_v45, 0.0 }
 0x58d   :  { %v15553_v61 = vpop.eup %15552  ;;  %2185 = vadd.xlane.f32.xlu1 %v2184_v42 }
 0x58e   :  { %13972 = vmatprep.mubr.msk.f32.mxu1 %vm712_vm2, %v15553_v61  ;;  %v2181_v58 = vsel %vm712_vm2, %v15553_v61, 0.0 }
 0x58f   :  { %v15555_v49 = vpop.eup %15554  ;;  %13973 = vmatmul.mubr.msk.f32.vlgmr.msra.gmra.mxu1 %vm712_vm2, %v15551_v45  ;;  %2182 = vadd.xlane.f32.xlu0 %v2181_v58 }
 0x590   :  { %14013 = vmatpush3.msra.mxu1 %v16892_v28  ;;  %v2190_v53 = vsel %vm712_vm2, %v15555_v49, 0.0 }
 0x591   :  { %v15557_v44 = vpop.eup %15556  ;;  %14014 = vmatprep.subr.mxu1 %v1971_v43  ;;  %2191 = vadd.xlane.f32.xlu1 %v2190_v53 }
 0x592   :  { %14015 = vmatpush3.msra.mxu1 %v1971_v43  ;;  %13975 = vmatprep.mubr.msk.f32.mxu1 %vm712_vm2, %v15557_v44  ;;  %v2187_v39 = vsel %vm712_vm2, %v15557_v44, 0.0 }
 0x593   :  { %v15559_v56 = vpop.eup %15558  ;;  %14016 = vmatprep.subr.mxu1 %v16884_v52  ;;  %13976 = vmatmul.mubr.msk.f32.gmra.mxu1 %vm712_vm2, %v15555_v49 }
 0x594   :  { %14017 = vmatpush3.msra.mxu1 %v16884_v52  ;;  %2188 = vadd.xlane.f32.xlu0 %v2187_v39  ;;  %v2196_v28 = vsel %vm712_vm2, %v15559_v56, 0.0 }
 0x595   :  { %v15561_v30 = vpop.eup %15560  ;;  %14018 = vmatprep.subr.mxu1 %v16886_v26  ;;  %2197 = vadd.xlane.f32.xlu1 %v2196_v28 }
 0x596   :  { %14019 = vmatpush3.msra.mxu1 %v16886_v26  ;;  %13978 = vmatprep.mubr.msk.f32.mxu1 %vm712_vm2, %v15561_v30  ;;  %v2193_v60 = vsel %vm712_vm2, %v15561_v30, 0.0 }
 0x597   :  { %v15563_v5 = vpop.eup %15562  ;;  %14020 = vmatprep.subr.mxu1 %v16880_v25  ;;  %13979 = vmatmul.mubr.msk.f32.gmra.mxu1 %vm712_vm2, %v15559_v56 }
 0x598   :  { %14021 = vmatpush3.msra.mxu1 %v16880_v25  ;;  %2194 = vadd.xlane.f32.xlu0 %v2193_v60  ;;  %v2202_v52 = vsel %vm712_vm2, %v15563_v5, 0.0 }
 0x599   :  { %v15565_v46 = vpop.eup %15564  ;;  %14022 = vmatprep.subr.mxu1 %v16882_v47  ;;  %v2508_v50 = vpop.xlane.xlu1 %2507  ;;  %2203 = vadd.xlane.f32.xlu1 %v2202_v52 }
 0x59a   :  { %14023 = vmatpush3.msra.mxu1 %v16882_v47  ;;  %v2528_v26 = vsub.f32 %v16888_v27, %v2508_v50  ;;  %13981 = vmatprep.mubr.msk.f32.mxu1 %vm712_vm2, %v15565_v46  ;;  %v2199_v11 = vsel %vm712_vm2, %v15565_v46, 0.0 }
 0x59b   :  { %14024 = vmatprep.subr.mxu1 %v16876_v36  ;;  %13982 = vmatmul.mubr.msk.f32.gmra.mxu1 %vm712_vm2, %v15563_v5  ;;  %v2505_v25 = vpop.xlane.xlu0 %2504 }
 0x59c   :  { %v2537_v32 = vmul.f32 1.442695, %v2528_v26  ;;  %14025 = vmatpush3.msra.mxu1 %v16876_v36  ;;  %2200 = vadd.xlane.f32.xlu0 %v2199_v11  ;;  %v2527_v48 = vsub.f32 %v16894_v51, %v2505_v25  ;;  %v11696_v11 = vld [vmem:[%s19832_s4 + $0x4] sm:$0xf]  ;;  %v11737_v25 = vld [vmem:[%s19828_s2 + $0x58] sm:$0xff] }
 0x59d   :  { %14026 = vmatprep.subr.mxu1 %v16878_v9  ;;  %v2514_v47 = vpop.xlane.xlu1 %2513 }
 0x59e   :  { %15566 = vpow2.f32 %v2537_v32  ;;  %v2535_v27 = vmul.f32 1.442695, %v2527_v48  ;;  %14027 = vmatpush3.msra.mxu1 %v16878_v9  ;;  %v2530_v7 = vsub.f32 %v16899_v29, %v2514_v47  ;;  %v11717_v32 = vld [vmem:[%s19830_s1 + $0x58] sm:$0xff]  ;;  %v11716_v48 = vld [vmem:[%s19830_s1 + $0x50] sm:$0xff]  ;;  %v11715_v47 = vld [vmem:[%s19830_s1 + $0x48] sm:$0xff] }
 0x59f   :  { %v2511_v37 = vpop.xlane.xlu0 %2510  ;;  %14040 = vmatprep.subr.msk.mxu1 %vm1349_vm3, %v11696_v11  ;;  %14066 = vmatprep.subr.mxu0 %v11717_v32 }
 0x5a0   :  { %15568 = vpow2.f32 %v2535_v27  ;;  %v2541_v0 = vmul.f32 1.442695, %v2530_v7  ;;  %v2529_v8 = vsub.f32 %v16903_v55, %v2511_v37  ;;  %14067 = vmatpush3.msra.mxu0 %v11717_v32  ;;  %v11714_v27 = vld [vmem:[%s19830_s1 + $0x40] sm:$0xff] }
 0x5a1   :  { %v2520_v1 = vpop.xlane.xlu1 %2519  ;;  %14068 = vmatprep.subr.mxu0 %v11716_v48 }
 0x5a2   :  { %15570 = vpow2.f32 %v2541_v0  ;;  %v2539_v36 = vmul.f32 1.442695, %v2529_v8  ;;  %v2532_v13 = vsub.f32 %v16907_v31, %v2520_v1  ;;  %14069 = vmatpush3.msra.mxu0 %v11716_v48  ;;  %v11735_v1 = vld [vmem:[%s19828_s2 + $0x48] sm:$0xff] }
 0x5a3   :  { %v2517_v51 = vpop.xlane.xlu0 %2516  ;;  %14070 = vmatprep.subr.mxu0 %v11715_v47 }
 0x5a4   :  { %15572 = vpow2.f32 %v2539_v36  ;;  %v2545_v45 = vmul.f32 1.442695, %v2532_v13  ;;  %v2531_v42 = vsub.f32 %v16911_v10, %v2517_v51  ;;  %14071 = vmatpush3.msra.mxu0 %v11715_v47  ;;  %v11734_v51 = vld [vmem:[%s19828_s2 + $0x40] sm:$0xff] }
 0x5a5   :  { %v2526_v61 = vpop.xlane.xlu1 %2525  ;;  %14072 = vmatprep.subr.mxu0 %v11714_v27 }
 0x5a6   :  { %15574 = vpow2.f32 %v2545_v45  ;;  %v2543_v9 = vmul.f32 1.442695, %v2531_v42  ;;  %v2534_v29 = vsub.f32 %v16915_v59, %v2526_v61  ;;  %14073 = vmatpush3.msra.mxu0 %v11714_v27 }
 0x5a7   :  { %v2523_v43 = vpop.xlane.xlu0 %2522  ;;  %14075 = vmatmul.mubr.msk.f32.vlgmr.msra.gmra.mxu0 %vm50_vm0, %v16627_v14 }
 0x5a8   :  { %15576 = vpow2.f32 %v2543_v9  ;;  %v2549_v58 = vmul.f32 1.442695, %v2534_v29  ;;  %v2533_v55 = vsub.f32 %v16919_v38, %v2523_v43  ;;  %14077 = vmatprep.mubr.msk.f32.mxu0 %vm50_vm0, %v16634_v15 }
 0x5aa   :  { %15578 = vpow2.f32 %v2549_v58  ;;  %v2547_v49 = vmul.f32 1.442695, %v2533_v55 }
 0x5ab   :  { %v15567_v53 = vpop.eup %15566  ;;  %14078 = vmatmul.mubr.msk.f32.gmra.mxu0 %vm50_vm0, %v16641_v16 }
 0x5ac   :  { %15580 = vpow2.f32 %v2547_v49  ;;  %v2554_v31 = vsel %vm712_vm2, %v15567_v53, 0.0  ;;  %14080 = vmatprep.mubr.msk.f32.mxu0 %vm50_vm0, %v16648_v17 }
 0x5ad   :  { %v15569_v44 = vpop.eup %15568  ;;  %2555 = vadd.xlane.f32.xlu1 %v2554_v31 }
 0x5ae   :  { %14028 = vmatprep.mubr.msk.f32.mxu1 %vm712_vm2, %v15569_v44  ;;  %v2551_v10 = vsel %vm712_vm2, %v15569_v44, 0.0 }
 0x5af   :  { %v15571_v39 = vpop.eup %15570  ;;  %14029 = vmatmul.mubr.msk.f32.vlgmr.msra.gmra.mxu1 %vm712_vm2, %v15567_v53  ;;  %2552 = vadd.xlane.f32.xlu0 %v2551_v10 }
 0x5b0   :  { %v2560_v59 = vsel %vm712_vm2, %v15571_v39, 0.0  ;;  %14041 = vmatpush3.msk.msra.mxu1 %vm1349_vm3, %v11696_v11  ;;  %14081 = vmatmul.mubr.msk.f32.gmra.mxu0 %vm50_vm0, %v16655_v18 }
 0x5b1   :  { %v15573_v56 = vpop.eup %15572  ;;  %2561 = vadd.xlane.f32.xlu1 %v2560_v59  ;;  %14098 = vmatprep.subr.mxu1 %v11737_v25 }
 0x5b2   :  { %14031 = vmatprep.mubr.msk.f32.mxu1 %vm712_vm2, %v15573_v56  ;;  %v2557_v38 = vsel %vm712_vm2, %v15573_v56, 0.0  ;;  %14083 = vmatprep.mubr.msk.f32.mxu0 %vm50_vm0, %v16662_v19 }
 0x5b3   :  { %v15575_v28 = vpop.eup %15574  ;;  %14032 = vmatmul.mubr.msk.f32.gmra.mxu1 %vm712_vm2, %v15571_v39  ;;  %2558 = vadd.xlane.f32.xlu0 %v2557_v38 }
 0x5b4   :  { %v2566_v30 = vsel %vm712_vm2, %v15575_v28, 0.0  ;;  %14084 = vmatmul.mubr.msk.f32.gmra.mxu0 %vm50_vm0, %v16669_v20 }
 0x5b5   :  { %v15577_v60 = vpop.eup %15576  ;;  %2567 = vadd.xlane.f32.xlu1 %v2566_v30  ;;  %14086 = vmatprep.mubr.msk.f32.mxu0 %vm50_vm0, %v16676_v21 }
 0x5b6   :  { %14034 = vmatprep.mubr.msk.f32.mxu1 %vm712_vm2, %v15577_v60  ;;  %v2563_v5 = vsel %vm712_vm2, %v15577_v60, 0.0 }
 0x5b7   :  { %v15579_v52 = vpop.eup %15578  ;;  %14035 = vmatmul.mubr.msk.f32.gmra.mxu1 %vm712_vm2, %v15575_v28  ;;  %2564 = vadd.xlane.f32.xlu0 %v2563_v5 }
 0x5b8   :  { %v2572_v46 = vsel %vm712_vm2, %v15579_v52, 0.0  ;;  %14087 = vmatmul.mubr.msk.f32.gmra.mxu0 %vm50_vm0, %v16683_v2 }
 0x5b9   :  { %v15581_v50 = vpop.eup %15580  ;;  %2573 = vadd.xlane.f32.xlu1 %v2572_v46  ;;  %14089 = vmatprep.mubr.msk.f32.mxu0 %vm50_vm0, %v16690_v22 }
 0x5ba   :  { %14037 = vmatprep.mubr.msk.f32.mxu1 %vm712_vm2, %v15581_v50  ;;  %v2569_v26 = vsel %vm712_vm2, %v15581_v50, 0.0 }
 0x5bb   :  { %14038 = vmatmul.mubr.msk.f32.gmra.mxu1 %vm712_vm2, %v15579_v52  ;;  %2570 = vadd.xlane.f32.xlu0 %v2569_v26 }
 0x5bc   :  { %14090 = vmatmul.mubr.msk.f32.gmra.mxu0 %vm50_vm0, %v16697_v23 }
 0x5bd   :  { %14092 = vmatprep.mubr.msk.f32.mxu0 %vm50_vm0, %v16704_v24 }
 0x5c0   :  { %14093 = vmatmul.mubr.msk.f32.gmra.mxu0 %vm50_vm0, %v16711_v33 }
 0x5c1   :  { %14095 = vmatprep.mubr.msk.f32.mxu0 %vm50_vm0, %v16718_v34 }
 0x5c4   :  { %14096 = vmatmul.mubr.msk.f32.gmra.mxu0 %vm50_vm0, %v16725_v35  ;;  %v11736_v35 = vld [vmem:[%s19828_s2 + $0x50] sm:$0xff] }
 0x5c5   :  { %14138 = vmatprep.mubr.msk.f32.mxu0 %vm50_vm0, %v16620_v12 }
 0x616   :  { %v2186_v15 = vpop.xlane.xlu1 %2185 }
 0x618   :  { %v2183_v14 = vpop.xlane.xlu0 %2182 }
 0x619   :  { %15582 = vrcp.f32 %v2183_v14 }
 0x61a   :  { %v2192_v17 = vpop.xlane.xlu1 %2191  ;;  %15584 = vrcp.f32 %v2186_v15 }
 0x61d   :  { %v2189_v16 = vpop.xlane.xlu0 %2188 }
 0x61e   :  { %15586 = vrcp.f32 %v2189_v16  ;;  %v2198_v19 = vpop.xlane.xlu1 %2197 }
 0x61f   :  { %15588 = vrcp.f32 %v2192_v17 }
 0x621   :  { %v2195_v18 = vpop.xlane.xlu0 %2194 }
 0x622   :  { %15590 = vrcp.f32 %v2195_v18  ;;  %v2204_v21 = vpop.xlane.xlu1 %2203 }
 0x623   :  { %15592 = vrcp.f32 %v2198_v19 }
 0x625   :  { %v2201_v20 = vpop.xlane.xlu0 %2200 }
 0x626   :  { %15594 = vrcp.f32 %v2201_v20  ;;  %v15583_v22 = vpop.eup %15582 }
 0x627   :  { %15596 = vrcp.f32 %v2204_v21  ;;  %v15585_v12 = vpop.eup %15584 }
 0x62b   :  { %v15587_v7 = vpop.eup %15586 }
 0x62c   :  { %v15589_v0 = vpop.eup %15588 }
 0x62f   :  { %v15591_v45 = vpop.eup %15590 }
 0x630   :  { %v15593_v61 = vpop.eup %15592 }
 0x633   :  { %v15595_v49 = vpop.eup %15594 }
 0x634   :  { %v15597_v31 = vpop.eup %15596 }
 0x636   :  { %v2556_v55 = vpop.xlane.xlu1 %2555 }
 0x638   :  { %v2553_v29 = vpop.xlane.xlu0 %2552 }
 0x639   :  { %15598 = vrcp.f32 %v2553_v29 }
 0x63a   :  { %v2562_v59 = vpop.xlane.xlu1 %2561  ;;  %15600 = vrcp.f32 %v2556_v55  ;;  %v11474_v55 = vld [vmem:[%s19833_s5] ss:$0 sm:$0xff] }
 0x63c   :  { %v2559_v39 = vpop.xlane.xlu0 %2558 }
 0x63d   :  { %15602 = vrcp.f32 %v2559_v39 }
 0x63e   :  { %v2568_v38 = vpop.xlane.xlu1 %2567  ;;  %15604 = vrcp.f32 %v2562_v59 }
 0x640   :  { %v2565_v56 = vpop.xlane.xlu0 %2564 }
 0x641   :  { %15606 = vrcp.f32 %v2565_v56 }
 0x642   :  { %15608 = vrcp.f32 %v2568_v38  ;;  %v2574_v30 = vpop.xlane.xlu1 %2573  ;;  %v1503_v38 = vadd.f32 %v16760_v57, %v11474_v55  ;;  %v11755_v57 = vld [vmem:[%s19831_s3 + $0x48] sm:$0xff] }
 0x644   :  { %v2571_v28 = vpop.xlane.xlu0 %2570 }
 0x645   :  { %15610 = vrcp.f32 %v2571_v28 }
 0x646   :  { %v15599_v5 = vpop.eup %15598  ;;  %15612 = vrcp.f32 %v2574_v30 }
 0x647   :  { %v15601_v46 = vpop.eup %15600 }
 0x64f   :  { %v13974_v2 = vpop.f32.mrf.mxu1 }
 0x650   :  { %v2343_v33 = vmul.f32 %v15585_v12, %v13974_v2 }
 0x651   :  { %v2295_v23 = vpop.f32.mrf.mxu1 }
 0x652   :  { %v2342_v24 = vmul.f32 %v15583_v22, %v2295_v23 }
 0x653   :  { %v13977_v34 = vpop.f32.mrf.mxu1 }
 0x654   :  { %14042 = vmatprep.mubr.msk.f32.mxu1 %vm558_vm1, %v2342_v24  ;;  %v2345_v36 = vmul.f32 %v15589_v0, %v13977_v34  ;;  %v17060_v24 = vld [vmem:[%s19829_s0] sm:$0xff]  ;;  %v17074_v34 = vld [vmem:[%s19829_s0 + $0x10] sm:$0xff] }
 0x655   :  { %v2305_v37 = vpop.f32.mrf.mxu1  ;;  %14043 = vmatmul.mubr.msk.f32.vlgmr.msra.gmra.mxu1 %vm558_vm1, %v2343_v33  ;;  %v17067_v33 = vld [vmem:[%s19829_s0 + $0x8] sm:$0xff]  ;;  %v17102_v0 = vld [vmem:[%s19829_s0 + $0x30] sm:$0xff] }
 0x656   :  { %v2344_v8 = vmul.f32 %v15587_v7, %v2305_v37  ;;  %14099 = vmatpush3.msra.mxu1 %v11737_v25  ;;  %v15603_v25 = vpop.eup %15602  ;;  %v17088_v7 = vld [vmem:[%s19829_s0 + $0x20] sm:$0xff]  ;;  %v17095_v37 = vld [vmem:[%s19829_s0 + $0x28] sm:$0xff] }
 0x657   :  { %v13980_v13 = vpop.f32.mrf.mxu1  ;;  %14100 = vmatprep.subr.mxu1 %v11736_v35  ;;  %v15605_v48 = vpop.eup %15604 }
 0x658   :  { %14045 = vmatprep.mubr.msk.f32.mxu1 %vm558_vm1, %v2344_v8  ;;  %14101 = vmatpush3.msra.mxu1 %v11736_v35  ;;  %v2347_v43 = vmul.f32 %v15593_v61, %v13980_v13  ;;  %v15607_v15 = vpop.eup %15606  ;;  %v17081_v35 = vld [vmem:[%s19829_s0 + $0x18] sm:$0xff]  ;;  %v17130_v13 = vld [vmem:[%s19829_s0 + $0x50] sm:$0xff] }
 0x659   :  { %v2315_v42 = vpop.f32.mrf.mxu1  ;;  %14046 = vmatmul.mubr.msk.f32.gmra.mxu1 %vm558_vm1, %v2345_v36  ;;  %14102 = vmatprep.subr.mxu1 %v11735_v1  ;;  %v15609_v17 = vpop.eup %15608  ;;  %v17109_v8 = vld [vmem:[%s19829_s0 + $0x38] sm:$0xff]  ;;  %v17123_v36 = vld [vmem:[%s19829_s0 + $0x48] sm:$0xff]  ;;  %v17158_v61 = vld [vmem:[%s19829_s0 + $0x70] sm:$0xff] }
 0x65a   :  { %v2346_v9 = vmul.f32 %v15591_v45, %v2315_v42  ;;  %14103 = vmatpush3.msra.mxu1 %v11735_v1  ;;  %v15611_v21 = vpop.eup %15610  ;;  %v17116_v1 = vld [vmem:[%s19829_s0 + $0x40] sm:$0xff]  ;;  %v17151_v42 = vld [vmem:[%s19829_s0 + $0x68] sm:$0xff] }
 0x65b   :  { %v13983_v58 = vpop.f32.mrf.mxu1  ;;  %14104 = vmatprep.subr.mxu1 %v11734_v51  ;;  %v15613_v22 = vpop.eup %15612  ;;  %v17144_v45 = vld [vmem:[%s19829_s0 + $0x60] sm:$0xff] }
 0x65c   :  { %14048 = vmatprep.mubr.msk.f32.mxu1 %vm558_vm1, %v2346_v9  ;;  %14105 = vmatpush3.msra.mxu1 %v11734_v51  ;;  %v2349_v10 = vmul.f32 %v15597_v31, %v13983_v58  ;;  %v17137_v51 = vld [vmem:[%s19829_s0 + $0x58] sm:$0xff] }
 0x65d   :  { %v2325_v53 = vpop.f32.mrf.mxu1  ;;  %14049 = vmatmul.mubr.msk.f32.gmra.mxu1 %vm558_vm1, %v2347_v43  ;;  %v17165_v9 = vld [vmem:[%s19829_s0 + $0x78] sm:$0xff] }
 0x65e   :  { %v2348_v44 = vmul.f32 %v15595_v49, %v2325_v53  ;;  %v1499_v49 = vadd.f32 %v16744_v63, %v11474_v55  ;;  %v11757_v63 = vld [vmem:[%s19831_s3 + $0x58] sm:$0xff] }
 0x65f   :  { %14130 = vmatprep.subr.mxu0 %v11757_v63 }
 0x660   :  { %14051 = vmatprep.mubr.msk.f32.mxu1 %vm558_vm1, %v2348_v44  ;;  %14131 = vmatpush3.msra.mxu0 %v11757_v63 }
 0x661   :  { %14052 = vmatmul.mubr.msk.f32.gmra.mxu1 %vm558_vm1, %v2349_v10  ;;  %v1501_v10 = vadd.f32 %v16752_v54, %v11474_v55  ;;  %v1505_v54 = vadd.f32 %v16768_v40, %v11474_v55 }
 0x667   :  { %v17169_v29 = vpop.f32.mrf.mxu0 }
 0x669   :  { %v3005_v43 = vpop.f32.mrf.mxu0 }
 0x66a   :  { %v3084_v58 = vmul.f32 0.5, %v3005_v43 }
 0x66f   :  { %v14030_v60 = vpop.f32.mrf.mxu1 }
 0x670   :  { %v2713_v26 = vmul.f32 %v15601_v46, %v14030_v60  ;;  %v11756_v60 = vld [vmem:[%s19831_s3 + $0x50] sm:$0xff] }
 0x671   :  { %v2665_v52 = vpop.f32.mrf.mxu1  ;;  %14132 = vmatprep.subr.mxu0 %v11756_v60 }
 0x672   :  { %v2712_v50 = vmul.f32 %v15599_v5, %v2665_v52  ;;  %14133 = vmatpush3.msra.mxu0 %v11756_v60 }
 0x673   :  { %v14033_v11 = vpop.f32.mrf.mxu1  ;;  %14134 = vmatprep.subr.mxu0 %v11755_v57 }
 0x674   :  { %14054 = vmatprep.mubr.msk.f32.mxu1 %vm558_vm1, %v2712_v50  ;;  %v2715_v27 = vmul.f32 %v15605_v48, %v14033_v11  ;;  %v11754_v50 = vld [vmem:[%s19831_s3 + $0x40] sm:$0xff]  ;;  %14135 = vmatpush3.msra.mxu0 %v11755_v57  ;;  %v1509_v48 = vadd.f32 %v16784_v4, %v11474_v55 }
 0x675   :  { %v2675_v32 = vpop.f32.mrf.mxu1  ;;  %14055 = vmatmul.mubr.msk.f32.gmra.mxu1 %vm558_vm1, %v2713_v26  ;;  %14136 = vmatprep.subr.mxu0 %v11754_v50  ;;  %v1507_v26 = vadd.f32 %v16776_v62, %v11474_v55 }
 0x676   :  { %v2714_v47 = vmul.f32 %v15603_v25, %v2675_v32  ;;  %14137 = vmatpush3.msra.mxu0 %v11754_v50  ;;  %v3085_v50 = vmul.f32 0.5, %v17169_v29 }
 0x677   :  { %v14036_v14 = vpop.f32.mrf.mxu1  ;;  %14139 = vmatmul.mubr.msk.f32.vlgmr.msra.gmra.mxu0 %vm50_vm0, %v17067_v33 }
 0x678   :  { %14057 = vmatprep.mubr.msk.f32.mxu1 %vm558_vm1, %v2714_v47  ;;  %v2717_v19 = vmul.f32 %v15609_v17, %v14036_v14  ;;  %14141 = vmatprep.mubr.msk.f32.mxu0 %vm50_vm0, %v17074_v34  ;;  %v1511_v14 = vadd.f32 %v16792_v41, %v11474_v55  ;;  %v1513_v17 = vadd.f32 %v16800_v3, %v11474_v55 }
 0x679   :  { %v2685_v16 = vpop.f32.mrf.mxu1  ;;  %14058 = vmatmul.mubr.msk.f32.gmra.mxu1 %vm558_vm1, %v2715_v27 }
 0x67a   :  { %v2716_v18 = vmul.f32 %v15607_v15, %v2685_v16 }
 0x67b   :  { %v14039_v20 = vpop.f32.mrf.mxu1  ;;  %14142 = vmatmul.mubr.msk.f32.gmra.mxu0 %vm50_vm0, %v17081_v35 }
 0x67c   :  { %14060 = vmatprep.mubr.msk.f32.mxu1 %vm558_vm1, %v2716_v18  ;;  %v2719_v12 = vmul.f32 %v15613_v22, %v14039_v20  ;;  %14144 = vmatprep.mubr.msk.f32.mxu0 %vm50_vm0, %v17088_v7 }
 0x67d   :  { %v2695_v2 = vpop.f32.mrf.mxu1  ;;  %14061 = vmatmul.mubr.msk.f32.gmra.mxu1 %vm558_vm1, %v2717_v19 }
 0x67e   :  { %v2718_v23 = vmul.f32 %v15611_v21, %v2695_v2 }
 0x67f   :  { %14145 = vmatmul.mubr.msk.f32.gmra.mxu0 %vm50_vm0, %v17095_v37 }
 0x680   :  { %14063 = vmatprep.mubr.msk.f32.mxu1 %vm558_vm1, %v2718_v23  ;;  %14147 = vmatprep.mubr.msk.f32.mxu0 %vm50_vm0, %v17102_v0 }
 0x681   :  { %14064 = vmatmul.mubr.msk.f32.gmra.mxu1 %vm558_vm1, %v2719_v12 }
 0x682   :  { %14106 = vmatprep.mubr.msk.f32.mxu1 %vm50_vm0, %v17060_v24 }
 0x683   :  { %14148 = vmatmul.mubr.msk.f32.gmra.mxu0 %vm50_vm0, %v17109_v8 }
 0x684   :  { %14150 = vmatprep.mubr.msk.f32.mxu0 %vm50_vm0, %v17116_v1 }
 0x685   :  { %14107 = vmatmul.mubr.msk.f32.vlgmr.msra.gmra.mxu1 %vm50_vm0, %v17067_v33 }
 0x686   :  { %14109 = vmatprep.mubr.msk.f32.mxu1 %vm50_vm0, %v17074_v34 }
 0x687   :  { %14151 = vmatmul.mubr.msk.f32.gmra.mxu0 %vm50_vm0, %v17123_v36 }
 0x688   :  { %14153 = vmatprep.mubr.msk.f32.mxu0 %vm50_vm0, %v17130_v13 }
 0x689   :  { %14110 = vmatmul.mubr.msk.f32.gmra.mxu1 %vm50_vm0, %v17081_v35 }
 0x68a   :  { %14112 = vmatprep.mubr.msk.f32.mxu1 %vm50_vm0, %v17088_v7 }
 0x68b   :  { %14154 = vmatmul.mubr.msk.f32.gmra.mxu0 %vm50_vm0, %v17137_v51 }
 0x68c   :  { %14156 = vmatprep.mubr.msk.f32.mxu0 %vm50_vm0, %v17144_v45 }
 0x68d   :  { %14113 = vmatmul.mubr.msk.f32.gmra.mxu1 %vm50_vm0, %v17095_v37 }
 0x68e   :  { %14115 = vmatprep.mubr.msk.f32.mxu1 %vm50_vm0, %v17102_v0 }
 0x68f   :  { %14157 = vmatmul.mubr.msk.f32.gmra.mxu0 %vm50_vm0, %v17151_v42 }
 0x690   :  { %14159 = vmatprep.mubr.msk.f32.mxu0 %vm50_vm0, %v17158_v61 }
 0x691   :  { %14116 = vmatmul.mubr.msk.f32.gmra.mxu1 %vm50_vm0, %v17109_v8 }
 0x692   :  { %14118 = vmatprep.mubr.msk.f32.mxu1 %vm50_vm0, %v17116_v1 }
 0x693   :  { %14160 = vmatmul.mubr.msk.f32.gmra.mxu0 %vm50_vm0, %v17165_v9 }
 0x695   :  { %14119 = vmatmul.mubr.msk.f32.gmra.mxu1 %vm50_vm0, %v17123_v36 }
 0x696   :  { %14121 = vmatprep.mubr.msk.f32.mxu1 %vm50_vm0, %v17130_v13 }
 0x699   :  { %14122 = vmatmul.mubr.msk.f32.gmra.mxu1 %vm50_vm0, %v17137_v51 }
 0x69a   :  { %14124 = vmatprep.mubr.msk.f32.mxu1 %vm50_vm0, %v17144_v45 }
 0x69d   :  { %14125 = vmatmul.mubr.msk.f32.gmra.mxu1 %vm50_vm0, %v17151_v42 }
 0x69e   :  { %14127 = vmatprep.mubr.msk.f32.mxu1 %vm50_vm0, %v17158_v61 }
 0x6a1   :  { %14128 = vmatmul.mubr.msk.f32.gmra.mxu1 %vm50_vm0, %v17165_v9 }
 0x6a2   :  { %14178 = vmatprep.mubr.msk.f32.mxu1 %vm558_vm1, %v3084_v58 }
 0x715   :  { %v14044_v53 = vpop.f32.mrf.mxu1 }
 0x716   :  { %v17176_v31 = vadd.f32 %v14044_v53, %v1499_v49  ;;  %v14079_v49 = vpop.f32.mrf.mxu0 }
 0x717   :  { %v17178_v44 = vpop.f32.mrf.mxu1 }
 0x718   :  { %19842 = vst [vmem:[#allocation9_spill] sm:$0xff] %v17178_v44 }
 0x719   :  { %v14047_v39 = vpop.f32.mrf.mxu1 }
 0x71a   :  { %v17181_v59 = vadd.f32 %v14047_v39, %v1501_v10  ;;  %v3015_v10 = vpop.f32.mrf.mxu0 }
 0x71b   :  { %v17183_v56 = vpop.f32.mrf.mxu1 }
 0x71c   :  { %19843 = vst [vmem:[#allocation10_spill] sm:$0xff] %v17183_v56 }
 0x71d   :  { %v14050_v28 = vpop.f32.mrf.mxu1 }
 0x71e   :  { %v17186_v30 = vadd.f32 %v14050_v28, %v1503_v38  ;;  %v14082_v38 = vpop.f32.mrf.mxu0 }
 0x71f   :  { %v17194_v5 = vpop.f32.mrf.mxu1 }
 0x720   :  { %19844 = vst [vmem:[#allocation11_spill] sm:$0xff] %v17194_v5  ;;  %v3025_v63 = vpop.f32.mrf.mxu0 }
 0x721   :  { %v14053_v52 = vpop.f32.mrf.mxu1 }
 0x722   :  { %v17200_v46 = vadd.f32 %v14053_v52, %v1505_v54  ;;  %v14085_v54 = vpop.f32.mrf.mxu0  ;;  %v3086_v52 = vmul.f32 0.5, %v3015_v10 }
 0x723   :  { %v17217_v40 = vpop.f32.mrf.mxu1 }
 0x724   :  { %19845 = vst [vmem:[#allocation12_spill] sm:$0xff] %v17217_v40 }
 0x735   :  { %v14056_v11 = vpop.f32.mrf.mxu1 }
 0x736   :  { %v17224_v25 = vadd.f32 %v14056_v11, %v1507_v26  ;;  %v3087_v26 = vmul.f32 0.5, %v14079_v49  ;;  %v3035_v11 = vpop.f32.mrf.mxu0 }
 0x737   :  { %v17226_v32 = vpop.f32.mrf.mxu1  ;;  %v3090_v29 = vmul.f32 0.5, %v3035_v11 }
 0x738   :  { %19846 = vst [vmem:[#allocation13_spill] sm:$0xff] %v17226_v32 }
 0x739   :  { %v14059_v47 = vpop.f32.mrf.mxu1 }
 0x73a   :  { %v17233_v27 = vadd.f32 %v14059_v47, %v1509_v48  ;;  %v3088_v47 = vmul.f32 0.5, %v3025_v63 }
 0x73b   :  { %v17235_v62 = vpop.f32.mrf.mxu1 }
 0x73c   :  { %19847 = vst [vmem:[#allocation14_spill] sm:$0xff] %v17235_v62 }
 0x73d   :  { %v14062_v15 = vpop.f32.mrf.mxu1 }
 0x73e   :  { %v17242_v16 = vadd.f32 %v14062_v15, %v1511_v14  ;;  %v14088_v14 = vpop.f32.mrf.mxu0  ;;  %v3089_v15 = vmul.f32 0.5, %v14082_v38 }
 0x73f   :  { %v17244_v4 = vpop.f32.mrf.mxu1 }
 0x740   :  { %19848 = vst [vmem:[#allocation15_spill] sm:$0xff] %v17244_v4 }
 0x741   :  { %v14065_v18 = vpop.f32.mrf.mxu1 }
 0x742   :  { %v17251_v19 = vadd.f32 %v14065_v18, %v1513_v17  ;;  %v3045_v17 = vpop.f32.mrf.mxu0  ;;  %v3091_v18 = vmul.f32 0.5, %v14085_v54 }
 0x743   :  { %v17253_v41 = vpop.f32.mrf.mxu1 }
 0x744   :  { %19849 = vst [vmem:[#allocation16_spill] sm:$0xff] %v17253_v41 }
 0x745   :  { %v14108_v20 = vpop.f32.mrf.mxu1 }
 0x747   :  { %v3171_v21 = vpop.f32.mrf.mxu1 }
 0x749   :  { %v14111_v2 = vpop.f32.mrf.mxu1 }
 0x74b   :  { %v3181_v22 = vpop.f32.mrf.mxu1 }
 0x74d   :  { %v14114_v23 = vpop.f32.mrf.mxu1 }
 0x74f   :  { %v3191_v12 = vpop.f32.mrf.mxu1 }
 0x751   :  { %v14117_v43 = vpop.f32.mrf.mxu1 }
 0x752   :  { %14162 = vmatprep.subr.msk.mxu1 %vm558_vm1, %v14117_v43 }
 0x753   :  { %v3201_v3 = vpop.f32.mrf.mxu1  ;;  %14163 = vmatpush3.xpose.msk.msra.mxu1 %vm558_vm1, %v14117_v43  ;;  %v3093_v43 = vmul.f32 0.5, %v14088_v14 }
 0x754   :  { %14164 = vmatprep.subr.msk.mxu1 %vm558_vm1, %v3201_v3 }
 0x755   :  { %v14120_v58 = vpop.f32.mrf.mxu1 }
 0x757   :  { %14165 = vmatpush3.xpose.msk.msra.mxu1 %vm558_vm1, %v3201_v3  ;;  %v3211_v55 = vpop.f32.mrf.mxu1 }
 0x758   :  { %14166 = vmatprep.subr.msk.mxu1 %vm558_vm1, %v14114_v23 }
 0x759   :  { %v14123_v53 = vpop.f32.mrf.mxu1 }
 0x75b   :  { %14167 = vmatpush3.xpose.msk.msra.mxu1 %vm558_vm1, %v14114_v23  ;;  %v3221_v39 = vpop.f32.mrf.mxu1 }
 0x75c   :  { %14168 = vmatprep.subr.msk.mxu1 %vm558_vm1, %v3191_v12 }
 0x75d   :  { %v14126_v28 = vpop.f32.mrf.mxu1 }
 0x75f   :  { %14169 = vmatpush3.xpose.msk.msra.mxu1 %vm558_vm1, %v3191_v12  ;;  %v3231_v60 = vpop.f32.mrf.mxu1 }
 0x760   :  { %14170 = vmatprep.subr.msk.mxu1 %vm558_vm1, %v14111_v2 }
 0x761   :  { %v14129_v57 = vpop.f32.mrf.mxu1 }
 0x763   :  { %14171 = vmatpush3.xpose.msk.msra.mxu1 %vm558_vm1, %v14111_v2  ;;  %v3241_v48 = vpop.f32.mrf.mxu1 }
 0x764   :  { %14172 = vmatprep.subr.msk.mxu1 %vm558_vm1, %v3181_v22 }
 0x767   :  { %14173 = vmatpush3.xpose.msk.msra.mxu1 %vm558_vm1, %v3181_v22 }
 0x768   :  { %14174 = vmatprep.subr.msk.mxu1 %vm558_vm1, %v14108_v20 }
 0x76b   :  { %14175 = vmatpush3.xpose.msk.msra.mxu1 %vm558_vm1, %v14108_v20  ;;  %v3092_v20 = vmul.f32 0.5, %v3045_v17 }
 0x76c   :  { %14176 = vmatprep.subr.msk.mxu1 %vm558_vm1, %v3171_v21 }
 0x76f   :  { %14177 = vmatpush3.xpose.msk.msra.mxu1 %vm558_vm1, %v3171_v21  ;;  %v14091_v21 = vpop.f32.mrf.mxu0 }
 0x770   :  { %14218 = vmatprep.subr.msk.mxu1 %vm558_vm1, %v14129_v57 }
 0x771   :  { %v3055_v2 = vpop.f32.mrf.mxu0 }
 0x772   :  { %14179 = vmatmul.mubr.msk.f32.vlgmr.msra.gmra.mxu1 %vm558_vm1, %v3085_v50  ;;  %v3094_v12 = vmul.f32 0.5, %v3055_v2 }
 0x773   :  { %14219 = vmatpush3.xpose.msk.msra.mxu1 %vm558_vm1, %v14129_v57  ;;  %14181 = vmatprep.mubr.msk.f32.mxu1 %vm558_vm1, %v3086_v52  ;;  %v14094_v22 = vpop.f32.mrf.mxu0 }
 0x774   :  { %14220 = vmatprep.subr.msk.mxu1 %vm558_vm1, %v3241_v48 }
 0x775   :  { %v3065_v23 = vpop.f32.mrf.mxu0 }
 0x776   :  { %14182 = vmatmul.mubr.msk.f32.gmra.mxu1 %vm558_vm1, %v3087_v26  ;;  %v3096_v49 = vmul.f32 0.5, %v3065_v23 }
 0x777   :  { %14221 = vmatpush3.xpose.msk.msra.mxu1 %vm558_vm1, %v3241_v48  ;;  %14184 = vmatprep.mubr.msk.f32.mxu1 %vm558_vm1, %v3088_v47  ;;  %v14097_v3 = vpop.f32.mrf.mxu0 }
 0x778   :  { %14222 = vmatprep.subr.msk.mxu1 %vm558_vm1, %v14126_v28 }
 0x779   :  { %v3075_v10 = vpop.f32.mrf.mxu0 }
 0x77a   :  { %14185 = vmatmul.mubr.msk.f32.gmra.mxu1 %vm558_vm1, %v3089_v15 }
 0x77b   :  { %14223 = vmatpush3.xpose.msk.msra.mxu1 %vm558_vm1, %v14126_v28  ;;  %14187 = vmatprep.mubr.msk.f32.mxu1 %vm558_vm1, %v3090_v29  ;;  %v14140_v38 = vpop.f32.mrf.mxu0 }
 0x77c   :  { %14224 = vmatprep.subr.msk.mxu1 %vm558_vm1, %v3231_v60 }
 0x77d   :  { %v3321_v28 = vpop.f32.mrf.mxu0 }
 0x77e   :  { %14188 = vmatmul.mubr.msk.f32.gmra.mxu1 %vm558_vm1, %v3091_v18 }
 0x77f   :  { %14225 = vmatpush3.xpose.msk.msra.mxu1 %vm558_vm1, %v3231_v60  ;;  %14234 = vmatprep.mubr.msk.f32.mxu1 %vm558_vm1, %v3092_v20  ;;  %v14143_v63 = vpop.f32.mrf.mxu0 }
 0x780   :  { %14226 = vmatprep.subr.msk.mxu1 %vm558_vm1, %v14123_v53 }
 0x781   :  { %v3331_v60 = vpop.f32.mrf.mxu0 }
 0x783   :  { %14227 = vmatpush3.xpose.msk.msra.mxu1 %vm558_vm1, %v14123_v53  ;;  %v3095_v53 = vmul.f32 0.5, %v14091_v21  ;;  %v14146_v54 = vpop.f32.mrf.mxu0 }
 0x784   :  { %14228 = vmatprep.subr.msk.mxu1 %vm558_vm1, %v3221_v39 }
 0x785   :  { %v3341_v57 = vpop.f32.mrf.mxu0 }
 0x787   :  { %14229 = vmatpush3.xpose.msk.msra.mxu1 %vm558_vm1, %v3221_v39  ;;  %v3097_v39 = vmul.f32 0.5, %v14094_v22  ;;  %v14149_v52 = vpop.f32.mrf.mxu0 }
 0x788   :  { %14230 = vmatprep.subr.msk.mxu1 %vm558_vm1, %v14120_v58  ;;  %14190 = vmatprep.subr.mxu0 %v14149_v52 }
 0x789   :  { %v3351_v50 = vpop.f32.mrf.mxu0  ;;  %14191 = vmatpush3.msra.mxu0 %v14149_v52 }
 0x78a   :  { %14192 = vmatprep.subr.mxu0 %v3351_v50 }
 0x78b   :  { %14231 = vmatpush3.xpose.msk.msra.mxu1 %vm558_vm1, %v14120_v58  ;;  %v3098_v58 = vmul.f32 0.5, %v3075_v10  ;;  %14193 = vmatpush3.msra.mxu0 %v3351_v50 }
 0x78c   :  { %14232 = vmatprep.subr.msk.mxu1 %vm558_vm1, %v3211_v55  ;;  %14194 = vmatprep.subr.mxu0 %v14146_v54 }
 0x78d   :  { %14195 = vmatpush3.msra.mxu0 %v14146_v54 }
 0x78e   :  { %14196 = vmatprep.subr.mxu0 %v3341_v57 }
 0x78f   :  { %14233 = vmatpush3.xpose.msk.msra.mxu1 %vm558_vm1, %v3211_v55  ;;  %v3099_v55 = vmul.f32 0.5, %v14097_v3  ;;  %14197 = vmatpush3.msra.mxu0 %v3341_v57  ;;  %v17327_v3 = vpop.f32.mrf.mxu0 }
 0x790   :  { %14198 = vmatprep.subr.mxu0 %v14143_v63 }
 0x791   :  { %14199 = vmatpush3.msra.mxu0 %v14143_v63 }
 0x792   :  { %14235 = vmatmul.mubr.msk.f32.vlgmr.msra.gmra.mxu1 %vm558_vm1, %v3093_v43  ;;  %14200 = vmatprep.subr.mxu0 %v3331_v60 }
 0x793   :  { %14237 = vmatprep.mubr.msk.f32.mxu1 %vm558_vm1, %v3094_v12  ;;  %14201 = vmatpush3.msra.mxu0 %v3331_v60 }
 0x794   :  { %14202 = vmatprep.subr.mxu0 %v14140_v38 }
 0x795   :  { %14203 = vmatpush3.msra.mxu0 %v14140_v38 }
 0x796   :  { %14238 = vmatmul.mubr.msk.f32.gmra.mxu1 %vm558_vm1, %v3095_v53  ;;  %14204 = vmatprep.subr.mxu0 %v3321_v28 }
 0x797   :  { %14240 = vmatprep.mubr.msk.f32.mxu1 %vm558_vm1, %v3096_v49  ;;  %14205 = vmatpush3.msra.mxu0 %v3321_v28  ;;  %v17329_v49 = vpop.f32.mrf.mxu0 }
 0x799   :  { %v17331_v53 = vpop.f32.mrf.mxu0 }
 0x79a   :  { %14241 = vmatmul.mubr.msk.f32.gmra.mxu1 %vm558_vm1, %v3097_v39 }
 0x79b   :  { %14243 = vmatprep.mubr.msk.f32.mxu1 %vm558_vm1, %v3098_v58  ;;  %v17333_v10 = vpop.f32.mrf.mxu0 }
 0x79d   :  { %v17335_v58 = vpop.f32.mrf.mxu0 }
 0x79e   :  { %14244 = vmatmul.mubr.msk.f32.gmra.mxu1 %vm558_vm1, %v3099_v55 }
 0x79f   :  { %14308 = vmatprep.mubr.msk.f32.mxu1 %vm50_vm0, %v17060_v24  ;;  %v17337_v39 = vpop.f32.mrf.mxu0 }
 0x7a1   :  { %v17343_v28 = vpop.f32.mrf.mxu0 }
 0x7a2   :  { %14246 = vmatprep.subr.mxu0 %v17343_v28 }
 0x832   :  { %v14180_v26 = vpop.f32.mrf.mxu1 }
 0x833   :  { %v3556_v11 = vsel %vm712_vm2, %v14180_v26, -inf }
 0x834   :  { %3557 = vmax.xlane.f32.xlu1 %v3556_v11  ;;  %v3514_v48 = vpop.f32.mrf.mxu1 }
 0x835   :  { %v3553_v47 = vsel %vm712_vm2, %v3514_v48, -inf }
 0x836   :  { %3554 = vmax.xlane.f32.xlu0 %v3553_v47  ;;  %v14183_v14 = vpop.f32.mrf.mxu1 }
 0x837   :  { %v3562_v15 = vsel %vm712_vm2, %v14183_v14, -inf }
 0x838   :  { %3563 = vmax.xlane.f32.xlu1 %v3562_v15  ;;  %v3524_v29 = vpop.f32.mrf.mxu1 }
 0x839   :  { %v3559_v17 = vsel %vm712_vm2, %v3524_v29, -inf }
 0x83a   :  { %3560 = vmax.xlane.f32.xlu0 %v3559_v17  ;;  %v17311_v18 = vpop.f32.mrf.mxu1 }
 0x83b   :  { %v3568_v20 = vsel %vm712_vm2, %v17311_v18, -inf }
 0x83c   :  { %3569 = vmax.xlane.f32.xlu1 %v3568_v20  ;;  %v17315_v21 = vpop.f32.mrf.mxu1 }
 0x83d   :  { %v3565_v2 = vsel %vm712_vm2, %v17315_v21, -inf }
 0x83e   :  { %3566 = vmax.xlane.f32.xlu0 %v3565_v2  ;;  %v17319_v22 = vpop.f32.mrf.mxu1 }
 0x83f   :  { %v3574_v23 = vsel %vm712_vm2, %v17319_v22, -inf }
 0x840   :  { %3575 = vmax.xlane.f32.xlu1 %v3574_v23  ;;  %v17323_v12 = vpop.f32.mrf.mxu1 }
 0x841   :  { %v3571_v43 = vsel %vm712_vm2, %v17323_v12, -inf }
 0x842   :  { %3572 = vmax.xlane.f32.xlu0 %v3571_v43 }
 0x852   :  { %v17339_v55 = vpop.f32.mrf.mxu1 }
 0x853   :  { %v3926_v38 = vsel %vm712_vm2, %v17339_v55, -inf }
 0x854   :  { %3927 = vmax.xlane.f32.xlu1 %v3926_v38  ;;  %v17345_v63 = vpop.f32.mrf.mxu1 }
 0x855   :  { %v3923_v60 = vsel %vm712_vm2, %v17345_v63, -inf }
 0x856   :  { %v17350_v54 = vpop.f32.mrf.mxu1  ;;  %3924 = vmax.xlane.f32.xlu0 %v3923_v60 }
 0x857   :  { %v3932_v57 = vsel %vm712_vm2, %v17350_v54, -inf }
 0x858   :  { %3933 = vmax.xlane.f32.xlu1 %v3932_v57  ;;  %v17354_v52 = vpop.f32.mrf.mxu1 }
 0x859   :  { %v3929_v50 = vsel %vm712_vm2, %v17354_v52, -inf }
 0x85a   :  { %v17358_v11 = vpop.f32.mrf.mxu1  ;;  %3930 = vmax.xlane.f32.xlu0 %v3929_v50 }
 0x85b   :  { %v3938_v47 = vsel %vm712_vm2, %v17358_v11, -inf }
 0x85c   :  { %3939 = vmax.xlane.f32.xlu1 %v3938_v47  ;;  %v17362_v15 = vpop.f32.mrf.mxu1 }
 0x85d   :  { %v3935_v17 = vsel %vm712_vm2, %v17362_v15, -inf }
 0x85e   :  { %v17366_v20 = vpop.f32.mrf.mxu1  ;;  %3936 = vmax.xlane.f32.xlu0 %v3935_v17 }
 0x85f   :  { %v3944_v2 = vsel %vm712_vm2, %v17366_v20, -inf }
 0x860   :  { %3945 = vmax.xlane.f32.xlu1 %v3944_v2  ;;  %v17370_v23 = vpop.f32.mrf.mxu1 }
 0x861   :  { %v3941_v43 = vsel %vm712_vm2, %v17370_v23, -inf }
 0x862   :  { %3942 = vmax.xlane.f32.xlu0 %v3941_v43 }
 0x8bd   :  { %v3558_v38 = vpop.xlane.xlu1 %3557 }
 0x8be   :  { %v3578_v60 = vsub.f32 %v14180_v26, %v3558_v38 }
 0x8bf   :  { %v3555_v57 = vpop.xlane.xlu0 %3554 }
 0x8c0   :  { %v3587_v50 = vmul.f32 1.442695, %v3578_v60  ;;  %v3577_v47 = vsub.f32 %v3514_v48, %v3555_v57 }
 0x8c1   :  { %v3564_v41 = vpop.xlane.xlu1 %3563 }
 0x8c2   :  { %15614 = vpow2.f32 %v3587_v50  ;;  %v3585_v4 = vmul.f32 1.442695, %v3577_v47  ;;  %v3580_v62 = vsub.f32 %v14183_v14, %v3564_v41 }
 0x8c3   :  { %v3561_v17 = vpop.xlane.xlu0 %3560 }
 0x8c4   :  { %15616 = vpow2.f32 %v3585_v4  ;;  %v3591_v32 = vmul.f32 1.442695, %v3580_v62  ;;  %v3579_v40 = vsub.f32 %v3524_v29, %v3561_v17 }
 0x8c5   :  { %v3570_v2 = vpop.xlane.xlu1 %3569 }
 0x8c6   :  { %15618 = vpow2.f32 %v3591_v32  ;;  %v3589_v5 = vmul.f32 1.442695, %v3579_v40  ;;  %v3582_v56 = vsub.f32 %v17311_v18, %v3570_v2 }
 0x8c7   :  { %v3567_v44 = vpop.xlane.xlu0 %3566 }
 0x8c8   :  { %15620 = vpow2.f32 %v3589_v5  ;;  %v3595_v43 = vmul.f32 1.442695, %v3582_v56  ;;  %v3581_v26 = vsub.f32 %v17315_v21, %v3567_v44  ;;  %v3391_v44 = vpop.f32.mrf.mxu0 }
 0x8c9   :  { %v3576_v38 = vpop.xlane.xlu1 %3575 }
 0x8ca   :  { %15622 = vpow2.f32 %v3595_v43  ;;  %v3593_v48 = vmul.f32 1.442695, %v3581_v26  ;;  %v3584_v60 = vsub.f32 %v17319_v22, %v3576_v38 }
 0x8cb   :  { %v3573_v41 = vpop.xlane.xlu0 %3572 }
 0x8cc   :  { %15624 = vpow2.f32 %v3593_v48  ;;  %v3599_v4 = vmul.f32 1.442695, %v3584_v60  ;;  %v3583_v62 = vsub.f32 %v17323_v12, %v3573_v41 }
 0x8ce   :  { %15626 = vpow2.f32 %v3599_v4  ;;  %v3597_v32 = vmul.f32 1.442695, %v3583_v62 }
 0x8cf   :  { %v15615_v40 = vpop.eup %15614 }
 0x8d0   :  { %15628 = vpow2.f32 %v3597_v32  ;;  %v3604_v14 = vsel %vm712_vm2, %v15615_v40, 0.0 }
 0x8d1   :  { %v15617_v5 = vpop.eup %15616  ;;  %3605 = vadd.xlane.f32.xlu1 %v3604_v14 }
 0x8d2   :  { %14206 = vmatprep.mubr.msk.f32.mxu0 %vm712_vm2, %v15617_v5  ;;  %v3601_v56 = vsel %vm712_vm2, %v15617_v5, 0.0 }
 0x8d3   :  { %v15619_v29 = vpop.eup %15618  ;;  %14207 = vmatmul.mubr.msk.f32.vlgmr.msra.gmra.mxu0 %vm712_vm2, %v15615_v40  ;;  %3602 = vadd.xlane.f32.xlu0 %v3601_v56 }
 0x8d4   :  { %14247 = vmatpush3.msra.mxu0 %v17343_v28  ;;  %v3610_v18 = vsel %vm712_vm2, %v15619_v29, 0.0 }
 0x8d5   :  { %v15621_v21 = vpop.eup %15620  ;;  %14248 = vmatprep.subr.mxu0 %v3391_v44  ;;  %3611 = vadd.xlane.f32.xlu1 %v3610_v18 }
 0x8d6   :  { %14249 = vmatpush3.msra.mxu0 %v3391_v44  ;;  %14209 = vmatprep.mubr.msk.f32.mxu0 %vm712_vm2, %v15621_v21  ;;  %v3607_v22 = vsel %vm712_vm2, %v15621_v21, 0.0 }
 0x8d7   :  { %v15623_v12 = vpop.eup %15622  ;;  %14250 = vmatprep.subr.mxu0 %v17335_v58  ;;  %14210 = vmatmul.mubr.msk.f32.gmra.mxu0 %vm712_vm2, %v15619_v29 }
 0x8d8   :  { %14251 = vmatpush3.msra.mxu0 %v17335_v58  ;;  %3608 = vadd.xlane.f32.xlu0 %v3607_v22  ;;  %v3616_v28 = vsel %vm712_vm2, %v15623_v12, 0.0 }
 0x8d9   :  { %v15625_v57 = vpop.eup %15624  ;;  %14252 = vmatprep.subr.mxu0 %v17337_v39  ;;  %3617 = vadd.xlane.f32.xlu1 %v3616_v28 }
 0x8da   :  { %14253 = vmatpush3.msra.mxu0 %v17337_v39  ;;  %14212 = vmatprep.mubr.msk.f32.mxu0 %vm712_vm2, %v15625_v57  ;;  %v3613_v50 = vsel %vm712_vm2, %v15625_v57, 0.0 }
 0x8db   :  { %v15627_v47 = vpop.eup %15626  ;;  %14254 = vmatprep.subr.mxu0 %v17331_v53  ;;  %14213 = vmatmul.mubr.msk.f32.gmra.mxu0 %vm712_vm2, %v15623_v12 }
 0x8dc   :  { %14255 = vmatpush3.msra.mxu0 %v17331_v53  ;;  %3614 = vadd.xlane.f32.xlu0 %v3613_v50  ;;  %v3622_v58 = vsel %vm712_vm2, %v15627_v47, 0.0 }
 0x8dd   :  { %v15629_v17 = vpop.eup %15628  ;;  %14256 = vmatprep.subr.mxu0 %v17333_v10  ;;  %v3928_v2 = vpop.xlane.xlu1 %3927  ;;  %3623 = vadd.xlane.f32.xlu1 %v3622_v58 }
 0x8de   :  { %14257 = vmatpush3.msra.mxu0 %v17333_v10  ;;  %v3948_v39 = vsub.f32 %v17339_v55, %v3928_v2  ;;  %14215 = vmatprep.mubr.msk.f32.mxu0 %vm712_vm2, %v15629_v17  ;;  %v3619_v43 = vsel %vm712_vm2, %v15629_v17, 0.0 }
 0x8df   :  { %14258 = vmatprep.subr.mxu0 %v17327_v3  ;;  %14216 = vmatmul.mubr.msk.f32.gmra.mxu0 %vm712_vm2, %v15627_v47  ;;  %v3925_v53 = vpop.xlane.xlu0 %3924 }
 0x8e0   :  { %v3957_v26 = vmul.f32 1.442695, %v3948_v39  ;;  %14259 = vmatpush3.msra.mxu0 %v17327_v3  ;;  %3620 = vadd.xlane.f32.xlu0 %v3619_v43  ;;  %v3947_v38 = vsub.f32 %v17345_v63, %v3925_v53  ;;  %v11822_v43 = vld [vmem:[%s19832_s4 + $0x8] sm:$0xf]  ;;  %v11863_v53 = vld [vmem:[%s19828_s2 + $0x78] sm:$0xff] }
 0x8e1   :  { %14260 = vmatprep.subr.mxu0 %v17329_v49  ;;  %v3934_v10 = vpop.xlane.xlu1 %3933 }
 0x8e2   :  { %15630 = vpow2.f32 %v3957_v26  ;;  %v3955_v55 = vmul.f32 1.442695, %v3947_v38  ;;  %14261 = vmatpush3.msra.mxu0 %v17329_v49  ;;  %v3950_v48 = vsub.f32 %v17350_v54, %v3934_v10  ;;  %v11843_v26 = vld [vmem:[%s19830_s1 + $0x78] sm:$0xff]  ;;  %v11842_v38 = vld [vmem:[%s19830_s1 + $0x70] sm:$0xff]  ;;  %v11841_v10 = vld [vmem:[%s19830_s1 + $0x68] sm:$0xff] }
 0x8e3   :  { %v3931_v60 = vpop.xlane.xlu0 %3930  ;;  %14274 = vmatprep.subr.msk.mxu0 %vm1349_vm3, %v11822_v43  ;;  %14300 = vmatprep.subr.mxu1 %v11843_v26 }
 0x8e4   :  { %15632 = vpow2.f32 %v3955_v55  ;;  %v3961_v41 = vmul.f32 1.442695, %v3950_v48  ;;  %v3949_v4 = vsub.f32 %v17354_v52, %v3931_v60  ;;  %14301 = vmatpush3.msra.mxu1 %v11843_v26  ;;  %v11840_v55 = vld [vmem:[%s19830_s1 + $0x60] sm:$0xff] }
 0x8e5   :  { %v3940_v62 = vpop.xlane.xlu1 %3939  ;;  %14302 = vmatprep.subr.mxu1 %v11842_v38 }
 0x8e6   :  { %15634 = vpow2.f32 %v3961_v41  ;;  %v3959_v3 = vmul.f32 1.442695, %v3949_v4  ;;  %v3952_v32 = vsub.f32 %v17358_v11, %v3940_v62  ;;  %14303 = vmatpush3.msra.mxu1 %v11842_v38  ;;  %v11861_v62 = vld [vmem:[%s19828_s2 + $0x68] sm:$0xff] }
 0x8e7   :  { %v3937_v63 = vpop.xlane.xlu0 %3936  ;;  %14304 = vmatprep.subr.mxu1 %v11841_v10 }
 0x8e8   :  { %15636 = vpow2.f32 %v3959_v3  ;;  %v3965_v40 = vmul.f32 1.442695, %v3952_v32  ;;  %v3951_v14 = vsub.f32 %v17362_v15, %v3937_v63  ;;  %14305 = vmatpush3.msra.mxu1 %v11841_v10  ;;  %v11860_v63 = vld [vmem:[%s19828_s2 + $0x60] sm:$0xff] }
 0x8e9   :  { %v3946_v5 = vpop.xlane.xlu1 %3945  ;;  %14306 = vmatprep.subr.mxu1 %v11840_v55 }
 0x8ea   :  { %15638 = vpow2.f32 %v3965_v40  ;;  %v3963_v49 = vmul.f32 1.442695, %v3951_v14  ;;  %v3954_v54 = vsub.f32 %v17366_v20, %v3946_v5  ;;  %14307 = vmatpush3.msra.mxu1 %v11840_v55 }
 0x8eb   :  { %v3943_v44 = vpop.xlane.xlu0 %3942  ;;  %14309 = vmatmul.mubr.msk.f32.vlgmr.msra.gmra.mxu1 %vm50_vm0, %v17067_v33 }
 0x8ec   :  { %15640 = vpow2.f32 %v3963_v49  ;;  %v3969_v56 = vmul.f32 1.442695, %v3954_v54  ;;  %v3953_v52 = vsub.f32 %v17370_v23, %v3943_v44  ;;  %14311 = vmatprep.mubr.msk.f32.mxu1 %vm50_vm0, %v17074_v34 }
 0x8ee   :  { %15642 = vpow2.f32 %v3969_v56  ;;  %v3967_v29 = vmul.f32 1.442695, %v3953_v52 }
 0x8ef   :  { %v15631_v18 = vpop.eup %15630  ;;  %14312 = vmatmul.mubr.msk.f32.gmra.mxu1 %vm50_vm0, %v17081_v35 }
 0x8f0   :  { %15644 = vpow2.f32 %v3967_v29  ;;  %v3974_v11 = vsel %vm712_vm2, %v15631_v18, 0.0  ;;  %14314 = vmatprep.mubr.msk.f32.mxu1 %vm50_vm0, %v17088_v7 }
 0x8f1   :  { %v15633_v21 = vpop.eup %15632  ;;  %3975 = vadd.xlane.f32.xlu1 %v3974_v11 }
 0x8f2   :  { %14262 = vmatprep.mubr.msk.f32.mxu0 %vm712_vm2, %v15633_v21  ;;  %v3971_v15 = vsel %vm712_vm2, %v15633_v21, 0.0 }
 0x8f3   :  { %v15635_v22 = vpop.eup %15634  ;;  %14263 = vmatmul.mubr.msk.f32.vlgmr.msra.gmra.mxu0 %vm712_vm2, %v15631_v18  ;;  %3972 = vadd.xlane.f32.xlu0 %v3971_v15 }
 0x8f4   :  { %v3980_v20 = vsel %vm712_vm2, %v15635_v22, 0.0  ;;  %14275 = vmatpush3.msk.msra.mxu0 %vm1349_vm3, %v11822_v43  ;;  %14315 = vmatmul.mubr.msk.f32.gmra.mxu1 %vm50_vm0, %v17095_v37 }
 0x8f5   :  { %v15637_v12 = vpop.eup %15636  ;;  %3981 = vadd.xlane.f32.xlu1 %v3980_v20  ;;  %14332 = vmatprep.subr.mxu0 %v11863_v53 }
 0x8f6   :  { %14265 = vmatprep.mubr.msk.f32.mxu0 %vm712_vm2, %v15637_v12  ;;  %v3977_v23 = vsel %vm712_vm2, %v15637_v12, 0.0  ;;  %14317 = vmatprep.mubr.msk.f32.mxu1 %vm50_vm0, %v17102_v0 }
 0x8f7   :  { %v15639_v28 = vpop.eup %15638  ;;  %14266 = vmatmul.mubr.msk.f32.gmra.mxu0 %vm712_vm2, %v15635_v22  ;;  %3978 = vadd.xlane.f32.xlu0 %v3977_v23 }
 0x8f8   :  { %v3986_v57 = vsel %vm712_vm2, %v15639_v28, 0.0  ;;  %14318 = vmatmul.mubr.msk.f32.gmra.mxu1 %vm50_vm0, %v17109_v8 }
 0x8f9   :  { %v15641_v50 = vpop.eup %15640  ;;  %3987 = vadd.xlane.f32.xlu1 %v3986_v57  ;;  %14320 = vmatprep.mubr.msk.f32.mxu1 %vm50_vm0, %v17116_v1 }
 0x8fa   :  { %14268 = vmatprep.mubr.msk.f32.mxu0 %vm712_vm2, %v15641_v50  ;;  %v3983_v47 = vsel %vm712_vm2, %v15641_v50, 0.0 }
 0x8fb   :  { %v15643_v58 = vpop.eup %15642  ;;  %14269 = vmatmul.mubr.msk.f32.gmra.mxu0 %vm712_vm2, %v15639_v28  ;;  %3984 = vadd.xlane.f32.xlu0 %v3983_v47 }
 0x8fc   :  { %v3992_v17 = vsel %vm712_vm2, %v15643_v58, 0.0  ;;  %14321 = vmatmul.mubr.msk.f32.gmra.mxu1 %vm50_vm0, %v17123_v36 }
 0x8fd   :  { %v15645_v2 = vpop.eup %15644  ;;  %3993 = vadd.xlane.f32.xlu1 %v3992_v17  ;;  %14323 = vmatprep.mubr.msk.f32.mxu1 %vm50_vm0, %v17130_v13 }
 0x8fe   :  { %14271 = vmatprep.mubr.msk.f32.mxu0 %vm712_vm2, %v15645_v2  ;;  %v3989_v39 = vsel %vm712_vm2, %v15645_v2, 0.0 }
 0x8ff   :  { %14272 = vmatmul.mubr.msk.f32.gmra.mxu0 %vm712_vm2, %v15643_v58  ;;  %3990 = vadd.xlane.f32.xlu0 %v3989_v39 }
 0x900   :  { %14324 = vmatmul.mubr.msk.f32.gmra.mxu1 %vm50_vm0, %v17137_v51 }
 0x901   :  { %14326 = vmatprep.mubr.msk.f32.mxu1 %vm50_vm0, %v17144_v45 }
 0x904   :  { %14327 = vmatmul.mubr.msk.f32.gmra.mxu1 %vm50_vm0, %v17151_v42 }
 0x905   :  { %14329 = vmatprep.mubr.msk.f32.mxu1 %vm50_vm0, %v17158_v61 }
 0x908   :  { %14330 = vmatmul.mubr.msk.f32.gmra.mxu1 %vm50_vm0, %v17165_v9  ;;  %v11862_v9 = vld [vmem:[%s19828_s2 + $0x70] sm:$0xff] }
 0x909   :  { %14372 = vmatprep.mubr.msk.f32.mxu1 %vm50_vm0, %v17060_v24 }
 0x95a   :  { %v3606_v34 = vpop.xlane.xlu1 %3605 }
 0x95c   :  { %v3603_v33 = vpop.xlane.xlu0 %3602 }
 0x95d   :  { %15646 = vrcp.f32 %v3603_v33 }
 0x95e   :  { %v3612_v7 = vpop.xlane.xlu1 %3611  ;;  %15648 = vrcp.f32 %v3606_v34 }
 0x961   :  { %v3609_v35 = vpop.xlane.xlu0 %3608 }
 0x962   :  { %15650 = vrcp.f32 %v3609_v35  ;;  %v3618_v0 = vpop.xlane.xlu1 %3617 }
 0x963   :  { %15652 = vrcp.f32 %v3612_v7 }
 0x965   :  { %v3615_v37 = vpop.xlane.xlu0 %3614 }
 0x966   :  { %15654 = vrcp.f32 %v3615_v37  ;;  %v3624_v1 = vpop.xlane.xlu1 %3623 }
 0x967   :  { %15656 = vrcp.f32 %v3618_v0 }
 0x969   :  { %v3621_v8 = vpop.xlane.xlu0 %3620 }
 0x96a   :  { %15658 = vrcp.f32 %v3621_v8  ;;  %v15647_v13 = vpop.eup %15646 }
 0x96b   :  { %15660 = vrcp.f32 %v3624_v1  ;;  %v15649_v24 = vpop.eup %15648 }
 0x96f   :  { %v15651_v48 = vpop.eup %15650 }
 0x970   :  { %v15653_v41 = vpop.eup %15652 }
 0x973   :  { %v15655_v40 = vpop.eup %15654 }
 0x974   :  { %v15657_v5 = vpop.eup %15656 }
 0x977   :  { %v15659_v29 = vpop.eup %15658 }
 0x978   :  { %v15661_v11 = vpop.eup %15660 }
 0x97a   :  { %v3976_v52 = vpop.xlane.xlu1 %3975 }
 0x97c   :  { %v3973_v54 = vpop.xlane.xlu0 %3972 }
 0x97d   :  { %15662 = vrcp.f32 %v3973_v54 }
 0x97e   :  { %v3982_v20 = vpop.xlane.xlu1 %3981  ;;  %15664 = vrcp.f32 %v3976_v52 }
 0x980   :  { %v3979_v22 = vpop.xlane.xlu0 %3978 }
 0x981   :  { %15666 = vrcp.f32 %v3979_v22 }
 0x982   :  { %v3988_v23 = vpop.xlane.xlu1 %3987  ;;  %15668 = vrcp.f32 %v3982_v20 }
 0x984   :  { %v3985_v12 = vpop.xlane.xlu0 %3984 }
 0x985   :  { %15670 = vrcp.f32 %v3985_v12  ;;  %v11883_v12 = vld [vmem:[%s19831_s3 + $0x78] sm:$0xff] }
 0x986   :  { %15672 = vrcp.f32 %v3988_v23  ;;  %v3994_v57 = vpop.xlane.xlu1 %3993  ;;  %14364 = vmatprep.subr.mxu1 %v11883_v12 }
 0x987   :  { %14365 = vmatpush3.msra.mxu1 %v11883_v12 }
 0x988   :  { %v3991_v28 = vpop.xlane.xlu0 %3990 }
 0x989   :  { %15674 = vrcp.f32 %v3991_v28 }
 0x98a   :  { %v15663_v47 = vpop.eup %15662  ;;  %15676 = vrcp.f32 %v3994_v57  ;;  %v11880_v57 = vld [vmem:[%s19831_s3 + $0x60] sm:$0xff] }
 0x98b   :  { %v15665_v17 = vpop.eup %15664 }
 0x993   :  { %v14208_v36 = vpop.f32.mrf.mxu0 }
 0x994   :  { %v3763_v42 = vmul.f32 %v15649_v24, %v14208_v36 }
 0x995   :  { %v3715_v51 = vpop.f32.mrf.mxu0 }
 0x996   :  { %v3762_v45 = vmul.f32 %v15647_v13, %v3715_v51 }
 0x997   :  { %v14211_v61 = vpop.f32.mrf.mxu0 }
 0x998   :  { %14276 = vmatprep.mubr.msk.f32.mxu0 %vm558_vm1, %v3762_v45  ;;  %v3765_v3 = vmul.f32 %v15653_v41, %v14211_v61  ;;  %v17511_v45 = vld [vmem:[%s19829_s0] sm:$0xff]  ;;  %v17525_v61 = vld [vmem:[%s19829_s0 + $0x10] sm:$0xff] }
 0x999   :  { %v3725_v60 = vpop.f32.mrf.mxu0  ;;  %14277 = vmatmul.mubr.msk.f32.vlgmr.msra.gmra.mxu0 %vm558_vm1, %v3763_v42  ;;  %v17518_v42 = vld [vmem:[%s19829_s0 + $0x8] sm:$0xff]  ;;  %v17553_v41 = vld [vmem:[%s19829_s0 + $0x30] sm:$0xff] }
 0x99a   :  { %v3764_v4 = vmul.f32 %v15651_v48, %v3725_v60  ;;  %14333 = vmatpush3.msra.mxu0 %v11863_v53  ;;  %v15667_v53 = vpop.eup %15666  ;;  %v17539_v48 = vld [vmem:[%s19829_s0 + $0x20] sm:$0xff]  ;;  %v17546_v60 = vld [vmem:[%s19829_s0 + $0x28] sm:$0xff] }
 0x99b   :  { %v14214_v32 = vpop.f32.mrf.mxu0  ;;  %14334 = vmatprep.subr.mxu0 %v11862_v9  ;;  %v15669_v38 = vpop.eup %15668 }
 0x99c   :  { %14279 = vmatprep.mubr.msk.f32.mxu0 %vm558_vm1, %v3764_v4  ;;  %14335 = vmatpush3.msra.mxu0 %v11862_v9  ;;  %v3767_v44 = vmul.f32 %v15657_v5, %v14214_v32  ;;  %v15671_v34 = vpop.eup %15670  ;;  %v17532_v9 = vld [vmem:[%s19829_s0 + $0x18] sm:$0xff]  ;;  %v17581_v32 = vld [vmem:[%s19829_s0 + $0x50] sm:$0xff] }
 0x99d   :  { %v3735_v14 = vpop.f32.mrf.mxu0  ;;  %14280 = vmatmul.mubr.msk.f32.gmra.mxu0 %vm558_vm1, %v3765_v3  ;;  %14336 = vmatprep.subr.mxu0 %v11861_v62  ;;  %v15673_v7 = vpop.eup %15672  ;;  %v17560_v4 = vld [vmem:[%s19829_s0 + $0x38] sm:$0xff]  ;;  %v17574_v3 = vld [vmem:[%s19829_s0 + $0x48] sm:$0xff]  ;;  %v17609_v5 = vld [vmem:[%s19829_s0 + $0x70] sm:$0xff] }
 0x99e   :  { %v3766_v49 = vmul.f32 %v15655_v40, %v3735_v14  ;;  %14337 = vmatpush3.msra.mxu0 %v11861_v62  ;;  %v15675_v1 = vpop.eup %15674  ;;  %v17567_v62 = vld [vmem:[%s19829_s0 + $0x40] sm:$0xff]  ;;  %v17602_v14 = vld [vmem:[%s19829_s0 + $0x68] sm:$0xff] }
 0x99f   :  { %v14217_v56 = vpop.f32.mrf.mxu0  ;;  %14338 = vmatprep.subr.mxu0 %v11860_v63  ;;  %v15677_v13 = vpop.eup %15676  ;;  %v17595_v40 = vld [vmem:[%s19829_s0 + $0x60] sm:$0xff] }
 0x9a0   :  { %14282 = vmatprep.mubr.msk.f32.mxu0 %vm558_vm1, %v3766_v49  ;;  %14339 = vmatpush3.msra.mxu0 %v11860_v63  ;;  %v3769_v15 = vmul.f32 %v15661_v11, %v14217_v56  ;;  %v17588_v63 = vld [vmem:[%s19829_s0 + $0x58] sm:$0xff] }
 0x9a1   :  { %v3745_v18 = vpop.f32.mrf.mxu0  ;;  %14283 = vmatmul.mubr.msk.f32.gmra.mxu0 %vm558_vm1, %v3767_v44  ;;  %v17616_v49 = vld [vmem:[%s19829_s0 + $0x78] sm:$0xff] }
 0x9a2   :  { %v3768_v21 = vmul.f32 %v15659_v29, %v3745_v18 }
 0x9a4   :  { %14285 = vmatprep.mubr.msk.f32.mxu0 %vm558_vm1, %v3768_v21 }
 0x9a5   :  { %14286 = vmatmul.mubr.msk.f32.gmra.mxu0 %vm558_vm1, %v3769_v15 }
 0x9ab   :  { %v17620_v54 = vpop.f32.mrf.mxu1 }
 0x9ac   :  { %v4505_v12 = vmul.f32 0.5, %v17620_v54 }
 0x9ad   :  { %v4425_v44 = vpop.f32.mrf.mxu1 }
 0x9ae   :  { %v4504_v56 = vmul.f32 0.5, %v4425_v44 }
 0x9b3   :  { %v14264_v50 = vpop.f32.mrf.mxu0 }
 0x9b4   :  { %v4133_v39 = vmul.f32 %v15665_v17, %v14264_v50 }
 0x9b5   :  { %v4085_v58 = vpop.f32.mrf.mxu0 }
 0x9b6   :  { %v4132_v2 = vmul.f32 %v15663_v47, %v4085_v58 }
 0x9b7   :  { %v14267_v43 = vpop.f32.mrf.mxu0 }
 0x9b8   :  { %14288 = vmatprep.mubr.msk.f32.mxu0 %vm558_vm1, %v4132_v2  ;;  %v4135_v55 = vmul.f32 %v15669_v38, %v14267_v43 }
 0x9b9   :  { %v4095_v26 = vpop.f32.mrf.mxu0  ;;  %14289 = vmatmul.mubr.msk.f32.gmra.mxu0 %vm558_vm1, %v4133_v39 }
 0x9ba   :  { %v4134_v10 = vmul.f32 %v15667_v53, %v4095_v26 }
 0x9bb   :  { %v14270_v33 = vpop.f32.mrf.mxu0 }
 0x9bc   :  { %14291 = vmatprep.mubr.msk.f32.mxu0 %vm558_vm1, %v4134_v10  ;;  %v4137_v0 = vmul.f32 %v15673_v7, %v14270_v33 }
 0x9bd   :  { %v4105_v35 = vpop.f32.mrf.mxu0  ;;  %14292 = vmatmul.mubr.msk.f32.gmra.mxu0 %vm558_vm1, %v4135_v55 }
 0x9be   :  { %v4136_v37 = vmul.f32 %v15671_v34, %v4105_v35 }
 0x9bf   :  { %v14273_v8 = vpop.f32.mrf.mxu0 }
 0x9c0   :  { %14294 = vmatprep.mubr.msk.f32.mxu0 %vm558_vm1, %v4136_v37  ;;  %v4139_v24 = vmul.f32 %v15677_v13, %v14273_v8  ;;  %v14313_v8 = vpop.f32.mrf.mxu1 }
 0x9c1   :  { %v4115_v36 = vpop.f32.mrf.mxu0  ;;  %14295 = vmatmul.mubr.msk.f32.gmra.mxu0 %vm558_vm1, %v4137_v0 }
 0x9c2   :  { %v4138_v51 = vmul.f32 %v15675_v1, %v4115_v36  ;;  %v4435_v36 = vpop.f32.mrf.mxu1 }
 0x9c4   :  { %14297 = vmatprep.mubr.msk.f32.mxu0 %vm558_vm1, %v4138_v51  ;;  %v14316_v51 = vpop.f32.mrf.mxu1 }
 0x9c5   :  { %14298 = vmatmul.mubr.msk.f32.gmra.mxu0 %vm558_vm1, %v4139_v24 }
 0x9c6   :  { %14340 = vmatprep.mubr.msk.f32.mxu0 %vm50_vm0, %v17511_v45  ;;  %v4445_v44 = vpop.f32.mrf.mxu1 }
 0x9c9   :  { %14341 = vmatmul.mubr.msk.f32.vlgmr.msra.gmra.mxu0 %vm50_vm0, %v17518_v42 }
 0x9ca   :  { %14343 = vmatprep.mubr.msk.f32.mxu0 %vm50_vm0, %v17525_v61 }
 0x9cd   :  { %14344 = vmatmul.mubr.msk.f32.gmra.mxu0 %vm50_vm0, %v17532_v9 }
 0x9ce   :  { %14346 = vmatprep.mubr.msk.f32.mxu0 %vm50_vm0, %v17539_v48 }
 0x9d1   :  { %14347 = vmatmul.mubr.msk.f32.gmra.mxu0 %vm50_vm0, %v17546_v60 }
 0x9d2   :  { %14349 = vmatprep.mubr.msk.f32.mxu0 %vm50_vm0, %v17553_v41 }
 0x9d5   :  { %14350 = vmatmul.mubr.msk.f32.gmra.mxu0 %vm50_vm0, %v17560_v4 }
 0x9d6   :  { %14352 = vmatprep.mubr.msk.f32.mxu0 %vm50_vm0, %v17567_v62 }
 0x9d9   :  { %14353 = vmatmul.mubr.msk.f32.gmra.mxu0 %vm50_vm0, %v17574_v3 }
 0x9da   :  { %14355 = vmatprep.mubr.msk.f32.mxu0 %vm50_vm0, %v17581_v32 }
 0x9dd   :  { %14356 = vmatmul.mubr.msk.f32.gmra.mxu0 %vm50_vm0, %v17588_v63 }
 0x9de   :  { %14358 = vmatprep.mubr.msk.f32.mxu0 %vm50_vm0, %v17595_v40 }
 0x9e1   :  { %14359 = vmatmul.mubr.msk.f32.gmra.mxu0 %vm50_vm0, %v17602_v14 }
 0x9e2   :  { %14361 = vmatprep.mubr.msk.f32.mxu0 %vm50_vm0, %v17609_v5 }
 0x9e5   :  { %14362 = vmatmul.mubr.msk.f32.gmra.mxu0 %vm50_vm0, %v17616_v49 }
 0x9e6   :  { %14412 = vmatprep.mubr.msk.f32.mxu0 %vm558_vm1, %v4504_v56 }
 0xa59   :  { %v14278_v52 = vpop.f32.mrf.mxu0 }
 0xa5a   :  { %v17624_v29 = vadd.f32 %v14278_v52, %v17176_v31  ;;  %v11882_v31 = vld [vmem:[%s19831_s3 + $0x70] sm:$0xff]  ;;  %v14319_v52 = vpop.f32.mrf.mxu1 }
 0xa5b   :  { %v17626_v18 = vpop.f32.mrf.mxu0  ;;  %14366 = vmatprep.subr.mxu1 %v11882_v31 }
 0xa5c   :  { %19850 = vst [vmem:[#allocation17_spill] sm:$0xff] %v17626_v18  ;;  %14367 = vmatpush3.msra.mxu1 %v11882_v31  ;;  %v4507_v31 = vmul.f32 0.5, %v14313_v8 }
 0xa5d   :  { %v14281_v11 = vpop.f32.mrf.mxu0 }
 0xa5e   :  { %v17629_v21 = vadd.f32 %v14281_v11, %v17181_v59  ;;  %v11881_v59 = vld [vmem:[%s19831_s3 + $0x68] sm:$0xff] }
 0xa5f   :  { %v17631_v15 = vpop.f32.mrf.mxu0  ;;  %14368 = vmatprep.subr.mxu1 %v11881_v59 }
 0xa60   :  { %19851 = vst [vmem:[#allocation18_spill] sm:$0xff] %v17631_v15  ;;  %14369 = vmatpush3.msra.mxu1 %v11881_v59  ;;  %v4455_v59 = vpop.f32.mrf.mxu1 }
 0xa61   :  { %v14284_v22 = vpop.f32.mrf.mxu0  ;;  %14370 = vmatprep.subr.mxu1 %v11880_v57  ;;  %v4510_v54 = vmul.f32 0.5, %v4455_v59 }
 0xa62   :  { %v17634_v20 = vadd.f32 %v14284_v22, %v17186_v30  ;;  %14371 = vmatpush3.msra.mxu1 %v11880_v57  ;;  %v4506_v22 = vmul.f32 0.5, %v4435_v36  ;;  %v4508_v57 = vmul.f32 0.5, %v4445_v44 }
 0xa63   :  { %v17642_v23 = vpop.f32.mrf.mxu0  ;;  %14373 = vmatmul.mubr.msk.f32.vlgmr.msra.gmra.mxu1 %vm50_vm0, %v17518_v42 }
 0xa64   :  { %19852 = vst [vmem:[#allocation19_spill] sm:$0xff] %v17642_v23  ;;  %14375 = vmatprep.mubr.msk.f32.mxu1 %vm50_vm0, %v17525_v61 }
 0xa65   :  { %v14287_v28 = vpop.f32.mrf.mxu0 }
 0xa66   :  { %v17648_v30 = vadd.f32 %v14287_v28, %v17200_v46 }
 0xa67   :  { %14376 = vmatmul.mubr.msk.f32.gmra.mxu1 %vm50_vm0, %v17532_v9  ;;  %v17665_v46 = vpop.f32.mrf.mxu0 }
 0xa68   :  { %14378 = vmatprep.mubr.msk.f32.mxu1 %vm50_vm0, %v17539_v48  ;;  %19853 = vst [vmem:[#allocation20_spill] sm:$0xff] %v17665_v46 }
 0xa6b   :  { %14379 = vmatmul.mubr.msk.f32.gmra.mxu1 %vm50_vm0, %v17546_v60 }
 0xa6c   :  { %14381 = vmatprep.mubr.msk.f32.mxu1 %vm50_vm0, %v17553_v41 }
 0xa6f   :  { %14382 = vmatmul.mubr.msk.f32.gmra.mxu1 %vm50_vm0, %v17560_v4 }
 0xa70   :  { %14384 = vmatprep.mubr.msk.f32.mxu1 %vm50_vm0, %v17567_v62 }
 0xa73   :  { %14385 = vmatmul.mubr.msk.f32.gmra.mxu1 %vm50_vm0, %v17574_v3 }
 0xa74   :  { %14387 = vmatprep.mubr.msk.f32.mxu1 %vm50_vm0, %v17581_v32 }
 0xa77   :  { %14388 = vmatmul.mubr.msk.f32.gmra.mxu1 %vm50_vm0, %v17588_v63 }
 0xa78   :  { %14390 = vmatprep.mubr.msk.f32.mxu1 %vm50_vm0, %v17595_v40 }
 0xa79   :  { %v14290_v50 = vpop.f32.mrf.mxu0 }
 0xa7a   :  { %v17672_v47 = vadd.f32 %v14290_v50, %v17224_v25  ;;  %v14322_v50 = vpop.f32.mrf.mxu1 }
 0xa7b   :  { %v17674_v58 = vpop.f32.mrf.mxu0  ;;  %14391 = vmatmul.mubr.msk.f32.gmra.mxu1 %vm50_vm0, %v17602_v14 }
 0xa7c   :  { %19854 = vst [vmem:[#allocation21_spill] sm:$0xff] %v17674_v58  ;;  %14393 = vmatprep.mubr.msk.f32.mxu1 %vm50_vm0, %v17609_v5 }
 0xa7d   :  { %v14293_v17 = vpop.f32.mrf.mxu0 }
 0xa7e   :  { %v17681_v2 = vadd.f32 %v14293_v17, %v17233_v27  ;;  %v4509_v17 = vmul.f32 0.5, %v14316_v51 }
 0xa7f   :  { %v17683_v39 = vpop.f32.mrf.mxu0  ;;  %14394 = vmatmul.mubr.msk.f32.gmra.mxu1 %vm50_vm0, %v17616_v49 }
 0xa80   :  { %19855 = vst [vmem:[#allocation22_spill] sm:$0xff] %v17683_v39 }
 0xa81   :  { %v14296_v25 = vpop.f32.mrf.mxu0 }
 0xa82   :  { %v17690_v43 = vadd.f32 %v14296_v25, %v17242_v16  ;;  %v4465_v25 = vpop.f32.mrf.mxu1 }
 0xa83   :  { %v17692_v53 = vpop.f32.mrf.mxu0 }
 0xa84   :  { %19856 = vst [vmem:[#allocation23_spill] sm:$0xff] %v17692_v53 }
 0xa85   :  { %v14299_v27 = vpop.f32.mrf.mxu0 }
 0xa86   :  { %v17699_v26 = vadd.f32 %v14299_v27, %v17251_v19  ;;  %v4511_v27 = vmul.f32 0.5, %v14319_v52 }
 0xa87   :  { %v17701_v38 = vpop.f32.mrf.mxu0 }
 0xa88   :  { %19857 = vst [vmem:[#allocation24_spill] sm:$0xff] %v17701_v38 }
 0xa89   :  { %v14342_v10 = vpop.f32.mrf.mxu0 }
 0xa8b   :  { %v4591_v16 = vpop.f32.mrf.mxu0 }
 0xa8d   :  { %v14345_v55 = vpop.f32.mrf.mxu0 }
 0xa8f   :  { %v4601_v33 = vpop.f32.mrf.mxu0 }
 0xa91   :  { %v14348_v34 = vpop.f32.mrf.mxu0 }
 0xa93   :  { %v4611_v35 = vpop.f32.mrf.mxu0 }
 0xa95   :  { %v14351_v7 = vpop.f32.mrf.mxu0 }
 0xa96   :  { %14396 = vmatprep.subr.msk.mxu0 %vm558_vm1, %v14351_v7 }
 0xa97   :  { %v4621_v37 = vpop.f32.mrf.mxu0  ;;  %14397 = vmatpush3.xpose.msk.msra.mxu0 %vm558_vm1, %v14351_v7  ;;  %v4513_v7 = vmul.f32 0.5, %v14322_v50 }
 0xa98   :  { %14398 = vmatprep.subr.msk.mxu0 %vm558_vm1, %v4621_v37 }
 0xa99   :  { %v14354_v19 = vpop.f32.mrf.mxu0 }
 0xa9b   :  { %14399 = vmatpush3.xpose.msk.msra.mxu0 %vm558_vm1, %v4621_v37  ;;  %v4631_v0 = vpop.f32.mrf.mxu0 }
 0xa9c   :  { %14400 = vmatprep.subr.msk.mxu0 %vm558_vm1, %v14348_v34 }
 0xa9d   :  { %v14357_v1 = vpop.f32.mrf.mxu0 }
 0xa9f   :  { %14401 = vmatpush3.xpose.msk.msra.mxu0 %vm558_vm1, %v14348_v34  ;;  %v4641_v13 = vpop.f32.mrf.mxu0 }
 0xaa0   :  { %14402 = vmatprep.subr.msk.mxu0 %vm558_vm1, %v4611_v35 }
 0xaa1   :  { %v14360_v24 = vpop.f32.mrf.mxu0 }
 0xaa3   :  { %14403 = vmatpush3.xpose.msk.msra.mxu0 %vm558_vm1, %v4611_v35  ;;  %v4651_v56 = vpop.f32.mrf.mxu0 }
 0xaa4   :  { %14404 = vmatprep.subr.msk.mxu0 %vm558_vm1, %v14345_v55 }
 0xaa5   :  { %v14363_v11 = vpop.f32.mrf.mxu0 }
 0xaa7   :  { %14405 = vmatpush3.xpose.msk.msra.mxu0 %vm558_vm1, %v14345_v55  ;;  %v4661_v28 = vpop.f32.mrf.mxu0 }
 0xaa8   :  { %14406 = vmatprep.subr.msk.mxu0 %vm558_vm1, %v4601_v33 }
 0xaab   :  { %14407 = vmatpush3.xpose.msk.msra.mxu0 %vm558_vm1, %v4601_v33 }
 0xaac   :  { %14408 = vmatprep.subr.msk.mxu0 %vm558_vm1, %v14342_v10 }
 0xaaf   :  { %14409 = vmatpush3.xpose.msk.msra.mxu0 %vm558_vm1, %v14342_v10  ;;  %v4512_v10 = vmul.f32 0.5, %v4465_v25 }
 0xab0   :  { %14410 = vmatprep.subr.msk.mxu0 %vm558_vm1, %v4591_v16 }
 0xab3   :  { %14411 = vmatpush3.xpose.msk.msra.mxu0 %vm558_vm1, %v4591_v16  ;;  %v14325_v16 = vpop.f32.mrf.mxu1 }
 0xab4   :  { %14452 = vmatprep.subr.msk.mxu0 %vm558_vm1, %v14363_v11 }
 0xab5   :  { %v4475_v55 = vpop.f32.mrf.mxu1 }
 0xab6   :  { %14413 = vmatmul.mubr.msk.f32.vlgmr.msra.gmra.mxu0 %vm558_vm1, %v4505_v12  ;;  %v4514_v35 = vmul.f32 0.5, %v4475_v55 }
 0xab7   :  { %14453 = vmatpush3.xpose.msk.msra.mxu0 %vm558_vm1, %v14363_v11  ;;  %14415 = vmatprep.mubr.msk.f32.mxu0 %vm558_vm1, %v4506_v22  ;;  %v14328_v33 = vpop.f32.mrf.mxu1 }
 0xab8   :  { %14454 = vmatprep.subr.msk.mxu0 %vm558_vm1, %v4661_v28 }
 0xab9   :  { %v4485_v34 = vpop.f32.mrf.mxu1 }
 0xaba   :  { %14416 = vmatmul.mubr.msk.f32.gmra.mxu0 %vm558_vm1, %v4507_v31  ;;  %v4516_v8 = vmul.f32 0.5, %v4485_v34 }
 0xabb   :  { %14455 = vmatpush3.xpose.msk.msra.mxu0 %vm558_vm1, %v4661_v28  ;;  %14418 = vmatprep.mubr.msk.f32.mxu0 %vm558_vm1, %v4508_v57  ;;  %v14331_v37 = vpop.f32.mrf.mxu1 }
 0xabc   :  { %14456 = vmatprep.subr.msk.mxu0 %vm558_vm1, %v14360_v24 }
 0xabd   :  { %v4495_v36 = vpop.f32.mrf.mxu1 }
 0xabe   :  { %14419 = vmatmul.mubr.msk.f32.gmra.mxu0 %vm558_vm1, %v4509_v17 }
 0xabf   :  { %14457 = vmatpush3.xpose.msk.msra.mxu0 %vm558_vm1, %v14360_v24  ;;  %14421 = vmatprep.mubr.msk.f32.mxu0 %vm558_vm1, %v4510_v54 }
 0xac0   :  { %14458 = vmatprep.subr.msk.mxu0 %vm558_vm1, %v4651_v56 }
 0xac2   :  { %14422 = vmatmul.mubr.msk.f32.gmra.mxu0 %vm558_vm1, %v4511_v27 }
 0xac3   :  { %14459 = vmatpush3.xpose.msk.msra.mxu0 %vm558_vm1, %v4651_v56  ;;  %14468 = vmatprep.mubr.msk.f32.mxu0 %vm558_vm1, %v4512_v10 }
 0xac4   :  { %14460 = vmatprep.subr.msk.mxu0 %vm558_vm1, %v14357_v1 }
 0xac7   :  { %14461 = vmatpush3.xpose.msk.msra.mxu0 %vm558_vm1, %v14357_v1  ;;  %v4515_v1 = vmul.f32 0.5, %v14325_v16 }
 0xac8   :  { %14462 = vmatprep.subr.msk.mxu0 %vm558_vm1, %v4641_v13 }
 0xacb   :  { %14463 = vmatpush3.xpose.msk.msra.mxu0 %vm558_vm1, %v4641_v13  ;;  %v4517_v13 = vmul.f32 0.5, %v14328_v33 }
 0xacc   :  { %14464 = vmatprep.subr.msk.mxu0 %vm558_vm1, %v14354_v19 }
 0xacf   :  { %14465 = vmatpush3.xpose.msk.msra.mxu0 %vm558_vm1, %v14354_v19  ;;  %v4518_v19 = vmul.f32 0.5, %v4495_v36 }
 0xad0   :  { %14466 = vmatprep.subr.msk.mxu0 %vm558_vm1, %v4631_v0 }
 0xad3   :  { %14467 = vmatpush3.xpose.msk.msra.mxu0 %vm558_vm1, %v4631_v0  ;;  %v4519_v0 = vmul.f32 0.5, %v14331_v37 }
 0xad6   :  { %14469 = vmatmul.mubr.msk.f32.vlgmr.msra.gmra.mxu0 %vm558_vm1, %v4513_v7 }
 0xad7   :  { %14471 = vmatprep.mubr.msk.f32.mxu0 %vm558_vm1, %v4514_v35 }
 0xada   :  { %14472 = vmatmul.mubr.msk.f32.gmra.mxu0 %vm558_vm1, %v4515_v1 }
 0xadb   :  { %14474 = vmatprep.mubr.msk.f32.mxu0 %vm558_vm1, %v4516_v8 }
 0xade   :  { %14475 = vmatmul.mubr.msk.f32.gmra.mxu0 %vm558_vm1, %v4517_v13 }
 0xadf   :  { %14477 = vmatprep.mubr.msk.f32.mxu0 %vm558_vm1, %v4518_v19 }
 0xae2   :  { %14478 = vmatmul.mubr.msk.f32.gmra.mxu0 %vm558_vm1, %v4519_v0 }
 0xae3   :  { %14542 = vmatprep.mubr.msk.f32.mxu0 %vm50_vm0, %v17511_v45 }
 0xb23   :  { %v14374_v51 = vpop.f32.mrf.mxu1 }
 0xb25   :  { %v4741_v24 = vpop.f32.mrf.mxu1 }
 0xb27   :  { %v14377_v44 = vpop.f32.mrf.mxu1 }
 0xb29   :  { %v4751_v56 = vpop.f32.mrf.mxu1 }
 0xb2b   :  { %v14380_v52 = vpop.f32.mrf.mxu1 }
 0xb2d   :  { %v4761_v11 = vpop.f32.mrf.mxu1 }
 0xb2f   :  { %v14383_v22 = vpop.f32.mrf.mxu1 }
 0xb30   :  { %14424 = vmatprep.subr.mxu1 %v14383_v22 }
 0xb31   :  { %v4771_v12 = vpop.f32.mrf.mxu1  ;;  %14425 = vmatpush3.msra.mxu1 %v14383_v22 }
 0xb32   :  { %14426 = vmatprep.subr.mxu1 %v4771_v12 }
 0xb33   :  { %14427 = vmatpush3.msra.mxu1 %v4771_v12  ;;  %v17775_v37 = vpop.f32.mrf.mxu1 }
 0xb34   :  { %14428 = vmatprep.subr.mxu1 %v14380_v52 }
 0xb35   :  { %14429 = vmatpush3.msra.mxu1 %v14380_v52  ;;  %v17777_v8 = vpop.f32.mrf.mxu1 }
 0xb36   :  { %14430 = vmatprep.subr.mxu1 %v4761_v11 }
 0xb37   :  { %14431 = vmatpush3.msra.mxu1 %v4761_v11  ;;  %v17779_v1 = vpop.f32.mrf.mxu1 }
 0xb38   :  { %14432 = vmatprep.subr.mxu1 %v14377_v44 }
 0xb39   :  { %14433 = vmatpush3.msra.mxu1 %v14377_v44  ;;  %v17781_v36 = vpop.f32.mrf.mxu1 }
 0xb3a   :  { %14434 = vmatprep.subr.mxu1 %v4751_v56 }
 0xb3b   :  { %14435 = vmatpush3.msra.mxu1 %v4751_v56  ;;  %v17783_v19 = vpop.f32.mrf.mxu1 }
 0xb3c   :  { %14436 = vmatprep.subr.mxu1 %v14374_v51 }
 0xb3d   :  { %14437 = vmatpush3.msra.mxu1 %v14374_v51  ;;  %v17785_v13 = vpop.f32.mrf.mxu1 }
 0xb3e   :  { %14438 = vmatprep.subr.mxu1 %v4741_v24 }
 0xb3f   :  { %14439 = vmatpush3.msra.mxu1 %v4741_v24  ;;  %v17791_v24 = vpop.f32.mrf.mxu1 }
 0xb40   :  { %14480 = vmatprep.subr.mxu1 %v17791_v24 }
 0xb76   :  { %v14414_v31 = vpop.f32.mrf.mxu0 }
 0xb77   :  { %v4976_v59 = vsel %vm712_vm2, %v14414_v31, -inf }
 0xb78   :  { %4977 = vmax.xlane.f32.xlu1 %v4976_v59  ;;  %v4934_v28 = vpop.f32.mrf.mxu0 }
 0xb79   :  { %v4973_v57 = vsel %vm712_vm2, %v4934_v28, -inf }
 0xb7a   :  { %4974 = vmax.xlane.f32.xlu0 %v4973_v57  ;;  %v14417_v50 = vpop.f32.mrf.mxu0 }
 0xb7b   :  { %v4982_v17 = vsel %vm712_vm2, %v14417_v50, -inf }
 0xb7c   :  { %4983 = vmax.xlane.f32.xlu1 %v4982_v17  ;;  %v4944_v54 = vpop.f32.mrf.mxu0 }
 0xb7d   :  { %v4979_v25 = vsel %vm712_vm2, %v4944_v54, -inf }
 0xb7e   :  { %4980 = vmax.xlane.f32.xlu0 %v4979_v25  ;;  %v17759_v27 = vpop.f32.mrf.mxu0 }
 0xb7f   :  { %v4988_v10 = vsel %vm712_vm2, %v17759_v27, -inf }
 0xb80   :  { %4989 = vmax.xlane.f32.xlu1 %v4988_v10  ;;  %v17763_v16 = vpop.f32.mrf.mxu0 }
 0xb81   :  { %v4985_v55 = vsel %vm712_vm2, %v17763_v16, -inf }
 0xb82   :  { %4986 = vmax.xlane.f32.xlu0 %v4985_v55  ;;  %v17767_v33 = vpop.f32.mrf.mxu0 }
 0xb83   :  { %v4994_v34 = vsel %vm712_vm2, %v17767_v33, -inf }
 0xb84   :  { %4995 = vmax.xlane.f32.xlu1 %v4994_v34  ;;  %v17771_v35 = vpop.f32.mrf.mxu0 }
 0xb85   :  { %v4991_v7 = vsel %vm712_vm2, %v17771_v35, -inf }
 0xb86   :  { %4992 = vmax.xlane.f32.xlu0 %v4991_v7 }
 0xb96   :  { %v17787_v0 = vpop.f32.mrf.mxu0 }
 0xb97   :  { %v5346_v51 = vsel %vm712_vm2, %v17787_v0, -inf }
 0xb98   :  { %5347 = vmax.xlane.f32.xlu1 %v5346_v51  ;;  %v17793_v44 = vpop.f32.mrf.mxu0 }
 0xb99   :  { %v5343_v56 = vsel %vm712_vm2, %v17793_v44, -inf }
 0xb9a   :  { %v17798_v52 = vpop.f32.mrf.mxu0  ;;  %5344 = vmax.xlane.f32.xlu0 %v5343_v56 }
 0xb9b   :  { %v5352_v11 = vsel %vm712_vm2, %v17798_v52, -inf }
 0xb9c   :  { %5353 = vmax.xlane.f32.xlu1 %v5352_v11  ;;  %v17802_v22 = vpop.f32.mrf.mxu0 }
 0xb9d   :  { %v5349_v12 = vsel %vm712_vm2, %v17802_v22, -inf }
 0xb9e   :  { %v17806_v59 = vpop.f32.mrf.mxu0  ;;  %5350 = vmax.xlane.f32.xlu0 %v5349_v12 }
 0xb9f   :  { %v5358_v57 = vsel %vm712_vm2, %v17806_v59, -inf }
 0xba0   :  { %5359 = vmax.xlane.f32.xlu1 %v5358_v57  ;;  %v17810_v17 = vpop.f32.mrf.mxu0 }
 0xba1   :  { %v5355_v25 = vsel %vm712_vm2, %v17810_v17, -inf }
 0xba2   :  { %v17814_v10 = vpop.f32.mrf.mxu0  ;;  %5356 = vmax.xlane.f32.xlu0 %v5355_v25 }
 0xba3   :  { %v5364_v55 = vsel %vm712_vm2, %v17814_v10, -inf }
 0xba4   :  { %5365 = vmax.xlane.f32.xlu1 %v5364_v55  ;;  %v17818_v34 = vpop.f32.mrf.mxu0 }
 0xba5   :  { %v5361_v7 = vsel %vm712_vm2, %v17818_v34, -inf }
 0xba6   :  { %5362 = vmax.xlane.f32.xlu0 %v5361_v7 }
 0xc01   :  { %v4978_v51 = vpop.xlane.xlu1 %4977 }
 0xc02   :  { %v4998_v56 = vsub.f32 %v14414_v31, %v4978_v51 }
 0xc03   :  { %v4975_v11 = vpop.xlane.xlu0 %4974 }
 0xc04   :  { %v5007_v12 = vmul.f32 1.442695, %v4998_v56  ;;  %v4997_v57 = vsub.f32 %v4934_v28, %v4975_v11 }
 0xc05   :  { %v4984_v38 = vpop.xlane.xlu1 %4983 }
 0xc06   :  { %15678 = vpow2.f32 %v5007_v12  ;;  %v5005_v53 = vmul.f32 1.442695, %v4997_v57  ;;  %v5000_v39 = vsub.f32 %v14417_v50, %v4984_v38 }
 0xc07   :  { %v4981_v25 = vpop.xlane.xlu0 %4980 }
 0xc08   :  { %15680 = vpow2.f32 %v5005_v53  ;;  %v5011_v58 = vmul.f32 1.442695, %v5000_v39  ;;  %v4999_v46 = vsub.f32 %v4944_v54, %v4981_v25 }
 0xc09   :  { %v4990_v55 = vpop.xlane.xlu1 %4989 }
 0xc0a   :  { %15682 = vpow2.f32 %v5011_v58  ;;  %v5009_v23 = vmul.f32 1.442695, %v4999_v46  ;;  %v5002_v15 = vsub.f32 %v17759_v27, %v4990_v55 }
 0xc0b   :  { %v4987_v18 = vpop.xlane.xlu0 %4986 }
 0xc0c   :  { %15684 = vpow2.f32 %v5009_v23  ;;  %v5015_v7 = vmul.f32 1.442695, %v5002_v15  ;;  %v5001_v31 = vsub.f32 %v17763_v16, %v4987_v18  ;;  %v4811_v18 = vpop.f32.mrf.mxu1 }
 0xc0d   :  { %v4996_v51 = vpop.xlane.xlu1 %4995 }
 0xc0e   :  { %15686 = vpow2.f32 %v5015_v7  ;;  %v5013_v28 = vmul.f32 1.442695, %v5001_v31  ;;  %v5004_v56 = vsub.f32 %v17767_v33, %v4996_v51 }
 0xc0f   :  { %v4993_v38 = vpop.xlane.xlu0 %4992 }
 0xc10   :  { %15688 = vpow2.f32 %v5013_v28  ;;  %v5019_v53 = vmul.f32 1.442695, %v5004_v56  ;;  %v5003_v39 = vsub.f32 %v17771_v35, %v4993_v38 }
 0xc12   :  { %15690 = vpow2.f32 %v5019_v53  ;;  %v5017_v58 = vmul.f32 1.442695, %v5003_v39 }
 0xc13   :  { %v15679_v46 = vpop.eup %15678 }
 0xc14   :  { %15692 = vpow2.f32 %v5017_v58  ;;  %v5024_v50 = vsel %vm712_vm2, %v15679_v46, 0.0 }
 0xc15   :  { %v15681_v23 = vpop.eup %15680  ;;  %5025 = vadd.xlane.f32.xlu1 %v5024_v50 }
 0xc16   :  { %14440 = vmatprep.mubr.msk.f32.mxu1 %vm712_vm2, %v15681_v23  ;;  %v5021_v15 = vsel %vm712_vm2, %v15681_v23, 0.0 }
 0xc17   :  { %v15683_v54 = vpop.eup %15682  ;;  %14441 = vmatmul.mubr.msk.f32.vlgmr.msra.gmra.mxu1 %vm712_vm2, %v15679_v46  ;;  %5022 = vadd.xlane.f32.xlu0 %v5021_v15 }
 0xc18   :  { %14481 = vmatpush3.msra.mxu1 %v17791_v24  ;;  %v5030_v27 = vsel %vm712_vm2, %v15683_v54, 0.0 }
 0xc19   :  { %v15685_v16 = vpop.eup %15684  ;;  %14482 = vmatprep.subr.mxu1 %v4811_v18  ;;  %5031 = vadd.xlane.f32.xlu1 %v5030_v27 }
 0xc1a   :  { %14483 = vmatpush3.msra.mxu1 %v4811_v18  ;;  %14443 = vmatprep.mubr.msk.f32.mxu1 %vm712_vm2, %v15685_v16  ;;  %v5027_v33 = vsel %vm712_vm2, %v15685_v16, 0.0 }
 0xc1b   :  { %v15687_v35 = vpop.eup %15686  ;;  %14484 = vmatprep.subr.mxu1 %v17783_v19  ;;  %14444 = vmatmul.mubr.msk.f32.gmra.mxu1 %vm712_vm2, %v15683_v54 }
 0xc1c   :  { %14485 = vmatpush3.msra.mxu1 %v17783_v19  ;;  %5028 = vadd.xlane.f32.xlu0 %v5027_v33  ;;  %v5036_v24 = vsel %vm712_vm2, %v15687_v35, 0.0 }
 0xc1d   :  { %v15689_v11 = vpop.eup %15688  ;;  %14486 = vmatprep.subr.mxu1 %v17785_v13  ;;  %5037 = vadd.xlane.f32.xlu1 %v5036_v24 }
 0xc1e   :  { %14487 = vmatpush3.msra.mxu1 %v17785_v13  ;;  %14446 = vmatprep.mubr.msk.f32.mxu1 %vm712_vm2, %v15689_v11  ;;  %v5033_v12 = vsel %vm712_vm2, %v15689_v11, 0.0 }
 0xc1f   :  { %v15691_v57 = vpop.eup %15690  ;;  %14488 = vmatprep.subr.mxu1 %v17779_v1  ;;  %14447 = vmatmul.mubr.msk.f32.gmra.mxu1 %vm712_vm2, %v15687_v35 }
 0xc20   :  { %14489 = vmatpush3.msra.mxu1 %v17779_v1  ;;  %5034 = vadd.xlane.f32.xlu0 %v5033_v12  ;;  %v5042_v19 = vsel %vm712_vm2, %v15691_v57, 0.0 }
 0xc21   :  { %v15693_v25 = vpop.eup %15692  ;;  %14490 = vmatprep.subr.mxu1 %v17781_v36  ;;  %v5348_v55 = vpop.xlane.xlu1 %5347  ;;  %5043 = vadd.xlane.f32.xlu1 %v5042_v19 }
 0xc22   :  { %14491 = vmatpush3.msra.mxu1 %v17781_v36  ;;  %v5368_v13 = vsub.f32 %v17787_v0, %v5348_v55  ;;  %14449 = vmatprep.mubr.msk.f32.mxu1 %vm712_vm2, %v15693_v25  ;;  %v5039_v7 = vsel %vm712_vm2, %v15693_v25, 0.0 }
 0xc23   :  { %14492 = vmatprep.subr.mxu1 %v17775_v37  ;;  %14450 = vmatmul.mubr.msk.f32.gmra.mxu1 %vm712_vm2, %v15691_v57  ;;  %v5345_v1 = vpop.xlane.xlu0 %5344 }
 0xc24   :  { %v5377_v31 = vmul.f32 1.442695, %v5368_v13  ;;  %14493 = vmatpush3.msra.mxu1 %v17775_v37  ;;  %5040 = vadd.xlane.f32.xlu0 %v5039_v7  ;;  %v5367_v51 = vsub.f32 %v17793_v44, %v5345_v1  ;;  %v11948_v7 = vld [vmem:[%s19832_s4 + $0xc] sm:$0xf]  ;;  %v11989_v1 = vld [vmem:[%s19828_s2 + $0x98] sm:$0xff] }
 0xc25   :  { %14494 = vmatprep.subr.mxu1 %v17777_v8  ;;  %v5354_v36 = vpop.xlane.xlu1 %5353 }
 0xc26   :  { %15694 = vpow2.f32 %v5377_v31  ;;  %v5375_v0 = vmul.f32 1.442695, %v5367_v51  ;;  %14495 = vmatpush3.msra.mxu1 %v17777_v8  ;;  %v5370_v28 = vsub.f32 %v17798_v52, %v5354_v36  ;;  %v11969_v31 = vld [vmem:[%s19830_s1 + $0x98] sm:$0xff]  ;;  %v11968_v51 = vld [vmem:[%s19830_s1 + $0x90] sm:$0xff]  ;;  %v11967_v36 = vld [vmem:[%s19830_s1 + $0x88] sm:$0xff] }
 0xc27   :  { %v5351_v56 = vpop.xlane.xlu0 %5350  ;;  %14508 = vmatprep.subr.msk.mxu1 %vm1349_vm3, %v11948_v7  ;;  %14534 = vmatprep.subr.mxu0 %v11969_v31 }
 0xc28   :  { %15696 = vpow2.f32 %v5375_v0  ;;  %v5381_v38 = vmul.f32 1.442695, %v5370_v28  ;;  %v5369_v53 = vsub.f32 %v17802_v22, %v5351_v56  ;;  %14535 = vmatpush3.msra.mxu0 %v11969_v31  ;;  %v11966_v0 = vld [vmem:[%s19830_s1 + $0x80] sm:$0xff] }
 0xc29   :  { %v5360_v39 = vpop.xlane.xlu1 %5359  ;;  %14536 = vmatprep.subr.mxu0 %v11968_v51 }
 0xc2a   :  { %15698 = vpow2.f32 %v5381_v38  ;;  %v5379_v37 = vmul.f32 1.442695, %v5369_v53  ;;  %v5372_v58 = vsub.f32 %v17806_v59, %v5360_v39  ;;  %14537 = vmatpush3.msra.mxu0 %v11968_v51  ;;  %v11987_v39 = vld [vmem:[%s19828_s2 + $0x88] sm:$0xff] }
 0xc2b   :  { %v5357_v44 = vpop.xlane.xlu0 %5356  ;;  %14538 = vmatprep.subr.mxu0 %v11967_v36 }
 0xc2c   :  { %15700 = vpow2.f32 %v5379_v37  ;;  %v5385_v46 = vmul.f32 1.442695, %v5372_v58  ;;  %v5371_v50 = vsub.f32 %v17810_v17, %v5357_v44  ;;  %14539 = vmatpush3.msra.mxu0 %v11967_v36  ;;  %v11986_v44 = vld [vmem:[%s19828_s2 + $0x80] sm:$0xff] }
 0xc2d   :  { %v5366_v23 = vpop.xlane.xlu1 %5365  ;;  %14540 = vmatprep.subr.mxu0 %v11966_v0 }
 0xc2e   :  { %15702 = vpow2.f32 %v5385_v46  ;;  %v5383_v8 = vmul.f32 1.442695, %v5371_v50  ;;  %v5374_v52 = vsub.f32 %v17814_v10, %v5366_v23  ;;  %14541 = vmatpush3.msra.mxu0 %v11966_v0 }
 0xc2f   :  { %v5363_v18 = vpop.xlane.xlu0 %5362  ;;  %14543 = vmatmul.mubr.msk.f32.vlgmr.msra.gmra.mxu0 %vm50_vm0, %v17518_v42 }
 0xc30   :  { %15704 = vpow2.f32 %v5383_v8  ;;  %v5389_v15 = vmul.f32 1.442695, %v5374_v52  ;;  %v5373_v22 = vsub.f32 %v17818_v34, %v5363_v18  ;;  %14545 = vmatprep.mubr.msk.f32.mxu0 %vm50_vm0, %v17525_v61 }
 0xc32   :  { %15706 = vpow2.f32 %v5389_v15  ;;  %v5387_v54 = vmul.f32 1.442695, %v5373_v22 }
 0xc33   :  { %v15695_v27 = vpop.eup %15694  ;;  %14546 = vmatmul.mubr.msk.f32.gmra.mxu0 %vm50_vm0, %v17532_v9 }
 0xc34   :  { %15708 = vpow2.f32 %v5387_v54  ;;  %v5394_v59 = vsel %vm712_vm2, %v15695_v27, 0.0  ;;  %14548 = vmatprep.mubr.msk.f32.mxu0 %vm50_vm0, %v17539_v48 }
 0xc35   :  { %v15697_v16 = vpop.eup %15696  ;;  %5395 = vadd.xlane.f32.xlu1 %v5394_v59 }
 0xc36   :  { %14496 = vmatprep.mubr.msk.f32.mxu1 %vm712_vm2, %v15697_v16  ;;  %v5391_v17 = vsel %vm712_vm2, %v15697_v16, 0.0 }
 0xc37   :  { %v15699_v33 = vpop.eup %15698  ;;  %14497 = vmatmul.mubr.msk.f32.vlgmr.msra.gmra.mxu1 %vm712_vm2, %v15695_v27  ;;  %5392 = vadd.xlane.f32.xlu0 %v5391_v17 }
 0xc38   :  { %v5400_v10 = vsel %vm712_vm2, %v15699_v33, 0.0  ;;  %14509 = vmatpush3.msk.msra.mxu1 %vm1349_vm3, %v11948_v7  ;;  %14549 = vmatmul.mubr.msk.f32.gmra.mxu0 %vm50_vm0, %v17546_v60 }
 0xc39   :  { %v15701_v35 = vpop.eup %15700  ;;  %5401 = vadd.xlane.f32.xlu1 %v5400_v10  ;;  %14566 = vmatprep.subr.mxu1 %v11989_v1 }
 0xc3a   :  { %14499 = vmatprep.mubr.msk.f32.mxu1 %vm712_vm2, %v15701_v35  ;;  %v5397_v34 = vsel %vm712_vm2, %v15701_v35, 0.0  ;;  %14551 = vmatprep.mubr.msk.f32.mxu0 %vm50_vm0, %v17553_v41 }
 0xc3b   :  { %v15703_v24 = vpop.eup %15702  ;;  %14500 = vmatmul.mubr.msk.f32.gmra.mxu1 %vm712_vm2, %v15699_v33  ;;  %5398 = vadd.xlane.f32.xlu0 %v5397_v34 }
 0xc3c   :  { %v5406_v11 = vsel %vm712_vm2, %v15703_v24, 0.0  ;;  %14552 = vmatmul.mubr.msk.f32.gmra.mxu0 %vm50_vm0, %v17560_v4 }
 0xc3d   :  { %v15705_v12 = vpop.eup %15704  ;;  %5407 = vadd.xlane.f32.xlu1 %v5406_v11  ;;  %14554 = vmatprep.mubr.msk.f32.mxu0 %vm50_vm0, %v17567_v62 }
 0xc3e   :  { %14502 = vmatprep.mubr.msk.f32.mxu1 %vm712_vm2, %v15705_v12  ;;  %v5403_v57 = vsel %vm712_vm2, %v15705_v12, 0.0 }
 0xc3f   :  { %v15707_v19 = vpop.eup %15706  ;;  %14503 = vmatmul.mubr.msk.f32.gmra.mxu1 %vm712_vm2, %v15703_v24  ;;  %5404 = vadd.xlane.f32.xlu0 %v5403_v57 }
 0xc40   :  { %v5412_v25 = vsel %vm712_vm2, %v15707_v19, 0.0  ;;  %14555 = vmatmul.mubr.msk.f32.gmra.mxu0 %vm50_vm0, %v17574_v3 }
 0xc41   :  { %v15709_v55 = vpop.eup %15708  ;;  %5413 = vadd.xlane.f32.xlu1 %v5412_v25  ;;  %14557 = vmatprep.mubr.msk.f32.mxu0 %vm50_vm0, %v17581_v32 }
 0xc42   :  { %14505 = vmatprep.mubr.msk.f32.mxu1 %vm712_vm2, %v15709_v55  ;;  %v5409_v13 = vsel %vm712_vm2, %v15709_v55, 0.0 }
 0xc43   :  { %14506 = vmatmul.mubr.msk.f32.gmra.mxu1 %vm712_vm2, %v15707_v19  ;;  %5410 = vadd.xlane.f32.xlu0 %v5409_v13 }
 0xc44   :  { %14558 = vmatmul.mubr.msk.f32.gmra.mxu0 %vm50_vm0, %v17588_v63 }
 0xc45   :  { %14560 = vmatprep.mubr.msk.f32.mxu0 %vm50_vm0, %v17595_v40 }
 0xc48   :  { %14561 = vmatmul.mubr.msk.f32.gmra.mxu0 %vm50_vm0, %v17602_v14 }
 0xc49   :  { %14563 = vmatprep.mubr.msk.f32.mxu0 %vm50_vm0, %v17609_v5 }
 0xc4c   :  { %14564 = vmatmul.mubr.msk.f32.gmra.mxu0 %vm50_vm0, %v17616_v49  ;;  %v11988_v49 = vld [vmem:[%s19828_s2 + $0x90] sm:$0xff] }
 0xc4d   :  { %14606 = vmatprep.mubr.msk.f32.mxu0 %vm50_vm0, %v17511_v45 }
 0xc9e   :  { %v5026_v61 = vpop.xlane.xlu1 %5025 }
 0xca0   :  { %v5023_v42 = vpop.xlane.xlu0 %5022 }
 0xca1   :  { %15710 = vrcp.f32 %v5023_v42 }
 0xca2   :  { %v5032_v48 = vpop.xlane.xlu1 %5031  ;;  %15712 = vrcp.f32 %v5026_v61 }
 0xca5   :  { %v5029_v9 = vpop.xlane.xlu0 %5028 }
 0xca6   :  { %15714 = vrcp.f32 %v5029_v9  ;;  %v5038_v41 = vpop.xlane.xlu1 %5037 }
 0xca7   :  { %15716 = vrcp.f32 %v5032_v48 }
 0xca9   :  { %v5035_v60 = vpop.xlane.xlu0 %5034 }
 0xcaa   :  { %15718 = vrcp.f32 %v5035_v60  ;;  %v5044_v62 = vpop.xlane.xlu1 %5043 }
 0xcab   :  { %15720 = vrcp.f32 %v5038_v41 }
 0xcad   :  { %v5041_v4 = vpop.xlane.xlu0 %5040 }
 0xcae   :  { %15722 = vrcp.f32 %v5041_v4  ;;  %v15711_v32 = vpop.eup %15710 }
 0xcaf   :  { %15724 = vrcp.f32 %v5044_v62  ;;  %v15713_v45 = vpop.eup %15712 }
 0xcb3   :  { %v15715_v28 = vpop.eup %15714 }
 0xcb4   :  { %v15717_v38 = vpop.eup %15716 }
 0xcb7   :  { %v15719_v46 = vpop.eup %15718 }
 0xcb8   :  { %v15721_v23 = vpop.eup %15720 }
 0xcbb   :  { %v15723_v54 = vpop.eup %15722 }
 0xcbc   :  { %v15725_v59 = vpop.eup %15724 }
 0xcbe   :  { %v5396_v22 = vpop.xlane.xlu1 %5395 }
 0xcc0   :  { %v5393_v52 = vpop.xlane.xlu0 %5392 }
 0xcc1   :  { %15726 = vrcp.f32 %v5393_v52 }
 0xcc2   :  { %v5402_v10 = vpop.xlane.xlu1 %5401  ;;  %15728 = vrcp.f32 %v5396_v22 }
 0xcc4   :  { %v5399_v33 = vpop.xlane.xlu0 %5398 }
 0xcc5   :  { %15730 = vrcp.f32 %v5399_v33 }
 0xcc6   :  { %v5408_v34 = vpop.xlane.xlu1 %5407  ;;  %15732 = vrcp.f32 %v5402_v10 }
 0xcc8   :  { %v5405_v35 = vpop.xlane.xlu0 %5404 }
 0xcc9   :  { %15734 = vrcp.f32 %v5405_v35  ;;  %v12009_v35 = vld [vmem:[%s19831_s3 + $0x98] sm:$0xff] }
 0xcca   :  { %15736 = vrcp.f32 %v5408_v34  ;;  %v5414_v11 = vpop.xlane.xlu1 %5413  ;;  %14598 = vmatprep.subr.mxu0 %v12009_v35 }
 0xccb   :  { %14599 = vmatpush3.msra.mxu0 %v12009_v35 }
 0xccc   :  { %v5411_v24 = vpop.xlane.xlu0 %5410 }
 0xccd   :  { %15738 = vrcp.f32 %v5411_v24 }
 0xcce   :  { %v15727_v57 = vpop.eup %15726  ;;  %15740 = vrcp.f32 %v5414_v11  ;;  %v12006_v11 = vld [vmem:[%s19831_s3 + $0x80] sm:$0xff] }
 0xccf   :  { %v15729_v25 = vpop.eup %15728 }
 0xcd7   :  { %v14442_v3 = vpop.f32.mrf.mxu1 }
 0xcd8   :  { %v5183_v14 = vmul.f32 %v15713_v45, %v14442_v3 }
 0xcd9   :  { %v5135_v63 = vpop.f32.mrf.mxu1 }
 0xcda   :  { %v5182_v40 = vmul.f32 %v15711_v32, %v5135_v63 }
 0xcdb   :  { %v14445_v5 = vpop.f32.mrf.mxu1 }
 0xcdc   :  { %14510 = vmatprep.mubr.msk.f32.mxu1 %vm558_vm1, %v5182_v40  ;;  %v5185_v37 = vmul.f32 %v15717_v38, %v14445_v5  ;;  %v17959_v40 = vld [vmem:[%s19829_s0] sm:$0xff]  ;;  %v17973_v5 = vld [vmem:[%s19829_s0 + $0x10] sm:$0xff] }
 0xcdd   :  { %v5145_v56 = vpop.f32.mrf.mxu1  ;;  %14511 = vmatmul.mubr.msk.f32.vlgmr.msra.gmra.mxu1 %vm558_vm1, %v5183_v14  ;;  %v17966_v14 = vld [vmem:[%s19829_s0 + $0x8] sm:$0xff]  ;;  %v18001_v38 = vld [vmem:[%s19829_s0 + $0x30] sm:$0xff] }
 0xcde   :  { %v5184_v53 = vmul.f32 %v15715_v28, %v5145_v56  ;;  %14567 = vmatpush3.msra.mxu1 %v11989_v1  ;;  %v15731_v1 = vpop.eup %15730  ;;  %v17987_v28 = vld [vmem:[%s19829_s0 + $0x20] sm:$0xff]  ;;  %v17994_v56 = vld [vmem:[%s19829_s0 + $0x28] sm:$0xff] }
 0xcdf   :  { %v14448_v58 = vpop.f32.mrf.mxu1  ;;  %14568 = vmatprep.subr.mxu1 %v11988_v49  ;;  %v15733_v51 = vpop.eup %15732 }
 0xce0   :  { %14513 = vmatprep.mubr.msk.f32.mxu1 %vm558_vm1, %v5184_v53  ;;  %14569 = vmatpush3.msra.mxu1 %v11988_v49  ;;  %v5187_v18 = vmul.f32 %v15721_v23, %v14448_v58  ;;  %v15735_v61 = vpop.eup %15734  ;;  %v17980_v49 = vld [vmem:[%s19829_s0 + $0x18] sm:$0xff]  ;;  %v18029_v58 = vld [vmem:[%s19829_s0 + $0x50] sm:$0xff] }
 0xce1   :  { %v5155_v50 = vpop.f32.mrf.mxu1  ;;  %14514 = vmatmul.mubr.msk.f32.gmra.mxu1 %vm558_vm1, %v5185_v37  ;;  %14570 = vmatprep.subr.mxu1 %v11987_v39  ;;  %v15737_v48 = vpop.eup %15736  ;;  %v18008_v53 = vld [vmem:[%s19829_s0 + $0x38] sm:$0xff]  ;;  %v18022_v37 = vld [vmem:[%s19829_s0 + $0x48] sm:$0xff]  ;;  %v18057_v23 = vld [vmem:[%s19829_s0 + $0x70] sm:$0xff] }
 0xce2   :  { %v5186_v8 = vmul.f32 %v15719_v46, %v5155_v50  ;;  %14571 = vmatpush3.msra.mxu1 %v11987_v39  ;;  %v15739_v62 = vpop.eup %15738  ;;  %v18015_v39 = vld [vmem:[%s19829_s0 + $0x40] sm:$0xff]  ;;  %v18050_v50 = vld [vmem:[%s19829_s0 + $0x68] sm:$0xff] }
 0xce3   :  { %v14451_v15 = vpop.f32.mrf.mxu1  ;;  %14572 = vmatprep.subr.mxu1 %v11986_v44  ;;  %v15741_v32 = vpop.eup %15740  ;;  %v18043_v46 = vld [vmem:[%s19829_s0 + $0x60] sm:$0xff] }
 0xce4   :  { %14516 = vmatprep.mubr.msk.f32.mxu1 %vm558_vm1, %v5186_v8  ;;  %14573 = vmatpush3.msra.mxu1 %v11986_v44  ;;  %v5189_v17 = vmul.f32 %v15725_v59, %v14451_v15  ;;  %v18036_v44 = vld [vmem:[%s19829_s0 + $0x58] sm:$0xff] }
 0xce5   :  { %v5165_v27 = vpop.f32.mrf.mxu1  ;;  %14517 = vmatmul.mubr.msk.f32.gmra.mxu1 %vm558_vm1, %v5187_v18  ;;  %v18064_v8 = vld [vmem:[%s19829_s0 + $0x78] sm:$0xff] }
 0xce6   :  { %v5188_v16 = vmul.f32 %v15723_v54, %v5165_v27 }
 0xce8   :  { %14519 = vmatprep.mubr.msk.f32.mxu1 %vm558_vm1, %v5188_v16 }
 0xce9   :  { %14520 = vmatmul.mubr.msk.f32.gmra.mxu1 %vm558_vm1, %v5189_v17 }
 0xcef   :  { %v18068_v52 = vpop.f32.mrf.mxu0 }
 0xcf0   :  { %v5925_v35 = vmul.f32 0.5, %v18068_v52 }
 0xcf1   :  { %v5845_v18 = vpop.f32.mrf.mxu0 }
 0xcf2   :  { %v5924_v15 = vmul.f32 0.5, %v5845_v18 }
 0xcf7   :  { %v14498_v12 = vpop.f32.mrf.mxu1 }
 0xcf8   :  { %v5553_v13 = vmul.f32 %v15729_v25, %v14498_v12 }
 0xcf9   :  { %v5505_v19 = vpop.f32.mrf.mxu1 }
 0xcfa   :  { %v5552_v55 = vmul.f32 %v15727_v57, %v5505_v19 }
 0xcfb   :  { %v14501_v7 = vpop.f32.mrf.mxu1 }
 0xcfc   :  { %14522 = vmatprep.mubr.msk.f32.mxu1 %vm558_vm1, %v5552_v55  ;;  %v5555_v0 = vmul.f32 %v15733_v51, %v14501_v7 }
 0xcfd   :  { %v5515_v31 = vpop.f32.mrf.mxu1  ;;  %14523 = vmatmul.mubr.msk.f32.gmra.mxu1 %vm558_vm1, %v5553_v13 }
 0xcfe   :  { %v5554_v36 = vmul.f32 %v15731_v1, %v5515_v31 }
 0xcff   :  { %v14504_v42 = vpop.f32.mrf.mxu1 }
 0xd00   :  { %14525 = vmatprep.mubr.msk.f32.mxu1 %vm558_vm1, %v5554_v36  ;;  %v5557_v41 = vmul.f32 %v15737_v48, %v14504_v42 }
 0xd01   :  { %v5525_v9 = vpop.f32.mrf.mxu1  ;;  %14526 = vmatmul.mubr.msk.f32.gmra.mxu1 %vm558_vm1, %v5555_v0 }
 0xd02   :  { %v5556_v60 = vmul.f32 %v15735_v61, %v5525_v9 }
 0xd03   :  { %v14507_v4 = vpop.f32.mrf.mxu1 }
 0xd04   :  { %14528 = vmatprep.mubr.msk.f32.mxu1 %vm558_vm1, %v5556_v60  ;;  %v5559_v45 = vmul.f32 %v15741_v32, %v14507_v4  ;;  %v14547_v4 = vpop.f32.mrf.mxu0 }
 0xd05   :  { %v5535_v3 = vpop.f32.mrf.mxu1  ;;  %14529 = vmatmul.mubr.msk.f32.gmra.mxu1 %vm558_vm1, %v5557_v41 }
 0xd06   :  { %v5558_v63 = vmul.f32 %v15739_v62, %v5535_v3  ;;  %v5855_v3 = vpop.f32.mrf.mxu0 }
 0xd08   :  { %14531 = vmatprep.mubr.msk.f32.mxu1 %vm558_vm1, %v5558_v63  ;;  %v14550_v63 = vpop.f32.mrf.mxu0 }
 0xd09   :  { %14532 = vmatmul.mubr.msk.f32.gmra.mxu1 %vm558_vm1, %v5559_v45 }
 0xd0a   :  { %14574 = vmatprep.mubr.msk.f32.mxu1 %vm50_vm0, %v17959_v40  ;;  %v5865_v18 = vpop.f32.mrf.mxu0 }
 0xd0d   :  { %14575 = vmatmul.mubr.msk.f32.vlgmr.msra.gmra.mxu1 %vm50_vm0, %v17966_v14 }
 0xd0e   :  { %14577 = vmatprep.mubr.msk.f32.mxu1 %vm50_vm0, %v17973_v5 }
 0xd11   :  { %14578 = vmatmul.mubr.msk.f32.gmra.mxu1 %vm50_vm0, %v17980_v49 }
 0xd12   :  { %14580 = vmatprep.mubr.msk.f32.mxu1 %vm50_vm0, %v17987_v28 }
 0xd15   :  { %14581 = vmatmul.mubr.msk.f32.gmra.mxu1 %vm50_vm0, %v17994_v56 }
 0xd16   :  { %14583 = vmatprep.mubr.msk.f32.mxu1 %vm50_vm0, %v18001_v38 }
 0xd19   :  { %14584 = vmatmul.mubr.msk.f32.gmra.mxu1 %vm50_vm0, %v18008_v53 }
 0xd1a   :  { %14586 = vmatprep.mubr.msk.f32.mxu1 %vm50_vm0, %v18015_v39 }
 0xd1d   :  { %14587 = vmatmul.mubr.msk.f32.gmra.mxu1 %vm50_vm0, %v18022_v37 }
 0xd1e   :  { %14589 = vmatprep.mubr.msk.f32.mxu1 %vm50_vm0, %v18029_v58 }
 0xd21   :  { %14590 = vmatmul.mubr.msk.f32.gmra.mxu1 %vm50_vm0, %v18036_v44 }
 0xd22   :  { %14592 = vmatprep.mubr.msk.f32.mxu1 %vm50_vm0, %v18043_v46 }
 0xd25   :  { %14593 = vmatmul.mubr.msk.f32.gmra.mxu1 %vm50_vm0, %v18050_v50 }
 0xd26   :  { %14595 = vmatprep.mubr.msk.f32.mxu1 %vm50_vm0, %v18057_v23 }
 0xd29   :  { %14596 = vmatmul.mubr.msk.f32.gmra.mxu1 %vm50_vm0, %v18064_v8 }
 0xd2a   :  { %14646 = vmatprep.mubr.msk.f32.mxu1 %vm558_vm1, %v5924_v15 }
 0xd9d   :  { %v14512_v22 = vpop.f32.mrf.mxu1 }
 0xd9e   :  { %v18072_v54 = vadd.f32 %v14512_v22, %v17624_v29  ;;  %v12008_v29 = vld [vmem:[%s19831_s3 + $0x90] sm:$0xff]  ;;  %v14553_v22 = vpop.f32.mrf.mxu0 }
 0xd9f   :  { %v18074_v27 = vpop.f32.mrf.mxu1  ;;  %14600 = vmatprep.subr.mxu0 %v12008_v29 }
 0xda0   :  { %19858 = vst [vmem:[#allocation25_spill] sm:$0xff] %v18074_v27  ;;  %14601 = vmatpush3.msra.mxu0 %v12008_v29  ;;  %v5927_v29 = vmul.f32 0.5, %v14547_v4 }
 0xda1   :  { %v14515_v59 = vpop.f32.mrf.mxu1 }
 0xda2   :  { %v18077_v16 = vadd.f32 %v14515_v59, %v17629_v21  ;;  %v12007_v21 = vld [vmem:[%s19831_s3 + $0x88] sm:$0xff] }
 0xda3   :  { %v18079_v17 = vpop.f32.mrf.mxu1  ;;  %14602 = vmatprep.subr.mxu0 %v12007_v21 }
 0xda4   :  { %19859 = vst [vmem:[#allocation26_spill] sm:$0xff] %v18079_v17  ;;  %14603 = vmatpush3.msra.mxu0 %v12007_v21  ;;  %v5875_v21 = vpop.f32.mrf.mxu0 }
 0xda5   :  { %v14518_v33 = vpop.f32.mrf.mxu1  ;;  %14604 = vmatprep.subr.mxu0 %v12006_v11  ;;  %v5930_v52 = vmul.f32 0.5, %v5875_v21 }
 0xda6   :  { %v18082_v10 = vadd.f32 %v14518_v33, %v17634_v20  ;;  %14605 = vmatpush3.msra.mxu0 %v12006_v11  ;;  %v5926_v33 = vmul.f32 0.5, %v5855_v3  ;;  %v5928_v11 = vmul.f32 0.5, %v5865_v18 }
 0xda7   :  { %v18090_v34 = vpop.f32.mrf.mxu1  ;;  %14607 = vmatmul.mubr.msk.f32.vlgmr.msra.gmra.mxu0 %vm50_vm0, %v17966_v14 }
 0xda8   :  { %19860 = vst [vmem:[#allocation27_spill] sm:$0xff] %v18090_v34  ;;  %14609 = vmatprep.mubr.msk.f32.mxu0 %vm50_vm0, %v17973_v5 }
 0xda9   :  { %v14521_v24 = vpop.f32.mrf.mxu1 }
 0xdaa   :  { %v18096_v20 = vadd.f32 %v14521_v24, %v17648_v30 }
 0xdab   :  { %14610 = vmatmul.mubr.msk.f32.gmra.mxu0 %vm50_vm0, %v17980_v49  ;;  %v18113_v30 = vpop.f32.mrf.mxu1 }
 0xdac   :  { %14612 = vmatprep.mubr.msk.f32.mxu0 %vm50_vm0, %v17987_v28  ;;  %19861 = vst [vmem:[#allocation28_spill] sm:$0xff] %v18113_v30 }
 0xdaf   :  { %14613 = vmatmul.mubr.msk.f32.gmra.mxu0 %vm50_vm0, %v17994_v56 }
 0xdb0   :  { %14615 = vmatprep.mubr.msk.f32.mxu0 %vm50_vm0, %v18001_v38 }
 0xdb3   :  { %14616 = vmatmul.mubr.msk.f32.gmra.mxu0 %vm50_vm0, %v18008_v53 }
 0xdb4   :  { %14618 = vmatprep.mubr.msk.f32.mxu0 %vm50_vm0, %v18015_v39 }
 0xdb7   :  { %14619 = vmatmul.mubr.msk.f32.gmra.mxu0 %vm50_vm0, %v18022_v37 }
 0xdb8   :  { %14621 = vmatprep.mubr.msk.f32.mxu0 %vm50_vm0, %v18029_v58 }
 0xdbb   :  { %14622 = vmatmul.mubr.msk.f32.gmra.mxu0 %vm50_vm0, %v18036_v44 }
 0xdbc   :  { %14624 = vmatprep.mubr.msk.f32.mxu0 %vm50_vm0, %v18043_v46 }
 0xdbd   :  { %v14524_v12 = vpop.f32.mrf.mxu1 }
 0xdbe   :  { %v18120_v57 = vadd.f32 %v14524_v12, %v17672_v47  ;;  %v14556_v12 = vpop.f32.mrf.mxu0 }
 0xdbf   :  { %v18122_v19 = vpop.f32.mrf.mxu1  ;;  %14625 = vmatmul.mubr.msk.f32.gmra.mxu0 %vm50_vm0, %v18050_v50 }
 0xdc0   :  { %19862 = vst [vmem:[#allocation29_spill] sm:$0xff] %v18122_v19  ;;  %14627 = vmatprep.mubr.msk.f32.mxu0 %vm50_vm0, %v18057_v23 }
 0xdc1   :  { %v14527_v25 = vpop.f32.mrf.mxu1 }
 0xdc2   :  { %v18129_v55 = vadd.f32 %v14527_v25, %v17681_v2  ;;  %v5929_v25 = vmul.f32 0.5, %v14550_v63 }
 0xdc3   :  { %v18131_v13 = vpop.f32.mrf.mxu1  ;;  %14628 = vmatmul.mubr.msk.f32.gmra.mxu0 %vm50_vm0, %v18064_v8 }
 0xdc4   :  { %19863 = vst [vmem:[#allocation30_spill] sm:$0xff] %v18131_v13 }
 0xdc5   :  { %v14530_v47 = vpop.f32.mrf.mxu1 }
 0xdc6   :  { %v18138_v7 = vadd.f32 %v14530_v47, %v17690_v43  ;;  %v5885_v47 = vpop.f32.mrf.mxu0 }
 0xdc7   :  { %v18140_v1 = vpop.f32.mrf.mxu1 }
 0xdc8   :  { %19864 = vst [vmem:[#allocation31_spill] sm:$0xff] %v18140_v1 }
 0xdc9   :  { %v14533_v2 = vpop.f32.mrf.mxu1 }
 0xdca   :  { %v18147_v31 = vadd.f32 %v14533_v2, %v17699_v26  ;;  %v5931_v2 = vmul.f32 0.5, %v14553_v22 }
 0xdcb   :  { %v18149_v51 = vpop.f32.mrf.mxu1 }
 0xdcc   :  { %19865 = vst [vmem:[#allocation32_spill] sm:$0xff] %v18149_v51 }
 0xdcd   :  { %v14576_v36 = vpop.f32.mrf.mxu1 }
 0xdcf   :  { %v6011_v43 = vpop.f32.mrf.mxu1 }
 0xdd1   :  { %v14579_v0 = vpop.f32.mrf.mxu1 }
 0xdd3   :  { %v6021_v42 = vpop.f32.mrf.mxu1 }
 0xdd5   :  { %v14582_v61 = vpop.f32.mrf.mxu1 }
 0xdd7   :  { %v6031_v9 = vpop.f32.mrf.mxu1 }
 0xdd9   :  { %v14585_v48 = vpop.f32.mrf.mxu1 }
 0xdda   :  { %14630 = vmatprep.subr.msk.mxu1 %vm558_vm1, %v14585_v48 }
 0xddb   :  { %v6041_v60 = vpop.f32.mrf.mxu1  ;;  %14631 = vmatpush3.xpose.msk.msra.mxu1 %vm558_vm1, %v14585_v48  ;;  %v5933_v48 = vmul.f32 0.5, %v14556_v12 }
 0xddc   :  { %14632 = vmatprep.subr.msk.mxu1 %vm558_vm1, %v6041_v60 }
 0xddd   :  { %v14588_v26 = vpop.f32.mrf.mxu1 }
 0xddf   :  { %14633 = vmatpush3.xpose.msk.msra.mxu1 %vm558_vm1, %v6041_v60  ;;  %v6051_v41 = vpop.f32.mrf.mxu1 }
 0xde0   :  { %14634 = vmatprep.subr.msk.mxu1 %vm558_vm1, %v14582_v61 }
 0xde1   :  { %v14591_v62 = vpop.f32.mrf.mxu1 }
 0xde3   :  { %14635 = vmatpush3.xpose.msk.msra.mxu1 %vm558_vm1, %v14582_v61  ;;  %v6061_v32 = vpop.f32.mrf.mxu1 }
 0xde4   :  { %14636 = vmatprep.subr.msk.mxu1 %vm558_vm1, %v6031_v9 }
 0xde5   :  { %v14594_v45 = vpop.f32.mrf.mxu1 }
 0xde7   :  { %14637 = vmatpush3.xpose.msk.msra.mxu1 %vm558_vm1, %v6031_v9  ;;  %v6071_v15 = vpop.f32.mrf.mxu1 }
 0xde8   :  { %14638 = vmatprep.subr.msk.mxu1 %vm558_vm1, %v14579_v0 }
 0xde9   :  { %v14597_v59 = vpop.f32.mrf.mxu1 }
 0xdeb   :  { %14639 = vmatpush3.xpose.msk.msra.mxu1 %vm558_vm1, %v14579_v0  ;;  %v6081_v24 = vpop.f32.mrf.mxu1 }
 0xdec   :  { %14640 = vmatprep.subr.msk.mxu1 %vm558_vm1, %v6021_v42 }
 0xdef   :  { %14641 = vmatpush3.xpose.msk.msra.mxu1 %vm558_vm1, %v6021_v42 }
 0xdf0   :  { %14642 = vmatprep.subr.msk.mxu1 %vm558_vm1, %v14576_v36 }
 0xdf3   :  { %14643 = vmatpush3.xpose.msk.msra.mxu1 %vm558_vm1, %v14576_v36  ;;  %v5932_v36 = vmul.f32 0.5, %v5885_v47 }
 0xdf4   :  { %14644 = vmatprep.subr.msk.mxu1 %vm558_vm1, %v6011_v43 }
 0xdf7   :  { %14645 = vmatpush3.xpose.msk.msra.mxu1 %vm558_vm1, %v6011_v43  ;;  %v14559_v43 = vpop.f32.mrf.mxu0 }
 0xdf8   :  { %14686 = vmatprep.subr.msk.mxu1 %vm558_vm1, %v14597_v59 }
 0xdf9   :  { %v5895_v0 = vpop.f32.mrf.mxu0 }
 0xdfa   :  { %14647 = vmatmul.mubr.msk.f32.vlgmr.msra.gmra.mxu1 %vm558_vm1, %v5925_v35  ;;  %v5934_v9 = vmul.f32 0.5, %v5895_v0 }
 0xdfb   :  { %14687 = vmatpush3.xpose.msk.msra.mxu1 %vm558_vm1, %v14597_v59  ;;  %14649 = vmatprep.mubr.msk.f32.mxu1 %vm558_vm1, %v5926_v33  ;;  %v14562_v42 = vpop.f32.mrf.mxu0 }
 0xdfc   :  { %14688 = vmatprep.subr.msk.mxu1 %vm558_vm1, %v6081_v24 }
 0xdfd   :  { %v5905_v61 = vpop.f32.mrf.mxu0 }
 0xdfe   :  { %14650 = vmatmul.mubr.msk.f32.gmra.mxu1 %vm558_vm1, %v5927_v29  ;;  %v5936_v4 = vmul.f32 0.5, %v5905_v61 }
 0xdff   :  { %14689 = vmatpush3.xpose.msk.msra.mxu1 %vm558_vm1, %v6081_v24  ;;  %14652 = vmatprep.mubr.msk.f32.mxu1 %vm558_vm1, %v5928_v11  ;;  %v14565_v60 = vpop.f32.mrf.mxu0 }
 0xe00   :  { %14690 = vmatprep.subr.msk.mxu1 %vm558_vm1, %v14594_v45 }
 0xe01   :  { %v5915_v3 = vpop.f32.mrf.mxu0 }
 0xe02   :  { %14653 = vmatmul.mubr.msk.f32.gmra.mxu1 %vm558_vm1, %v5929_v25 }
 0xe03   :  { %14691 = vmatpush3.xpose.msk.msra.mxu1 %vm558_vm1, %v14594_v45  ;;  %14655 = vmatprep.mubr.msk.f32.mxu1 %vm558_vm1, %v5930_v52 }
 0xe04   :  { %14692 = vmatprep.subr.msk.mxu1 %vm558_vm1, %v6071_v15 }
 0xe06   :  { %14656 = vmatmul.mubr.msk.f32.gmra.mxu1 %vm558_vm1, %v5931_v2 }
 0xe07   :  { %14693 = vmatpush3.xpose.msk.msra.mxu1 %vm558_vm1, %v6071_v15  ;;  %14702 = vmatprep.mubr.msk.f32.mxu1 %vm558_vm1, %v5932_v36 }
 0xe08   :  { %14694 = vmatprep.subr.msk.mxu1 %vm558_vm1, %v14591_v62 }
 0xe0b   :  { %14695 = vmatpush3.xpose.msk.msra.mxu1 %vm558_vm1, %v14591_v62  ;;  %v5935_v62 = vmul.f32 0.5, %v14559_v43 }
 0xe0c   :  { %14696 = vmatprep.subr.msk.mxu1 %vm558_vm1, %v6061_v32 }
 0xe0f   :  { %14697 = vmatpush3.xpose.msk.msra.mxu1 %vm558_vm1, %v6061_v32  ;;  %v5937_v32 = vmul.f32 0.5, %v14562_v42 }
 0xe10   :  { %14698 = vmatprep.subr.msk.mxu1 %vm558_vm1, %v14588_v26 }
 0xe13   :  { %14699 = vmatpush3.xpose.msk.msra.mxu1 %vm558_vm1, %v14588_v26  ;;  %v5938_v26 = vmul.f32 0.5, %v5915_v3 }
 0xe14   :  { %14700 = vmatprep.subr.msk.mxu1 %vm558_vm1, %v6051_v41 }
 0xe17   :  { %14701 = vmatpush3.xpose.msk.msra.mxu1 %vm558_vm1, %v6051_v41  ;;  %v5939_v41 = vmul.f32 0.5, %v14565_v60 }
 0xe1a   :  { %14703 = vmatmul.mubr.msk.f32.vlgmr.msra.gmra.mxu1 %vm558_vm1, %v5933_v48 }
 0xe1b   :  { %14705 = vmatprep.mubr.msk.f32.mxu1 %vm558_vm1, %v5934_v9 }
 0xe1e   :  { %14706 = vmatmul.mubr.msk.f32.gmra.mxu1 %vm558_vm1, %v5935_v62 }
 0xe1f   :  { %14708 = vmatprep.mubr.msk.f32.mxu1 %vm558_vm1, %v5936_v4 }
 0xe22   :  { %14709 = vmatmul.mubr.msk.f32.gmra.mxu1 %vm558_vm1, %v5937_v32 }
 0xe23   :  { %14711 = vmatprep.mubr.msk.f32.mxu1 %vm558_vm1, %v5938_v26 }
 0xe26   :  { %14712 = vmatmul.mubr.msk.f32.gmra.mxu1 %vm558_vm1, %v5939_v41 }
 0xe27   :  { %14776 = vmatprep.mubr.msk.f32.mxu1 %vm50_vm0, %v17959_v40 }
 0xe67   :  { %v14608_v63 = vpop.f32.mrf.mxu0 }
 0xe69   :  { %v6161_v45 = vpop.f32.mrf.mxu0 }
 0xe6b   :  { %v14611_v18 = vpop.f32.mrf.mxu0 }
 0xe6d   :  { %v6171_v15 = vpop.f32.mrf.mxu0 }
 0xe6f   :  { %v14614_v22 = vpop.f32.mrf.mxu0 }
 0xe71   :  { %v6181_v59 = vpop.f32.mrf.mxu0 }
 0xe73   :  { %v14617_v33 = vpop.f32.mrf.mxu0 }
 0xe74   :  { %14658 = vmatprep.subr.mxu0 %v14617_v33 }
 0xe75   :  { %v6191_v35 = vpop.f32.mrf.mxu0  ;;  %14659 = vmatpush3.msra.mxu0 %v14617_v33 }
 0xe76   :  { %14660 = vmatprep.subr.mxu0 %v6191_v35 }
 0xe77   :  { %14661 = vmatpush3.msra.mxu0 %v6191_v35  ;;  %v18223_v60 = vpop.f32.mrf.mxu0 }
 0xe78   :  { %14662 = vmatprep.subr.mxu0 %v14614_v22 }
 0xe79   :  { %14663 = vmatpush3.msra.mxu0 %v14614_v22  ;;  %v18225_v4 = vpop.f32.mrf.mxu0 }
 0xe7a   :  { %14664 = vmatprep.subr.mxu0 %v6181_v59 }
 0xe7b   :  { %14665 = vmatpush3.msra.mxu0 %v6181_v59  ;;  %v18227_v62 = vpop.f32.mrf.mxu0 }
 0xe7c   :  { %14666 = vmatprep.subr.mxu0 %v14611_v18 }
 0xe7d   :  { %14667 = vmatpush3.msra.mxu0 %v14611_v18  ;;  %v18229_v3 = vpop.f32.mrf.mxu0 }
 0xe7e   :  { %14668 = vmatprep.subr.mxu0 %v6171_v15 }
 0xe7f   :  { %14669 = vmatpush3.msra.mxu0 %v6171_v15  ;;  %v18231_v26 = vpop.f32.mrf.mxu0 }
 0xe80   :  { %14670 = vmatprep.subr.mxu0 %v14608_v63 }
 0xe81   :  { %14671 = vmatpush3.msra.mxu0 %v14608_v63  ;;  %v18233_v32 = vpop.f32.mrf.mxu0 }
 0xe82   :  { %14672 = vmatprep.subr.mxu0 %v6161_v45 }
 0xe83   :  { %14673 = vmatpush3.msra.mxu0 %v6161_v45  ;;  %v18239_v45 = vpop.f32.mrf.mxu0 }
 0xe84   :  { %14714 = vmatprep.subr.mxu0 %v18239_v45 }
 0xeba   :  { %v14648_v29 = vpop.f32.mrf.mxu1 }
 0xebb   :  { %v6396_v21 = vsel %vm712_vm2, %v14648_v29, -inf }
 0xebc   :  { %6397 = vmax.xlane.f32.xlu1 %v6396_v21  ;;  %v6354_v24 = vpop.f32.mrf.mxu1 }
 0xebd   :  { %v6393_v11 = vsel %vm712_vm2, %v6354_v24, -inf }
 0xebe   :  { %6394 = vmax.xlane.f32.xlu0 %v6393_v11  ;;  %v14651_v12 = vpop.f32.mrf.mxu1 }
 0xebf   :  { %v6402_v25 = vsel %vm712_vm2, %v14651_v12, -inf }
 0xec0   :  { %6403 = vmax.xlane.f32.xlu1 %v6402_v25  ;;  %v6364_v52 = vpop.f32.mrf.mxu1 }
 0xec1   :  { %v6399_v47 = vsel %vm712_vm2, %v6364_v52, -inf }
 0xec2   :  { %6400 = vmax.xlane.f32.xlu0 %v6399_v47  ;;  %v18207_v2 = vpop.f32.mrf.mxu1 }
 0xec3   :  { %v6408_v36 = vsel %vm712_vm2, %v18207_v2, -inf }
 0xec4   :  { %6409 = vmax.xlane.f32.xlu1 %v6408_v36  ;;  %v18211_v43 = vpop.f32.mrf.mxu1 }
 0xec5   :  { %v6405_v0 = vsel %vm712_vm2, %v18211_v43, -inf }
 0xec6   :  { %6406 = vmax.xlane.f32.xlu0 %v6405_v0  ;;  %v18215_v42 = vpop.f32.mrf.mxu1 }
 0xec7   :  { %v6414_v61 = vsel %vm712_vm2, %v18215_v42, -inf }
 0xec8   :  { %6415 = vmax.xlane.f32.xlu1 %v6414_v61  ;;  %v18219_v9 = vpop.f32.mrf.mxu1 }
 0xec9   :  { %v6411_v48 = vsel %vm712_vm2, %v18219_v9, -inf }
 0xeca   :  { %6412 = vmax.xlane.f32.xlu0 %v6411_v48 }
 0xeda   :  { %v18235_v41 = vpop.f32.mrf.mxu1 }
 0xedb   :  { %v6766_v63 = vsel %vm712_vm2, %v18235_v41, -inf }
 0xedc   :  { %6767 = vmax.xlane.f32.xlu1 %v6766_v63  ;;  %v18241_v18 = vpop.f32.mrf.mxu1 }
 0xedd   :  { %v6763_v15 = vsel %vm712_vm2, %v18241_v18, -inf }
 0xede   :  { %v18246_v22 = vpop.f32.mrf.mxu1  ;;  %6764 = vmax.xlane.f32.xlu0 %v6763_v15 }
 0xedf   :  { %v6772_v59 = vsel %vm712_vm2, %v18246_v22, -inf }
 0xee0   :  { %6773 = vmax.xlane.f32.xlu1 %v6772_v59  ;;  %v18250_v33 = vpop.f32.mrf.mxu1 }
 0xee1   :  { %v6769_v35 = vsel %vm712_vm2, %v18250_v33, -inf }
 0xee2   :  { %v18254_v21 = vpop.f32.mrf.mxu1  ;;  %6770 = vmax.xlane.f32.xlu0 %v6769_v35 }
 0xee3   :  { %v6778_v11 = vsel %vm712_vm2, %v18254_v21, -inf }
 0xee4   :  { %6779 = vmax.xlane.f32.xlu1 %v6778_v11  ;;  %v18258_v25 = vpop.f32.mrf.mxu1 }
 0xee5   :  { %v6775_v47 = vsel %vm712_vm2, %v18258_v25, -inf }
 0xee6   :  { %v18262_v36 = vpop.f32.mrf.mxu1  ;;  %6776 = vmax.xlane.f32.xlu0 %v6775_v47 }
 0xee7   :  { %v6784_v0 = vsel %vm712_vm2, %v18262_v36, -inf }
 0xee8   :  { %6785 = vmax.xlane.f32.xlu1 %v6784_v0  ;;  %v18266_v61 = vpop.f32.mrf.mxu1 }
 0xee9   :  { %v6781_v48 = vsel %vm712_vm2, %v18266_v61, -inf }
 0xeea   :  { %6782 = vmax.xlane.f32.xlu0 %v6781_v48 }
 0xf45   :  { %v6398_v63 = vpop.xlane.xlu1 %6397 }
 0xf46   :  { %v6418_v15 = vsub.f32 %v14648_v29, %v6398_v63 }
 0xf47   :  { %v6395_v59 = vpop.xlane.xlu0 %6394 }
 0xf48   :  { %v6427_v35 = vmul.f32 1.442695, %v6418_v15  ;;  %v6417_v11 = vsub.f32 %v6354_v24, %v6395_v59 }
 0xf49   :  { %v6404_v51 = vpop.xlane.xlu1 %6403 }
 0xf4a   :  { %15742 = vpow2.f32 %v6427_v35  ;;  %v6425_v1 = vmul.f32 1.442695, %v6417_v11  ;;  %v6420_v13 = vsub.f32 %v14651_v12, %v6404_v51 }
 0xf4b   :  { %v6401_v47 = vpop.xlane.xlu0 %6400 }
 0xf4c   :  { %15744 = vpow2.f32 %v6425_v1  ;;  %v6431_v19 = vmul.f32 1.442695, %v6420_v13  ;;  %v6419_v30 = vsub.f32 %v6364_v52, %v6401_v47 }
 0xf4d   :  { %v6410_v0 = vpop.xlane.xlu1 %6409 }
 0xf4e   :  { %15746 = vpow2.f32 %v6431_v19  ;;  %v6429_v34 = vmul.f32 1.442695, %v6419_v30  ;;  %v6422_v17 = vsub.f32 %v18207_v2, %v6410_v0 }
 0xf4f   :  { %v6407_v27 = vpop.xlane.xlu0 %6406 }
 0xf50   :  { %15748 = vpow2.f32 %v6429_v34  ;;  %v6435_v48 = vmul.f32 1.442695, %v6422_v17  ;;  %v6421_v29 = vsub.f32 %v18211_v43, %v6407_v27  ;;  %v6231_v27 = vpop.f32.mrf.mxu0 }
 0xf51   :  { %v6416_v63 = vpop.xlane.xlu1 %6415 }
 0xf52   :  { %15750 = vpow2.f32 %v6435_v48  ;;  %v6433_v24 = vmul.f32 1.442695, %v6421_v29  ;;  %v6424_v15 = vsub.f32 %v18215_v42, %v6416_v63 }
 0xf53   :  { %v6413_v51 = vpop.xlane.xlu0 %6412 }
 0xf54   :  { %15752 = vpow2.f32 %v6433_v24  ;;  %v6439_v1 = vmul.f32 1.442695, %v6424_v15  ;;  %v6423_v13 = vsub.f32 %v18219_v9, %v6413_v51 }
 0xf56   :  { %15754 = vpow2.f32 %v6439_v1  ;;  %v6437_v19 = vmul.f32 1.442695, %v6423_v13 }
 0xf57   :  { %v15743_v30 = vpop.eup %15742 }
 0xf58   :  { %15756 = vpow2.f32 %v6437_v19  ;;  %v6444_v12 = vsel %vm712_vm2, %v15743_v30, 0.0 }
 0xf59   :  { %v15745_v34 = vpop.eup %15744  ;;  %6445 = vadd.xlane.f32.xlu1 %v6444_v12 }
 0xf5a   :  { %14674 = vmatprep.mubr.msk.f32.mxu0 %vm712_vm2, %v15745_v34  ;;  %v6441_v17 = vsel %vm712_vm2, %v15745_v34, 0.0 }
 0xf5b   :  { %v15747_v52 = vpop.eup %15746  ;;  %14675 = vmatmul.mubr.msk.f32.vlgmr.msra.gmra.mxu0 %vm712_vm2, %v15743_v30  ;;  %6442 = vadd.xlane.f32.xlu0 %v6441_v17 }
 0xf5c   :  { %14715 = vmatpush3.msra.mxu0 %v18239_v45  ;;  %v6450_v2 = vsel %vm712_vm2, %v15747_v52, 0.0 }
 0xf5d   :  { %v15749_v43 = vpop.eup %15748  ;;  %14716 = vmatprep.subr.mxu0 %v6231_v27  ;;  %6451 = vadd.xlane.f32.xlu1 %v6450_v2 }
 0xf5e   :  { %14717 = vmatpush3.msra.mxu0 %v6231_v27  ;;  %14677 = vmatprep.mubr.msk.f32.mxu0 %vm712_vm2, %v15749_v43  ;;  %v6447_v42 = vsel %vm712_vm2, %v15749_v43, 0.0 }
 0xf5f   :  { %v15751_v9 = vpop.eup %15750  ;;  %14718 = vmatprep.subr.mxu0 %v18231_v26  ;;  %14678 = vmatmul.mubr.msk.f32.gmra.mxu0 %vm712_vm2, %v15747_v52 }
 0xf60   :  { %14719 = vmatpush3.msra.mxu0 %v18231_v26  ;;  %6448 = vadd.xlane.f32.xlu0 %v6447_v42  ;;  %v6456_v45 = vsel %vm712_vm2, %v15751_v9, 0.0 }
 0xf61   :  { %v15753_v59 = vpop.eup %15752  ;;  %14720 = vmatprep.subr.mxu0 %v18233_v32  ;;  %6457 = vadd.xlane.f32.xlu1 %v6456_v45 }
 0xf62   :  { %14721 = vmatpush3.msra.mxu0 %v18233_v32  ;;  %14680 = vmatprep.mubr.msk.f32.mxu0 %vm712_vm2, %v15753_v59  ;;  %v6453_v35 = vsel %vm712_vm2, %v15753_v59, 0.0 }
 0xf63   :  { %v15755_v11 = vpop.eup %15754  ;;  %14722 = vmatprep.subr.mxu0 %v18227_v62  ;;  %14681 = vmatmul.mubr.msk.f32.gmra.mxu0 %vm712_vm2, %v15751_v9 }
 0xf64   :  { %14723 = vmatpush3.msra.mxu0 %v18227_v62  ;;  %6454 = vadd.xlane.f32.xlu0 %v6453_v35  ;;  %v6462_v26 = vsel %vm712_vm2, %v15755_v11, 0.0 }
 0xf65   :  { %v15757_v47 = vpop.eup %15756  ;;  %14724 = vmatprep.subr.mxu0 %v18229_v3  ;;  %v6768_v0 = vpop.xlane.xlu1 %6767  ;;  %6463 = vadd.xlane.f32.xlu1 %v6462_v26 }
 0xf66   :  { %14725 = vmatpush3.msra.mxu0 %v18229_v3  ;;  %v6788_v32 = vsub.f32 %v18235_v41, %v6768_v0  ;;  %14683 = vmatprep.mubr.msk.f32.mxu0 %vm712_vm2, %v15757_v47  ;;  %v6459_v48 = vsel %vm712_vm2, %v15757_v47, 0.0 }
 0xf67   :  { %14726 = vmatprep.subr.mxu0 %v18223_v60  ;;  %14684 = vmatmul.mubr.msk.f32.gmra.mxu0 %vm712_vm2, %v15755_v11  ;;  %v6765_v62 = vpop.xlane.xlu0 %6764 }
 0xf68   :  { %v6797_v29 = vmul.f32 1.442695, %v6788_v32  ;;  %14727 = vmatpush3.msra.mxu0 %v18223_v60  ;;  %6460 = vadd.xlane.f32.xlu0 %v6459_v48  ;;  %v6787_v63 = vsub.f32 %v18241_v18, %v6765_v62  ;;  %v12074_v48 = vld [vmem:[%s19832_s4 + $0x10] sm:$0xf]  ;;  %v12115_v62 = vld [vmem:[%s19828_s2 + $0xb8] sm:$0xff] }
 0xf69   :  { %14728 = vmatprep.subr.mxu0 %v18225_v4  ;;  %v6774_v3 = vpop.xlane.xlu1 %6773 }
 0xf6a   :  { %15758 = vpow2.f32 %v6797_v29  ;;  %v6795_v41 = vmul.f32 1.442695, %v6787_v63  ;;  %14729 = vmatpush3.msra.mxu0 %v18225_v4  ;;  %v6790_v24 = vsub.f32 %v18246_v22, %v6774_v3  ;;  %v12095_v29 = vld [vmem:[%s19830_s1 + $0xb8] sm:$0xff]  ;;  %v12094_v63 = vld [vmem:[%s19830_s1 + $0xb0] sm:$0xff]  ;;  %v12093_v3 = vld [vmem:[%s19830_s1 + $0xa8] sm:$0xff] }
 0xf6b   :  { %v6771_v15 = vpop.xlane.xlu0 %6770  ;;  %14742 = vmatprep.subr.msk.mxu0 %vm1349_vm3, %v12074_v48  ;;  %14768 = vmatprep.subr.mxu1 %v12095_v29 }
 0xf6c   :  { %15760 = vpow2.f32 %v6795_v41  ;;  %v6801_v51 = vmul.f32 1.442695, %v6790_v24  ;;  %v6789_v1 = vsub.f32 %v18250_v33, %v6771_v15  ;;  %14769 = vmatpush3.msra.mxu1 %v12095_v29  ;;  %v12092_v41 = vld [vmem:[%s19830_s1 + $0xa0] sm:$0xff] }
 0xf6d   :  { %v6780_v13 = vpop.xlane.xlu1 %6779  ;;  %14770 = vmatprep.subr.mxu1 %v12094_v63 }
 0xf6e   :  { %15762 = vpow2.f32 %v6801_v51  ;;  %v6799_v60 = vmul.f32 1.442695, %v6789_v1  ;;  %v6792_v19 = vsub.f32 %v18254_v21, %v6780_v13  ;;  %14771 = vmatpush3.msra.mxu1 %v12094_v63  ;;  %v12113_v13 = vld [vmem:[%s19828_s2 + $0xa8] sm:$0xff] }
 0xf6f   :  { %v6777_v18 = vpop.xlane.xlu0 %6776  ;;  %14772 = vmatprep.subr.mxu1 %v12093_v3 }
 0xf70   :  { %15764 = vpow2.f32 %v6799_v60  ;;  %v6805_v30 = vmul.f32 1.442695, %v6792_v19  ;;  %v6791_v12 = vsub.f32 %v18258_v25, %v6777_v18  ;;  %14773 = vmatpush3.msra.mxu1 %v12093_v3  ;;  %v12112_v18 = vld [vmem:[%s19828_s2 + $0xa0] sm:$0xff] }
 0xf71   :  { %v6786_v34 = vpop.xlane.xlu1 %6785  ;;  %14774 = vmatprep.subr.mxu1 %v12092_v41 }
 0xf72   :  { %15766 = vpow2.f32 %v6805_v30  ;;  %v6803_v4 = vmul.f32 1.442695, %v6791_v12  ;;  %v6794_v22 = vsub.f32 %v18262_v36, %v6786_v34  ;;  %14775 = vmatpush3.msra.mxu1 %v12092_v41 }
 0xf73   :  { %v6783_v27 = vpop.xlane.xlu0 %6782  ;;  %14777 = vmatmul.mubr.msk.f32.vlgmr.msra.gmra.mxu1 %vm50_vm0, %v17966_v14 }
 0xf74   :  { %15768 = vpow2.f32 %v6803_v4  ;;  %v6809_v17 = vmul.f32 1.442695, %v6794_v22  ;;  %v6793_v33 = vsub.f32 %v18266_v61, %v6783_v27  ;;  %14779 = vmatprep.mubr.msk.f32.mxu1 %vm50_vm0, %v17973_v5 }
 0xf76   :  { %15770 = vpow2.f32 %v6809_v17  ;;  %v6807_v52 = vmul.f32 1.442695, %v6793_v33 }
 0xf77   :  { %v15759_v2 = vpop.eup %15758  ;;  %14780 = vmatmul.mubr.msk.f32.gmra.mxu1 %vm50_vm0, %v17980_v49 }
 0xf78   :  { %15772 = vpow2.f32 %v6807_v52  ;;  %v6814_v21 = vsel %vm712_vm2, %v15759_v2, 0.0  ;;  %14782 = vmatprep.mubr.msk.f32.mxu1 %vm50_vm0, %v17987_v28 }
 0xf79   :  { %v15761_v43 = vpop.eup %15760  ;;  %6815 = vadd.xlane.f32.xlu1 %v6814_v21 }
 0xf7a   :  { %14730 = vmatprep.mubr.msk.f32.mxu0 %vm712_vm2, %v15761_v43  ;;  %v6811_v25 = vsel %vm712_vm2, %v15761_v43, 0.0 }
 0xf7b   :  { %v15763_v42 = vpop.eup %15762  ;;  %14731 = vmatmul.mubr.msk.f32.vlgmr.msra.gmra.mxu0 %vm712_vm2, %v15759_v2  ;;  %6812 = vadd.xlane.f32.xlu0 %v6811_v25 }
 0xf7c   :  { %v6820_v36 = vsel %vm712_vm2, %v15763_v42, 0.0  ;;  %14743 = vmatpush3.msk.msra.mxu0 %vm1349_vm3, %v12074_v48  ;;  %14783 = vmatmul.mubr.msk.f32.gmra.mxu1 %vm50_vm0, %v17994_v56 }
 0xf7d   :  { %v15765_v9 = vpop.eup %15764  ;;  %6821 = vadd.xlane.f32.xlu1 %v6820_v36  ;;  %14800 = vmatprep.subr.mxu0 %v12115_v62 }
 0xf7e   :  { %14733 = vmatprep.mubr.msk.f32.mxu0 %vm712_vm2, %v15765_v9  ;;  %v6817_v61 = vsel %vm712_vm2, %v15765_v9, 0.0  ;;  %14785 = vmatprep.mubr.msk.f32.mxu1 %vm50_vm0, %v18001_v38 }
 0xf7f   :  { %v15767_v45 = vpop.eup %15766  ;;  %14734 = vmatmul.mubr.msk.f32.gmra.mxu0 %vm712_vm2, %v15763_v42  ;;  %6818 = vadd.xlane.f32.xlu0 %v6817_v61 }
 0xf80   :  { %v6826_v59 = vsel %vm712_vm2, %v15767_v45, 0.0  ;;  %14786 = vmatmul.mubr.msk.f32.gmra.mxu1 %vm50_vm0, %v18008_v53 }
 0xf81   :  { %v15769_v35 = vpop.eup %15768  ;;  %6827 = vadd.xlane.f32.xlu1 %v6826_v59  ;;  %14788 = vmatprep.mubr.msk.f32.mxu1 %vm50_vm0, %v18015_v39 }
 0xf82   :  { %14736 = vmatprep.mubr.msk.f32.mxu0 %vm712_vm2, %v15769_v35  ;;  %v6823_v11 = vsel %vm712_vm2, %v15769_v35, 0.0 }
 0xf83   :  { %v15771_v26 = vpop.eup %15770  ;;  %14737 = vmatmul.mubr.msk.f32.gmra.mxu0 %vm712_vm2, %v15767_v45  ;;  %6824 = vadd.xlane.f32.xlu0 %v6823_v11 }
 0xf84   :  { %v6832_v47 = vsel %vm712_vm2, %v15771_v26, 0.0  ;;  %14789 = vmatmul.mubr.msk.f32.gmra.mxu1 %vm50_vm0, %v18022_v37 }
 0xf85   :  { %v15773_v0 = vpop.eup %15772  ;;  %6833 = vadd.xlane.f32.xlu1 %v6832_v47  ;;  %14791 = vmatprep.mubr.msk.f32.mxu1 %vm50_vm0, %v18029_v58 }
 0xf86   :  { %14739 = vmatprep.mubr.msk.f32.mxu0 %vm712_vm2, %v15773_v0  ;;  %v6829_v32 = vsel %vm712_vm2, %v15773_v0, 0.0 }
 0xf87   :  { %14740 = vmatmul.mubr.msk.f32.gmra.mxu0 %vm712_vm2, %v15771_v26  ;;  %6830 = vadd.xlane.f32.xlu0 %v6829_v32 }
 0xf88   :  { %14792 = vmatmul.mubr.msk.f32.gmra.mxu1 %vm50_vm0, %v18036_v44 }
 0xf89   :  { %14794 = vmatprep.mubr.msk.f32.mxu1 %vm50_vm0, %v18043_v46 }
 0xf8c   :  { %14795 = vmatmul.mubr.msk.f32.gmra.mxu1 %vm50_vm0, %v18050_v50 }
 0xf8d   :  { %14797 = vmatprep.mubr.msk.f32.mxu1 %vm50_vm0, %v18057_v23 }
 0xf90   :  { %14798 = vmatmul.mubr.msk.f32.gmra.mxu1 %vm50_vm0, %v18064_v8  ;;  %v12114_v8 = vld [vmem:[%s19828_s2 + $0xb0] sm:$0xff] }
 0xf91   :  { %14840 = vmatprep.mubr.msk.f32.mxu1 %vm50_vm0, %v17959_v40 }
 0xfe2   :  { %v6446_v5 = vpop.xlane.xlu1 %6445 }
 0xfe4   :  { %v6443_v14 = vpop.xlane.xlu0 %6442 }
 0xfe5   :  { %15774 = vrcp.f32 %v6443_v14 }
 0xfe6   :  { %v6452_v28 = vpop.xlane.xlu1 %6451  ;;  %15776 = vrcp.f32 %v6446_v5 }
 0xfe9   :  { %v6449_v49 = vpop.xlane.xlu0 %6448 }
 0xfea   :  { %15778 = vrcp.f32 %v6449_v49  ;;  %v6458_v38 = vpop.xlane.xlu1 %6457 }
 0xfeb   :  { %15780 = vrcp.f32 %v6452_v28 }
 0xfed   :  { %v6455_v56 = vpop.xlane.xlu0 %6454 }
 0xfee   :  { %15782 = vrcp.f32 %v6455_v56  ;;  %v6464_v39 = vpop.xlane.xlu1 %6463 }
 0xfef   :  { %15784 = vrcp.f32 %v6458_v38 }
 0xff1   :  { %v6461_v53 = vpop.xlane.xlu0 %6460 }
 0xff2   :  { %15786 = vrcp.f32 %v6461_v53  ;;  %v15775_v58 = vpop.eup %15774 }
 0xff3   :  { %15788 = vrcp.f32 %v6464_v39  ;;  %v15777_v40 = vpop.eup %15776 }
 0xff7   :  { %v15779_v24 = vpop.eup %15778 }
 0xff8   :  { %v15781_v51 = vpop.eup %15780 }
 0xffb   :  { %v15783_v30 = vpop.eup %15782 }
 0xffc   :  { %v15785_v34 = vpop.eup %15784 }
 0xfff   :  { %v15787_v52 = vpop.eup %15786 }
0x1000   :  { %v15789_v21 = vpop.eup %15788 }
0x1002   :  { %v6816_v33 = vpop.xlane.xlu1 %6815 }
0x1004   :  { %v6813_v22 = vpop.xlane.xlu0 %6812 }
0x1005   :  { %15790 = vrcp.f32 %v6813_v22 }
0x1006   :  { %v6822_v36 = vpop.xlane.xlu1 %6821  ;;  %15792 = vrcp.f32 %v6816_v33 }
0x1008   :  { %v6819_v42 = vpop.xlane.xlu0 %6818 }
0x1009   :  { %15794 = vrcp.f32 %v6819_v42 }
0x100a   :  { %v6828_v61 = vpop.xlane.xlu1 %6827  ;;  %15796 = vrcp.f32 %v6822_v36 }
0x100c   :  { %v6825_v9 = vpop.xlane.xlu0 %6824 }
0x100d   :  { %15798 = vrcp.f32 %v6825_v9  ;;  %v12135_v9 = vld [vmem:[%s19831_s3 + $0xb8] sm:$0xff] }
0x100e   :  { %15800 = vrcp.f32 %v6828_v61  ;;  %v6834_v59 = vpop.xlane.xlu1 %6833  ;;  %14832 = vmatprep.subr.mxu1 %v12135_v9 }
0x100f   :  { %14833 = vmatpush3.msra.mxu1 %v12135_v9 }
0x1010   :  { %v6831_v45 = vpop.xlane.xlu0 %6830 }
0x1011   :  { %15802 = vrcp.f32 %v6831_v45 }
0x1012   :  { %v15791_v11 = vpop.eup %15790  ;;  %15804 = vrcp.f32 %v6834_v59  ;;  %v12132_v59 = vld [vmem:[%s19831_s3 + $0xa0] sm:$0xff] }
0x1013   :  { %v15793_v47 = vpop.eup %15792 }
0x101b   :  { %v14676_v37 = vpop.f32.mrf.mxu0 }
0x101c   :  { %v6603_v50 = vmul.f32 %v15777_v40, %v14676_v37 }
0x101d   :  { %v6555_v44 = vpop.f32.mrf.mxu0 }
0x101e   :  { %v6602_v46 = vmul.f32 %v15775_v58, %v6555_v44 }
0x101f   :  { %v14679_v23 = vpop.f32.mrf.mxu0 }
0x1020   :  { %14744 = vmatprep.mubr.msk.f32.mxu0 %vm558_vm1, %v6602_v46  ;;  %v6605_v60 = vmul.f32 %v15781_v51, %v14679_v23  ;;  %v18407_v46 = vld [vmem:[%s19829_s0] sm:$0xff]  ;;  %v18421_v23 = vld [vmem:[%s19829_s0 + $0x10] sm:$0xff] }
0x1021   :  { %v6565_v15 = vpop.f32.mrf.mxu0  ;;  %14745 = vmatmul.mubr.msk.f32.vlgmr.msra.gmra.mxu0 %vm558_vm1, %v6603_v50  ;;  %v18414_v50 = vld [vmem:[%s19829_s0 + $0x8] sm:$0xff]  ;;  %v18449_v51 = vld [vmem:[%s19829_s0 + $0x30] sm:$0xff] }
0x1022   :  { %v6604_v1 = vmul.f32 %v15779_v24, %v6565_v15  ;;  %14801 = vmatpush3.msra.mxu0 %v12115_v62  ;;  %v15795_v62 = vpop.eup %15794  ;;  %v18435_v24 = vld [vmem:[%s19829_s0 + $0x20] sm:$0xff]  ;;  %v18442_v15 = vld [vmem:[%s19829_s0 + $0x28] sm:$0xff] }
0x1023   :  { %v14682_v19 = vpop.f32.mrf.mxu0  ;;  %14802 = vmatprep.subr.mxu0 %v12114_v8  ;;  %v15797_v63 = vpop.eup %15796 }
0x1024   :  { %14747 = vmatprep.mubr.msk.f32.mxu0 %vm558_vm1, %v6604_v1  ;;  %14803 = vmatpush3.msra.mxu0 %v12114_v8  ;;  %v6607_v27 = vmul.f32 %v15785_v34, %v14682_v19  ;;  %v15799_v5 = vpop.eup %15798  ;;  %v18428_v8 = vld [vmem:[%s19829_s0 + $0x18] sm:$0xff]  ;;  %v18477_v19 = vld [vmem:[%s19829_s0 + $0x50] sm:$0xff] }
0x1025   :  { %v6575_v12 = vpop.f32.mrf.mxu0  ;;  %14748 = vmatmul.mubr.msk.f32.gmra.mxu0 %vm558_vm1, %v6605_v60  ;;  %14804 = vmatprep.subr.mxu0 %v12113_v13  ;;  %v15801_v28 = vpop.eup %15800  ;;  %v18456_v1 = vld [vmem:[%s19829_s0 + $0x38] sm:$0xff]  ;;  %v18470_v60 = vld [vmem:[%s19829_s0 + $0x48] sm:$0xff]  ;;  %v18505_v34 = vld [vmem:[%s19829_s0 + $0x70] sm:$0xff] }
0x1026   :  { %v6606_v4 = vmul.f32 %v15783_v30, %v6575_v12  ;;  %14805 = vmatpush3.msra.mxu0 %v12113_v13  ;;  %v15803_v39 = vpop.eup %15802  ;;  %v18463_v13 = vld [vmem:[%s19829_s0 + $0x40] sm:$0xff]  ;;  %v18498_v12 = vld [vmem:[%s19829_s0 + $0x68] sm:$0xff] }
0x1027   :  { %v14685_v17 = vpop.f32.mrf.mxu0  ;;  %14806 = vmatprep.subr.mxu0 %v12112_v18  ;;  %v15805_v58 = vpop.eup %15804  ;;  %v18491_v30 = vld [vmem:[%s19829_s0 + $0x60] sm:$0xff] }
0x1028   :  { %14750 = vmatprep.mubr.msk.f32.mxu0 %vm558_vm1, %v6606_v4  ;;  %14807 = vmatpush3.msra.mxu0 %v12112_v18  ;;  %v6609_v25 = vmul.f32 %v15789_v21, %v14685_v17  ;;  %v18484_v18 = vld [vmem:[%s19829_s0 + $0x58] sm:$0xff] }
0x1029   :  { %v6585_v2 = vpop.f32.mrf.mxu0  ;;  %14751 = vmatmul.mubr.msk.f32.gmra.mxu0 %vm558_vm1, %v6607_v27  ;;  %v18512_v4 = vld [vmem:[%s19829_s0 + $0x78] sm:$0xff] }
0x102a   :  { %v6608_v43 = vmul.f32 %v15787_v52, %v6585_v2 }
0x102c   :  { %14753 = vmatprep.mubr.msk.f32.mxu0 %vm558_vm1, %v6608_v43 }
0x102d   :  { %14754 = vmatmul.mubr.msk.f32.gmra.mxu0 %vm558_vm1, %v6609_v25 }
0x1033   :  { %v18516_v22 = vpop.f32.mrf.mxu1 }
0x1034   :  { %v7345_v9 = vmul.f32 0.5, %v18516_v22 }
0x1035   :  { %v7265_v27 = vpop.f32.mrf.mxu1 }
0x1036   :  { %v7344_v17 = vmul.f32 0.5, %v7265_v27 }
0x103b   :  { %v14732_v35 = vpop.f32.mrf.mxu0 }
0x103c   :  { %v6973_v32 = vmul.f32 %v15793_v47, %v14732_v35 }
0x103d   :  { %v6925_v26 = vpop.f32.mrf.mxu0 }
0x103e   :  { %v6972_v0 = vmul.f32 %v15791_v11, %v6925_v26 }
0x103f   :  { %v14735_v48 = vpop.f32.mrf.mxu0 }
0x1040   :  { %14756 = vmatprep.mubr.msk.f32.mxu0 %vm558_vm1, %v6972_v0  ;;  %v6975_v41 = vmul.f32 %v15797_v63, %v14735_v48 }
0x1041   :  { %v6935_v29 = vpop.f32.mrf.mxu0  ;;  %14757 = vmatmul.mubr.msk.f32.gmra.mxu0 %vm558_vm1, %v6973_v32 }
0x1042   :  { %v6974_v3 = vmul.f32 %v15795_v62, %v6935_v29 }
0x1043   :  { %v14738_v14 = vpop.f32.mrf.mxu0 }
0x1044   :  { %14759 = vmatprep.mubr.msk.f32.mxu0 %vm558_vm1, %v6974_v3  ;;  %v6977_v38 = vmul.f32 %v15801_v28, %v14738_v14 }
0x1045   :  { %v6945_v49 = vpop.f32.mrf.mxu0  ;;  %14760 = vmatmul.mubr.msk.f32.gmra.mxu0 %vm558_vm1, %v6975_v41 }
0x1046   :  { %v6976_v56 = vmul.f32 %v15799_v5, %v6945_v49 }
0x1047   :  { %v14741_v53 = vpop.f32.mrf.mxu0 }
0x1048   :  { %14762 = vmatprep.mubr.msk.f32.mxu0 %vm558_vm1, %v6976_v56  ;;  %v6979_v40 = vmul.f32 %v15805_v58, %v14741_v53  ;;  %v14781_v53 = vpop.f32.mrf.mxu1 }
0x1049   :  { %v6955_v37 = vpop.f32.mrf.mxu0  ;;  %14763 = vmatmul.mubr.msk.f32.gmra.mxu0 %vm558_vm1, %v6977_v38 }
0x104a   :  { %v6978_v44 = vmul.f32 %v15803_v39, %v6955_v37  ;;  %v7275_v37 = vpop.f32.mrf.mxu1 }
0x104c   :  { %14765 = vmatprep.mubr.msk.f32.mxu0 %vm558_vm1, %v6978_v44  ;;  %v14784_v44 = vpop.f32.mrf.mxu1 }
0x104d   :  { %14766 = vmatmul.mubr.msk.f32.gmra.mxu0 %vm558_vm1, %v6979_v40 }
0x104e   :  { %14808 = vmatprep.mubr.msk.f32.mxu0 %vm50_vm0, %v18407_v46  ;;  %v7285_v27 = vpop.f32.mrf.mxu1 }
0x1051   :  { %14809 = vmatmul.mubr.msk.f32.vlgmr.msra.gmra.mxu0 %vm50_vm0, %v18414_v50 }
0x1052   :  { %14811 = vmatprep.mubr.msk.f32.mxu0 %vm50_vm0, %v18421_v23 }
0x1055   :  { %14812 = vmatmul.mubr.msk.f32.gmra.mxu0 %vm50_vm0, %v18428_v8 }
0x1056   :  { %14814 = vmatprep.mubr.msk.f32.mxu0 %vm50_vm0, %v18435_v24 }
0x1059   :  { %14815 = vmatmul.mubr.msk.f32.gmra.mxu0 %vm50_vm0, %v18442_v15 }
0x105a   :  { %14817 = vmatprep.mubr.msk.f32.mxu0 %vm50_vm0, %v18449_v51 }
0x105d   :  { %14818 = vmatmul.mubr.msk.f32.gmra.mxu0 %vm50_vm0, %v18456_v1 }
0x105e   :  { %14820 = vmatprep.mubr.msk.f32.mxu0 %vm50_vm0, %v18463_v13 }
0x1061   :  { %14821 = vmatmul.mubr.msk.f32.gmra.mxu0 %vm50_vm0, %v18470_v60 }
0x1062   :  { %14823 = vmatprep.mubr.msk.f32.mxu0 %vm50_vm0, %v18477_v19 }
0x1065   :  { %14824 = vmatmul.mubr.msk.f32.gmra.mxu0 %vm50_vm0, %v18484_v18 }
0x1066   :  { %14826 = vmatprep.mubr.msk.f32.mxu0 %vm50_vm0, %v18491_v30 }
0x1069   :  { %14827 = vmatmul.mubr.msk.f32.gmra.mxu0 %vm50_vm0, %v18498_v12 }
0x106a   :  { %14829 = vmatprep.mubr.msk.f32.mxu0 %vm50_vm0, %v18505_v34 }
0x106d   :  { %14830 = vmatmul.mubr.msk.f32.gmra.mxu0 %vm50_vm0, %v18512_v4 }
0x106e   :  { %14880 = vmatprep.mubr.msk.f32.mxu0 %vm558_vm1, %v7344_v17 }
0x10e1   :  { %v14746_v33 = vpop.f32.mrf.mxu0 }
0x10e2   :  { %v18520_v52 = vadd.f32 %v14746_v33, %v18072_v54  ;;  %v12134_v54 = vld [vmem:[%s19831_s3 + $0xb0] sm:$0xff]  ;;  %v14787_v33 = vpop.f32.mrf.mxu1 }
0x10e3   :  { %v18522_v2 = vpop.f32.mrf.mxu0  ;;  %14834 = vmatprep.subr.mxu1 %v12134_v54 }
0x10e4   :  { %19866 = vst [vmem:[#allocation33_spill] sm:$0xff] %v18522_v2  ;;  %14835 = vmatpush3.msra.mxu1 %v12134_v54  ;;  %v7347_v54 = vmul.f32 0.5, %v14781_v53 }
0x10e5   :  { %v14749_v21 = vpop.f32.mrf.mxu0 }
0x10e6   :  { %v18525_v43 = vadd.f32 %v14749_v21, %v18077_v16  ;;  %v12133_v16 = vld [vmem:[%s19831_s3 + $0xa8] sm:$0xff] }
0x10e7   :  { %v18527_v25 = vpop.f32.mrf.mxu0  ;;  %14836 = vmatprep.subr.mxu1 %v12133_v16 }
0x10e8   :  { %19867 = vst [vmem:[#allocation34_spill] sm:$0xff] %v18527_v25  ;;  %14837 = vmatpush3.msra.mxu1 %v12133_v16  ;;  %v7295_v16 = vpop.f32.mrf.mxu1 }
0x10e9   :  { %v14752_v42 = vpop.f32.mrf.mxu0  ;;  %14838 = vmatprep.subr.mxu1 %v12132_v59  ;;  %v7350_v22 = vmul.f32 0.5, %v7295_v16 }
0x10ea   :  { %v18530_v36 = vadd.f32 %v14752_v42, %v18082_v10  ;;  %14839 = vmatpush3.msra.mxu1 %v12132_v59  ;;  %v7346_v42 = vmul.f32 0.5, %v7275_v37  ;;  %v7348_v59 = vmul.f32 0.5, %v7285_v27 }
0x10eb   :  { %v18538_v61 = vpop.f32.mrf.mxu0  ;;  %14841 = vmatmul.mubr.msk.f32.vlgmr.msra.gmra.mxu1 %vm50_vm0, %v18414_v50 }
0x10ec   :  { %19868 = vst [vmem:[#allocation35_spill] sm:$0xff] %v18538_v61  ;;  %14843 = vmatprep.mubr.msk.f32.mxu1 %vm50_vm0, %v18421_v23 }
0x10ed   :  { %v14755_v45 = vpop.f32.mrf.mxu0 }
0x10ee   :  { %v18544_v10 = vadd.f32 %v14755_v45, %v18096_v20 }
0x10ef   :  { %14844 = vmatmul.mubr.msk.f32.gmra.mxu1 %vm50_vm0, %v18428_v8  ;;  %v18561_v20 = vpop.f32.mrf.mxu0 }
0x10f0   :  { %14846 = vmatprep.mubr.msk.f32.mxu1 %vm50_vm0, %v18435_v24  ;;  %19869 = vst [vmem:[#allocation36_spill] sm:$0xff] %v18561_v20 }
0x10f3   :  { %14847 = vmatmul.mubr.msk.f32.gmra.mxu1 %vm50_vm0, %v18442_v15 }
0x10f4   :  { %14849 = vmatprep.mubr.msk.f32.mxu1 %vm50_vm0, %v18449_v51 }
0x10f7   :  { %14850 = vmatmul.mubr.msk.f32.gmra.mxu1 %vm50_vm0, %v18456_v1 }
0x10f8   :  { %14852 = vmatprep.mubr.msk.f32.mxu1 %vm50_vm0, %v18463_v13 }
0x10fb   :  { %14853 = vmatmul.mubr.msk.f32.gmra.mxu1 %vm50_vm0, %v18470_v60 }
0x10fc   :  { %14855 = vmatprep.mubr.msk.f32.mxu1 %vm50_vm0, %v18477_v19 }
0x10ff   :  { %14856 = vmatmul.mubr.msk.f32.gmra.mxu1 %vm50_vm0, %v18484_v18 }
0x1100   :  { %14858 = vmatprep.mubr.msk.f32.mxu1 %vm50_vm0, %v18491_v30 }
0x1101   :  { %v14758_v35 = vpop.f32.mrf.mxu0 }
0x1102   :  { %v18568_v11 = vadd.f32 %v14758_v35, %v18120_v57  ;;  %v14790_v35 = vpop.f32.mrf.mxu1 }
0x1103   :  { %v18570_v26 = vpop.f32.mrf.mxu0  ;;  %14859 = vmatmul.mubr.msk.f32.gmra.mxu1 %vm50_vm0, %v18498_v12 }
0x1104   :  { %19870 = vst [vmem:[#allocation37_spill] sm:$0xff] %v18570_v26  ;;  %14861 = vmatprep.mubr.msk.f32.mxu1 %vm50_vm0, %v18505_v34 }
0x1105   :  { %v14761_v47 = vpop.f32.mrf.mxu0 }
0x1106   :  { %v18577_v0 = vadd.f32 %v14761_v47, %v18129_v55  ;;  %v7349_v47 = vmul.f32 0.5, %v14784_v44 }
0x1107   :  { %v18579_v32 = vpop.f32.mrf.mxu0  ;;  %14862 = vmatmul.mubr.msk.f32.gmra.mxu1 %vm50_vm0, %v18512_v4 }
0x1108   :  { %19871 = vst [vmem:[#allocation38_spill] sm:$0xff] %v18579_v32 }
0x1109   :  { %v14764_v57 = vpop.f32.mrf.mxu0 }
0x110a   :  { %v18586_v48 = vadd.f32 %v14764_v57, %v18138_v7  ;;  %v7305_v57 = vpop.f32.mrf.mxu1 }
0x110b   :  { %v18588_v62 = vpop.f32.mrf.mxu0 }
0x110c   :  { %19872 = vst [vmem:[#allocation39_spill] sm:$0xff] %v18588_v62 }
0x110d   :  { %v14767_v55 = vpop.f32.mrf.mxu0 }
0x110e   :  { %v18595_v29 = vadd.f32 %v14767_v55, %v18147_v31  ;;  %v7351_v55 = vmul.f32 0.5, %v14787_v33 }
0x110f   :  { %v18597_v63 = vpop.f32.mrf.mxu0 }
0x1110   :  { %19873 = vst [vmem:[#allocation40_spill] sm:$0xff] %v18597_v63 }
0x1111   :  { %v14810_v3 = vpop.f32.mrf.mxu0 }
0x1113   :  { %v7431_v7 = vpop.f32.mrf.mxu0 }
0x1115   :  { %v14813_v41 = vpop.f32.mrf.mxu0 }
0x1117   :  { %v7441_v14 = vpop.f32.mrf.mxu0 }
0x1119   :  { %v14816_v5 = vpop.f32.mrf.mxu0 }
0x111b   :  { %v7451_v49 = vpop.f32.mrf.mxu0 }
0x111d   :  { %v14819_v28 = vpop.f32.mrf.mxu0 }
0x111e   :  { %14864 = vmatprep.subr.msk.mxu0 %vm558_vm1, %v14819_v28 }
0x111f   :  { %v7461_v56 = vpop.f32.mrf.mxu0  ;;  %14865 = vmatpush3.xpose.msk.msra.mxu0 %vm558_vm1, %v14819_v28  ;;  %v7353_v28 = vmul.f32 0.5, %v14790_v35 }
0x1120   :  { %14866 = vmatprep.subr.msk.mxu0 %vm558_vm1, %v7461_v56 }
0x1121   :  { %v14822_v31 = vpop.f32.mrf.mxu0 }
0x1123   :  { %14867 = vmatpush3.xpose.msk.msra.mxu0 %vm558_vm1, %v7461_v56  ;;  %v7471_v38 = vpop.f32.mrf.mxu0 }
0x1124   :  { %14868 = vmatprep.subr.msk.mxu0 %vm558_vm1, %v14816_v5 }
0x1125   :  { %v14825_v39 = vpop.f32.mrf.mxu0 }
0x1127   :  { %14869 = vmatpush3.xpose.msk.msra.mxu0 %vm558_vm1, %v14816_v5  ;;  %v7481_v58 = vpop.f32.mrf.mxu0 }
0x1128   :  { %14870 = vmatprep.subr.msk.mxu0 %vm558_vm1, %v7451_v49 }
0x1129   :  { %v14828_v40 = vpop.f32.mrf.mxu0 }
0x112b   :  { %14871 = vmatpush3.xpose.msk.msra.mxu0 %vm558_vm1, %v7451_v49  ;;  %v7491_v17 = vpop.f32.mrf.mxu0 }
0x112c   :  { %14872 = vmatprep.subr.msk.mxu0 %vm558_vm1, %v14813_v41 }
0x112d   :  { %v14831_v21 = vpop.f32.mrf.mxu0 }
0x112f   :  { %14873 = vmatpush3.xpose.msk.msra.mxu0 %vm558_vm1, %v14813_v41  ;;  %v7501_v45 = vpop.f32.mrf.mxu0 }
0x1130   :  { %14874 = vmatprep.subr.msk.mxu0 %vm558_vm1, %v7441_v14 }
0x1133   :  { %14875 = vmatpush3.xpose.msk.msra.mxu0 %vm558_vm1, %v7441_v14 }
0x1134   :  { %14876 = vmatprep.subr.msk.mxu0 %vm558_vm1, %v14810_v3 }
0x1137   :  { %14877 = vmatpush3.xpose.msk.msra.mxu0 %vm558_vm1, %v14810_v3  ;;  %v7352_v3 = vmul.f32 0.5, %v7305_v57 }
0x1138   :  { %14878 = vmatprep.subr.msk.mxu0 %vm558_vm1, %v7431_v7 }
0x113b   :  { %14879 = vmatpush3.xpose.msk.msra.mxu0 %vm558_vm1, %v7431_v7  ;;  %v14793_v7 = vpop.f32.mrf.mxu1 }
0x113c   :  { %14920 = vmatprep.subr.msk.mxu0 %vm558_vm1, %v14831_v21 }
0x113d   :  { %v7315_v41 = vpop.f32.mrf.mxu1 }
0x113e   :  { %14881 = vmatmul.mubr.msk.f32.vlgmr.msra.gmra.mxu0 %vm558_vm1, %v7345_v9  ;;  %v7354_v49 = vmul.f32 0.5, %v7315_v41 }
0x113f   :  { %14921 = vmatpush3.xpose.msk.msra.mxu0 %vm558_vm1, %v14831_v21  ;;  %14883 = vmatprep.mubr.msk.f32.mxu0 %vm558_vm1, %v7346_v42  ;;  %v14796_v14 = vpop.f32.mrf.mxu1 }
0x1140   :  { %14922 = vmatprep.subr.msk.mxu0 %vm558_vm1, %v7501_v45 }
0x1141   :  { %v7325_v5 = vpop.f32.mrf.mxu1 }
0x1142   :  { %14884 = vmatmul.mubr.msk.f32.gmra.mxu0 %vm558_vm1, %v7347_v54  ;;  %v7356_v53 = vmul.f32 0.5, %v7325_v5 }
0x1143   :  { %14923 = vmatpush3.xpose.msk.msra.mxu0 %vm558_vm1, %v7501_v45  ;;  %14886 = vmatprep.mubr.msk.f32.mxu0 %vm558_vm1, %v7348_v59  ;;  %v14799_v56 = vpop.f32.mrf.mxu1 }
0x1144   :  { %14924 = vmatprep.subr.msk.mxu0 %vm558_vm1, %v14828_v40 }
0x1145   :  { %v7335_v37 = vpop.f32.mrf.mxu1 }
0x1146   :  { %14887 = vmatmul.mubr.msk.f32.gmra.mxu0 %vm558_vm1, %v7349_v47 }
0x1147   :  { %14925 = vmatpush3.xpose.msk.msra.mxu0 %vm558_vm1, %v14828_v40  ;;  %14889 = vmatprep.mubr.msk.f32.mxu0 %vm558_vm1, %v7350_v22 }
0x1148   :  { %14926 = vmatprep.subr.msk.mxu0 %vm558_vm1, %v7491_v17 }
0x114a   :  { %14890 = vmatmul.mubr.msk.f32.gmra.mxu0 %vm558_vm1, %v7351_v55 }
0x114b   :  { %14927 = vmatpush3.xpose.msk.msra.mxu0 %vm558_vm1, %v7491_v17  ;;  %14936 = vmatprep.mubr.msk.f32.mxu0 %vm558_vm1, %v7352_v3 }
0x114c   :  { %14928 = vmatprep.subr.msk.mxu0 %vm558_vm1, %v14825_v39 }
0x114f   :  { %14929 = vmatpush3.xpose.msk.msra.mxu0 %vm558_vm1, %v14825_v39  ;;  %v7355_v39 = vmul.f32 0.5, %v14793_v7 }
0x1150   :  { %14930 = vmatprep.subr.msk.mxu0 %vm558_vm1, %v7481_v58 }
0x1153   :  { %14931 = vmatpush3.xpose.msk.msra.mxu0 %vm558_vm1, %v7481_v58  ;;  %v7357_v58 = vmul.f32 0.5, %v14796_v14 }
0x1154   :  { %14932 = vmatprep.subr.msk.mxu0 %vm558_vm1, %v14822_v31 }
0x1157   :  { %14933 = vmatpush3.xpose.msk.msra.mxu0 %vm558_vm1, %v14822_v31  ;;  %v7358_v31 = vmul.f32 0.5, %v7335_v37 }
0x1158   :  { %14934 = vmatprep.subr.msk.mxu0 %vm558_vm1, %v7471_v38 }
0x115b   :  { %14935 = vmatpush3.xpose.msk.msra.mxu0 %vm558_vm1, %v7471_v38  ;;  %v7359_v38 = vmul.f32 0.5, %v14799_v56 }
0x115e   :  { %14937 = vmatmul.mubr.msk.f32.vlgmr.msra.gmra.mxu0 %vm558_vm1, %v7353_v28 }
0x115f   :  { %14939 = vmatprep.mubr.msk.f32.mxu0 %vm558_vm1, %v7354_v49 }
0x1162   :  { %14940 = vmatmul.mubr.msk.f32.gmra.mxu0 %vm558_vm1, %v7355_v39 }
0x1163   :  { %14942 = vmatprep.mubr.msk.f32.mxu0 %vm558_vm1, %v7356_v53 }
0x1166   :  { %14943 = vmatmul.mubr.msk.f32.gmra.mxu0 %vm558_vm1, %v7357_v58 }
0x1167   :  { %14945 = vmatprep.mubr.msk.f32.mxu0 %vm558_vm1, %v7358_v31 }
0x116a   :  { %14946 = vmatmul.mubr.msk.f32.gmra.mxu0 %vm558_vm1, %v7359_v38 }
0x116b   :  { %15010 = vmatprep.mubr.msk.f32.mxu0 %vm50_vm0, %v18407_v46 }
0x11ab   :  { %v14842_v44 = vpop.f32.mrf.mxu1 }
0x11ad   :  { %v7581_v40 = vpop.f32.mrf.mxu1 }
0x11af   :  { %v14845_v27 = vpop.f32.mrf.mxu1 }
0x11b1   :  { %v7591_v17 = vpop.f32.mrf.mxu1 }
0x11b3   :  { %v14848_v33 = vpop.f32.mrf.mxu1 }
0x11b5   :  { %v7601_v21 = vpop.f32.mrf.mxu1 }
0x11b7   :  { %v14851_v42 = vpop.f32.mrf.mxu1 }
0x11b8   :  { %14892 = vmatprep.subr.mxu1 %v14851_v42 }
0x11b9   :  { %v7611_v9 = vpop.f32.mrf.mxu1  ;;  %14893 = vmatpush3.msra.mxu1 %v14851_v42 }
0x11ba   :  { %14894 = vmatprep.subr.mxu1 %v7611_v9 }
0x11bb   :  { %14895 = vmatpush3.msra.mxu1 %v7611_v9  ;;  %v18671_v56 = vpop.f32.mrf.mxu1 }
0x11bc   :  { %14896 = vmatprep.subr.mxu1 %v14848_v33 }
0x11bd   :  { %14897 = vmatpush3.msra.mxu1 %v14848_v33  ;;  %v18673_v53 = vpop.f32.mrf.mxu1 }
0x11be   :  { %14898 = vmatprep.subr.mxu1 %v7601_v21 }
0x11bf   :  { %14899 = vmatpush3.msra.mxu1 %v7601_v21  ;;  %v18675_v39 = vpop.f32.mrf.mxu1 }
0x11c0   :  { %14900 = vmatprep.subr.mxu1 %v14845_v27 }
0x11c1   :  { %14901 = vmatpush3.msra.mxu1 %v14845_v27  ;;  %v18677_v37 = vpop.f32.mrf.mxu1 }
0x11c2   :  { %14902 = vmatprep.subr.mxu1 %v7591_v17 }
0x11c3   :  { %14903 = vmatpush3.msra.mxu1 %v7591_v17  ;;  %v18679_v31 = vpop.f32.mrf.mxu1 }
0x11c4   :  { %14904 = vmatprep.subr.mxu1 %v14842_v44 }
0x11c5   :  { %14905 = vmatpush3.msra.mxu1 %v14842_v44  ;;  %v18681_v58 = vpop.f32.mrf.mxu1 }
0x11c6   :  { %14906 = vmatprep.subr.mxu1 %v7581_v40 }
0x11c7   :  { %14907 = vmatpush3.msra.mxu1 %v7581_v40  ;;  %v18687_v40 = vpop.f32.mrf.mxu1 }
0x11c8   :  { %14948 = vmatprep.subr.mxu1 %v18687_v40 }
0x11fe   :  { %v14882_v54 = vpop.f32.mrf.mxu0 }
0x11ff   :  { %v7816_v16 = vsel %vm712_vm2, %v14882_v54, -inf }
0x1200   :  { %7817 = vmax.xlane.f32.xlu1 %v7816_v16  ;;  %v7774_v45 = vpop.f32.mrf.mxu0 }
0x1201   :  { %v7813_v59 = vsel %vm712_vm2, %v7774_v45, -inf }
0x1202   :  { %7814 = vmax.xlane.f32.xlu0 %v7813_v59  ;;  %v14885_v35 = vpop.f32.mrf.mxu0 }
0x1203   :  { %v7822_v47 = vsel %vm712_vm2, %v14885_v35, -inf }
0x1204   :  { %7823 = vmax.xlane.f32.xlu1 %v7822_v47  ;;  %v7784_v22 = vpop.f32.mrf.mxu0 }
0x1205   :  { %v7819_v57 = vsel %vm712_vm2, %v7784_v22, -inf }
0x1206   :  { %7820 = vmax.xlane.f32.xlu0 %v7819_v57  ;;  %v18655_v55 = vpop.f32.mrf.mxu0 }
0x1207   :  { %v7828_v3 = vsel %vm712_vm2, %v18655_v55, -inf }
0x1208   :  { %7829 = vmax.xlane.f32.xlu1 %v7828_v3  ;;  %v18659_v7 = vpop.f32.mrf.mxu0 }
0x1209   :  { %v7825_v41 = vsel %vm712_vm2, %v18659_v7, -inf }
0x120a   :  { %7826 = vmax.xlane.f32.xlu0 %v7825_v41  ;;  %v18663_v14 = vpop.f32.mrf.mxu0 }
0x120b   :  { %v7834_v5 = vsel %vm712_vm2, %v18663_v14, -inf }
0x120c   :  { %7835 = vmax.xlane.f32.xlu1 %v7834_v5  ;;  %v18667_v49 = vpop.f32.mrf.mxu0 }
0x120d   :  { %v7831_v28 = vsel %vm712_vm2, %v18667_v49, -inf }
0x120e   :  { %7832 = vmax.xlane.f32.xlu0 %v7831_v28 }
0x121e   :  { %v18683_v38 = vpop.f32.mrf.mxu0 }
0x121f   :  { %v8186_v44 = vsel %vm712_vm2, %v18683_v38, -inf }
0x1220   :  { %8187 = vmax.xlane.f32.xlu1 %v8186_v44  ;;  %v18689_v27 = vpop.f32.mrf.mxu0 }
0x1221   :  { %v8183_v17 = vsel %vm712_vm2, %v18689_v27, -inf }
0x1222   :  { %v18694_v33 = vpop.f32.mrf.mxu0  ;;  %8184 = vmax.xlane.f32.xlu0 %v8183_v17 }
0x1223   :  { %v8192_v21 = vsel %vm712_vm2, %v18694_v33, -inf }
0x1224   :  { %8193 = vmax.xlane.f32.xlu1 %v8192_v21  ;;  %v18698_v42 = vpop.f32.mrf.mxu0 }
0x1225   :  { %v8189_v9 = vsel %vm712_vm2, %v18698_v42, -inf }
0x1226   :  { %v18702_v16 = vpop.f32.mrf.mxu0  ;;  %8190 = vmax.xlane.f32.xlu0 %v8189_v9 }
0x1227   :  { %v8198_v59 = vsel %vm712_vm2, %v18702_v16, -inf }
0x1228   :  { %8199 = vmax.xlane.f32.xlu1 %v8198_v59  ;;  %v18706_v47 = vpop.f32.mrf.mxu0 }
0x1229   :  { %v8195_v57 = vsel %vm712_vm2, %v18706_v47, -inf }
0x122a   :  { %v18710_v3 = vpop.f32.mrf.mxu0  ;;  %8196 = vmax.xlane.f32.xlu0 %v8195_v57 }
0x122b   :  { %v8204_v41 = vsel %vm712_vm2, %v18710_v3, -inf }
0x122c   :  { %8205 = vmax.xlane.f32.xlu1 %v8204_v41  ;;  %v18714_v5 = vpop.f32.mrf.mxu0 }
0x122d   :  { %v8201_v28 = vsel %vm712_vm2, %v18714_v5, -inf }
0x122e   :  { %8202 = vmax.xlane.f32.xlu0 %v8201_v28 }
0x1289   :  { %v7818_v44 = vpop.xlane.xlu1 %7817 }
0x128a   :  { %v7838_v17 = vsub.f32 %v14882_v54, %v7818_v44 }
0x128b   :  { %v7815_v21 = vpop.xlane.xlu0 %7814 }
0x128c   :  { %v7847_v9 = vmul.f32 1.442695, %v7838_v17  ;;  %v7837_v59 = vsub.f32 %v7774_v45, %v7815_v21 }
0x128d   :  { %v7824_v63 = vpop.xlane.xlu1 %7823 }
0x128e   :  { %15806 = vpow2.f32 %v7847_v9  ;;  %v7845_v62 = vmul.f32 1.442695, %v7837_v59  ;;  %v7840_v32 = vsub.f32 %v14885_v35, %v7824_v63 }
0x128f   :  { %v7821_v57 = vpop.xlane.xlu0 %7820 }
0x1290   :  { %15808 = vpow2.f32 %v7845_v62  ;;  %v7851_v26 = vmul.f32 1.442695, %v7840_v32  ;;  %v7839_v20 = vsub.f32 %v7784_v22, %v7821_v57 }
0x1291   :  { %v7830_v41 = vpop.xlane.xlu1 %7829 }
0x1292   :  { %15810 = vpow2.f32 %v7851_v26  ;;  %v7849_v61 = vmul.f32 1.442695, %v7839_v20  ;;  %v7842_v25 = vsub.f32 %v18655_v55, %v7830_v41 }
0x1293   :  { %v7827_v2 = vpop.xlane.xlu0 %7826 }
0x1294   :  { %15812 = vpow2.f32 %v7849_v61  ;;  %v7855_v28 = vmul.f32 1.442695, %v7842_v25  ;;  %v7841_v54 = vsub.f32 %v18659_v7, %v7827_v2  ;;  %v7651_v2 = vpop.f32.mrf.mxu1 }
0x1295   :  { %v7836_v44 = vpop.xlane.xlu1 %7835 }
0x1296   :  { %15814 = vpow2.f32 %v7855_v28  ;;  %v7853_v45 = vmul.f32 1.442695, %v7841_v54  ;;  %v7844_v17 = vsub.f32 %v18663_v14, %v7836_v44 }
0x1297   :  { %v7833_v63 = vpop.xlane.xlu0 %7832 }
0x1298   :  { %15816 = vpow2.f32 %v7853_v45  ;;  %v7859_v62 = vmul.f32 1.442695, %v7844_v17  ;;  %v7843_v32 = vsub.f32 %v18667_v49, %v7833_v63 }
0x129a   :  { %15818 = vpow2.f32 %v7859_v62  ;;  %v7857_v26 = vmul.f32 1.442695, %v7843_v32 }
0x129b   :  { %v15807_v20 = vpop.eup %15806 }
0x129c   :  { %15820 = vpow2.f32 %v7857_v26  ;;  %v7864_v35 = vsel %vm712_vm2, %v15807_v20, 0.0 }
0x129d   :  { %v15809_v61 = vpop.eup %15808  ;;  %7865 = vadd.xlane.f32.xlu1 %v7864_v35 }
0x129e   :  { %14908 = vmatprep.mubr.msk.f32.mxu1 %vm712_vm2, %v15809_v61  ;;  %v7861_v25 = vsel %vm712_vm2, %v15809_v61, 0.0 }
0x129f   :  { %v15811_v22 = vpop.eup %15810  ;;  %14909 = vmatmul.mubr.msk.f32.vlgmr.msra.gmra.mxu1 %vm712_vm2, %v15807_v20  ;;  %7862 = vadd.xlane.f32.xlu0 %v7861_v25 }
0x12a0   :  { %14949 = vmatpush3.msra.mxu1 %v18687_v40  ;;  %v7870_v55 = vsel %vm712_vm2, %v15811_v22, 0.0 }
0x12a1   :  { %v15813_v7 = vpop.eup %15812  ;;  %14950 = vmatprep.subr.mxu1 %v7651_v2  ;;  %7871 = vadd.xlane.f32.xlu1 %v7870_v55 }
0x12a2   :  { %14951 = vmatpush3.msra.mxu1 %v7651_v2  ;;  %14911 = vmatprep.mubr.msk.f32.mxu1 %vm712_vm2, %v15813_v7  ;;  %v7867_v14 = vsel %vm712_vm2, %v15813_v7, 0.0 }
0x12a3   :  { %v15815_v49 = vpop.eup %15814  ;;  %14952 = vmatprep.subr.mxu1 %v18679_v31  ;;  %14912 = vmatmul.mubr.msk.f32.gmra.mxu1 %vm712_vm2, %v15811_v22 }
0x12a4   :  { %14953 = vmatpush3.msra.mxu1 %v18679_v31  ;;  %7868 = vadd.xlane.f32.xlu0 %v7867_v14  ;;  %v7876_v40 = vsel %vm712_vm2, %v15815_v49, 0.0 }
0x12a5   :  { %v15817_v21 = vpop.eup %15816  ;;  %14954 = vmatprep.subr.mxu1 %v18681_v58  ;;  %7877 = vadd.xlane.f32.xlu1 %v7876_v40 }
0x12a6   :  { %14955 = vmatpush3.msra.mxu1 %v18681_v58  ;;  %14914 = vmatprep.mubr.msk.f32.mxu1 %vm712_vm2, %v15817_v21  ;;  %v7873_v9 = vsel %vm712_vm2, %v15817_v21, 0.0 }
0x12a7   :  { %v15819_v59 = vpop.eup %15818  ;;  %14956 = vmatprep.subr.mxu1 %v18675_v39  ;;  %14915 = vmatmul.mubr.msk.f32.gmra.mxu1 %vm712_vm2, %v15815_v49 }
0x12a8   :  { %14957 = vmatpush3.msra.mxu1 %v18675_v39  ;;  %7874 = vadd.xlane.f32.xlu0 %v7873_v9  ;;  %v7882_v31 = vsel %vm712_vm2, %v15819_v59, 0.0 }
0x12a9   :  { %v15821_v57 = vpop.eup %15820  ;;  %14958 = vmatprep.subr.mxu1 %v18677_v37  ;;  %v8188_v41 = vpop.xlane.xlu1 %8187  ;;  %7883 = vadd.xlane.f32.xlu1 %v7882_v31 }
0x12aa   :  { %14959 = vmatpush3.msra.mxu1 %v18677_v37  ;;  %v8208_v58 = vsub.f32 %v18683_v38, %v8188_v41  ;;  %14917 = vmatprep.mubr.msk.f32.mxu1 %vm712_vm2, %v15821_v57  ;;  %v7879_v28 = vsel %vm712_vm2, %v15821_v57, 0.0 }
0x12ab   :  { %14960 = vmatprep.subr.mxu1 %v18671_v56  ;;  %14918 = vmatmul.mubr.msk.f32.gmra.mxu1 %vm712_vm2, %v15819_v59  ;;  %v8185_v39 = vpop.xlane.xlu0 %8184 }
0x12ac   :  { %v8217_v54 = vmul.f32 1.442695, %v8208_v58  ;;  %14961 = vmatpush3.msra.mxu1 %v18671_v56  ;;  %7880 = vadd.xlane.f32.xlu0 %v7879_v28  ;;  %v8207_v44 = vsub.f32 %v18689_v27, %v8185_v39  ;;  %v12200_v28 = vld [vmem:[%s19832_s4 + $0x14] sm:$0xf]  ;;  %v12241_v39 = vld [vmem:[%s19828_s2 + $0xd8] sm:$0xff] }
0x12ad   :  { %14962 = vmatprep.subr.mxu1 %v18673_v53  ;;  %v8194_v37 = vpop.xlane.xlu1 %8193 }
0x12ae   :  { %15822 = vpow2.f32 %v8217_v54  ;;  %v8215_v38 = vmul.f32 1.442695, %v8207_v44  ;;  %14963 = vmatpush3.msra.mxu1 %v18673_v53  ;;  %v8210_v45 = vsub.f32 %v18694_v33, %v8194_v37  ;;  %v12221_v54 = vld [vmem:[%s19830_s1 + $0xd8] sm:$0xff]  ;;  %v12220_v44 = vld [vmem:[%s19830_s1 + $0xd0] sm:$0xff]  ;;  %v12219_v37 = vld [vmem:[%s19830_s1 + $0xc8] sm:$0xff] }
0x12af   :  { %v8191_v17 = vpop.xlane.xlu0 %8190  ;;  %14976 = vmatprep.subr.msk.mxu1 %vm1349_vm3, %v12200_v28  ;;  %15002 = vmatprep.subr.mxu0 %v12221_v54 }
0x12b0   :  { %15824 = vpow2.f32 %v8215_v38  ;;  %v8221_v63 = vmul.f32 1.442695, %v8210_v45  ;;  %v8209_v62 = vsub.f32 %v18698_v42, %v8191_v17  ;;  %15003 = vmatpush3.msra.mxu0 %v12221_v54  ;;  %v12218_v38 = vld [vmem:[%s19830_s1 + $0xc0] sm:$0xff] }
0x12b1   :  { %v8200_v32 = vpop.xlane.xlu1 %8199  ;;  %15004 = vmatprep.subr.mxu0 %v12220_v44 }
0x12b2   :  { %15826 = vpow2.f32 %v8221_v63  ;;  %v8219_v56 = vmul.f32 1.442695, %v8209_v62  ;;  %v8212_v26 = vsub.f32 %v18702_v16, %v8200_v32  ;;  %15005 = vmatpush3.msra.mxu0 %v12220_v44  ;;  %v12239_v32 = vld [vmem:[%s19828_s2 + $0xc8] sm:$0xff] }
0x12b3   :  { %v8197_v27 = vpop.xlane.xlu0 %8196  ;;  %15006 = vmatprep.subr.mxu0 %v12219_v37 }
0x12b4   :  { %15828 = vpow2.f32 %v8219_v56  ;;  %v8225_v20 = vmul.f32 1.442695, %v8212_v26  ;;  %v8211_v35 = vsub.f32 %v18706_v47, %v8197_v27  ;;  %15007 = vmatpush3.msra.mxu0 %v12219_v37  ;;  %v12238_v27 = vld [vmem:[%s19828_s2 + $0xc0] sm:$0xff] }
0x12b5   :  { %v8206_v61 = vpop.xlane.xlu1 %8205  ;;  %15008 = vmatprep.subr.mxu0 %v12218_v38 }
0x12b6   :  { %15830 = vpow2.f32 %v8225_v20  ;;  %v8223_v53 = vmul.f32 1.442695, %v8211_v35  ;;  %v8214_v33 = vsub.f32 %v18710_v3, %v8206_v61  ;;  %15009 = vmatpush3.msra.mxu0 %v12218_v38 }
0x12b7   :  { %v8203_v2 = vpop.xlane.xlu0 %8202  ;;  %15011 = vmatmul.mubr.msk.f32.vlgmr.msra.gmra.mxu0 %vm50_vm0, %v18414_v50 }
0x12b8   :  { %15832 = vpow2.f32 %v8223_v53  ;;  %v8229_v25 = vmul.f32 1.442695, %v8214_v33  ;;  %v8213_v42 = vsub.f32 %v18714_v5, %v8203_v2  ;;  %15013 = vmatprep.mubr.msk.f32.mxu0 %vm50_vm0, %v18421_v23 }
0x12ba   :  { %15834 = vpow2.f32 %v8229_v25  ;;  %v8227_v22 = vmul.f32 1.442695, %v8213_v42 }
0x12bb   :  { %v15823_v55 = vpop.eup %15822  ;;  %15014 = vmatmul.mubr.msk.f32.gmra.mxu0 %vm50_vm0, %v18428_v8 }
0x12bc   :  { %15836 = vpow2.f32 %v8227_v22  ;;  %v8234_v16 = vsel %vm712_vm2, %v15823_v55, 0.0  ;;  %15016 = vmatprep.mubr.msk.f32.mxu0 %vm50_vm0, %v18435_v24 }
0x12bd   :  { %v15825_v7 = vpop.eup %15824  ;;  %8235 = vadd.xlane.f32.xlu1 %v8234_v16 }
0x12be   :  { %14964 = vmatprep.mubr.msk.f32.mxu1 %vm712_vm2, %v15825_v7  ;;  %v8231_v47 = vsel %vm712_vm2, %v15825_v7, 0.0 }
0x12bf   :  { %v15827_v14 = vpop.eup %15826  ;;  %14965 = vmatmul.mubr.msk.f32.vlgmr.msra.gmra.mxu1 %vm712_vm2, %v15823_v55  ;;  %8232 = vadd.xlane.f32.xlu0 %v8231_v47 }
0x12c0   :  { %v8240_v3 = vsel %vm712_vm2, %v15827_v14, 0.0  ;;  %14977 = vmatpush3.msk.msra.mxu1 %vm1349_vm3, %v12200_v28  ;;  %15017 = vmatmul.mubr.msk.f32.gmra.mxu0 %vm50_vm0, %v18442_v15 }
0x12c1   :  { %v15829_v49 = vpop.eup %15828  ;;  %8241 = vadd.xlane.f32.xlu1 %v8240_v3  ;;  %15034 = vmatprep.subr.mxu1 %v12241_v39 }
0x12c2   :  { %14967 = vmatprep.mubr.msk.f32.mxu1 %vm712_vm2, %v15829_v49  ;;  %v8237_v5 = vsel %vm712_vm2, %v15829_v49, 0.0  ;;  %15019 = vmatprep.mubr.msk.f32.mxu0 %vm50_vm0, %v18449_v51 }
0x12c3   :  { %v15831_v40 = vpop.eup %15830  ;;  %14968 = vmatmul.mubr.msk.f32.gmra.mxu1 %vm712_vm2, %v15827_v14  ;;  %8238 = vadd.xlane.f32.xlu0 %v8237_v5 }
0x12c4   :  { %v8246_v21 = vsel %vm712_vm2, %v15831_v40, 0.0  ;;  %15020 = vmatmul.mubr.msk.f32.gmra.mxu0 %vm50_vm0, %v18456_v1 }
0x12c5   :  { %v15833_v9 = vpop.eup %15832  ;;  %8247 = vadd.xlane.f32.xlu1 %v8246_v21  ;;  %15022 = vmatprep.mubr.msk.f32.mxu0 %vm50_vm0, %v18463_v13 }
0x12c6   :  { %14970 = vmatprep.mubr.msk.f32.mxu1 %vm712_vm2, %v15833_v9  ;;  %v8243_v59 = vsel %vm712_vm2, %v15833_v9, 0.0 }
0x12c7   :  { %v15835_v31 = vpop.eup %15834  ;;  %14971 = vmatmul.mubr.msk.f32.gmra.mxu1 %vm712_vm2, %v15831_v40  ;;  %8244 = vadd.xlane.f32.xlu0 %v8243_v59 }
0x12c8   :  { %v8252_v57 = vsel %vm712_vm2, %v15835_v31, 0.0  ;;  %15023 = vmatmul.mubr.msk.f32.gmra.mxu0 %vm50_vm0, %v18470_v60 }
0x12c9   :  { %v15837_v41 = vpop.eup %15836  ;;  %8253 = vadd.xlane.f32.xlu1 %v8252_v57  ;;  %15025 = vmatprep.mubr.msk.f32.mxu0 %vm50_vm0, %v18477_v19 }
0x12ca   :  { %14973 = vmatprep.mubr.msk.f32.mxu1 %vm712_vm2, %v15837_v41  ;;  %v8249_v58 = vsel %vm712_vm2, %v15837_v41, 0.0 }
0x12cb   :  { %14974 = vmatmul.mubr.msk.f32.gmra.mxu1 %vm712_vm2, %v15835_v31  ;;  %8250 = vadd.xlane.f32.xlu0 %v8249_v58 }
0x12cc   :  { %15026 = vmatmul.mubr.msk.f32.gmra.mxu0 %vm50_vm0, %v18484_v18 }
0x12cd   :  { %15028 = vmatprep.mubr.msk.f32.mxu0 %vm50_vm0, %v18491_v30 }
0x12d0   :  { %15029 = vmatmul.mubr.msk.f32.gmra.mxu0 %vm50_vm0, %v18498_v12 }
0x12d1   :  { %15031 = vmatprep.mubr.msk.f32.mxu0 %vm50_vm0, %v18505_v34 }
0x12d4   :  { %15032 = vmatmul.mubr.msk.f32.gmra.mxu0 %vm50_vm0, %v18512_v4  ;;  %v12240_v4 = vld [vmem:[%s19828_s2 + $0xd0] sm:$0xff] }
0x12d5   :  { %15074 = vmatprep.mubr.msk.f32.mxu0 %vm50_vm0, %v18407_v46 }
0x1326   :  { %v7866_v23 = vpop.xlane.xlu1 %7865 }
0x1328   :  { %v7863_v50 = vpop.xlane.xlu0 %7862 }
0x1329   :  { %15838 = vrcp.f32 %v7863_v50 }
0x132a   :  { %v7872_v24 = vpop.xlane.xlu1 %7871  ;;  %15840 = vrcp.f32 %v7866_v23 }
0x132d   :  { %v7869_v8 = vpop.xlane.xlu0 %7868 }
0x132e   :  { %15842 = vrcp.f32 %v7869_v8  ;;  %v7878_v51 = vpop.xlane.xlu1 %7877 }
0x132f   :  { %15844 = vrcp.f32 %v7872_v24 }
0x1331   :  { %v7875_v15 = vpop.xlane.xlu0 %7874 }
0x1332   :  { %15846 = vrcp.f32 %v7875_v15  ;;  %v7884_v13 = vpop.xlane.xlu1 %7883 }
0x1333   :  { %15848 = vrcp.f32 %v7878_v51 }
0x1335   :  { %v7881_v1 = vpop.xlane.xlu0 %7880 }
0x1336   :  { %15850 = vrcp.f32 %v7881_v1  ;;  %v15839_v19 = vpop.eup %15838 }
0x1337   :  { %15852 = vrcp.f32 %v7884_v13  ;;  %v15841_v46 = vpop.eup %15840 }
0x133b   :  { %v15843_v45 = vpop.eup %15842 }
0x133c   :  { %v15845_v63 = vpop.eup %15844 }
0x133f   :  { %v15847_v20 = vpop.eup %15846 }
0x1340   :  { %v15849_v61 = vpop.eup %15848 }
0x1343   :  { %v15851_v22 = vpop.eup %15850 }
0x1344   :  { %v15853_v16 = vpop.eup %15852 }
0x1346   :  { %v8236_v42 = vpop.xlane.xlu1 %8235 }
0x1348   :  { %v8233_v33 = vpop.xlane.xlu0 %8232 }
0x1349   :  { %15854 = vrcp.f32 %v8233_v33 }
0x134a   :  { %v8242_v3 = vpop.xlane.xlu1 %8241  ;;  %15856 = vrcp.f32 %v8236_v42 }
0x134c   :  { %v8239_v14 = vpop.xlane.xlu0 %8238 }
0x134d   :  { %15858 = vrcp.f32 %v8239_v14 }
0x134e   :  { %v8248_v5 = vpop.xlane.xlu1 %8247  ;;  %15860 = vrcp.f32 %v8242_v3 }
0x1350   :  { %v8245_v49 = vpop.xlane.xlu0 %8244 }
0x1351   :  { %15862 = vrcp.f32 %v8245_v49  ;;  %v12261_v49 = vld [vmem:[%s19831_s3 + $0xd8] sm:$0xff] }
0x1352   :  { %15864 = vrcp.f32 %v8248_v5  ;;  %v8254_v21 = vpop.xlane.xlu1 %8253  ;;  %15066 = vmatprep.subr.mxu0 %v12261_v49 }
0x1353   :  { %15067 = vmatpush3.msra.mxu0 %v12261_v49 }
0x1354   :  { %v8251_v40 = vpop.xlane.xlu0 %8250 }
0x1355   :  { %15866 = vrcp.f32 %v8251_v40 }
0x1356   :  { %v15855_v59 = vpop.eup %15854  ;;  %15868 = vrcp.f32 %v8254_v21  ;;  %v12258_v21 = vld [vmem:[%s19831_s3 + $0xc0] sm:$0xff] }
0x1357   :  { %v15857_v57 = vpop.eup %15856 }
0x135f   :  { %v14910_v60 = vpop.f32.mrf.mxu1 }
0x1360   :  { %v8023_v12 = vmul.f32 %v15841_v46, %v14910_v60 }
0x1361   :  { %v7975_v18 = vpop.f32.mrf.mxu1 }
0x1362   :  { %v8022_v30 = vmul.f32 %v15839_v19, %v7975_v18 }
0x1363   :  { %v14913_v34 = vpop.f32.mrf.mxu1 }
0x1364   :  { %14978 = vmatprep.mubr.msk.f32.mxu1 %vm558_vm1, %v8022_v30  ;;  %v8025_v56 = vmul.f32 %v15845_v63, %v14913_v34  ;;  %v18855_v30 = vld [vmem:[%s19829_s0] sm:$0xff]  ;;  %v18869_v34 = vld [vmem:[%s19829_s0 + $0x10] sm:$0xff] }
0x1365   :  { %v7985_v17 = vpop.f32.mrf.mxu1  ;;  %14979 = vmatmul.mubr.msk.f32.vlgmr.msra.gmra.mxu1 %vm558_vm1, %v8023_v12  ;;  %v18862_v12 = vld [vmem:[%s19829_s0 + $0x8] sm:$0xff]  ;;  %v18897_v63 = vld [vmem:[%s19829_s0 + $0x30] sm:$0xff] }
0x1366   :  { %v8024_v62 = vmul.f32 %v15843_v45, %v7985_v17  ;;  %15035 = vmatpush3.msra.mxu1 %v12241_v39  ;;  %v15859_v39 = vpop.eup %15858  ;;  %v18883_v45 = vld [vmem:[%s19829_s0 + $0x20] sm:$0xff]  ;;  %v18890_v17 = vld [vmem:[%s19829_s0 + $0x28] sm:$0xff] }
0x1367   :  { %v14916_v26 = vpop.f32.mrf.mxu1  ;;  %15036 = vmatprep.subr.mxu1 %v12240_v4  ;;  %v15861_v44 = vpop.eup %15860 }
0x1368   :  { %14981 = vmatprep.mubr.msk.f32.mxu1 %vm558_vm1, %v8024_v62  ;;  %15037 = vmatpush3.msra.mxu1 %v12240_v4  ;;  %v8027_v2 = vmul.f32 %v15849_v61, %v14916_v26  ;;  %v15863_v23 = vpop.eup %15862  ;;  %v18876_v4 = vld [vmem:[%s19829_s0 + $0x18] sm:$0xff]  ;;  %v18925_v26 = vld [vmem:[%s19829_s0 + $0x50] sm:$0xff] }
0x1369   :  { %v7995_v35 = vpop.f32.mrf.mxu1  ;;  %14982 = vmatmul.mubr.msk.f32.gmra.mxu1 %vm558_vm1, %v8025_v56  ;;  %15038 = vmatprep.subr.mxu1 %v12239_v32  ;;  %v15865_v24 = vpop.eup %15864  ;;  %v18904_v62 = vld [vmem:[%s19829_s0 + $0x38] sm:$0xff]  ;;  %v18918_v56 = vld [vmem:[%s19829_s0 + $0x48] sm:$0xff]  ;;  %v18953_v61 = vld [vmem:[%s19829_s0 + $0x70] sm:$0xff] }
0x136a   :  { %v8026_v53 = vmul.f32 %v15847_v20, %v7995_v35  ;;  %15039 = vmatpush3.msra.mxu1 %v12239_v32  ;;  %v15867_v13 = vpop.eup %15866  ;;  %v18911_v32 = vld [vmem:[%s19829_s0 + $0x40] sm:$0xff]  ;;  %v18946_v35 = vld [vmem:[%s19829_s0 + $0x68] sm:$0xff] }
0x136b   :  { %v14919_v25 = vpop.f32.mrf.mxu1  ;;  %15040 = vmatprep.subr.mxu1 %v12238_v27  ;;  %v15869_v19 = vpop.eup %15868  ;;  %v18939_v20 = vld [vmem:[%s19829_s0 + $0x60] sm:$0xff] }
0x136c   :  { %14984 = vmatprep.mubr.msk.f32.mxu1 %vm558_vm1, %v8026_v53  ;;  %15041 = vmatpush3.msra.mxu1 %v12238_v27  ;;  %v8029_v47 = vmul.f32 %v15853_v16, %v14919_v25  ;;  %v18932_v27 = vld [vmem:[%s19829_s0 + $0x58] sm:$0xff] }
0x136d   :  { %v8005_v55 = vpop.f32.mrf.mxu1  ;;  %14985 = vmatmul.mubr.msk.f32.gmra.mxu1 %vm558_vm1, %v8027_v2  ;;  %v18960_v53 = vld [vmem:[%s19829_s0 + $0x78] sm:$0xff] }
0x136e   :  { %v8028_v7 = vmul.f32 %v15851_v22, %v8005_v55 }
0x1370   :  { %14987 = vmatprep.mubr.msk.f32.mxu1 %vm558_vm1, %v8028_v7 }
0x1371   :  { %14988 = vmatmul.mubr.msk.f32.gmra.mxu1 %vm558_vm1, %v8029_v47 }
0x1377   :  { %v18964_v33 = vpop.f32.mrf.mxu0 }
0x1378   :  { %v8765_v49 = vmul.f32 0.5, %v18964_v33 }
0x1379   :  { %v8685_v2 = vpop.f32.mrf.mxu0 }
0x137a   :  { %v8764_v25 = vmul.f32 0.5, %v8685_v2 }
0x137f   :  { %v14966_v9 = vpop.f32.mrf.mxu1 }
0x1380   :  { %v8393_v58 = vmul.f32 %v15857_v57, %v14966_v9 }
0x1381   :  { %v8345_v31 = vpop.f32.mrf.mxu1 }
0x1382   :  { %v8392_v41 = vmul.f32 %v15855_v59, %v8345_v31 }
0x1383   :  { %v14969_v28 = vpop.f32.mrf.mxu1 }
0x1384   :  { %14990 = vmatprep.mubr.msk.f32.mxu1 %vm558_vm1, %v8392_v41  ;;  %v8395_v38 = vmul.f32 %v15861_v44, %v14969_v28 }
0x1385   :  { %v8355_v54 = vpop.f32.mrf.mxu1  ;;  %14991 = vmatmul.mubr.msk.f32.gmra.mxu1 %vm558_vm1, %v8393_v58 }
0x1386   :  { %v8394_v37 = vmul.f32 %v15859_v39, %v8355_v54 }
0x1387   :  { %v14972_v50 = vpop.f32.mrf.mxu1 }
0x1388   :  { %14993 = vmatprep.mubr.msk.f32.mxu1 %vm558_vm1, %v8394_v37  ;;  %v8397_v51 = vmul.f32 %v15865_v24, %v14972_v50 }
0x1389   :  { %v8365_v8 = vpop.f32.mrf.mxu1  ;;  %14994 = vmatmul.mubr.msk.f32.gmra.mxu1 %vm558_vm1, %v8395_v38 }
0x138a   :  { %v8396_v15 = vmul.f32 %v15863_v23, %v8365_v8 }
0x138b   :  { %v14975_v1 = vpop.f32.mrf.mxu1 }
0x138c   :  { %14996 = vmatprep.mubr.msk.f32.mxu1 %vm558_vm1, %v8396_v15  ;;  %v8399_v46 = vmul.f32 %v15869_v19, %v14975_v1  ;;  %v15015_v1 = vpop.f32.mrf.mxu0 }
0x138d   :  { %v8375_v60 = vpop.f32.mrf.mxu1  ;;  %14997 = vmatmul.mubr.msk.f32.gmra.mxu1 %vm558_vm1, %v8397_v51 }
0x138e   :  { %v8398_v18 = vmul.f32 %v15867_v13, %v8375_v60  ;;  %v8695_v60 = vpop.f32.mrf.mxu0 }
0x1390   :  { %14999 = vmatprep.mubr.msk.f32.mxu1 %vm558_vm1, %v8398_v18  ;;  %v15018_v18 = vpop.f32.mrf.mxu0 }
0x1391   :  { %15000 = vmatmul.mubr.msk.f32.gmra.mxu1 %vm558_vm1, %v8399_v46 }
0x1392   :  { %15042 = vmatprep.mubr.msk.f32.mxu1 %vm50_vm0, %v18855_v30  ;;  %v8705_v2 = vpop.f32.mrf.mxu0 }
0x1395   :  { %15043 = vmatmul.mubr.msk.f32.vlgmr.msra.gmra.mxu1 %vm50_vm0, %v18862_v12 }
0x1396   :  { %15045 = vmatprep.mubr.msk.f32.mxu1 %vm50_vm0, %v18869_v34 }
0x1399   :  { %15046 = vmatmul.mubr.msk.f32.gmra.mxu1 %vm50_vm0, %v18876_v4 }
0x139a   :  { %15048 = vmatprep.mubr.msk.f32.mxu1 %vm50_vm0, %v18883_v45 }
0x139d   :  { %15049 = vmatmul.mubr.msk.f32.gmra.mxu1 %vm50_vm0, %v18890_v17 }
0x139e   :  { %15051 = vmatprep.mubr.msk.f32.mxu1 %vm50_vm0, %v18897_v63 }
0x13a1   :  { %15052 = vmatmul.mubr.msk.f32.gmra.mxu1 %vm50_vm0, %v18904_v62 }
0x13a2   :  { %15054 = vmatprep.mubr.msk.f32.mxu1 %vm50_vm0, %v18911_v32 }
0x13a5   :  { %15055 = vmatmul.mubr.msk.f32.gmra.mxu1 %vm50_vm0, %v18918_v56 }
0x13a6   :  { %15057 = vmatprep.mubr.msk.f32.mxu1 %vm50_vm0, %v18925_v26 }
0x13a9   :  { %15058 = vmatmul.mubr.msk.f32.gmra.mxu1 %vm50_vm0, %v18932_v27 }
0x13aa   :  { %15060 = vmatprep.mubr.msk.f32.mxu1 %vm50_vm0, %v18939_v20 }
0x13ad   :  { %15061 = vmatmul.mubr.msk.f32.gmra.mxu1 %vm50_vm0, %v18946_v35 }
0x13ae   :  { %15063 = vmatprep.mubr.msk.f32.mxu1 %vm50_vm0, %v18953_v61 }
0x13b1   :  { %15064 = vmatmul.mubr.msk.f32.gmra.mxu1 %vm50_vm0, %v18960_v53 }
0x13b2   :  { %15114 = vmatprep.mubr.msk.f32.mxu1 %vm558_vm1, %v8764_v25 }
0x1425   :  { %v14980_v42 = vpop.f32.mrf.mxu1 }
0x1426   :  { %v18968_v22 = vadd.f32 %v14980_v42, %v18520_v52  ;;  %v12260_v52 = vld [vmem:[%s19831_s3 + $0xd0] sm:$0xff]  ;;  %v15021_v42 = vpop.f32.mrf.mxu0 }
0x1427   :  { %v18970_v55 = vpop.f32.mrf.mxu1  ;;  %15068 = vmatprep.subr.mxu0 %v12260_v52 }
0x1428   :  { %15069 = vmatpush3.msra.mxu0 %v12260_v52  ;;  %v8767_v52 = vmul.f32 0.5, %v15015_v1 }
0x1429   :  { %v14983_v16 = vpop.f32.mrf.mxu1 }
0x142a   :  { %v18973_v7 = vadd.f32 %v14983_v16, %v18525_v43  ;;  %v12259_v43 = vld [vmem:[%s19831_s3 + $0xc8] sm:$0xff] }
0x142b   :  { %v18975_v47 = vpop.f32.mrf.mxu1  ;;  %15070 = vmatprep.subr.mxu0 %v12259_v43 }
0x142c   :  { %15071 = vmatpush3.msra.mxu0 %v12259_v43  ;;  %v8715_v43 = vpop.f32.mrf.mxu0 }
0x142d   :  { %v14986_v14 = vpop.f32.mrf.mxu1  ;;  %15072 = vmatprep.subr.mxu0 %v12258_v21  ;;  %v8770_v33 = vmul.f32 0.5, %v8715_v43 }
0x142e   :  { %v18978_v3 = vadd.f32 %v14986_v14, %v18530_v36  ;;  %15073 = vmatpush3.msra.mxu0 %v12258_v21  ;;  %v8766_v14 = vmul.f32 0.5, %v8695_v60  ;;  %v8768_v21 = vmul.f32 0.5, %v8705_v2 }
0x142f   :  { %v18986_v5 = vpop.f32.mrf.mxu1  ;;  %15075 = vmatmul.mubr.msk.f32.vlgmr.msra.gmra.mxu0 %vm50_vm0, %v18862_v12 }
0x1430   :  { %15077 = vmatprep.mubr.msk.f32.mxu0 %vm50_vm0, %v18869_v34 }
0x1431   :  { %v14989_v40 = vpop.f32.mrf.mxu1 }
0x1432   :  { %v18992_v36 = vadd.f32 %v14989_v40, %v18544_v10 }
0x1433   :  { %15078 = vmatmul.mubr.msk.f32.gmra.mxu0 %vm50_vm0, %v18876_v4  ;;  %v19009_v10 = vpop.f32.mrf.mxu1 }
0x1434   :  { %15080 = vmatprep.mubr.msk.f32.mxu0 %vm50_vm0, %v18883_v45 }
0x1437   :  { %15081 = vmatmul.mubr.msk.f32.gmra.mxu0 %vm50_vm0, %v18890_v17 }
0x1438   :  { %15083 = vmatprep.mubr.msk.f32.mxu0 %vm50_vm0, %v18897_v63 }
0x143b   :  { %15084 = vmatmul.mubr.msk.f32.gmra.mxu0 %vm50_vm0, %v18904_v62 }
0x143c   :  { %15086 = vmatprep.mubr.msk.f32.mxu0 %vm50_vm0, %v18911_v32 }
0x143f   :  { %15087 = vmatmul.mubr.msk.f32.gmra.mxu0 %vm50_vm0, %v18918_v56 }
0x1440   :  { %15089 = vmatprep.mubr.msk.f32.mxu0 %vm50_vm0, %v18925_v26 }
0x1443   :  { %15090 = vmatmul.mubr.msk.f32.gmra.mxu0 %vm50_vm0, %v18932_v27 }
0x1444   :  { %15092 = vmatprep.mubr.msk.f32.mxu0 %vm50_vm0, %v18939_v20 }
0x1445   :  { %v14992_v9 = vpop.f32.mrf.mxu1 }
0x1446   :  { %v19016_v59 = vadd.f32 %v14992_v9, %v18568_v11  ;;  %v15024_v9 = vpop.f32.mrf.mxu0 }
0x1447   :  { %v19018_v31 = vpop.f32.mrf.mxu1  ;;  %15093 = vmatmul.mubr.msk.f32.gmra.mxu0 %vm50_vm0, %v18946_v35 }
0x1448   :  { %19874 = vst [vmem:[#allocation41_spill] sm:$0xff] %v19016_v59  ;;  %19875 = vst [vmem:[#allocation42_spill] sm:$0xff] %v19018_v31  ;;  %15095 = vmatprep.mubr.msk.f32.mxu0 %vm50_vm0, %v18953_v61 }
0x1449   :  { %v14995_v57 = vpop.f32.mrf.mxu1 }
0x144a   :  { %v19025_v41 = vadd.f32 %v14995_v57, %v18577_v0  ;;  %v8769_v57 = vmul.f32 0.5, %v15018_v18 }
0x144b   :  { %v19027_v58 = vpop.f32.mrf.mxu1  ;;  %15096 = vmatmul.mubr.msk.f32.gmra.mxu0 %vm50_vm0, %v18960_v53 }
0x144c   :  { %19876 = vst [vmem:[#allocation43_spill] sm:$0xff] %v19025_v41  ;;  %19877 = vst [vmem:[#allocation44_spill] sm:$0xff] %v19027_v58 }
0x144d   :  { %v14998_v11 = vpop.f32.mrf.mxu1 }
0x144e   :  { %v19034_v28 = vadd.f32 %v14998_v11, %v18586_v48  ;;  %v8725_v11 = vpop.f32.mrf.mxu0 }
0x144f   :  { %v19036_v39 = vpop.f32.mrf.mxu1 }
0x1450   :  { %19878 = vst [vmem:[#allocation45_spill] sm:$0xff] %v19034_v28  ;;  %19879 = vst [vmem:[#allocation46_spill] sm:$0xff] %v19036_v39 }
0x1451   :  { %v15001_v0 = vpop.f32.mrf.mxu1 }
0x1452   :  { %v19043_v54 = vadd.f32 %v15001_v0, %v18595_v29  ;;  %v8771_v0 = vmul.f32 0.5, %v15021_v42 }
0x1453   :  { %v19045_v44 = vpop.f32.mrf.mxu1 }
0x1454   :  { %19880 = vst [vmem:[#allocation47_spill] sm:$0xff] %v19043_v54  ;;  %19881 = vst [vmem:[#allocation48_spill] sm:$0xff] %v19045_v44 }
0x1455   :  { %v15044_v37 = vpop.f32.mrf.mxu1 }
0x1457   :  { %v8851_v48 = vpop.f32.mrf.mxu1 }
0x1459   :  { %v15047_v38 = vpop.f32.mrf.mxu1 }
0x145b   :  { %v8861_v50 = vpop.f32.mrf.mxu1 }
0x145d   :  { %v15050_v23 = vpop.f32.mrf.mxu1 }
0x145f   :  { %v8871_v8 = vpop.f32.mrf.mxu1 }
0x1461   :  { %v15053_v24 = vpop.f32.mrf.mxu1 }
0x1462   :  { %15098 = vmatprep.subr.msk.mxu1 %vm558_vm1, %v15053_v24 }
0x1463   :  { %v8881_v15 = vpop.f32.mrf.mxu1  ;;  %15099 = vmatpush3.xpose.msk.msra.mxu1 %vm558_vm1, %v15053_v24  ;;  %v8773_v24 = vmul.f32 0.5, %v15024_v9 }
0x1464   :  { %15100 = vmatprep.subr.msk.mxu1 %vm558_vm1, %v8881_v15 }
0x1465   :  { %v15056_v29 = vpop.f32.mrf.mxu1 }
0x1467   :  { %15101 = vmatpush3.xpose.msk.msra.mxu1 %vm558_vm1, %v8881_v15  ;;  %v8891_v51 = vpop.f32.mrf.mxu1 }
0x1468   :  { %15102 = vmatprep.subr.msk.mxu1 %vm558_vm1, %v15050_v23 }
0x1469   :  { %v15059_v13 = vpop.f32.mrf.mxu1 }
0x146b   :  { %15103 = vmatpush3.xpose.msk.msra.mxu1 %vm558_vm1, %v15050_v23  ;;  %v8901_v19 = vpop.f32.mrf.mxu1 }
0x146c   :  { %15104 = vmatprep.subr.msk.mxu1 %vm558_vm1, %v8871_v8 }
0x146d   :  { %v15062_v46 = vpop.f32.mrf.mxu1 }
0x146f   :  { %15105 = vmatpush3.xpose.msk.msra.mxu1 %vm558_vm1, %v8871_v8  ;;  %v8911_v25 = vpop.f32.mrf.mxu1 }
0x1470   :  { %15106 = vmatprep.subr.msk.mxu1 %vm558_vm1, %v15047_v38 }
0x1471   :  { %v15065_v16 = vpop.f32.mrf.mxu1 }
0x1473   :  { %15107 = vmatpush3.xpose.msk.msra.mxu1 %vm558_vm1, %v15047_v38  ;;  %v8921_v40 = vpop.f32.mrf.mxu1 }
0x1474   :  { %15108 = vmatprep.subr.msk.mxu1 %vm558_vm1, %v8861_v50 }
0x1477   :  { %15109 = vmatpush3.xpose.msk.msra.mxu1 %vm558_vm1, %v8861_v50 }
0x1478   :  { %15110 = vmatprep.subr.msk.mxu1 %vm558_vm1, %v15044_v37 }
0x147b   :  { %15111 = vmatpush3.xpose.msk.msra.mxu1 %vm558_vm1, %v15044_v37  ;;  %v8772_v37 = vmul.f32 0.5, %v8725_v11 }
0x147c   :  { %15112 = vmatprep.subr.msk.mxu1 %vm558_vm1, %v8851_v48 }
0x147f   :  { %15113 = vmatpush3.xpose.msk.msra.mxu1 %vm558_vm1, %v8851_v48  ;;  %v15027_v48 = vpop.f32.mrf.mxu0 }
0x1480   :  { %15154 = vmatprep.subr.msk.mxu1 %vm558_vm1, %v15065_v16 }
0x1481   :  { %v8735_v38 = vpop.f32.mrf.mxu0 }
0x1482   :  { %15115 = vmatmul.mubr.msk.f32.vlgmr.msra.gmra.mxu1 %vm558_vm1, %v8765_v49  ;;  %v8774_v8 = vmul.f32 0.5, %v8735_v38 }
0x1483   :  { %15155 = vmatpush3.xpose.msk.msra.mxu1 %vm558_vm1, %v15065_v16  ;;  %15117 = vmatprep.mubr.msk.f32.mxu1 %vm558_vm1, %v8766_v14  ;;  %v15030_v50 = vpop.f32.mrf.mxu0 }
0x1484   :  { %15156 = vmatprep.subr.msk.mxu1 %vm558_vm1, %v8921_v40 }
0x1485   :  { %v8745_v23 = vpop.f32.mrf.mxu0 }
0x1486   :  { %15118 = vmatmul.mubr.msk.f32.gmra.mxu1 %vm558_vm1, %v8767_v52  ;;  %v8776_v1 = vmul.f32 0.5, %v8745_v23 }
0x1487   :  { %15157 = vmatpush3.xpose.msk.msra.mxu1 %vm558_vm1, %v8921_v40  ;;  %15120 = vmatprep.mubr.msk.f32.mxu1 %vm558_vm1, %v8768_v21  ;;  %v15033_v15 = vpop.f32.mrf.mxu0 }
0x1488   :  { %15158 = vmatprep.subr.msk.mxu1 %vm558_vm1, %v15062_v46 }
0x1489   :  { %v8755_v60 = vpop.f32.mrf.mxu0 }
0x148a   :  { %15121 = vmatmul.mubr.msk.f32.gmra.mxu1 %vm558_vm1, %v8769_v57 }
0x148b   :  { %15159 = vmatpush3.xpose.msk.msra.mxu1 %vm558_vm1, %v15062_v46  ;;  %15123 = vmatprep.mubr.msk.f32.mxu1 %vm558_vm1, %v8770_v33 }
0x148c   :  { %15160 = vmatprep.subr.msk.mxu1 %vm558_vm1, %v8911_v25 }
0x148e   :  { %15124 = vmatmul.mubr.msk.f32.gmra.mxu1 %vm558_vm1, %v8771_v0 }
0x148f   :  { %15161 = vmatpush3.xpose.msk.msra.mxu1 %vm558_vm1, %v8911_v25  ;;  %15170 = vmatprep.mubr.msk.f32.mxu1 %vm558_vm1, %v8772_v37 }
0x1490   :  { %15162 = vmatprep.subr.msk.mxu1 %vm558_vm1, %v15059_v13 }
0x1493   :  { %15163 = vmatpush3.xpose.msk.msra.mxu1 %vm558_vm1, %v15059_v13  ;;  %v8775_v13 = vmul.f32 0.5, %v15027_v48 }
0x1494   :  { %15164 = vmatprep.subr.msk.mxu1 %vm558_vm1, %v8901_v19 }
0x1497   :  { %15165 = vmatpush3.xpose.msk.msra.mxu1 %vm558_vm1, %v8901_v19  ;;  %v8777_v19 = vmul.f32 0.5, %v15030_v50 }
0x1498   :  { %15166 = vmatprep.subr.msk.mxu1 %vm558_vm1, %v15056_v29 }
0x149b   :  { %15167 = vmatpush3.xpose.msk.msra.mxu1 %vm558_vm1, %v15056_v29  ;;  %v8778_v29 = vmul.f32 0.5, %v8755_v60 }
0x149c   :  { %15168 = vmatprep.subr.msk.mxu1 %vm558_vm1, %v8891_v51 }
0x149f   :  { %15169 = vmatpush3.xpose.msk.msra.mxu1 %vm558_vm1, %v8891_v51  ;;  %v8779_v51 = vmul.f32 0.5, %v15033_v15 }
0x14a2   :  { %15171 = vmatmul.mubr.msk.f32.vlgmr.msra.gmra.mxu1 %vm558_vm1, %v8773_v24 }
0x14a3   :  { %15173 = vmatprep.mubr.msk.f32.mxu1 %vm558_vm1, %v8774_v8 }
0x14a6   :  { %15174 = vmatmul.mubr.msk.f32.gmra.mxu1 %vm558_vm1, %v8775_v13 }
0x14a7   :  { %15176 = vmatprep.mubr.msk.f32.mxu1 %vm558_vm1, %v8776_v1 }
0x14aa   :  { %15177 = vmatmul.mubr.msk.f32.gmra.mxu1 %vm558_vm1, %v8777_v19 }
0x14ab   :  { %15179 = vmatprep.mubr.msk.f32.mxu1 %vm558_vm1, %v8778_v29 }
0x14ae   :  { %15180 = vmatmul.mubr.msk.f32.gmra.mxu1 %vm558_vm1, %v8779_v51 }
0x14af   :  { %15244 = vmatprep.mubr.msk.f32.mxu1 %vm50_vm0, %v18855_v30 }
0x14ef   :  { %v15076_v18 = vpop.f32.mrf.mxu0 }
0x14f1   :  { %v9001_v46 = vpop.f32.mrf.mxu0 }
0x14f3   :  { %v15079_v2 = vpop.f32.mrf.mxu0 }
0x14f5   :  { %v9011_v25 = vpop.f32.mrf.mxu0 }
0x14f7   :  { %v15082_v42 = vpop.f32.mrf.mxu0 }
0x14f9   :  { %v9021_v16 = vpop.f32.mrf.mxu0 }
0x14fb   :  { %v15085_v14 = vpop.f32.mrf.mxu0 }
0x14fc   :  { %15126 = vmatprep.subr.mxu0 %v15085_v14 }
0x14fd   :  { %v9031_v49 = vpop.f32.mrf.mxu0  ;;  %15127 = vmatpush3.msra.mxu0 %v15085_v14 }
0x14fe   :  { %15128 = vmatprep.subr.mxu0 %v9031_v49 }
0x14ff   :  { %15129 = vmatpush3.msra.mxu0 %v9031_v49  ;;  %v19119_v15 = vpop.f32.mrf.mxu0 }
0x1500   :  { %15130 = vmatprep.subr.mxu0 %v15082_v42 }
0x1501   :  { %15131 = vmatpush3.msra.mxu0 %v15082_v42  ;;  %v19121_v1 = vpop.f32.mrf.mxu0 }
0x1502   :  { %15132 = vmatprep.subr.mxu0 %v9021_v16 }
0x1503   :  { %15133 = vmatpush3.msra.mxu0 %v9021_v16  ;;  %v19123_v13 = vpop.f32.mrf.mxu0 }
0x1504   :  { %15134 = vmatprep.subr.mxu0 %v15079_v2 }
0x1505   :  { %15135 = vmatpush3.msra.mxu0 %v15079_v2  ;;  %v19125_v60 = vpop.f32.mrf.mxu0 }
0x1506   :  { %15136 = vmatprep.subr.mxu0 %v9011_v25 }
0x1507   :  { %15137 = vmatpush3.msra.mxu0 %v9011_v25  ;;  %v19127_v29 = vpop.f32.mrf.mxu0 }
0x1508   :  { %15138 = vmatprep.subr.mxu0 %v15076_v18 }
0x1509   :  { %15139 = vmatpush3.msra.mxu0 %v15076_v18  ;;  %v19129_v19 = vpop.f32.mrf.mxu0 }
0x150a   :  { %15140 = vmatprep.subr.mxu0 %v9001_v46 }
0x150b   :  { %15141 = vmatpush3.msra.mxu0 %v9001_v46  ;;  %v19135_v46 = vpop.f32.mrf.mxu0 }
0x150c   :  { %15182 = vmatprep.subr.mxu0 %v19135_v46 }
0x1542   :  { %v15116_v52 = vpop.f32.mrf.mxu1 }
0x1543   :  { %v9236_v43 = vsel %vm712_vm2, %v15116_v52, -inf }
0x1544   :  { %9237 = vmax.xlane.f32.xlu1 %v9236_v43  ;;  %v9194_v40 = vpop.f32.mrf.mxu1 }
0x1545   :  { %v9233_v21 = vsel %vm712_vm2, %v9194_v40, -inf }
0x1546   :  { %9234 = vmax.xlane.f32.xlu0 %v9233_v21  ;;  %v15119_v9 = vpop.f32.mrf.mxu1 }
0x1547   :  { %v9242_v57 = vsel %vm712_vm2, %v15119_v9, -inf }
0x1548   :  { %9243 = vmax.xlane.f32.xlu1 %v9242_v57  ;;  %v9204_v33 = vpop.f32.mrf.mxu1 }
0x1549   :  { %v9239_v11 = vsel %vm712_vm2, %v9204_v33, -inf }
0x154a   :  { %9240 = vmax.xlane.f32.xlu0 %v9239_v11  ;;  %v19103_v0 = vpop.f32.mrf.mxu1 }
0x154b   :  { %v9248_v37 = vsel %vm712_vm2, %v19103_v0, -inf }
0x154c   :  { %9249 = vmax.xlane.f32.xlu1 %v9248_v37  ;;  %v19107_v48 = vpop.f32.mrf.mxu1 }
0x154d   :  { %v9245_v38 = vsel %vm712_vm2, %v19107_v48, -inf }
0x154e   :  { %9246 = vmax.xlane.f32.xlu0 %v9245_v38  ;;  %v19111_v50 = vpop.f32.mrf.mxu1 }
0x154f   :  { %v9254_v23 = vsel %vm712_vm2, %v19111_v50, -inf }
0x1550   :  { %9255 = vmax.xlane.f32.xlu1 %v9254_v23  ;;  %v19115_v8 = vpop.f32.mrf.mxu1 }
0x1551   :  { %v9251_v24 = vsel %vm712_vm2, %v19115_v8, -inf }
0x1552   :  { %9252 = vmax.xlane.f32.xlu0 %v9251_v24 }
0x1562   :  { %v19131_v51 = vpop.f32.mrf.mxu1 }
0x1563   :  { %v9606_v18 = vsel %vm712_vm2, %v19131_v51, -inf }
0x1564   :  { %9607 = vmax.xlane.f32.xlu1 %v9606_v18  ;;  %v19137_v2 = vpop.f32.mrf.mxu1 }
0x1565   :  { %v9603_v25 = vsel %vm712_vm2, %v19137_v2, -inf }
0x1566   :  { %v19142_v42 = vpop.f32.mrf.mxu1  ;;  %9604 = vmax.xlane.f32.xlu0 %v9603_v25 }
0x1567   :  { %v9612_v16 = vsel %vm712_vm2, %v19142_v42, -inf }
0x1568   :  { %9613 = vmax.xlane.f32.xlu1 %v9612_v16  ;;  %v19146_v14 = vpop.f32.mrf.mxu1 }
0x1569   :  { %v9609_v49 = vsel %vm712_vm2, %v19146_v14, -inf }
0x156a   :  { %v19150_v43 = vpop.f32.mrf.mxu1  ;;  %9610 = vmax.xlane.f32.xlu0 %v9609_v49 }
0x156b   :  { %v9618_v21 = vsel %vm712_vm2, %v19150_v43, -inf }
0x156c   :  { %9619 = vmax.xlane.f32.xlu1 %v9618_v21  ;;  %v19154_v57 = vpop.f32.mrf.mxu1 }
0x156d   :  { %v9615_v11 = vsel %vm712_vm2, %v19154_v57, -inf }
0x156e   :  { %v19158_v37 = vpop.f32.mrf.mxu1  ;;  %9616 = vmax.xlane.f32.xlu0 %v9615_v11 }
0x156f   :  { %v9624_v38 = vsel %vm712_vm2, %v19158_v37, -inf }
0x1570   :  { %9625 = vmax.xlane.f32.xlu1 %v9624_v38  ;;  %v19162_v23 = vpop.f32.mrf.mxu1 }
0x1571   :  { %v9621_v24 = vsel %vm712_vm2, %v19162_v23, -inf }
0x1572   :  { %9622 = vmax.xlane.f32.xlu0 %v9621_v24 }
0x15cd   :  { %v9238_v18 = vpop.xlane.xlu1 %9237 }
0x15ce   :  { %v9258_v25 = vsub.f32 %v15116_v52, %v9238_v18 }
0x15cf   :  { %v9235_v16 = vpop.xlane.xlu0 %9234 }
0x15d0   :  { %v9267_v49 = vmul.f32 1.442695, %v9258_v25  ;;  %v9257_v21 = vsub.f32 %v9194_v40, %v9235_v16 }
0x15d1   :  { %v9244_v54 = vpop.xlane.xlu1 %9243 }
0x15d2   :  { %15870 = vpow2.f32 %v9267_v49  ;;  %v9265_v44 = vmul.f32 1.442695, %v9257_v21  ;;  %v9260_v28 = vsub.f32 %v15119_v9, %v9244_v54 }
0x15d3   :  { %v9241_v11 = vpop.xlane.xlu0 %9240 }
0x15d4   :  { %15872 = vpow2.f32 %v9265_v44  ;;  %v9271_v39 = vmul.f32 1.442695, %v9260_v28  ;;  %v9259_v41 = vsub.f32 %v9204_v33, %v9241_v11 }
0x15d5   :  { %v9250_v38 = vpop.xlane.xlu1 %9249 }
0x15d6   :  { %15874 = vpow2.f32 %v9271_v39  ;;  %v9269_v58 = vmul.f32 1.442695, %v9259_v41  ;;  %v9262_v59 = vsub.f32 %v19103_v0, %v9250_v38 }
0x15d7   :  { %v9247_v31 = vpop.xlane.xlu0 %9246 }
0x15d8   :  { %15876 = vpow2.f32 %v9269_v58  ;;  %v9275_v24 = vmul.f32 1.442695, %v9262_v59  ;;  %v9261_v52 = vsub.f32 %v19107_v48, %v9247_v31  ;;  %v9071_v59 = vpop.f32.mrf.mxu0 }
0x15d9   :  { %v9256_v18 = vpop.xlane.xlu1 %9255 }
0x15da   :  { %15878 = vpow2.f32 %v9275_v24  ;;  %v9273_v40 = vmul.f32 1.442695, %v9261_v52  ;;  %v9264_v25 = vsub.f32 %v19111_v50, %v9256_v18 }
0x15db   :  { %v9253_v54 = vpop.xlane.xlu0 %9252 }
0x15dc   :  { %15880 = vpow2.f32 %v9273_v40  ;;  %v9279_v44 = vmul.f32 1.442695, %v9264_v25  ;;  %v9263_v28 = vsub.f32 %v19115_v8, %v9253_v54 }
0x15de   :  { %15882 = vpow2.f32 %v9279_v44  ;;  %v9277_v39 = vmul.f32 1.442695, %v9263_v28 }
0x15df   :  { %v15871_v41 = vpop.eup %15870 }
0x15e0   :  { %15884 = vpow2.f32 %v9277_v39  ;;  %v9284_v9 = vsel %vm712_vm2, %v15871_v41, 0.0 }
0x15e1   :  { %v15873_v58 = vpop.eup %15872  ;;  %9285 = vadd.xlane.f32.xlu1 %v9284_v9 }
0x15e2   :  { %15142 = vmatprep.mubr.msk.f32.mxu0 %vm712_vm2, %v15873_v58  ;;  %v9281_v31 = vsel %vm712_vm2, %v15873_v58, 0.0 }
0x15e3   :  { %v15875_v33 = vpop.eup %15874  ;;  %15143 = vmatmul.mubr.msk.f32.vlgmr.msra.gmra.mxu0 %vm712_vm2, %v15871_v41  ;;  %9282 = vadd.xlane.f32.xlu0 %v9281_v31 }
0x15e4   :  { %15183 = vmatpush3.msra.mxu0 %v19135_v46  ;;  %v9290_v0 = vsel %vm712_vm2, %v15875_v33, 0.0 }
0x15e5   :  { %v15877_v48 = vpop.eup %15876  ;;  %15184 = vmatprep.subr.mxu0 %v9071_v59  ;;  %9291 = vadd.xlane.f32.xlu1 %v9290_v0 }
0x15e6   :  { %15185 = vmatpush3.msra.mxu0 %v9071_v59  ;;  %15145 = vmatprep.mubr.msk.f32.mxu0 %vm712_vm2, %v15877_v48  ;;  %v9287_v50 = vsel %vm712_vm2, %v15877_v48, 0.0 }
0x15e7   :  { %v15879_v8 = vpop.eup %15878  ;;  %15186 = vmatprep.subr.mxu0 %v19127_v29  ;;  %15146 = vmatmul.mubr.msk.f32.gmra.mxu0 %vm712_vm2, %v15875_v33 }
0x15e8   :  { %15187 = vmatpush3.msra.mxu0 %v19127_v29  ;;  %9288 = vadd.xlane.f32.xlu0 %v9287_v50  ;;  %v9296_v46 = vsel %vm712_vm2, %v15879_v8, 0.0 }
0x15e9   :  { %v15881_v16 = vpop.eup %15880  ;;  %15188 = vmatprep.subr.mxu0 %v19129_v19  ;;  %9297 = vadd.xlane.f32.xlu1 %v9296_v46 }
0x15ea   :  { %15189 = vmatpush3.msra.mxu0 %v19129_v19  ;;  %15148 = vmatprep.mubr.msk.f32.mxu0 %vm712_vm2, %v15881_v16  ;;  %v9293_v49 = vsel %vm712_vm2, %v15881_v16, 0.0 }
0x15eb   :  { %v15883_v21 = vpop.eup %15882  ;;  %15190 = vmatprep.subr.mxu0 %v19123_v13  ;;  %15149 = vmatmul.mubr.msk.f32.gmra.mxu0 %vm712_vm2, %v15879_v8 }
0x15ec   :  { %15191 = vmatpush3.msra.mxu0 %v19123_v13  ;;  %9294 = vadd.xlane.f32.xlu0 %v9293_v49  ;;  %v9302_v29 = vsel %vm712_vm2, %v15883_v21, 0.0 }
0x15ed   :  { %v15885_v11 = vpop.eup %15884  ;;  %15192 = vmatprep.subr.mxu0 %v19125_v60  ;;  %v9608_v38 = vpop.xlane.xlu1 %9607  ;;  %9303 = vadd.xlane.f32.xlu1 %v9302_v29 }
0x15ee   :  { %15193 = vmatpush3.msra.mxu0 %v19125_v60  ;;  %v9628_v19 = vsub.f32 %v19131_v51, %v9608_v38  ;;  %15151 = vmatprep.mubr.msk.f32.mxu0 %vm712_vm2, %v15885_v11  ;;  %v9299_v24 = vsel %vm712_vm2, %v15885_v11, 0.0 }
0x15ef   :  { %15194 = vmatprep.subr.mxu0 %v19119_v15  ;;  %15152 = vmatmul.mubr.msk.f32.gmra.mxu0 %vm712_vm2, %v15883_v21  ;;  %v9605_v13 = vpop.xlane.xlu0 %9604 }
0x15f0   :  { %v9637_v52 = vmul.f32 1.442695, %v9628_v19  ;;  %15195 = vmatpush3.msra.mxu0 %v19119_v15  ;;  %9300 = vadd.xlane.f32.xlu0 %v9299_v24  ;;  %v9627_v18 = vsub.f32 %v19137_v2, %v9605_v13  ;;  %v12326_v24 = vld [vmem:[%s19832_s4 + $0x18] sm:$0xf] }
0x15f1   :  { %15196 = vmatprep.subr.mxu0 %v19121_v1  ;;  %v9614_v60 = vpop.xlane.xlu1 %9613  ;;  %v12367_v13 = vld [vmem:[%s19828_s2 + $0xf8] sm:$0xff] }
0x15f2   :  { %15886 = vpow2.f32 %v9637_v52  ;;  %v9635_v51 = vmul.f32 1.442695, %v9627_v18  ;;  %15197 = vmatpush3.msra.mxu0 %v19121_v1  ;;  %v9630_v40 = vsub.f32 %v19142_v42, %v9614_v60  ;;  %v12347_v52 = vld [vmem:[%s19830_s1 + $0xf8] sm:$0xff]  ;;  %v12346_v18 = vld [vmem:[%s19830_s1 + $0xf0] sm:$0xff]  ;;  %v12345_v60 = vld [vmem:[%s19830_s1 + $0xe8] sm:$0xff] }
0x15f3   :  { %v9611_v25 = vpop.xlane.xlu0 %9610  ;;  %15210 = vmatprep.subr.msk.mxu0 %vm1349_vm3, %v12326_v24  ;;  %15236 = vmatprep.subr.mxu1 %v12347_v52 }
0x15f4   :  { %15888 = vpow2.f32 %v9635_v51  ;;  %v9641_v54 = vmul.f32 1.442695, %v9630_v40  ;;  %v9629_v44 = vsub.f32 %v19146_v14, %v9611_v25  ;;  %15237 = vmatpush3.msra.mxu1 %v12347_v52  ;;  %v12344_v51 = vld [vmem:[%s19830_s1 + $0xe0] sm:$0xff] }
0x15f5   :  { %v9620_v28 = vpop.xlane.xlu1 %9619  ;;  %15238 = vmatprep.subr.mxu1 %v12346_v18 }
0x15f6   :  { %15890 = vpow2.f32 %v9641_v54  ;;  %v9639_v15 = vmul.f32 1.442695, %v9629_v44  ;;  %v9632_v39 = vsub.f32 %v19150_v43, %v9620_v28  ;;  %15239 = vmatpush3.msra.mxu1 %v12346_v18  ;;  %v12365_v28 = vld [vmem:[%s19828_s2 + $0xe8] sm:$0xff] }
0x15f7   :  { %v9617_v2 = vpop.xlane.xlu0 %9616  ;;  %15240 = vmatprep.subr.mxu1 %v12345_v60 }
0x15f8   :  { %15892 = vpow2.f32 %v9639_v15  ;;  %v9645_v41 = vmul.f32 1.442695, %v9632_v39  ;;  %v9631_v9 = vsub.f32 %v19154_v57, %v9617_v2  ;;  %15241 = vmatpush3.msra.mxu1 %v12345_v60  ;;  %v12364_v2 = vld [vmem:[%s19828_s2 + $0xe0] sm:$0xff] }
0x15f9   :  { %v9626_v58 = vpop.xlane.xlu1 %9625  ;;  %15242 = vmatprep.subr.mxu1 %v12344_v51 }
0x15fa   :  { %15894 = vpow2.f32 %v9645_v41  ;;  %v9643_v1 = vmul.f32 1.442695, %v9631_v9  ;;  %v9634_v42 = vsub.f32 %v19158_v37, %v9626_v58  ;;  %15243 = vmatpush3.msra.mxu1 %v12344_v51 }
0x15fb   :  { %v9623_v59 = vpop.xlane.xlu0 %9622  ;;  %15245 = vmatmul.mubr.msk.f32.vlgmr.msra.gmra.mxu1 %vm50_vm0, %v18862_v12 }
0x15fc   :  { %15896 = vpow2.f32 %v9643_v1  ;;  %v9649_v31 = vmul.f32 1.442695, %v9634_v42  ;;  %v9633_v14 = vsub.f32 %v19162_v23, %v9623_v59  ;;  %15247 = vmatprep.mubr.msk.f32.mxu1 %vm50_vm0, %v18869_v34 }
0x15fe   :  { %15898 = vpow2.f32 %v9649_v31  ;;  %v9647_v33 = vmul.f32 1.442695, %v9633_v14 }
0x15ff   :  { %v15887_v0 = vpop.eup %15886  ;;  %15248 = vmatmul.mubr.msk.f32.gmra.mxu1 %vm50_vm0, %v18876_v4 }
0x1600   :  { %15900 = vpow2.f32 %v9647_v33  ;;  %v9654_v43 = vsel %vm712_vm2, %v15887_v0, 0.0  ;;  %15250 = vmatprep.mubr.msk.f32.mxu1 %vm50_vm0, %v18883_v45 }
0x1601   :  { %v15889_v48 = vpop.eup %15888  ;;  %9655 = vadd.xlane.f32.xlu1 %v9654_v43 }
0x1602   :  { %15198 = vmatprep.mubr.msk.f32.mxu0 %vm712_vm2, %v15889_v48  ;;  %v9651_v57 = vsel %vm712_vm2, %v15889_v48, 0.0 }
0x1603   :  { %v15891_v50 = vpop.eup %15890  ;;  %15199 = vmatmul.mubr.msk.f32.vlgmr.msra.gmra.mxu0 %vm712_vm2, %v15887_v0  ;;  %9652 = vadd.xlane.f32.xlu0 %v9651_v57 }
0x1604   :  { %v9660_v37 = vsel %vm712_vm2, %v15891_v50, 0.0  ;;  %15211 = vmatpush3.msk.msra.mxu0 %vm1349_vm3, %v12326_v24  ;;  %15251 = vmatmul.mubr.msk.f32.gmra.mxu1 %vm50_vm0, %v18890_v17 }
0x1605   :  { %v15893_v8 = vpop.eup %15892  ;;  %9661 = vadd.xlane.f32.xlu1 %v9660_v37  ;;  %15268 = vmatprep.subr.mxu0 %v12367_v13 }
0x1606   :  { %15201 = vmatprep.mubr.msk.f32.mxu0 %vm712_vm2, %v15893_v8  ;;  %v9657_v23 = vsel %vm712_vm2, %v15893_v8, 0.0  ;;  %15253 = vmatprep.mubr.msk.f32.mxu1 %vm50_vm0, %v18897_v63 }
0x1607   :  { %v15895_v46 = vpop.eup %15894  ;;  %15202 = vmatmul.mubr.msk.f32.gmra.mxu0 %vm712_vm2, %v15891_v50  ;;  %9658 = vadd.xlane.f32.xlu0 %v9657_v23 }
0x1608   :  { %v9666_v16 = vsel %vm712_vm2, %v15895_v46, 0.0  ;;  %15254 = vmatmul.mubr.msk.f32.gmra.mxu1 %vm50_vm0, %v18904_v62 }
0x1609   :  { %v15897_v49 = vpop.eup %15896  ;;  %9667 = vadd.xlane.f32.xlu1 %v9666_v16  ;;  %15256 = vmatprep.mubr.msk.f32.mxu1 %vm50_vm0, %v18911_v32 }
0x160a   :  { %15204 = vmatprep.mubr.msk.f32.mxu0 %vm712_vm2, %v15897_v49  ;;  %v9663_v21 = vsel %vm712_vm2, %v15897_v49, 0.0 }
0x160b   :  { %v15899_v29 = vpop.eup %15898  ;;  %15205 = vmatmul.mubr.msk.f32.gmra.mxu0 %vm712_vm2, %v15895_v46  ;;  %9664 = vadd.xlane.f32.xlu0 %v9663_v21 }
0x160c   :  { %v9672_v11 = vsel %vm712_vm2, %v15899_v29, 0.0  ;;  %15257 = vmatmul.mubr.msk.f32.gmra.mxu1 %vm50_vm0, %v18918_v56 }
0x160d   :  { %v15901_v38 = vpop.eup %15900  ;;  %9673 = vadd.xlane.f32.xlu1 %v9672_v11  ;;  %15259 = vmatprep.mubr.msk.f32.mxu1 %vm50_vm0, %v18925_v26 }
0x160e   :  { %15207 = vmatprep.mubr.msk.f32.mxu0 %vm712_vm2, %v15901_v38  ;;  %v9669_v19 = vsel %vm712_vm2, %v15901_v38, 0.0 }
0x160f   :  { %15208 = vmatmul.mubr.msk.f32.gmra.mxu0 %vm712_vm2, %v15899_v29  ;;  %9670 = vadd.xlane.f32.xlu0 %v9669_v19 }
0x1610   :  { %15260 = vmatmul.mubr.msk.f32.gmra.mxu1 %vm50_vm0, %v18932_v27 }
0x1611   :  { %15262 = vmatprep.mubr.msk.f32.mxu1 %vm50_vm0, %v18939_v20 }
0x1614   :  { %15263 = vmatmul.mubr.msk.f32.gmra.mxu1 %vm50_vm0, %v18946_v35 }
0x1615   :  { %15265 = vmatprep.mubr.msk.f32.mxu1 %vm50_vm0, %v18953_v61 }
0x1618   :  { %15266 = vmatmul.mubr.msk.f32.gmra.mxu1 %vm50_vm0, %v18960_v53  ;;  %v12366_v53 = vld [vmem:[%s19828_s2 + $0xf0] sm:$0xff] }
0x1619   :  { %15308 = vmatprep.mubr.msk.f32.mxu1 %vm50_vm0, %v18855_v30 }
0x166a   :  { %v9286_v34 = vpop.xlane.xlu1 %9285 }
0x166c   :  { %v9283_v12 = vpop.xlane.xlu0 %9282 }
0x166d   :  { %15902 = vrcp.f32 %v9283_v12 }
0x166e   :  { %v9292_v45 = vpop.xlane.xlu1 %9291  ;;  %15904 = vrcp.f32 %v9286_v34 }
0x1671   :  { %v9289_v4 = vpop.xlane.xlu0 %9288 }
0x1672   :  { %15906 = vrcp.f32 %v9289_v4  ;;  %v9298_v63 = vpop.xlane.xlu1 %9297 }
0x1673   :  { %15908 = vrcp.f32 %v9292_v45 }
0x1675   :  { %v9295_v17 = vpop.xlane.xlu0 %9294 }
0x1676   :  { %15910 = vrcp.f32 %v9295_v17  ;;  %v9304_v32 = vpop.xlane.xlu1 %9303 }
0x1677   :  { %15912 = vrcp.f32 %v9298_v63 }
0x1679   :  { %v9301_v62 = vpop.xlane.xlu0 %9300 }
0x167a   :  { %15914 = vrcp.f32 %v9301_v62  ;;  %v15903_v26 = vpop.eup %15902 }
0x167b   :  { %15916 = vrcp.f32 %v9304_v32  ;;  %v15905_v30 = vpop.eup %15904 }
0x167f   :  { %v15907_v40 = vpop.eup %15906 }
0x1680   :  { %v15909_v54 = vpop.eup %15908 }
0x1683   :  { %v15911_v41 = vpop.eup %15910 }
0x1684   :  { %v15913_v58 = vpop.eup %15912 }
0x1687   :  { %v15915_v33 = vpop.eup %15914 }
0x1688   :  { %v15917_v43 = vpop.eup %15916 }
0x168a   :  { %v9656_v14 = vpop.xlane.xlu1 %9655 }
0x168c   :  { %v9653_v42 = vpop.xlane.xlu0 %9652 }
0x168d   :  { %15918 = vrcp.f32 %v9653_v42 }
0x168e   :  { %v9662_v37 = vpop.xlane.xlu1 %9661  ;;  %15920 = vrcp.f32 %v9656_v14  ;;  %v19415_v14 = vld [vmem:[%s19833_s5] ss:$0 sm:$0xff] }
0x1690   :  { %v9659_v50 = vpop.xlane.xlu0 %9658 }
0x1691   :  { %15922 = vrcp.f32 %v9659_v50  ;;  %v19884_v50 = vld [vmem:[#allocation17_spill] sm:$0xff] }
0x1692   :  { %v9668_v23 = vpop.xlane.xlu1 %9667  ;;  %15924 = vrcp.f32 %v9662_v37 }
0x1694   :  { %v9665_v8 = vpop.xlane.xlu0 %9664 }
0x1695   :  { %15926 = vrcp.f32 %v9665_v8  ;;  %v19885_v8 = vld [vmem:[#allocation10_spill] sm:$0xff] }
0x1696   :  { %15928 = vrcp.f32 %v9668_v23  ;;  %v9674_v16 = vpop.xlane.xlu1 %9673 }
0x1698   :  { %v9671_v46 = vpop.xlane.xlu0 %9670 }
0x1699   :  { %15930 = vrcp.f32 %v9671_v46  ;;  %v19886_v46 = vld [vmem:[#allocation25_spill] sm:$0xff] }
0x169a   :  { %v15919_v21 = vpop.eup %15918  ;;  %15932 = vrcp.f32 %v9674_v16 }
0x169b   :  { %v15921_v11 = vpop.eup %15920 }
0x16a3   :  { %v15144_v56 = vpop.f32.mrf.mxu0 }
0x16a4   :  { %v9443_v35 = vmul.f32 %v15905_v30, %v15144_v56 }
0x16a5   :  { %v9395_v27 = vpop.f32.mrf.mxu0 }
0x16a6   :  { %v9442_v20 = vmul.f32 %v15903_v26, %v9395_v27 }
0x16a7   :  { %v15147_v61 = vpop.f32.mrf.mxu0 }
0x16a8   :  { %15212 = vmatprep.mubr.msk.f32.mxu0 %vm558_vm1, %v9442_v20  ;;  %v9445_v15 = vmul.f32 %v15909_v54, %v15147_v61  ;;  %v16094_v20 = vld [vmem:[%s19829_s0] sm:$0xff]  ;;  %v19314_v61 = vld [vmem:[%s19829_s0 + $0x10] sm:$0xff] }
0x16a9   :  { %v9405_v25 = vpop.f32.mrf.mxu0  ;;  %15213 = vmatmul.mubr.msk.f32.vlgmr.msra.gmra.mxu0 %vm558_vm1, %v9443_v35  ;;  %v19307_v35 = vld [vmem:[%s19829_s0 + $0x8] sm:$0xff]  ;;  %v19342_v54 = vld [vmem:[%s19829_s0 + $0x30] sm:$0xff] }
0x16aa   :  { %v9444_v44 = vmul.f32 %v15907_v40, %v9405_v25  ;;  %15269 = vmatpush3.msra.mxu0 %v12367_v13  ;;  %v15923_v13 = vpop.eup %15922  ;;  %v19328_v40 = vld [vmem:[%s19829_s0 + $0x20] sm:$0xff]  ;;  %v19335_v25 = vld [vmem:[%s19829_s0 + $0x28] sm:$0xff] }
0x16ab   :  { %v15150_v39 = vpop.f32.mrf.mxu0  ;;  %15270 = vmatprep.subr.mxu0 %v12366_v53  ;;  %v15925_v18 = vpop.eup %15924 }
0x16ac   :  { %15215 = vmatprep.mubr.msk.f32.mxu0 %vm558_vm1, %v9444_v44  ;;  %15271 = vmatpush3.msra.mxu0 %v12366_v53  ;;  %v9447_v59 = vmul.f32 %v15913_v58, %v15150_v39  ;;  %v15927_v34 = vpop.eup %15926  ;;  %v19321_v53 = vld [vmem:[%s19829_s0 + $0x18] sm:$0xff]  ;;  %v19370_v39 = vld [vmem:[%s19829_s0 + $0x50] sm:$0xff] }
0x16ad   :  { %v9415_v9 = vpop.f32.mrf.mxu0  ;;  %15216 = vmatmul.mubr.msk.f32.gmra.mxu0 %vm558_vm1, %v9445_v15  ;;  %15272 = vmatprep.subr.mxu0 %v12365_v28  ;;  %v15929_v45 = vpop.eup %15928  ;;  %v19349_v44 = vld [vmem:[%s19829_s0 + $0x38] sm:$0xff]  ;;  %v19363_v15 = vld [vmem:[%s19829_s0 + $0x48] sm:$0xff]  ;;  %v19398_v58 = vld [vmem:[%s19829_s0 + $0x70] sm:$0xff] }
0x16ae   :  { %v9446_v1 = vmul.f32 %v15911_v41, %v9415_v9  ;;  %15273 = vmatpush3.msra.mxu0 %v12365_v28  ;;  %v15931_v32 = vpop.eup %15930  ;;  %v19356_v28 = vld [vmem:[%s19829_s0 + $0x40] sm:$0xff]  ;;  %v19391_v9 = vld [vmem:[%s19829_s0 + $0x68] sm:$0xff] }
0x16af   :  { %v15153_v31 = vpop.f32.mrf.mxu0  ;;  %15274 = vmatprep.subr.mxu0 %v12364_v2  ;;  %v15933_v26 = vpop.eup %15932  ;;  %v19384_v41 = vld [vmem:[%s19829_s0 + $0x60] sm:$0xff] }
0x16b0   :  { %15218 = vmatprep.mubr.msk.f32.mxu0 %vm558_vm1, %v9446_v1  ;;  %15275 = vmatpush3.msra.mxu0 %v12364_v2  ;;  %v9449_v57 = vmul.f32 %v15917_v43, %v15153_v31  ;;  %v19377_v2 = vld [vmem:[%s19829_s0 + $0x58] sm:$0xff] }
0x16b1   :  { %v9425_v0 = vpop.f32.mrf.mxu0  ;;  %15219 = vmatmul.mubr.msk.f32.gmra.mxu0 %vm558_vm1, %v9447_v59  ;;  %v19405_v1 = vld [vmem:[%s19829_s0 + $0x78] sm:$0xff] }
0x16b2   :  { %v9448_v48 = vmul.f32 %v15915_v33, %v9425_v0  ;;  %v1498_v33 = vadd.f32 %v19415_v14, %v16746_v6  ;;  %v19882_v0 = vld [vmem:[#allocation9_spill] sm:$0xff]  ;;  %v19890_v6 = vld [vmem:[#allocation11_spill] sm:$0xff] }
0x16b4   :  { %15221 = vmatprep.mubr.msk.f32.mxu0 %vm558_vm1, %v9448_v48  ;;  %v2918_v43 = vadd.f32 %v19882_v0, %v1498_v33  ;;  %v19883_v48 = vld [vmem:[#allocation2_spill] sm:$0xff]  ;;  %v19898_v0 = vld [vmem:[#allocation35_spill] sm:$0xff] }
0x16b5   :  { %15222 = vmatmul.mubr.msk.f32.gmra.mxu0 %vm558_vm1, %v9449_v57  ;;  %v1500_v57 = vadd.f32 %v19415_v14, %v19883_v48 }
0x16b6   :  { %v4338_v37 = vadd.f32 %v19884_v50, %v2918_v43  ;;  %v19899_v50 = vld [vmem:[#allocation28_spill] sm:$0xff] }
0x16b7   :  { %v2920_v23 = vadd.f32 %v19885_v8, %v1500_v57 }
0x16b8   :  { %v5758_v16 = vadd.f32 %v19886_v46, %v4338_v37 }
0x16bb   :  { %v19409_v42 = vpop.f32.mrf.mxu1 }
0x16bd   :  { %v10105_v59 = vpop.f32.mrf.mxu1 }
0x16be   :  { %v10184_v31 = vmul.f32 0.5, %v10105_v59 }
0x16c3   :  { %v15200_v49 = vpop.f32.mrf.mxu0 }
0x16c4   :  { %v9813_v19 = vmul.f32 %v15921_v11, %v15200_v49  ;;  %v19887_v49 = vld [vmem:[#allocation3_spill] sm:$0xff] }
0x16c5   :  { %v9765_v29 = vpop.f32.mrf.mxu0 }
0x16c6   :  { %v9812_v38 = vmul.f32 %v15919_v21, %v9765_v29  ;;  %v1502_v21 = vadd.f32 %v19415_v14, %v19887_v49  ;;  %v19888_v29 = vld [vmem:[#allocation18_spill] sm:$0xff] }
0x16c7   :  { %v15203_v24 = vpop.f32.mrf.mxu0  ;;  %v4340_v11 = vadd.f32 %v19888_v29, %v2920_v23 }
0x16c8   :  { %15224 = vmatprep.mubr.msk.f32.mxu0 %vm558_vm1, %v9812_v38  ;;  %v9815_v51 = vmul.f32 %v15925_v18, %v15203_v24  ;;  %v19889_v38 = vld [vmem:[#allocation33_spill] sm:$0xff] }
0x16c9   :  { %v9775_v52 = vpop.f32.mrf.mxu0  ;;  %15225 = vmatmul.mubr.msk.f32.gmra.mxu0 %vm558_vm1, %v9813_v19  ;;  %v7178_v19 = vadd.f32 %v19889_v38, %v5758_v16  ;;  %v19900_v16 = vld [vmem:[#allocation36_spill] sm:$0xff]  ;;  %v12384_v38 = vld [vmem:[%s19831_s3 + $0xe0] sm:$0xff] }
0x16ca   :  { %v9814_v60 = vmul.f32 %v15923_v13, %v9775_v52  ;;  %v2922_v13 = vadd.f32 %v19890_v6, %v1502_v21  ;;  %v19891_v52 = vld [vmem:[#allocation26_spill] sm:$0xff]  ;;  %v19902_v6 = vld [vmem:[#allocation13_spill] sm:$0xff] }
0x16cb   :  { %v15206_v12 = vpop.f32.mrf.mxu0  ;;  %v5760_v18 = vadd.f32 %v19891_v52, %v4340_v11  ;;  %v19903_v52 = vld [vmem:[#allocation6_spill] sm:$0xff] }
0x16cc   :  { %15227 = vmatprep.mubr.msk.f32.mxu0 %vm558_vm1, %v9814_v60  ;;  %v9817_v63 = vmul.f32 %v15929_v45, %v15206_v12  ;;  %v8598_v60 = vadd.f32 %v18970_v55, %v7178_v19  ;;  %v19893_v45 = vld [vmem:[#allocation19_spill] sm:$0xff] }
0x16cd   :  { %v9785_v4 = vpop.f32.mrf.mxu0  ;;  %15228 = vmatmul.mubr.msk.f32.gmra.mxu0 %vm558_vm1, %v9815_v51 }
0x16ce   :  { %v9816_v17 = vmul.f32 %v15927_v34, %v9785_v4  ;;  %v19892_v34 = vld [vmem:[#allocation4_spill] sm:$0xff] }
0x16cf   :  { %v15209_v62 = vpop.f32.mrf.mxu0  ;;  %v1504_v4 = vadd.f32 %v19415_v14, %v19892_v34 }
0x16d0   :  { %15230 = vmatprep.mubr.msk.f32.mxu0 %vm558_vm1, %v9816_v17  ;;  %v9819_v30 = vmul.f32 %v15933_v26, %v15209_v62  ;;  %v4342_v17 = vadd.f32 %v19893_v45, %v2922_v13  ;;  %v19895_v26 = vld [vmem:[#allocation12_spill] sm:$0xff]  ;;  %v19908_v45 = vld [vmem:[#allocation22_spill] sm:$0xff] }
0x16d1   :  { %v9795_v56 = vpop.f32.mrf.mxu0  ;;  %15231 = vmatmul.mubr.msk.f32.gmra.mxu0 %vm558_vm1, %v9817_v63  ;;  %v19894_v63 = vld [vmem:[#allocation34_spill] sm:$0xff] }
0x16d2   :  { %v9818_v27 = vmul.f32 %v15931_v32, %v9795_v56  ;;  %v7180_v62 = vadd.f32 %v19894_v63, %v5760_v18  ;;  %v19904_v18 = vld [vmem:[#allocation21_spill] sm:$0xff] }
0x16d4   :  { %15233 = vmatprep.mubr.msk.f32.mxu0 %vm558_vm1, %v9818_v27  ;;  %v2924_v27 = vadd.f32 %v19895_v26, %v1504_v4  ;;  %v8600_v55 = vadd.f32 %v18975_v47, %v7180_v62  ;;  %v12386_v47 = vld [vmem:[%s19831_s3 + $0xf0] sm:$0xff]  ;;  %v19911_v26 = vld [vmem:[#allocation30_spill] sm:$0xff] }
0x16d5   :  { %15234 = vmatmul.mubr.msk.f32.gmra.mxu0 %vm558_vm1, %v9819_v30  ;;  %v19896_v30 = vld [vmem:[#allocation27_spill] sm:$0xff] }
0x16d6   :  { %15276 = vmatprep.mubr.msk.f32.mxu0 %vm50_vm0, %v16094_v20  ;;  %v5762_v20 = vadd.f32 %v19896_v30, %v4342_v17  ;;  %v19909_v17 = vld [vmem:[#allocation37_spill] sm:$0xff]  ;;  %v19912_v30 = vld [vmem:[#allocation42_spill] sm:$0xff] }
0x16d8   :  { %v7182_v43 = vadd.f32 %v19898_v0, %v5762_v20  ;;  %v19915_v0 = vld [vmem:[#allocation23_spill] sm:$0xff] }
0x16d9   :  { %15277 = vmatmul.mubr.msk.f32.vlgmr.msra.gmra.mxu0 %vm50_vm0, %v19307_v35 }
0x16da   :  { %15279 = vmatprep.mubr.msk.f32.mxu0 %vm50_vm0, %v19314_v61  ;;  %v8602_v8 = vadd.f32 %v18986_v5, %v7182_v43 }
0x16dd   :  { %15280 = vmatmul.mubr.msk.f32.gmra.mxu0 %vm50_vm0, %v19321_v53 }
0x16de   :  { %15282 = vmatprep.mubr.msk.f32.mxu0 %vm50_vm0, %v19328_v40 }
0x16e1   :  { %15283 = vmatmul.mubr.msk.f32.gmra.mxu0 %vm50_vm0, %v19335_v25 }
0x16e2   :  { %15285 = vmatprep.mubr.msk.f32.mxu0 %vm50_vm0, %v19342_v54 }
0x16e5   :  { %15286 = vmatmul.mubr.msk.f32.gmra.mxu0 %vm50_vm0, %v19349_v44 }
0x16e6   :  { %15288 = vmatprep.mubr.msk.f32.mxu0 %vm50_vm0, %v19356_v28 }
0x16e9   :  { %15289 = vmatmul.mubr.msk.f32.gmra.mxu0 %vm50_vm0, %v19363_v15 }
0x16ea   :  { %15291 = vmatprep.mubr.msk.f32.mxu0 %vm50_vm0, %v19370_v39 }
0x16ed   :  { %15292 = vmatmul.mubr.msk.f32.gmra.mxu0 %vm50_vm0, %v19377_v2 }
0x16ee   :  { %15294 = vmatprep.mubr.msk.f32.mxu0 %vm50_vm0, %v19384_v41 }
0x16f1   :  { %15295 = vmatmul.mubr.msk.f32.gmra.mxu0 %vm50_vm0, %v19391_v9 }
0x16f2   :  { %15297 = vmatprep.mubr.msk.f32.mxu0 %vm50_vm0, %v19398_v58 }
0x16f5   :  { %15298 = vmatmul.mubr.msk.f32.gmra.mxu0 %vm50_vm0, %v19405_v1 }
0x16f6   :  { %15348 = vmatprep.mubr.msk.f32.mxu0 %vm558_vm1, %v10184_v31  ;;  %v19897_v31 = vld [vmem:[#allocation20_spill] sm:$0xff] }
0x16f7   :  { %v4344_v33 = vadd.f32 %v19897_v31, %v2924_v27  ;;  %v19914_v31 = vld [vmem:[#allocation8_spill] sm:$0xff] }
0x16f9   :  { %v5764_v37 = vadd.f32 %v19899_v50, %v4344_v33  ;;  %v1512_v33 = vadd.f32 %v19415_v14, %v19914_v31 }
0x16fb   :  { %v7184_v49 = vadd.f32 %v19900_v16, %v5764_v37  ;;  %v19919_v16 = vld [vmem:[#allocation44_spill] sm:$0xff] }
0x16fd   :  { %v8604_v29 = vadd.f32 %v19009_v10, %v7184_v49 }
0x1769   :  { %v15214_v24 = vpop.f32.mrf.mxu0 }
0x176a   :  { %v19433_v51 = vadd.f32 %v15214_v24, %v18968_v22 }
0x176b   :  { %v9939_v12 = vpop.f32.mrf.mxu0 }
0x176c   :  { %v19439_v32 = vadd.f32 %v9939_v12, %v8598_v60  ;;  %v19906_v12 = vld [vmem:[#allocation29_spill] sm:$0xff] }
0x176d   :  { %v15217_v56 = vpop.f32.mrf.mxu0 }
0x176e   :  { %v19445_v22 = vadd.f32 %v15217_v56, %v18973_v7  ;;  %v12387_v7 = vld [vmem:[%s19831_s3 + $0xf8] sm:$0xff]  ;;  %v19910_v56 = vld [vmem:[#allocation15_spill] sm:$0xff] }
0x176f   :  { %v9949_v59 = vpop.f32.mrf.mxu0  ;;  %15300 = vmatprep.subr.mxu1 %v12387_v7 }
0x1770   :  { %v19449_v48 = vadd.f32 %v9949_v59, %v8600_v55  ;;  %15301 = vmatpush3.msra.mxu1 %v12387_v7  ;;  %v19913_v55 = vld [vmem:[#allocation41_spill] sm:$0xff] }
0x1771   :  { %v15220_v57 = vpop.f32.mrf.mxu0  ;;  %15302 = vmatprep.subr.mxu1 %v12386_v47 }
0x1772   :  { %v19454_v23 = vadd.f32 %v15220_v57, %v18978_v3  ;;  %v12385_v3 = vld [vmem:[%s19831_s3 + $0xe8] sm:$0xff]  ;;  %15303 = vmatpush3.msra.mxu1 %v12386_v47 }
0x1773   :  { %v9959_v46 = vpop.f32.mrf.mxu0  ;;  %15304 = vmatprep.subr.mxu1 %v12385_v3  ;;  %v19918_v47 = vld [vmem:[#allocation31_spill] sm:$0xff] }
0x1774   :  { %v19463_v21 = vadd.f32 %v9959_v46, %v8602_v8  ;;  %15305 = vmatpush3.msra.mxu1 %v12385_v3  ;;  %v19917_v8 = vld [vmem:[#allocation16_spill] sm:$0xff] }
0x1775   :  { %v15223_v5 = vpop.f32.mrf.mxu0  ;;  %15306 = vmatprep.subr.mxu1 %v12384_v38  ;;  %v2932_v7 = vadd.f32 %v19917_v8, %v1512_v33  ;;  %v10185_v8 = vmul.f32 0.5, %v19409_v42 }
0x1776   :  { %v19470_v11 = vadd.f32 %v15223_v5, %v18992_v36  ;;  %15307 = vmatpush3.msra.mxu1 %v12384_v38  ;;  %v19901_v36 = vld [vmem:[#allocation5_spill] sm:$0xff]  ;;  %v19921_v5 = vld [vmem:[#allocation24_spill] sm:$0xff]  ;;  %v19922_v38 = vld [vmem:[#allocation39_spill] sm:$0xff] }
0x1777   :  { %v9969_v19 = vpop.f32.mrf.mxu0  ;;  %15309 = vmatmul.mubr.msk.f32.vlgmr.msra.gmra.mxu1 %vm50_vm0, %v19307_v35  ;;  %v1506_v10 = vadd.f32 %v19415_v14, %v19901_v36  ;;  %v1508_v35 = vadd.f32 %v19415_v14, %v19903_v52 }
0x1778   :  { %v19475_v24 = vadd.f32 %v9969_v19, %v8604_v29  ;;  %15311 = vmatprep.mubr.msk.f32.mxu1 %vm50_vm0, %v19314_v61  ;;  %v19905_v61 = vld [vmem:[#allocation14_spill] sm:$0xff]  ;;  %v4352_v29 = vadd.f32 %v19921_v5, %v2932_v7 }
0x1779   :  { %v2926_v13 = vadd.f32 %v19902_v6, %v1506_v10  ;;  %v19923_v10 = vld [vmem:[#allocation32_spill] sm:$0xff] }
0x177a   :  { %v5772_v6 = vadd.f32 %v19923_v10, %v4352_v29 }
0x177b   :  { %15312 = vmatmul.mubr.msk.f32.gmra.mxu1 %vm50_vm0, %v19321_v53  ;;  %v4346_v60 = vadd.f32 %v19904_v18, %v2926_v13  ;;  %v2928_v53 = vadd.f32 %v19905_v61, %v1508_v35  ;;  %v19924_v13 = vld [vmem:[#allocation46_spill] sm:$0xff]  ;;  %v19925_v35 = vld [vmem:[#allocation45_spill] sm:$0xff] }
0x177c   :  { %15314 = vmatprep.mubr.msk.f32.mxu1 %vm50_vm0, %v19328_v40  ;;  %v19907_v40 = vld [vmem:[#allocation7_spill] sm:$0xff] }
0x177d   :  { %v5766_v34 = vadd.f32 %v19906_v12, %v4346_v60  ;;  %v1510_v4 = vadd.f32 %v19415_v14, %v19907_v40  ;;  %v19927_v12 = vld [vmem:[#allocation48_spill] sm:$0xff]  ;;  %v19928_v40 = vld [vmem:[#allocation47_spill] sm:$0xff] }
0x177f   :  { %15315 = vmatmul.mubr.msk.f32.gmra.mxu1 %vm50_vm0, %v19335_v25  ;;  %v4348_v25 = vadd.f32 %v19908_v45, %v2928_v53  ;;  %v7186_v63 = vadd.f32 %v19909_v17, %v5766_v34 }
0x1780   :  { %15317 = vmatprep.mubr.msk.f32.mxu1 %vm50_vm0, %v19342_v54  ;;  %v2930_v54 = vadd.f32 %v19910_v56, %v1510_v4 }
0x1781   :  { %v5768_v27 = vadd.f32 %v19911_v26, %v4348_v25  ;;  %v8606_v20 = vadd.f32 %v19912_v30, %v7186_v63  ;;  %v15249_v30 = vpop.f32.mrf.mxu1 }
0x1782   :  { %v4350_v43 = vadd.f32 %v19915_v0, %v2930_v54  ;;  %v10187_v7 = vmul.f32 0.5, %v15249_v30 }
0x1783   :  { %15318 = vmatmul.mubr.msk.f32.gmra.mxu1 %vm50_vm0, %v19349_v44 }
0x1784   :  { %15320 = vmatprep.mubr.msk.f32.mxu1 %vm50_vm0, %v19356_v28  ;;  %v19916_v28 = vld [vmem:[#allocation38_spill] sm:$0xff]  ;;  %v5770_v46 = vadd.f32 %v19918_v47, %v4350_v43 }
0x1785   :  { %v7188_v57 = vadd.f32 %v19916_v28, %v5768_v27 }
0x1786   :  { %v7190_v19 = vadd.f32 %v19922_v38, %v5770_v46 }
0x1787   :  { %15321 = vmatmul.mubr.msk.f32.gmra.mxu1 %vm50_vm0, %v19363_v15  ;;  %v8608_v49 = vadd.f32 %v19919_v16, %v7188_v57  ;;  %v19920_v15 = vld [vmem:[#allocation43_spill] sm:$0xff] }
0x1788   :  { %15323 = vmatprep.mubr.msk.f32.mxu1 %vm50_vm0, %v19370_v39  ;;  %v8610_v52 = vadd.f32 %v19924_v13, %v7190_v19 }
0x1789   :  { %v15226_v62 = vpop.f32.mrf.mxu0 }
0x178a   :  { %v19509_v59 = vadd.f32 %v15226_v62, %v19913_v55  ;;  %v10115_v55 = vpop.f32.mrf.mxu1 }
0x178b   :  { %v9979_v44 = vpop.f32.mrf.mxu0  ;;  %15324 = vmatmul.mubr.msk.f32.gmra.mxu1 %vm50_vm0, %v19377_v2  ;;  %v19926_v2 = vld [vmem:[#allocation40_spill] sm:$0xff] }
0x178c   :  { %v19517_v50 = vadd.f32 %v9979_v44, %v8606_v20  ;;  %15326 = vmatprep.mubr.msk.f32.mxu1 %vm50_vm0, %v19384_v41  ;;  %v7192_v61 = vadd.f32 %v19926_v2, %v5772_v6  ;;  %v15252_v31 = vpop.f32.mrf.mxu1 }
0x178d   :  { %v15229_v37 = vpop.f32.mrf.mxu0 }
0x178e   :  { %v19525_v3 = vadd.f32 %v15229_v37, %v19920_v15  ;;  %v8612_v34 = vadd.f32 %v19927_v12, %v7192_v61  ;;  %v10125_v0 = vpop.f32.mrf.mxu1  ;;  %v10186_v37 = vmul.f32 0.5, %v10115_v55  ;;  %v10189_v15 = vmul.f32 0.5, %v15252_v31 }
0x178f   :  { %v9989_v14 = vpop.f32.mrf.mxu0  ;;  %15327 = vmatmul.mubr.msk.f32.gmra.mxu1 %vm50_vm0, %v19391_v9  ;;  %v10188_v16 = vmul.f32 0.5, %v10125_v0 }
0x1790   :  { %v19531_v36 = vadd.f32 %v9989_v14, %v8608_v49  ;;  %15329 = vmatprep.mubr.msk.f32.mxu1 %vm50_vm0, %v19398_v58  ;;  %v15255_v28 = vpop.f32.mrf.mxu1 }
0x1791   :  { %v15232_v39 = vpop.f32.mrf.mxu0  ;;  %v10191_v5 = vmul.f32 0.5, %v15255_v28 }
0x1792   :  { %v19538_v18 = vadd.f32 %v15232_v39, %v19925_v35  ;;  %v10135_v47 = vpop.f32.mrf.mxu1 }
0x1793   :  { %v9999_v60 = vpop.f32.mrf.mxu0  ;;  %15330 = vmatmul.mubr.msk.f32.gmra.mxu1 %vm50_vm0, %v19405_v1  ;;  %v10190_v42 = vmul.f32 0.5, %v10135_v47 }
0x1794   :  { %v19543_v53 = vadd.f32 %v9999_v60, %v8610_v52  ;;  %v15258_v49 = vpop.f32.mrf.mxu1 }
0x1795   :  { %v15235_v41 = vpop.f32.mrf.mxu0  ;;  %v10193_v13 = vmul.f32 0.5, %v15258_v49 }
0x1796   :  { %v19549_v4 = vadd.f32 %v15235_v41, %v19928_v40  ;;  %v10145_v14 = vpop.f32.mrf.mxu1 }
0x1797   :  { %v10009_v45 = vpop.f32.mrf.mxu0  ;;  %v10192_v29 = vmul.f32 0.5, %v10145_v14 }
0x1798   :  { %v19553_v25 = vadd.f32 %v10009_v45, %v8612_v34  ;;  %v15261_v38 = vpop.f32.mrf.mxu1 }
0x1799   :  { %v15278_v9 = vpop.f32.mrf.mxu0  ;;  %v10195_v60 = vmul.f32 0.5, %v15261_v38 }
0x179a   :  { %v10155_v19 = vpop.f32.mrf.mxu1 }
0x179b   :  { %v10271_v17 = vpop.f32.mrf.mxu0  ;;  %v10194_v6 = vmul.f32 0.5, %v10155_v19 }
0x179c   :  { %v15264_v39 = vpop.f32.mrf.mxu1 }
0x179d   :  { %v15281_v63 = vpop.f32.mrf.mxu0  ;;  %v10197_v41 = vmul.f32 0.5, %v15264_v39 }
0x179e   :  { %v10165_v10 = vpop.f32.mrf.mxu1 }
0x179f   :  { %v10281_v62 = vpop.f32.mrf.mxu0  ;;  %v10196_v35 = vmul.f32 0.5, %v10165_v10 }
0x17a0   :  { %v15267_v52 = vpop.f32.mrf.mxu1 }
0x17a1   :  { %v15284_v56 = vpop.f32.mrf.mxu0  ;;  %v10199_v12 = vmul.f32 0.5, %v15267_v52 }
0x17a2   :  { %v10175_v2 = vpop.f32.mrf.mxu1 }
0x17a3   :  { %v10291_v54 = vpop.f32.mrf.mxu0  ;;  %v10198_v61 = vmul.f32 0.5, %v10175_v2 }
0x17a5   :  { %v15287_v26 = vpop.f32.mrf.mxu0 }
0x17a6   :  { %15332 = vmatprep.subr.msk.mxu0 %vm558_vm1, %v15287_v26 }
0x17a7   :  { %v10301_v58 = vpop.f32.mrf.mxu0  ;;  %15333 = vmatpush3.xpose.msk.msra.mxu0 %vm558_vm1, %v15287_v26 }
0x17a8   :  { %15334 = vmatprep.subr.msk.mxu0 %vm558_vm1, %v10301_v58 }
0x17a9   :  { %v15290_v27 = vpop.f32.mrf.mxu0 }
0x17ab   :  { %15335 = vmatpush3.xpose.msk.msra.mxu0 %vm558_vm1, %v10301_v58  ;;  %v10311_v1 = vpop.f32.mrf.mxu0 }
0x17ac   :  { %15336 = vmatprep.subr.msk.mxu0 %vm558_vm1, %v15284_v56 }
0x17ad   :  { %v15293_v20 = vpop.f32.mrf.mxu0 }
0x17af   :  { %15337 = vmatpush3.xpose.msk.msra.mxu0 %vm558_vm1, %v15284_v56  ;;  %v10321_v44 = vpop.f32.mrf.mxu0 }
0x17b0   :  { %15338 = vmatprep.subr.msk.mxu0 %vm558_vm1, %v10291_v54 }
0x17b1   :  { %v15296_v33 = vpop.f32.mrf.mxu0 }
0x17b3   :  { %15339 = vmatpush3.xpose.msk.msra.mxu0 %vm558_vm1, %v10291_v54  ;;  %v10331_v43 = vpop.f32.mrf.mxu0 }
0x17b4   :  { %15340 = vmatprep.subr.msk.mxu0 %vm558_vm1, %v15281_v63 }
0x17b5   :  { %v15299_v57 = vpop.f32.mrf.mxu0 }
0x17b7   :  { %15341 = vmatpush3.xpose.msk.msra.mxu0 %vm558_vm1, %v15281_v63  ;;  %v10341_v46 = vpop.f32.mrf.mxu0 }
0x17b8   :  { %15342 = vmatprep.subr.msk.mxu0 %vm558_vm1, %v10281_v62 }
0x17bb   :  { %15343 = vmatpush3.xpose.msk.msra.mxu0 %vm558_vm1, %v10281_v62 }
0x17bc   :  { %15344 = vmatprep.subr.msk.mxu0 %vm558_vm1, %v15278_v9 }
0x17bf   :  { %15345 = vmatpush3.xpose.msk.msra.mxu0 %vm558_vm1, %v15278_v9 }
0x17c0   :  { %15346 = vmatprep.subr.msk.mxu0 %vm558_vm1, %v10271_v17 }
0x17c3   :  { %15347 = vmatpush3.xpose.msk.msra.mxu0 %vm558_vm1, %v10271_v17 }
0x17c4   :  { %15388 = vmatprep.subr.msk.mxu0 %vm558_vm1, %v15299_v57 }
0x17c6   :  { %15349 = vmatmul.mubr.msk.f32.vlgmr.msra.gmra.mxu0 %vm558_vm1, %v10185_v8 }
0x17c7   :  { %15389 = vmatpush3.xpose.msk.msra.mxu0 %vm558_vm1, %v15299_v57  ;;  %15351 = vmatprep.mubr.msk.f32.mxu0 %vm558_vm1, %v10186_v37 }
0x17c8   :  { %15390 = vmatprep.subr.msk.mxu0 %vm558_vm1, %v10341_v46 }
0x17ca   :  { %15352 = vmatmul.mubr.msk.f32.gmra.mxu0 %vm558_vm1, %v10187_v7 }
0x17cb   :  { %15391 = vmatpush3.xpose.msk.msra.mxu0 %vm558_vm1, %v10341_v46  ;;  %15354 = vmatprep.mubr.msk.f32.mxu0 %vm558_vm1, %v10188_v16 }
0x17cc   :  { %15392 = vmatprep.subr.msk.mxu0 %vm558_vm1, %v15296_v33 }
0x17ce   :  { %15355 = vmatmul.mubr.msk.f32.gmra.mxu0 %vm558_vm1, %v10189_v15 }
0x17cf   :  { %15393 = vmatpush3.xpose.msk.msra.mxu0 %vm558_vm1, %v15296_v33  ;;  %15357 = vmatprep.mubr.msk.f32.mxu0 %vm558_vm1, %v10190_v42 }
0x17d0   :  { %15394 = vmatprep.subr.msk.mxu0 %vm558_vm1, %v10331_v43 }
0x17d2   :  { %15358 = vmatmul.mubr.msk.f32.gmra.mxu0 %vm558_vm1, %v10191_v5 }
0x17d3   :  { %15395 = vmatpush3.xpose.msk.msra.mxu0 %vm558_vm1, %v10331_v43  ;;  %15404 = vmatprep.mubr.msk.f32.mxu0 %vm558_vm1, %v10192_v29 }
0x17d4   :  { %15396 = vmatprep.subr.msk.mxu0 %vm558_vm1, %v15293_v20 }
0x17d7   :  { %15397 = vmatpush3.xpose.msk.msra.mxu0 %vm558_vm1, %v15293_v20 }
0x17d8   :  { %15398 = vmatprep.subr.msk.mxu0 %vm558_vm1, %v10321_v44 }
0x17db   :  { %15399 = vmatpush3.xpose.msk.msra.mxu0 %vm558_vm1, %v10321_v44 }
0x17dc   :  { %15400 = vmatprep.subr.msk.mxu0 %vm558_vm1, %v15290_v27 }
0x17df   :  { %15401 = vmatpush3.xpose.msk.msra.mxu0 %vm558_vm1, %v15290_v27 }
0x17e0   :  { %15402 = vmatprep.subr.msk.mxu0 %vm558_vm1, %v10311_v1 }
0x17e3   :  { %15403 = vmatpush3.xpose.msk.msra.mxu0 %vm558_vm1, %v10311_v1 }
0x17e6   :  { %15405 = vmatmul.mubr.msk.f32.vlgmr.msra.gmra.mxu0 %vm558_vm1, %v10193_v13 }
0x17e7   :  { %15407 = vmatprep.mubr.msk.f32.mxu0 %vm558_vm1, %v10194_v6 }
0x17ea   :  { %15408 = vmatmul.mubr.msk.f32.gmra.mxu0 %vm558_vm1, %v10195_v60 }
0x17eb   :  { %15410 = vmatprep.mubr.msk.f32.mxu0 %vm558_vm1, %v10196_v35 }
0x17ee   :  { %15411 = vmatmul.mubr.msk.f32.gmra.mxu0 %vm558_vm1, %v10197_v41 }
0x17ef   :  { %15413 = vmatprep.mubr.msk.f32.mxu0 %vm558_vm1, %v10198_v61 }
0x17f2   :  { %15414 = vmatmul.mubr.msk.f32.gmra.mxu0 %vm558_vm1, %v10199_v12 }
0x1837   :  { %v15310_v34 = vpop.f32.mrf.mxu1 }
0x1839   :  { %v10421_v40 = vpop.f32.mrf.mxu1 }
0x183b   :  { %v15313_v45 = vpop.f32.mrf.mxu1 }
0x183d   :  { %v10431_v9 = vpop.f32.mrf.mxu1 }
0x183f   :  { %v15316_v17 = vpop.f32.mrf.mxu1 }
0x1841   :  { %v10441_v63 = vpop.f32.mrf.mxu1 }
0x1843   :  { %v15319_v62 = vpop.f32.mrf.mxu1 }
0x1844   :  { %15360 = vmatprep.subr.mxu1 %v15319_v62 }
0x1845   :  { %v10451_v56 = vpop.f32.mrf.mxu1  ;;  %15361 = vmatpush3.msra.mxu1 %v15319_v62 }
0x1846   :  { %15362 = vmatprep.subr.mxu1 %v10451_v56 }
0x1847   :  { %15363 = vmatpush3.msra.mxu1 %v10451_v56  ;;  %v19623_v8 = vpop.f32.mrf.mxu1 }
0x1848   :  { %15364 = vmatprep.subr.mxu1 %v15316_v17 }
0x1849   :  { %15365 = vmatpush3.msra.mxu1 %v15316_v17  ;;  %v19625_v7 = vpop.f32.mrf.mxu1 }
0x184a   :  { %15366 = vmatprep.subr.mxu1 %v10441_v63 }
0x184b   :  { %15367 = vmatpush3.msra.mxu1 %v10441_v63  ;;  %v19627_v47 = vpop.f32.mrf.mxu1 }
0x184c   :  { %15368 = vmatprep.subr.mxu1 %v15313_v45 }
0x184d   :  { %15369 = vmatpush3.msra.mxu1 %v15313_v45  ;;  %v19629_v46 = vpop.f32.mrf.mxu1 }
0x184e   :  { %15370 = vmatprep.subr.mxu1 %v10431_v9 }
0x184f   :  { %15371 = vmatpush3.msra.mxu1 %v10431_v9  ;;  %v19631_v16 = vpop.f32.mrf.mxu1 }
0x1850   :  { %15372 = vmatprep.subr.mxu1 %v15310_v34 }
0x1851   :  { %15373 = vmatpush3.msra.mxu1 %v15310_v34  ;;  %v19633_v49 = vpop.f32.mrf.mxu1 }
0x1852   :  { %15374 = vmatprep.subr.mxu1 %v10421_v40 }
0x1853   :  { %15375 = vmatpush3.msra.mxu1 %v10421_v40  ;;  %v19639_v14 = vpop.f32.mrf.mxu1 }
0x1854   :  { %15416 = vmatprep.subr.mxu1 %v19639_v14 }
0x1886   :  { %v15350_v54 = vpop.f32.mrf.mxu0 }
0x1887   :  { %v10656_v26 = vsel %vm712_vm2, %v15350_v54, -inf }
0x1888   :  { %10657 = vmax.xlane.f32.xlu1 %v10656_v26  ;;  %v10614_v58 = vpop.f32.mrf.mxu0 }
0x1889   :  { %v10653_v27 = vsel %vm712_vm2, %v10614_v58, -inf }
0x188a   :  { %10654 = vmax.xlane.f32.xlu0 %v10653_v27  ;;  %v15353_v1 = vpop.f32.mrf.mxu0 }
0x188b   :  { %v10662_v30 = vsel %vm712_vm2, %v15353_v1, -inf }
0x188c   :  { %10663 = vmax.xlane.f32.xlu1 %v10662_v30  ;;  %v10624_v20 = vpop.f32.mrf.mxu0 }
0x188d   :  { %v10659_v55 = vsel %vm712_vm2, %v10624_v20, -inf }
0x188e   :  { %10660 = vmax.xlane.f32.xlu0 %v10659_v55  ;;  %v19607_v44 = vpop.f32.mrf.mxu0 }
0x188f   :  { %v10668_v31 = vsel %vm712_vm2, %v19607_v44, -inf }
0x1890   :  { %10669 = vmax.xlane.f32.xlu1 %v10668_v31  ;;  %v19611_v33 = vpop.f32.mrf.mxu0 }
0x1891   :  { %v10665_v0 = vsel %vm712_vm2, %v19611_v33, -inf }
0x1892   :  { %10666 = vmax.xlane.f32.xlu0 %v10665_v0  ;;  %v19615_v43 = vpop.f32.mrf.mxu0 }
0x1893   :  { %v10674_v28 = vsel %vm712_vm2, %v19615_v43, -inf }
0x1894   :  { %10675 = vmax.xlane.f32.xlu1 %v10674_v28  ;;  %v19619_v57 = vpop.f32.mrf.mxu0 }
0x1895   :  { %v10671_v37 = vsel %vm712_vm2, %v19619_v57, -inf }
0x1896   :  { %10672 = vmax.xlane.f32.xlu0 %v10671_v37 }
0x18a6   :  { %v19635_v15 = vpop.f32.mrf.mxu0 }
0x18a7   :  { %v11026_v42 = vsel %vm712_vm2, %v19635_v15, -inf }
0x18a8   :  { %11027 = vmax.xlane.f32.xlu1 %v11026_v42  ;;  %v19641_v5 = vpop.f32.mrf.mxu0 }
0x18a9   :  { %v11023_v29 = vsel %vm712_vm2, %v19641_v5, -inf }
0x18aa   :  { %v19646_v38 = vpop.f32.mrf.mxu0  ;;  %11024 = vmax.xlane.f32.xlu0 %v11023_v29 }
0x18ab   :  { %v11032_v19 = vsel %vm712_vm2, %v19646_v38, -inf }
0x18ac   :  { %11033 = vmax.xlane.f32.xlu1 %v11032_v19  ;;  %v19650_v39 = vpop.f32.mrf.mxu0 }
0x18ad   :  { %v11029_v10 = vsel %vm712_vm2, %v19650_v39, -inf }
0x18ae   :  { %v19654_v6 = vpop.f32.mrf.mxu0  ;;  %11030 = vmax.xlane.f32.xlu0 %v11029_v10 }
0x18af   :  { %v11038_v13 = vsel %vm712_vm2, %v19654_v6, -inf }
0x18b0   :  { %11039 = vmax.xlane.f32.xlu1 %v11038_v13  ;;  %v19658_v52 = vpop.f32.mrf.mxu0 }
0x18b1   :  { %v11035_v35 = vsel %vm712_vm2, %v19658_v52, -inf }
0x18b2   :  { %v19662_v60 = vpop.f32.mrf.mxu0  ;;  %11036 = vmax.xlane.f32.xlu0 %v11035_v35 }
0x18b3   :  { %v11044_v2 = vsel %vm712_vm2, %v19662_v60, -inf }
0x18b4   :  { %11045 = vmax.xlane.f32.xlu1 %v11044_v2  ;;  %v19666_v61 = vpop.f32.mrf.mxu0 }
0x18b5   :  { %v11041_v41 = vsel %vm712_vm2, %v19666_v61, -inf }
0x18b6   :  { %11042 = vmax.xlane.f32.xlu0 %v11041_v41 }
0x1911   :  { %v10658_v12 = vpop.xlane.xlu1 %10657 }
0x1912   :  { %v10678_v34 = vsub.f32 %v15350_v54, %v10658_v12 }
0x1913   :  { %v10655_v40 = vpop.xlane.xlu0 %10654 }
0x1914   :  { %v10687_v45 = vmul.f32 1.442695, %v10678_v34  ;;  %v10677_v9 = vsub.f32 %v10614_v58, %v10655_v40 }
0x1915   :  { %v10664_v17 = vpop.xlane.xlu1 %10663 }
0x1916   :  { %15934 = vpow2.f32 %v10687_v45  ;;  %v10685_v63 = vmul.f32 1.442695, %v10677_v9  ;;  %v10680_v62 = vsub.f32 %v15353_v1, %v10664_v17 }
0x1917   :  { %v10661_v56 = vpop.xlane.xlu0 %10660 }
0x1918   :  { %15936 = vpow2.f32 %v10685_v63  ;;  %v10691_v26 = vmul.f32 1.442695, %v10680_v62  ;;  %v10679_v27 = vsub.f32 %v10624_v20, %v10661_v56 }
0x1919   :  { %v10670_v30 = vpop.xlane.xlu1 %10669 }
0x191a   :  { %15938 = vpow2.f32 %v10691_v26  ;;  %v10689_v55 = vmul.f32 1.442695, %v10679_v27  ;;  %v10682_v31 = vsub.f32 %v19607_v44, %v10670_v30 }
0x191b   :  { %v10667_v0 = vpop.xlane.xlu0 %10666 }
0x191c   :  { %15940 = vpow2.f32 %v10689_v55  ;;  %v10695_v28 = vmul.f32 1.442695, %v10682_v31  ;;  %v10681_v54 = vsub.f32 %v19611_v33, %v10667_v0  ;;  %v10491_v33 = vpop.f32.mrf.mxu1 }
0x191d   :  { %v10676_v37 = vpop.xlane.xlu1 %10675 }
0x191e   :  { %15942 = vpow2.f32 %v10695_v28  ;;  %v10693_v58 = vmul.f32 1.442695, %v10681_v54  ;;  %v10684_v42 = vsub.f32 %v19615_v43, %v10676_v37 }
0x191f   :  { %v10673_v1 = vpop.xlane.xlu0 %10672 }
0x1920   :  { %15944 = vpow2.f32 %v10693_v58  ;;  %v10699_v29 = vmul.f32 1.442695, %v10684_v42  ;;  %v10683_v20 = vsub.f32 %v19619_v57, %v10673_v1 }
0x1922   :  { %15946 = vpow2.f32 %v10699_v29  ;;  %v10697_v19 = vmul.f32 1.442695, %v10683_v20 }
0x1923   :  { %v15935_v10 = vpop.eup %15934 }
0x1924   :  { %15948 = vpow2.f32 %v10697_v19  ;;  %v10704_v44 = vsel %vm712_vm2, %v15935_v10, 0.0 }
0x1925   :  { %v15937_v13 = vpop.eup %15936  ;;  %10705 = vadd.xlane.f32.xlu1 %v10704_v44 }
0x1926   :  { %15376 = vmatprep.mubr.msk.f32.mxu1 %vm712_vm2, %v15937_v13  ;;  %v10701_v35 = vsel %vm712_vm2, %v15937_v13, 0.0 }
0x1927   :  { %v15939_v2 = vpop.eup %15938  ;;  %15377 = vmatmul.mubr.msk.f32.vlgmr.msra.gmra.mxu1 %vm712_vm2, %v15935_v10  ;;  %10702 = vadd.xlane.f32.xlu0 %v10701_v35 }
0x1928   :  { %15417 = vmatpush3.msra.mxu1 %v19639_v14  ;;  %v10710_v43 = vsel %vm712_vm2, %v15939_v2, 0.0 }
0x1929   :  { %v15941_v57 = vpop.eup %15940  ;;  %15418 = vmatprep.subr.mxu1 %v10491_v33  ;;  %10711 = vadd.xlane.f32.xlu1 %v10710_v43 }
0x192a   :  { %15419 = vmatpush3.msra.mxu1 %v10491_v33  ;;  %15379 = vmatprep.mubr.msk.f32.mxu1 %vm712_vm2, %v15941_v57  ;;  %v10707_v41 = vsel %vm712_vm2, %v15941_v57, 0.0 }
0x192b   :  { %v15943_v12 = vpop.eup %15942  ;;  %15420 = vmatprep.subr.mxu1 %v19631_v16  ;;  %15380 = vmatmul.mubr.msk.f32.gmra.mxu1 %vm712_vm2, %v15939_v2 }
0x192c   :  { %15421 = vmatpush3.msra.mxu1 %v19631_v16  ;;  %10708 = vadd.xlane.f32.xlu0 %v10707_v41  ;;  %v10716_v14 = vsel %vm712_vm2, %v15943_v12, 0.0 }
0x192d   :  { %v15945_v34 = vpop.eup %15944  ;;  %15422 = vmatprep.subr.mxu1 %v19633_v49  ;;  %10717 = vadd.xlane.f32.xlu1 %v10716_v14 }
0x192e   :  { %15423 = vmatpush3.msra.mxu1 %v19633_v49  ;;  %15382 = vmatprep.mubr.msk.f32.mxu1 %vm712_vm2, %v15945_v34  ;;  %v10713_v40 = vsel %vm712_vm2, %v15945_v34, 0.0 }
0x192f   :  { %v15947_v45 = vpop.eup %15946  ;;  %15424 = vmatprep.subr.mxu1 %v19627_v47  ;;  %15383 = vmatmul.mubr.msk.f32.gmra.mxu1 %vm712_vm2, %v15943_v12  ;;  %v12452_v12 = vld [vmem:[%s19832_s4 + $0x1c] sm:$0xf] }
0x1930   :  { %15425 = vmatpush3.msra.mxu1 %v19627_v47  ;;  %10714 = vadd.xlane.f32.xlu0 %v10713_v40  ;;  %v10722_v16 = vsel %vm712_vm2, %v15947_v45, 0.0 }
0x1931   :  { %v15949_v9 = vpop.eup %15948  ;;  %15426 = vmatprep.subr.mxu1 %v19629_v46  ;;  %v11028_v17 = vpop.xlane.xlu1 %11027  ;;  %10723 = vadd.xlane.f32.xlu1 %v10722_v16 }
0x1932   :  { %15427 = vmatpush3.msra.mxu1 %v19629_v46  ;;  %v11048_v49 = vsub.f32 %v19635_v15, %v11028_v17  ;;  %15385 = vmatprep.mubr.msk.f32.mxu1 %vm712_vm2, %v15949_v9  ;;  %v10719_v63 = vsel %vm712_vm2, %v15949_v9, 0.0 }
0x1933   :  { %15428 = vmatprep.subr.mxu1 %v19623_v8  ;;  %15386 = vmatmul.mubr.msk.f32.gmra.mxu1 %vm712_vm2, %v15947_v45  ;;  %v11025_v47 = vpop.xlane.xlu0 %11024 }
0x1934   :  { %v11057_v62 = vmul.f32 1.442695, %v11048_v49  ;;  %15429 = vmatpush3.msra.mxu1 %v19623_v8  ;;  %10720 = vadd.xlane.f32.xlu0 %v10719_v63  ;;  %v11047_v56 = vsub.f32 %v19641_v5, %v11025_v47 }
0x1935   :  { %15430 = vmatprep.subr.mxu1 %v19625_v7  ;;  %v11034_v46 = vpop.xlane.xlu1 %11033 }
0x1936   :  { %15950 = vpow2.f32 %v11057_v62  ;;  %v11055_v15 = vmul.f32 1.442695, %v11047_v56  ;;  %15431 = vmatpush3.msra.mxu1 %v19625_v7  ;;  %v11050_v26 = vsub.f32 %v19646_v38, %v11034_v46 }
0x1937   :  { %v11031_v27 = vpop.xlane.xlu0 %11030  ;;  %15444 = vmatprep.subr.msk.mxu1 %vm1349_vm3, %v12452_v12 }
0x1938   :  { %15952 = vpow2.f32 %v11055_v15  ;;  %v11061_v30 = vmul.f32 1.442695, %v11050_v26  ;;  %v11049_v55 = vsub.f32 %v19650_v39, %v11031_v27 }
0x1939   :  { %v11040_v31 = vpop.xlane.xlu1 %11039 }
0x193a   :  { %15954 = vpow2.f32 %v11061_v30  ;;  %v11059_v8 = vmul.f32 1.442695, %v11049_v55  ;;  %v11052_v0 = vsub.f32 %v19654_v6, %v11040_v31 }
0x193b   :  { %v11037_v5 = vpop.xlane.xlu0 %11036 }
0x193c   :  { %15956 = vpow2.f32 %v11059_v8  ;;  %v11065_v28 = vmul.f32 1.442695, %v11052_v0  ;;  %v11051_v54 = vsub.f32 %v19658_v52, %v11037_v5 }
0x193d   :  { %v11046_v37 = vpop.xlane.xlu1 %11045 }
0x193e   :  { %15958 = vpow2.f32 %v11065_v28  ;;  %v11063_v7 = vmul.f32 1.442695, %v11051_v54  ;;  %v11054_v38 = vsub.f32 %v19662_v60, %v11046_v37 }
0x193f   :  { %v11043_v58 = vpop.xlane.xlu0 %11042 }
0x1940   :  { %15960 = vpow2.f32 %v11063_v7  ;;  %v11069_v42 = vmul.f32 1.442695, %v11054_v38  ;;  %v11053_v39 = vsub.f32 %v19666_v61, %v11043_v58 }
0x1942   :  { %15962 = vpow2.f32 %v11069_v42  ;;  %v11067_v1 = vmul.f32 1.442695, %v11053_v39 }
0x1943   :  { %v15951_v29 = vpop.eup %15950 }
0x1944   :  { %15964 = vpow2.f32 %v11067_v1  ;;  %v11074_v6 = vsel %vm712_vm2, %v15951_v29, 0.0 }
0x1945   :  { %v15953_v20 = vpop.eup %15952  ;;  %11075 = vadd.xlane.f32.xlu1 %v11074_v6 }
0x1946   :  { %15432 = vmatprep.mubr.msk.f32.mxu1 %vm712_vm2, %v15953_v20  ;;  %v11071_v52 = vsel %vm712_vm2, %v15953_v20, 0.0 }
0x1947   :  { %v15955_v19 = vpop.eup %15954  ;;  %15433 = vmatmul.mubr.msk.f32.vlgmr.msra.gmra.mxu1 %vm712_vm2, %v15951_v29  ;;  %11072 = vadd.xlane.f32.xlu0 %v11071_v52 }
0x1948   :  { %v11080_v60 = vsel %vm712_vm2, %v15955_v19, 0.0  ;;  %15445 = vmatpush3.msk.msra.mxu1 %vm1349_vm3, %v12452_v12 }
0x1949   :  { %v15957_v10 = vpop.eup %15956  ;;  %11081 = vadd.xlane.f32.xlu1 %v11080_v60 }
0x194a   :  { %15435 = vmatprep.mubr.msk.f32.mxu1 %vm712_vm2, %v15957_v10  ;;  %v11077_v61 = vsel %vm712_vm2, %v15957_v10, 0.0 }
0x194b   :  { %v15959_v44 = vpop.eup %15958  ;;  %15436 = vmatmul.mubr.msk.f32.gmra.mxu1 %vm712_vm2, %v15955_v19  ;;  %11078 = vadd.xlane.f32.xlu0 %v11077_v61 }
0x194c   :  { %v11086_v13 = vsel %vm712_vm2, %v15959_v44, 0.0 }
0x194d   :  { %v15961_v33 = vpop.eup %15960  ;;  %11087 = vadd.xlane.f32.xlu1 %v11086_v13 }
0x194e   :  { %15438 = vmatprep.mubr.msk.f32.mxu1 %vm712_vm2, %v15961_v33  ;;  %v11083_v35 = vsel %vm712_vm2, %v15961_v33, 0.0 }
0x194f   :  { %v15963_v2 = vpop.eup %15962  ;;  %15439 = vmatmul.mubr.msk.f32.gmra.mxu1 %vm712_vm2, %v15959_v44  ;;  %11084 = vadd.xlane.f32.xlu0 %v11083_v35 }
0x1950   :  { %v11092_v43 = vsel %vm712_vm2, %v15963_v2, 0.0 }
0x1951   :  { %v15965_v57 = vpop.eup %15964  ;;  %11093 = vadd.xlane.f32.xlu1 %v11092_v43 }
0x1952   :  { %15441 = vmatprep.mubr.msk.f32.mxu1 %vm712_vm2, %v15965_v57  ;;  %v11089_v41 = vsel %vm712_vm2, %v15965_v57, 0.0 }
0x1953   :  { %15442 = vmatmul.mubr.msk.f32.gmra.mxu1 %vm712_vm2, %v15963_v2  ;;  %11090 = vadd.xlane.f32.xlu0 %v11089_v41 }
0x19ae   :  { %v10706_v34 = vpop.xlane.xlu1 %10705 }
0x19b0   :  { %v10703_v14 = vpop.xlane.xlu0 %10702 }
0x19b1   :  { %15966 = vrcp.f32 %v10703_v14 }
0x19b2   :  { %v10712_v45 = vpop.xlane.xlu1 %10711  ;;  %15968 = vrcp.f32 %v10706_v34 }
0x19b5   :  { %v10709_v40 = vpop.xlane.xlu0 %10708 }
0x19b6   :  { %15970 = vrcp.f32 %v10709_v40  ;;  %v10718_v9 = vpop.xlane.xlu1 %10717 }
0x19b7   :  { %15972 = vrcp.f32 %v10712_v45 }
0x19b9   :  { %v10715_v16 = vpop.xlane.xlu0 %10714 }
0x19ba   :  { %15974 = vrcp.f32 %v10715_v16  ;;  %v10724_v49 = vpop.xlane.xlu1 %10723 }
0x19bb   :  { %15976 = vrcp.f32 %v10718_v9 }
0x19bd   :  { %v10721_v17 = vpop.xlane.xlu0 %10720 }
0x19be   :  { %15978 = vrcp.f32 %v10721_v17  ;;  %v15967_v47 = vpop.eup %15966 }
0x19bf   :  { %15980 = vrcp.f32 %v10724_v49  ;;  %v15969_v56 = vpop.eup %15968 }
0x19c3   :  { %v15971_v27 = vpop.eup %15970 }
0x19c4   :  { %v15973_v55 = vpop.eup %15972 }
0x19c7   :  { %v15975_v5 = vpop.eup %15974 }
0x19c8   :  { %v15977_v54 = vpop.eup %15976 }
0x19cb   :  { %v15979_v39 = vpop.eup %15978 }
0x19cc   :  { %v15981_v29 = vpop.eup %15980 }
0x19ce   :  { %v11076_v42 = vpop.xlane.xlu1 %11075 }
0x19d0   :  { %v11073_v7 = vpop.xlane.xlu0 %11072 }
0x19d1   :  { %15982 = vrcp.f32 %v11073_v7 }
0x19d2   :  { %v11082_v19 = vpop.xlane.xlu1 %11081  ;;  %15984 = vrcp.f32 %v11076_v42 }
0x19d4   :  { %v11079_v52 = vpop.xlane.xlu0 %11078 }
0x19d5   :  { %15986 = vrcp.f32 %v11079_v52 }
0x19d6   :  { %v11088_v10 = vpop.xlane.xlu1 %11087  ;;  %15988 = vrcp.f32 %v11082_v19 }
0x19d8   :  { %v11085_v60 = vpop.xlane.xlu0 %11084 }
0x19d9   :  { %15990 = vrcp.f32 %v11085_v60 }
0x19da   :  { %15992 = vrcp.f32 %v11088_v10  ;;  %v11094_v44 = vpop.xlane.xlu1 %11093 }
0x19dc   :  { %v11091_v61 = vpop.xlane.xlu0 %11090 }
0x19dd   :  { %15994 = vrcp.f32 %v11091_v61 }
0x19de   :  { %v15983_v33 = vpop.eup %15982  ;;  %15996 = vrcp.f32 %v11094_v44 }
0x19df   :  { %v15985_v2 = vpop.eup %15984 }
0x19e2   :  { %v15987_v12 = vpop.eup %15986 }
0x19e3   :  { %v15989_v34 = vpop.eup %15988 }
0x19e6   :  { %v15991_v9 = vpop.eup %15990 }
0x19e7   :  { %v15378_v63 = vpop.f32.mrf.mxu1  ;;  %v15993_v49 = vpop.eup %15992 }
0x19e8   :  { %v10863_v15 = vmul.f32 %v15969_v56, %v15378_v63 }
0x19e9   :  { %v10815_v62 = vpop.f32.mrf.mxu1 }
0x19ea   :  { %v10862_v46 = vmul.f32 %v15967_v47, %v10815_v62  ;;  %v15995_v56 = vpop.eup %15994 }
0x19eb   :  { %v15381_v26 = vpop.f32.mrf.mxu1 }
0x19ec   :  { %15446 = vmatprep.mubr.msk.f32.mxu1 %vm558_vm1, %v10862_v46  ;;  %v10865_v8 = vmul.f32 %v15973_v55, %v15381_v26 }
0x19ed   :  { %v10825_v30 = vpop.f32.mrf.mxu1  ;;  %15447 = vmatmul.mubr.msk.f32.vlgmr.msra.gmra.mxu1 %vm558_vm1, %v10863_v15  ;;  %v15997_v15 = vpop.eup %15996 }
0x19ee   :  { %v10864_v31 = vmul.f32 %v15971_v27, %v10825_v30 }
0x19ef   :  { %v15384_v0 = vpop.f32.mrf.mxu1 }
0x19f0   :  { %15449 = vmatprep.mubr.msk.f32.mxu1 %vm558_vm1, %v10864_v31  ;;  %v10867_v38 = vmul.f32 %v15977_v54, %v15384_v0 }
0x19f1   :  { %v10835_v28 = vpop.f32.mrf.mxu1  ;;  %15450 = vmatmul.mubr.msk.f32.gmra.mxu1 %vm558_vm1, %v10865_v8 }
0x19f2   :  { %v10866_v37 = vmul.f32 %v15975_v5, %v10835_v28 }
0x19f3   :  { %v15387_v58 = vpop.f32.mrf.mxu1 }
0x19f4   :  { %15452 = vmatprep.mubr.msk.f32.mxu1 %vm558_vm1, %v10866_v37  ;;  %v10869_v20 = vmul.f32 %v15981_v29, %v15387_v58 }
0x19f5   :  { %v10845_v1 = vpop.f32.mrf.mxu1  ;;  %15453 = vmatmul.mubr.msk.f32.gmra.mxu1 %vm558_vm1, %v10867_v38 }
0x19f6   :  { %v10868_v6 = vmul.f32 %v15979_v39, %v10845_v1 }
0x19f8   :  { %15455 = vmatprep.mubr.msk.f32.mxu1 %vm558_vm1, %v10868_v6 }
0x19f9   :  { %15456 = vmatmul.mubr.msk.f32.gmra.mxu1 %vm558_vm1, %v10869_v20 }
0x1a07   :  { %v15434_v13 = vpop.f32.mrf.mxu1 }
0x1a08   :  { %v11233_v57 = vmul.f32 %v15985_v2, %v15434_v13 }
0x1a09   :  { %v11185_v35 = vpop.f32.mrf.mxu1 }
0x1a0a   :  { %v11232_v43 = vmul.f32 %v15983_v33, %v11185_v35 }
0x1a0b   :  { %v15437_v41 = vpop.f32.mrf.mxu1 }
0x1a0c   :  { %15458 = vmatprep.mubr.msk.f32.mxu1 %vm558_vm1, %v11232_v43  ;;  %v11235_v45 = vmul.f32 %v15989_v34, %v15437_v41 }
0x1a0d   :  { %v11195_v14 = vpop.f32.mrf.mxu1  ;;  %15459 = vmatmul.mubr.msk.f32.gmra.mxu1 %vm558_vm1, %v11233_v57 }
0x1a0e   :  { %v11234_v40 = vmul.f32 %v15987_v12, %v11195_v14 }
0x1a0f   :  { %v15440_v16 = vpop.f32.mrf.mxu1 }
0x1a10   :  { %15461 = vmatprep.mubr.msk.f32.mxu1 %vm558_vm1, %v11234_v40  ;;  %v11237_v47 = vmul.f32 %v15993_v49, %v15440_v16 }
0x1a11   :  { %v11205_v17 = vpop.f32.mrf.mxu1  ;;  %15462 = vmatmul.mubr.msk.f32.gmra.mxu1 %vm558_vm1, %v11235_v45 }
0x1a12   :  { %v11236_v63 = vmul.f32 %v15991_v9, %v11205_v17 }
0x1a13   :  { %v15443_v62 = vpop.f32.mrf.mxu1 }
0x1a14   :  { %15464 = vmatprep.mubr.msk.f32.mxu1 %vm558_vm1, %v11236_v63  ;;  %v11239_v27 = vmul.f32 %v15997_v15, %v15443_v62 }
0x1a15   :  { %v11215_v46 = vpop.f32.mrf.mxu1  ;;  %15465 = vmatmul.mubr.msk.f32.gmra.mxu1 %vm558_vm1, %v11237_v47 }
0x1a16   :  { %v11238_v26 = vmul.f32 %v15995_v56, %v11215_v46 }
0x1a18   :  { %15467 = vmatprep.mubr.msk.f32.mxu1 %vm558_vm1, %v11238_v26 }
0x1a19   :  { %15468 = vmatmul.mubr.msk.f32.gmra.mxu1 %vm558_vm1, %v11239_v27 }
0x1aad   :  { %v15448_v30 = vpop.f32.mrf.mxu1 }
0x1aae   :  { %v11439_v55 = vadd.f32 %v15448_v30, %v19433_v51 }
0x1aaf   :  { %v11359_v31 = vpop.f32.mrf.mxu1 }
0x1ab0   :  { %11455 = vst.msk [vmem:[%s19834_s6 + $0x8] sm:$0xff] %vm50_vm0, %v11439_v55  ;;  %v11438_v8 = vadd.f32 %v11359_v31, %v19439_v32 }
0x1ab1   :  { %v15451_v0 = vpop.f32.mrf.mxu1 }
0x1ab2   :  { %11454 = vst.msk [vmem:[%s19834_s6] sm:$0xff] %vm50_vm0, %v11438_v8  ;;  %v11441_v5 = vadd.f32 %v15451_v0, %v19445_v22 }
0x1ab3   :  { %v11369_v28 = vpop.f32.mrf.mxu1 }
0x1ab4   :  { %11457 = vst.msk [vmem:[%s19834_s6 + $0x18] sm:$0xff] %vm50_vm0, %v11441_v5  ;;  %v11440_v51 = vadd.f32 %v11369_v28, %v19449_v48 }
0x1ab5   :  { %v15454_v54 = vpop.f32.mrf.mxu1 }
0x1ab6   :  { %11456 = vst.msk [vmem:[%s19834_s6 + $0x10] sm:$0xff] %vm50_vm0, %v11440_v51  ;;  %v11443_v32 = vadd.f32 %v15454_v54, %v19454_v23 }
0x1ab7   :  { %v11379_v37 = vpop.f32.mrf.mxu1 }
0x1ab8   :  { %11459 = vst.msk [vmem:[%s19834_s6 + $0x28] sm:$0xff] %vm50_vm0, %v11443_v32  ;;  %v11442_v22 = vadd.f32 %v11379_v37, %v19463_v21 }
0x1ab9   :  { %v15457_v7 = vpop.f32.mrf.mxu1 }
0x1aba   :  { %11458 = vst.msk [vmem:[%s19834_s6 + $0x20] sm:$0xff] %vm50_vm0, %v11442_v22  ;;  %v11445_v48 = vadd.f32 %v15457_v7, %v19470_v11 }
0x1abb   :  { %v11389_v38 = vpop.f32.mrf.mxu1 }
0x1abc   :  { %11461 = vst.msk [vmem:[%s19834_s6 + $0x38] sm:$0xff] %vm50_vm0, %v11445_v48  ;;  %v11444_v23 = vadd.f32 %v11389_v38, %v19475_v24 }
0x1abe   :  { %11460 = vst.msk [vmem:[%s19834_s6 + $0x30] sm:$0xff] %vm50_vm0, %v11444_v23 }
0x1acd   :  { %v15460_v21 = vpop.f32.mrf.mxu1 }
0x1ace   :  { %v11447_v58 = vadd.f32 %v15460_v21, %v19509_v59 }
0x1acf   :  { %v11399_v42 = vpop.f32.mrf.mxu1 }
0x1ad0   :  { %11463 = vst.msk [vmem:[%s19834_s6 + $0x48] sm:$0xff] %vm50_vm0, %v11447_v58  ;;  %v11446_v11 = vadd.f32 %v11399_v42, %v19517_v50 }
0x1ad1   :  { %v15463_v39 = vpop.f32.mrf.mxu1 }
0x1ad2   :  { %11462 = vst.msk [vmem:[%s19834_s6 + $0x40] sm:$0xff] %vm50_vm0, %v11446_v11  ;;  %v11449_v24 = vadd.f32 %v15463_v39, %v19525_v3 }
0x1ad3   :  { %v11409_v1 = vpop.f32.mrf.mxu1 }
0x1ad4   :  { %11465 = vst.msk [vmem:[%s19834_s6 + $0x58] sm:$0xff] %vm50_vm0, %v11449_v24  ;;  %v11448_v59 = vadd.f32 %v11409_v1, %v19531_v36 }
0x1ad5   :  { %v15466_v29 = vpop.f32.mrf.mxu1 }
0x1ad6   :  { %11464 = vst.msk [vmem:[%s19834_s6 + $0x50] sm:$0xff] %vm50_vm0, %v11448_v59  ;;  %v11451_v50 = vadd.f32 %v15466_v29, %v19538_v18 }
0x1ad7   :  { %v11419_v6 = vpop.f32.mrf.mxu1 }
0x1ad8   :  { %11467 = vst.msk [vmem:[%s19834_s6 + $0x68] sm:$0xff] %vm50_vm0, %v11451_v50  ;;  %v11450_v3 = vadd.f32 %v11419_v6, %v19543_v53 }
0x1ad9   :  { %v15469_v20 = vpop.f32.mrf.mxu1 }
0x1ada   :  { %11466 = vst.msk [vmem:[%s19834_s6 + $0x60] sm:$0xff] %vm50_vm0, %v11450_v3  ;;  %v11453_v36 = vadd.f32 %v15469_v20, %v19549_v4 }
0x1adb   :  { %v11429_v52 = vpop.f32.mrf.mxu1 }
0x1adc   :  { %11469 = vst.msk [vmem:[%s19834_s6 + $0x78] sm:$0xff] %vm50_vm0, %v11453_v36  ;;  %v11452_v18 = vadd.f32 %v11429_v52, %v19553_v25 }
0x1ade   :  { %11468 = vst.msk [vmem:[%s19834_s6 + $0x70] sm:$0xff] %vm50_vm0, %v11452_v18 }

</bundles_post_ra>
